<compile_context>
chip_gen: v5e
topology: v5e:2x2
jax: 0.10.0
libtpu: 0.0.40
codegen_flags: <defaults>
</compile_context>

<pallas_src>
import functools

import jax
import jax.numpy as jnp
import numpy as np
from jax.experimental import pallas as pl
from jax.experimental.pallas import tpu as pltpu

KSIZE = 4
STRIDE = 2


# ---------------------------------------------------------------------------
# Fused forward kernel: the whole Discriminator in one pallas_call.
# ---------------------------------------------------------------------------

def _disc_fused_kernel(
        x_ref,
        s0_ref, m0_ref, b0_ref,
        s1_ref, m1_ref, b1_ref, g1_ref, be1_ref, p1_ref,
        s2_ref, m2_ref, b2_ref, g2_ref, be2_ref, p2_ref,
        s3_ref, m3_ref, b3_ref, g3_ref, be3_ref, p3_ref,
        s4_ref, m4_ref, b4_ref,
        out_ref,
        *, alpha, eps, cnts):
    """Whole discriminator forward; every activation is VMEM-resident."""

    def conv(x, s_ref, m_ref, b_ref):
        rows = s_ref.shape[1]
        cols = m_ref.shape[2]
        acc = jnp.zeros((rows, cols), jnp.float32)
        for kh in range(KSIZE):
            # Row selection (H-direction stride + zero padding); 0/1 matrix,
            # exact in bf16 -> the selected activations are reproduced exactly.
            t = jnp.dot(s_ref[kh], x, preferred_element_type=jnp.float32)
            # Column mixing (W-direction stride/padding + channel mixing).
            acc = acc + jnp.dot(t.astype(jnp.bfloat16), m_ref[kh],
                                preferred_element_type=jnp.float32)
        return acc + b_ref[...]

    def batchnorm(y, g_ref, be_ref, p_ref, cnt):
        # Training-mode batch statistics, biased variance, centered two-pass.
        pmat = p_ref[...]                           # (WC, WC) f32 0/1 pooling
        inv_cnt = 1.0 / cnt
        wc = y.shape[1]
        rsum = jnp.broadcast_to(jnp.sum(y, axis=0, keepdims=True), (8, wc))
        mean = jnp.dot(rsum, pmat,
                       preferred_element_type=jnp.float32)[0:1, :] * inv_cnt
        d = y - mean
        qsum = jnp.broadcast_to(jnp.sum(d * d, axis=0, keepdims=True), (8, wc))
        var = jnp.dot(qsum, pmat,
                      preferred_element_type=jnp.float32)[0:1, :] * inv_cnt
        inv = jax.lax.rsqrt(jnp.maximum(var, 0.0) + eps)
        return d * (inv * g_ref[...]) + be_ref[...]

    def lrelu(y):
        return jnp.maximum(y, alpha * y)

    x = x_ref[...]                                   # (N*H0, W0*C0) bf16
    # Layer 0: Conv -> LeakyReLU
    x = lrelu(conv(x, s0_ref, m0_ref, b0_ref)).astype(jnp.bfloat16)
    # Layers 1-3: Conv -> BatchNorm -> LeakyReLU
    y = conv(x, s1_ref, m1_ref, b1_ref)
    x = lrelu(batchnorm(y, g1_ref, be1_ref, p1_ref, cnts[0])).astype(jnp.bfloat16)
    y = conv(x, s2_ref, m2_ref, b2_ref)
    x = lrelu(batchnorm(y, g2_ref, be2_ref, p2_ref, cnts[1])).astype(jnp.bfloat16)
    y = conv(x, s3_ref, m3_ref, b3_ref)
    x = lrelu(batchnorm(y, g3_ref, be3_ref, p3_ref, cnts[2])).astype(jnp.bfloat16)
    # Layer 4: final Conv (Cout padded to 128 lanes; wrapper slices column 0).
    out_ref[...] = conv(x, s4_ref, m4_ref, b4_ref).astype(out_ref.dtype)


# ---------------------------------------------------------------------------
# One-time host-side operand construction.
# ---------------------------------------------------------------------------

def _row_select(batch, h_in, h_out, pad, kh):
    """0/1 matrix picking input row (2*oh - pad + kh) for every output row."""
    s = np.zeros((batch * h_out, batch * h_in), np.float32)
    for b in range(batch):
        for oh in range(h_out):
            r = STRIDE * oh - pad + kh
            if 0 <= r < h_in:
                s[b * h_out + oh, b * h_in + r] = 1.0
    return s


def _col_matrix(w_oihw, w_in, w_out, pad, kh, co_pad):
    """Scatter W[:, :, kh, :] into a dense (W_in*Ci, W_out*Co_pad) matrix."""
    co, ci = w_oihw.shape[0], w_oihw.shape[1]
    m = np.zeros((w_in * ci, w_out * co_pad), np.float32)
    for ow in range(w_out):
        for kw in range(KSIZE):
            w = STRIDE * ow - pad + kw
            if 0 <= w < w_in:
                m[w * ci:(w + 1) * ci, ow * co_pad:ow * co_pad + co] = (
                    w_oihw[:, :, kh, kw].T)
    return m


def init_discriminator_params(key, channels_img, features_d):
    """Deterministic synthetic parameters in the PyTorch module's layout."""
    fd = features_d
    chans = [channels_img, fd, fd * 2, fd * 4, fd * 8, 1]
    params = []
    for li in range(5):
        cin, cout = chans[li], chans[li + 1]
        key, kw, kb = jax.random.split(key, 3)
        w = jax.random.normal(kw, (cout, cin, 4, 4), jnp.float32) * 0.05
        b = jax.random.normal(kb, (cout,), jnp.float32) * 0.01
        layer = {"w": w, "b": b}
        if li in (1, 2, 3):  # layers followed by BatchNorm2d
            layer["gamma"] = jnp.ones((cout,), jnp.float32)
            layer["beta"] = jnp.zeros((cout,), jnp.float32)
        params.append(layer)
    return params


def prepare_params(raw_params, batch, image_size):
    """Build the fused kernel's operands once (weights-only, no per-step work).

    Returns (flat_operands, bn_counts): flat_operands is the positional list
    of kernel operands after the input activation; bn_counts the static
    N*Ho*Wo element counts for the three BatchNorm layers.
    """
    assert batch <= 64, "fused single-block kernel is sized for small batches"
    h = w = image_size
    n_layers = len(raw_params)
    flat, cnts = [], []
    for li, p in enumerate(raw_params):
        w_oihw = np.asarray(p["w"], np.float32)
        bias = np.asarray(p["b"], np.float32)
        co = w_oihw.shape[0]
        pad = 1 if li < n_layers - 1 else 0
        ho = (h + 2 * pad - KSIZE) // STRIDE + 1
        wo = (w + 2 * pad - KSIZE) // STRIDE + 1
        co_pad = co if li < n_layers - 1 else 128     # final Cout=1 -> 128 lanes

        s = np.stack([_row_select(batch, h, ho, pad, kh) for kh in range(KSIZE)])
        m = np.stack([_col_matrix(w_oihw, w, wo, pad, kh, co_pad)
                      for kh in range(KSIZE)])
        bvec = np.tile(np.pad(bias, (0, co_pad - co)), wo)[None, :]

        flat += [jnp.asarray(s, jnp.bfloat16),
                 jnp.asarray(m, jnp.bfloat16),
                 jnp.asarray(bvec, jnp.float32)]

        if "gamma" in p:
            gvec = np.tile(np.asarray(p["gamma"], np.float32), wo)[None, :]
            bevec = np.tile(np.asarray(p["beta"], np.float32), wo)[None, :]
            chan = np.arange(wo * co) % co
            pmat = (chan[:, None] == chan[None, :]).astype(np.float32)
            flat += [jnp.asarray(gvec, jnp.float32),
                     jnp.asarray(bevec, jnp.float32),
                     jnp.asarray(pmat, jnp.float32)]
            cnts.append(batch * ho * wo)
        h, w = ho, wo
    return tuple(flat), tuple(cnts)


# ---------------------------------------------------------------------------
# Forward wrapper (single pallas_call) + pure-JAX reference for validation.
# ---------------------------------------------------------------------------

def discriminator_forward(flat_params, x, *, cnts, alpha=0.2, eps=1e-5):
    n, c, h, w = x.shape
    # One-time NCHW -> (N*H, W*C) bf16 entry transform; everything after this
    # lives in VMEM inside the single fused kernel.
    x2d = jnp.transpose(x, (0, 2, 3, 1)).reshape(n * h, w * c).astype(jnp.bfloat16)
    kernel = functools.partial(_disc_fused_kernel, alpha=alpha, eps=eps, cnts=cnts)
    out = pl.pallas_call(
        kernel,
        out_shape=jax.ShapeDtypeStruct((n, 128), jnp.float32),
        compiler_params=pltpu.CompilerParams(
            vmem_limit_bytes=32 * 1024 * 1024),
    )(x2d, *flat_params)
    # Final conv had Cout padded to 128 lanes: keep channel 0, emit NCHW.
    return out[:, :1].reshape(n, 1, 1, 1)


def _reference_forward(raw_params, x, alpha=0.2, eps=1e-5):
    """Pure-JAX (XLA) reference in the same bf16/f32 precision regime."""
    x = jnp.transpose(x, (0, 2, 3, 1)).astype(jnp.bfloat16)       # NHWC
    n_layers = len(raw_params)
    for li, p in enumerate(raw_params):
        w = jnp.transpose(p["w"], (2, 3, 1, 0)).astype(jnp.bfloat16)  # HWIO
        pad = 1 if li < n_layers - 1 else 0
        y = jax.lax.conv_general_dilated(
            x, w, (STRIDE, STRIDE), [(pad, pad), (pad, pad)],
            dimension_numbers=("NHWC", "HWIO", "NHWC"),
            preferred_element_type=jnp.float32)
        y = y + p["b"]
        if "gamma" in p:
            mean = jnp.mean(y, axis=(0, 1, 2), keepdims=True)
            var = jnp.mean((y - mean) ** 2, axis=(0, 1, 2), keepdims=True)
            y = (y - mean) * jax.lax.rsqrt(var + eps) * p["gamma"] + p["beta"]
        if li < n_layers - 1:
            y = jnp.maximum(y, alpha * y)
            x = y.astype(jnp.bfloat16)
        else:
            x = y
    return jnp.transpose(x, (0, 3, 1, 2))                         # NCHW


if __name__ == "__main__":
    batch, channels_img, features_d = 2, 3, 8
    H = W = 64  # 64 -> 32 -> 16 -> 8 -> 4 -> 1, as in the DCGAN discriminator

    key = jax.random.PRNGKey(0)
    key, kx = jax.random.split(key)
    x = jax.random.normal(kx, (batch, channels_img, H, W), jnp.float32)

    raw_params = init_discriminator_params(key, channels_img, features_d)
    flat_params, cnts = prepare_params(raw_params, batch, H)

    fwd = jax.jit(functools.partial(discriminator_forward, cnts=cnts))
    out = jax.block_until_ready(fwd(flat_params, x))

    ref = jax.block_until_ready(jax.jit(_reference_forward)(raw_params, x))

    assert out.shape == (batch, 1, 1, 1), out.shape
    assert bool(jnp.all(jnp.isfinite(out)))
    assert bool(jnp.allclose(out, ref, rtol=5e-2, atol=5e-2)), (out, ref)
    print("KERNEL_OK")
</pallas_src>

<mosaic_0001>
module attributes {stable_mosaic.version = 11 : i64} {
  func.func @_disc_fused_kernel(%arg0: memref<128x192xbf16, #tpu.memory_space<vmem>>, %arg1: memref<4x64x128xbf16, #tpu.memory_space<vmem>>, %arg2: memref<4x192x256xbf16, #tpu.memory_space<vmem>>, %arg3: memref<1x256xf32, #tpu.memory_space<vmem>>, %arg4: memref<4x32x64xbf16, #tpu.memory_space<vmem>>, %arg5: memref<4x256x256xbf16, #tpu.memory_space<vmem>>, %arg6: memref<1x256xf32, #tpu.memory_space<vmem>>, %arg7: memref<1x256xf32, #tpu.memory_space<vmem>>, %arg8: memref<1x256xf32, #tpu.memory_space<vmem>>, %arg9: memref<256x256xf32, #tpu.memory_space<vmem>>, %arg10: memref<4x16x32xbf16, #tpu.memory_space<vmem>>, %arg11: memref<4x256x256xbf16, #tpu.memory_space<vmem>>, %arg12: memref<1x256xf32, #tpu.memory_space<vmem>>, %arg13: memref<1x256xf32, #tpu.memory_space<vmem>>, %arg14: memref<1x256xf32, #tpu.memory_space<vmem>>, %arg15: memref<256x256xf32, #tpu.memory_space<vmem>>, %arg16: memref<4x8x16xbf16, #tpu.memory_space<vmem>>, %arg17: memref<4x256x256xbf16, #tpu.memory_space<vmem>>, %arg18: memref<1x256xf32, #tpu.memory_space<vmem>>, %arg19: memref<1x256xf32, #tpu.memory_space<vmem>>, %arg20: memref<1x256xf32, #tpu.memory_space<vmem>>, %arg21: memref<256x256xf32, #tpu.memory_space<vmem>>, %arg22: memref<4x2x8xbf16, #tpu.memory_space<vmem>>, %arg23: memref<4x256x128xbf16, #tpu.memory_space<vmem>>, %arg24: memref<1x128xf32, #tpu.memory_space<vmem>>, %arg25: memref<2x128xf32, #tpu.memory_space<vmem>>) attributes {dimension_semantics = [], scalar_prefetch = 0 : i64, scratch_operands = 0 : i64, tpu.core_type = #tpu.core_type<tc>} {
    %c0 = arith.constant 0 : index
    %c0_0 = arith.constant 0 : index
    %0 = vector.load %arg0[%c0, %c0_0] : memref<128x192xbf16, #tpu.memory_space<vmem>>, vector<128x192xbf16>
    %cst = arith.constant 0.000000e+00 : f32
    %1 = vector.broadcast %cst : f32 to vector<64x256xf32>
    %c0_1 = arith.constant 0 : index
    %c0_2 = arith.constant 0 : index
    %c0_3 = arith.constant 0 : index
    %2 = vector.load %arg1[%c0_1, %c0_2, %c0_3] : memref<4x64x128xbf16, #tpu.memory_space<vmem>>, vector<1x64x128xbf16>
    %3 = vector.shape_cast %2 : vector<1x64x128xbf16> to vector<64x128xbf16>
    %cst_4 = arith.constant dense<0.000000e+00> : vector<64x192xf32>
    %4 = tpu.matmul %3, %0, %cst_4 {dimension_numbers = #tpu.dot_dimension_numbers<[1], [0], [0], [1], [0, 0, 1, 1], [], []>} : vector<64x128xbf16>, vector<128x192xbf16>, vector<64x192xf32> -> vector<64x192xf32>
    %5 = arith.truncf %4 : vector<64x192xf32> to vector<64x192xbf16>
    %c0_5 = arith.constant 0 : index
    %c0_6 = arith.constant 0 : index
    %c0_7 = arith.constant 0 : index
    %6 = vector.load %arg2[%c0_5, %c0_6, %c0_7] : memref<4x192x256xbf16, #tpu.memory_space<vmem>>, vector<1x192x256xbf16>
    %7 = vector.shape_cast %6 : vector<1x192x256xbf16> to vector<192x256xbf16>
    %cst_8 = arith.constant dense<0.000000e+00> : vector<64x256xf32>
    %8 = tpu.matmul %5, %7, %cst_8 {dimension_numbers = #tpu.dot_dimension_numbers<[1], [0], [0], [1], [0, 0, 1, 1], [], []>} : vector<64x192xbf16>, vector<192x256xbf16>, vector<64x256xf32> -> vector<64x256xf32>
    %9 = arith.addf %1, %8 : vector<64x256xf32>
    %c1 = arith.constant 1 : index
    %c0_9 = arith.constant 0 : index
    %c0_10 = arith.constant 0 : index
    %10 = vector.load %arg1[%c1, %c0_9, %c0_10] : memref<4x64x128xbf16, #tpu.memory_space<vmem>>, vector<1x64x128xbf16>
    %11 = vector.shape_cast %10 : vector<1x64x128xbf16> to vector<64x128xbf16>
    %cst_11 = arith.constant dense<0.000000e+00> : vector<64x192xf32>
    %12 = tpu.matmul %11, %0, %cst_11 {dimension_numbers = #tpu.dot_dimension_numbers<[1], [0], [0], [1], [0, 0, 1, 1], [], []>} : vector<64x128xbf16>, vector<128x192xbf16>, vector<64x192xf32> -> vector<64x192xf32>
    %13 = arith.truncf %12 : vector<64x192xf32> to vector<64x192xbf16>
    %c1_12 = arith.constant 1 : index
    %c0_13 = arith.constant 0 : index
    %c0_14 = arith.constant 0 : index
    %14 = vector.load %arg2[%c1_12, %c0_13, %c0_14] : memref<4x192x256xbf16, #tpu.memory_space<vmem>>, vector<1x192x256xbf16>
    %15 = vector.shape_cast %14 : vector<1x192x256xbf16> to vector<192x256xbf16>
    %cst_15 = arith.constant dense<0.000000e+00> : vector<64x256xf32>
    %16 = tpu.matmul %13, %15, %cst_15 {dimension_numbers = #tpu.dot_dimension_numbers<[1], [0], [0], [1], [0, 0, 1, 1], [], []>} : vector<64x192xbf16>, vector<192x256xbf16>, vector<64x256xf32> -> vector<64x256xf32>
    %17 = arith.addf %9, %16 : vector<64x256xf32>
    %c2 = arith.constant 2 : index
    %c0_16 = arith.constant 0 : index
    %c0_17 = arith.constant 0 : index
    %18 = vector.load %arg1[%c2, %c0_16, %c0_17] : memref<4x64x128xbf16, #tpu.memory_space<vmem>>, vector<1x64x128xbf16>
    %19 = vector.shape_cast %18 : vector<1x64x128xbf16> to vector<64x128xbf16>
    %cst_18 = arith.constant dense<0.000000e+00> : vector<64x192xf32>
    %20 = tpu.matmul %19, %0, %cst_18 {dimension_numbers = #tpu.dot_dimension_numbers<[1], [0], [0], [1], [0, 0, 1, 1], [], []>} : vector<64x128xbf16>, vector<128x192xbf16>, vector<64x192xf32> -> vector<64x192xf32>
    %21 = arith.truncf %20 : vector<64x192xf32> to vector<64x192xbf16>
    %c2_19 = arith.constant 2 : index
    %c0_20 = arith.constant 0 : index
    %c0_21 = arith.constant 0 : index
    %22 = vector.load %arg2[%c2_19, %c0_20, %c0_21] : memref<4x192x256xbf16, #tpu.memory_space<vmem>>, vector<1x192x256xbf16>
    %23 = vector.shape_cast %22 : vector<1x192x256xbf16> to vector<192x256xbf16>
    %cst_22 = arith.constant dense<0.000000e+00> : vector<64x256xf32>
    %24 = tpu.matmul %21, %23, %cst_22 {dimension_numbers = #tpu.dot_dimension_numbers<[1], [0], [0], [1], [0, 0, 1, 1], [], []>} : vector<64x192xbf16>, vector<192x256xbf16>, vector<64x256xf32> -> vector<64x256xf32>
    %25 = arith.addf %17, %24 : vector<64x256xf32>
    %c3 = arith.constant 3 : index
    %c0_23 = arith.constant 0 : index
    %c0_24 = arith.constant 0 : index
    %26 = vector.load %arg1[%c3, %c0_23, %c0_24] : memref<4x64x128xbf16, #tpu.memory_space<vmem>>, vector<1x64x128xbf16>
    %27 = vector.shape_cast %26 : vector<1x64x128xbf16> to vector<64x128xbf16>
    %cst_25 = arith.constant dense<0.000000e+00> : vector<64x192xf32>
    %28 = tpu.matmul %27, %0, %cst_25 {dimension_numbers = #tpu.dot_dimension_numbers<[1], [0], [0], [1], [0, 0, 1, 1], [], []>} : vector<64x128xbf16>, vector<128x192xbf16>, vector<64x192xf32> -> vector<64x192xf32>
    %29 = arith.truncf %28 : vector<64x192xf32> to vector<64x192xbf16>
    %c3_26 = arith.constant 3 : index
    %c0_27 = arith.constant 0 : index
    %c0_28 = arith.constant 0 : index
    %30 = vector.load %arg2[%c3_26, %c0_27, %c0_28] : memref<4x192x256xbf16, #tpu.memory_space<vmem>>, vector<1x192x256xbf16>
    %31 = vector.shape_cast %30 : vector<1x192x256xbf16> to vector<192x256xbf16>
    %cst_29 = arith.constant dense<0.000000e+00> : vector<64x256xf32>
    %32 = tpu.matmul %29, %31, %cst_29 {dimension_numbers = #tpu.dot_dimension_numbers<[1], [0], [0], [1], [0, 0, 1, 1], [], []>} : vector<64x192xbf16>, vector<192x256xbf16>, vector<64x256xf32> -> vector<64x256xf32>
    %33 = arith.addf %25, %32 : vector<64x256xf32>
    %c0_30 = arith.constant 0 : index
    %c0_31 = arith.constant 0 : index
    %34 = vector.load %arg3[%c0_30, %c0_31] : memref<1x256xf32, #tpu.memory_space<vmem>>, vector<1x256xf32>
    %35 = vector.broadcast %34 : vector<1x256xf32> to vector<64x256xf32>
    %36 = arith.addf %33, %35 : vector<64x256xf32>
    %cst_32 = arith.constant 2.000000e-01 : f32
    %37 = vector.broadcast %cst_32 : f32 to vector<64x256xf32>
    %38 = arith.mulf %37, %36 : vector<64x256xf32>
    %39 = arith.maximumf %36, %38 : vector<64x256xf32>
    %40 = arith.truncf %39 : vector<64x256xf32> to vector<64x256xbf16>
    %cst_33 = arith.constant 0.000000e+00 : f32
    %41 = vector.broadcast %cst_33 : f32 to vector<32x256xf32>
    %c0_34 = arith.constant 0 : index
    %c0_35 = arith.constant 0 : index
    %c0_36 = arith.constant 0 : index
    %42 = vector.load %arg4[%c0_34, %c0_35, %c0_36] : memref<4x32x64xbf16, #tpu.memory_space<vmem>>, vector<1x32x64xbf16>
    %43 = vector.shape_cast %42 : vector<1x32x64xbf16> to vector<32x64xbf16>
    %cst_37 = arith.constant dense<0.000000e+00> : vector<32x256xf32>
    %44 = tpu.matmul %43, %40, %cst_37 {dimension_numbers = #tpu.dot_dimension_numbers<[1], [0], [0], [1], [0, 0, 1, 1], [], []>} : vector<32x64xbf16>, vector<64x256xbf16>, vector<32x256xf32> -> vector<32x256xf32>
    %45 = arith.truncf %44 : vector<32x256xf32> to vector<32x256xbf16>
    %c0_38 = arith.constant 0 : index
    %c0_39 = arith.constant 0 : index
    %c0_40 = arith.constant 0 : index
    %46 = vector.load %arg5[%c0_38, %c0_39, %c0_40] : memref<4x256x256xbf16, #tpu.memory_space<vmem>>, vector<1x256x256xbf16>
    %47 = vector.shape_cast %46 : vector<1x256x256xbf16> to vector<256x256xbf16>
    %cst_41 = arith.constant dense<0.000000e+00> : vector<32x256xf32>
    %48 = tpu.matmul %45, %47, %cst_41 {dimension_numbers = #tpu.dot_dimension_numbers<[1], [0], [0], [1], [0, 0, 1, 1], [], []>} : vector<32x256xbf16>, vector<256x256xbf16>, vector<32x256xf32> -> vector<32x256xf32>
    %49 = arith.addf %41, %48 : vector<32x256xf32>
    %c1_42 = arith.constant 1 : index
    %c0_43 = arith.constant 0 : index
    %c0_44 = arith.constant 0 : index
    %50 = vector.load %arg4[%c1_42, %c0_43, %c0_44] : memref<4x32x64xbf16, #tpu.memory_space<vmem>>, vector<1x32x64xbf16>
    %51 = vector.shape_cast %50 : vector<1x32x64xbf16> to vector<32x64xbf16>
    %cst_45 = arith.constant dense<0.000000e+00> : vector<32x256xf32>
    %52 = tpu.matmul %51, %40, %cst_45 {dimension_numbers = #tpu.dot_dimension_numbers<[1], [0], [0], [1], [0, 0, 1, 1], [], []>} : vector<32x64xbf16>, vector<64x256xbf16>, vector<32x256xf32> -> vector<32x256xf32>
    %53 = arith.truncf %52 : vector<32x256xf32> to vector<32x256xbf16>
    %c1_46 = arith.constant 1 : index
    %c0_47 = arith.constant 0 : index
    %c0_48 = arith.constant 0 : index
    %54 = vector.load %arg5[%c1_46, %c0_47, %c0_48] : memref<4x256x256xbf16, #tpu.memory_space<vmem>>, vector<1x256x256xbf16>
    %55 = vector.shape_cast %54 : vector<1x256x256xbf16> to vector<256x256xbf16>
    %cst_49 = arith.constant dense<0.000000e+00> : vector<32x256xf32>
    %56 = tpu.matmul %53, %55, %cst_49 {dimension_numbers = #tpu.dot_dimension_numbers<[1], [0], [0], [1], [0, 0, 1, 1], [], []>} : vector<32x256xbf16>, vector<256x256xbf16>, vector<32x256xf32> -> vector<32x256xf32>
    %57 = arith.addf %49, %56 : vector<32x256xf32>
    %c2_50 = arith.constant 2 : index
    %c0_51 = arith.constant 0 : index
    %c0_52 = arith.constant 0 : index
    %58 = vector.load %arg4[%c2_50, %c0_51, %c0_52] : memref<4x32x64xbf16, #tpu.memory_space<vmem>>, vector<1x32x64xbf16>
    %59 = vector.shape_cast %58 : vector<1x32x64xbf16> to vector<32x64xbf16>
    %cst_53 = arith.constant dense<0.000000e+00> : vector<32x256xf32>
    %60 = tpu.matmul %59, %40, %cst_53 {dimension_numbers = #tpu.dot_dimension_numbers<[1], [0], [0], [1], [0, 0, 1, 1], [], []>} : vector<32x64xbf16>, vector<64x256xbf16>, vector<32x256xf32> -> vector<32x256xf32>
    %61 = arith.truncf %60 : vector<32x256xf32> to vector<32x256xbf16>
    %c2_54 = arith.constant 2 : index
    %c0_55 = arith.constant 0 : index
    %c0_56 = arith.constant 0 : index
    %62 = vector.load %arg5[%c2_54, %c0_55, %c0_56] : memref<4x256x256xbf16, #tpu.memory_space<vmem>>, vector<1x256x256xbf16>
    %63 = vector.shape_cast %62 : vector<1x256x256xbf16> to vector<256x256xbf16>
    %cst_57 = arith.constant dense<0.000000e+00> : vector<32x256xf32>
    %64 = tpu.matmul %61, %63, %cst_57 {dimension_numbers = #tpu.dot_dimension_numbers<[1], [0], [0], [1], [0, 0, 1, 1], [], []>} : vector<32x256xbf16>, vector<256x256xbf16>, vector<32x256xf32> -> vector<32x256xf32>
    %65 = arith.addf %57, %64 : vector<32x256xf32>
    %c3_58 = arith.constant 3 : index
    %c0_59 = arith.constant 0 : index
    %c0_60 = arith.constant 0 : index
    %66 = vector.load %arg4[%c3_58, %c0_59, %c0_60] : memref<4x32x64xbf16, #tpu.memory_space<vmem>>, vector<1x32x64xbf16>
    %67 = vector.shape_cast %66 : vector<1x32x64xbf16> to vector<32x64xbf16>
    %cst_61 = arith.constant dense<0.000000e+00> : vector<32x256xf32>
    %68 = tpu.matmul %67, %40, %cst_61 {dimension_numbers = #tpu.dot_dimension_numbers<[1], [0], [0], [1], [0, 0, 1, 1], [], []>} : vector<32x64xbf16>, vector<64x256xbf16>, vector<32x256xf32> -> vector<32x256xf32>
    %69 = arith.truncf %68 : vector<32x256xf32> to vector<32x256xbf16>
    %c3_62 = arith.constant 3 : index
    %c0_63 = arith.constant 0 : index
    %c0_64 = arith.constant 0 : index
    %70 = vector.load %arg5[%c3_62, %c0_63, %c0_64] : memref<4x256x256xbf16, #tpu.memory_space<vmem>>, vector<1x256x256xbf16>
    %71 = vector.shape_cast %70 : vector<1x256x256xbf16> to vector<256x256xbf16>
    %cst_65 = arith.constant dense<0.000000e+00> : vector<32x256xf32>
    %72 = tpu.matmul %69, %71, %cst_65 {dimension_numbers = #tpu.dot_dimension_numbers<[1], [0], [0], [1], [0, 0, 1, 1], [], []>} : vector<32x256xbf16>, vector<256x256xbf16>, vector<32x256xf32> -> vector<32x256xf32>
    %73 = arith.addf %65, %72 : vector<32x256xf32>
    %c0_66 = arith.constant 0 : index
    %c0_67 = arith.constant 0 : index
    %74 = vector.load %arg6[%c0_66, %c0_67] : memref<1x256xf32, #tpu.memory_space<vmem>>, vector<1x256xf32>
    %75 = vector.broadcast %74 : vector<1x256xf32> to vector<32x256xf32>
    %76 = arith.addf %73, %75 : vector<32x256xf32>
    %c0_68 = arith.constant 0 : index
    %c0_69 = arith.constant 0 : index
    %77 = vector.load %arg9[%c0_68, %c0_69] : memref<256x256xf32, #tpu.memory_space<vmem>>, vector<256x256xf32>
    %cst_70 = arith.constant dense<0.000000e+00> : vector<256xf32>
    %78 = vector.multi_reduction <add>, %76, %cst_70 [0] : vector<32x256xf32> to vector<256xf32>
    %79 = vector.shape_cast %78 : vector<256xf32> to vector<1x256xf32>
    %80 = vector.shape_cast %79 : vector<1x256xf32> to vector<1x256xf32>
    %81 = vector.broadcast %80 : vector<1x256xf32> to vector<8x256xf32>
    %cst_71 = arith.constant dense<0.000000e+00> : vector<8x256xf32>
    %82 = tpu.matmul %81, %77, %cst_71 {dimension_numbers = #tpu.dot_dimension_numbers<[1], [0], [0], [1], [0, 0, 1, 1], [], []>} : vector<8x256xf32>, vector<256x256xf32>, vector<8x256xf32> -> vector<8x256xf32>
    %83 = vector.extract_strided_slice %82 {offsets = [0, 0], sizes = [1, 256], strides = [1, 1]} : vector<8x256xf32> to vector<1x256xf32>
    %cst_72 = arith.constant 0.001953125 : f32
    %84 = vector.broadcast %cst_72 : f32 to vector<1x256xf32>
    %85 = arith.mulf %83, %84 : vector<1x256xf32>
    %86 = vector.broadcast %85 : vector<1x256xf32> to vector<32x256xf32>
    %87 = arith.subf %76, %86 : vector<32x256xf32>
    %88 = arith.mulf %87, %87 : vector<32x256xf32>
    %cst_73 = arith.constant dense<0.000000e+00> : vector<256xf32>
    %89 = vector.multi_reduction <add>, %88, %cst_73 [0] : vector<32x256xf32> to vector<256xf32>
    %90 = vector.shape_cast %89 : vector<256xf32> to vector<1x256xf32>
    %91 = vector.shape_cast %90 : vector<1x256xf32> to vector<1x256xf32>
    %92 = vector.broadcast %91 : vector<1x256xf32> to vector<8x256xf32>
    %cst_74 = arith.constant dense<0.000000e+00> : vector<8x256xf32>
    %93 = tpu.matmul %92, %77, %cst_74 {dimension_numbers = #tpu.dot_dimension_numbers<[1], [0], [0], [1], [0, 0, 1, 1], [], []>} : vector<8x256xf32>, vector<256x256xf32>, vector<8x256xf32> -> vector<8x256xf32>
    %94 = vector.extract_strided_slice %93 {offsets = [0, 0], sizes = [1, 256], strides = [1, 1]} : vector<8x256xf32> to vector<1x256xf32>
    %cst_75 = arith.constant 0.001953125 : f32
    %95 = vector.broadcast %cst_75 : f32 to vector<1x256xf32>
    %96 = arith.mulf %94, %95 : vector<1x256xf32>
    %cst_76 = arith.constant 0.000000e+00 : f32
    %97 = vector.broadcast %cst_76 : f32 to vector<1x256xf32>
    %98 = arith.maximumf %96, %97 : vector<1x256xf32>
    %cst_77 = arith.constant 9.99999974E-6 : f32
    %99 = vector.broadcast %cst_77 : f32 to vector<1x256xf32>
    %100 = arith.addf %98, %99 : vector<1x256xf32>
    %101 = math.rsqrt %100 : vector<1x256xf32>
    %c0_78 = arith.constant 0 : index
    %c0_79 = arith.constant 0 : index
    %102 = vector.load %arg7[%c0_78, %c0_79] : memref<1x256xf32, #tpu.memory_space<vmem>>, vector<1x256xf32>
    %103 = arith.mulf %101, %102 : vector<1x256xf32>
    %104 = vector.broadcast %103 : vector<1x256xf32> to vector<32x256xf32>
    %105 = arith.mulf %87, %104 : vector<32x256xf32>
    %c0_80 = arith.constant 0 : index
    %c0_81 = arith.constant 0 : index
    %106 = vector.load %arg8[%c0_80, %c0_81] : memref<1x256xf32, #tpu.memory_space<vmem>>, vector<1x256xf32>
    %107 = vector.broadcast %106 : vector<1x256xf32> to vector<32x256xf32>
    %108 = arith.addf %105, %107 : vector<32x256xf32>
    %cst_82 = arith.constant 2.000000e-01 : f32
    %109 = vector.broadcast %cst_82 : f32 to vector<32x256xf32>
    %110 = arith.mulf %109, %108 : vector<32x256xf32>
    %111 = arith.maximumf %108, %110 : vector<32x256xf32>
    %112 = arith.truncf %111 : vector<32x256xf32> to vector<32x256xbf16>
    %cst_83 = arith.constant 0.000000e+00 : f32
    %113 = vector.broadcast %cst_83 : f32 to vector<16x256xf32>
    %c0_84 = arith.constant 0 : index
    %c0_85 = arith.constant 0 : index
    %c0_86 = arith.constant 0 : index
    %114 = vector.load %arg10[%c0_84, %c0_85, %c0_86] : memref<4x16x32xbf16, #tpu.memory_space<vmem>>, vector<1x16x32xbf16>
    %115 = vector.shape_cast %114 : vector<1x16x32xbf16> to vector<16x32xbf16>
    %cst_87 = arith.constant dense<0.000000e+00> : vector<16x256xf32>
    %116 = tpu.matmul %115, %112, %cst_87 {dimension_numbers = #tpu.dot_dimension_numbers<[1], [0], [0], [1], [0, 0, 1, 1], [], []>} : vector<16x32xbf16>, vector<32x256xbf16>, vector<16x256xf32> -> vector<16x256xf32>
    %117 = arith.truncf %116 : vector<16x256xf32> to vector<16x256xbf16>
    %c0_88 = arith.constant 0 : index
    %c0_89 = arith.constant 0 : index
    %c0_90 = arith.constant 0 : index
    %118 = vector.load %arg11[%c0_88, %c0_89, %c0_90] : memref<4x256x256xbf16, #tpu.memory_space<vmem>>, vector<1x256x256xbf16>
    %119 = vector.shape_cast %118 : vector<1x256x256xbf16> to vector<256x256xbf16>
    %cst_91 = arith.constant dense<0.000000e+00> : vector<16x256xf32>
    %120 = tpu.matmul %117, %119, %cst_91 {dimension_numbers = #tpu.dot_dimension_numbers<[1], [0], [0], [1], [0, 0, 1, 1], [], []>} : vector<16x256xbf16>, vector<256x256xbf16>, vector<16x256xf32> -> vector<16x256xf32>
    %121 = arith.addf %113, %120 : vector<16x256xf32>
    %c1_92 = arith.constant 1 : index
    %c0_93 = arith.constant 0 : index
    %c0_94 = arith.constant 0 : index
    %122 = vector.load %arg10[%c1_92, %c0_93, %c0_94] : memref<4x16x32xbf16, #tpu.memory_space<vmem>>, vector<1x16x32xbf16>
    %123 = vector.shape_cast %122 : vector<1x16x32xbf16> to vector<16x32xbf16>
    %cst_95 = arith.constant dense<0.000000e+00> : vector<16x256xf32>
    %124 = tpu.matmul %123, %112, %cst_95 {dimension_numbers = #tpu.dot_dimension_numbers<[1], [0], [0], [1], [0, 0, 1, 1], [], []>} : vector<16x32xbf16>, vector<32x256xbf16>, vector<16x256xf32> -> vector<16x256xf32>
    %125 = arith.truncf %124 : vector<16x256xf32> to vector<16x256xbf16>
    %c1_96 = arith.constant 1 : index
    %c0_97 = arith.constant 0 : index
    %c0_98 = arith.constant 0 : index
    %126 = vector.load %arg11[%c1_96, %c0_97, %c0_98] : memref<4x256x256xbf16, #tpu.memory_space<vmem>>, vector<1x256x256xbf16>
    %127 = vector.shape_cast %126 : vector<1x256x256xbf16> to vector<256x256xbf16>
    %cst_99 = arith.constant dense<0.000000e+00> : vector<16x256xf32>
    %128 = tpu.matmul %125, %127, %cst_99 {dimension_numbers = #tpu.dot_dimension_numbers<[1], [0], [0], [1], [0, 0, 1, 1], [], []>} : vector<16x256xbf16>, vector<256x256xbf16>, vector<16x256xf32> -> vector<16x256xf32>
    %129 = arith.addf %121, %128 : vector<16x256xf32>
    %c2_100 = arith.constant 2 : index
    %c0_101 = arith.constant 0 : index
    %c0_102 = arith.constant 0 : index
    %130 = vector.load %arg10[%c2_100, %c0_101, %c0_102] : memref<4x16x32xbf16, #tpu.memory_space<vmem>>, vector<1x16x32xbf16>
    %131 = vector.shape_cast %130 : vector<1x16x32xbf16> to vector<16x32xbf16>
    %cst_103 = arith.constant dense<0.000000e+00> : vector<16x256xf32>
    %132 = tpu.matmul %131, %112, %cst_103 {dimension_numbers = #tpu.dot_dimension_numbers<[1], [0], [0], [1], [0, 0, 1, 1], [], []>} : vector<16x32xbf16>, vector<32x256xbf16>, vector<16x256xf32> -> vector<16x256xf32>
    %133 = arith.truncf %132 : vector<16x256xf32> to vector<16x256xbf16>
    %c2_104 = arith.constant 2 : index
    %c0_105 = arith.constant 0 : index
    %c0_106 = arith.constant 0 : index
    %134 = vector.load %arg11[%c2_104, %c0_105, %c0_106] : memref<4x256x256xbf16, #tpu.memory_space<vmem>>, vector<1x256x256xbf16>
    %135 = vector.shape_cast %134 : vector<1x256x256xbf16> to vector<256x256xbf16>
    %cst_107 = arith.constant dense<0.000000e+00> : vector<16x256xf32>
    %136 = tpu.matmul %133, %135, %cst_107 {dimension_numbers = #tpu.dot_dimension_numbers<[1], [0], [0], [1], [0, 0, 1, 1], [], []>} : vector<16x256xbf16>, vector<256x256xbf16>, vector<16x256xf32> -> vector<16x256xf32>
    %137 = arith.addf %129, %136 : vector<16x256xf32>
    %c3_108 = arith.constant 3 : index
    %c0_109 = arith.constant 0 : index
    %c0_110 = arith.constant 0 : index
    %138 = vector.load %arg10[%c3_108, %c0_109, %c0_110] : memref<4x16x32xbf16, #tpu.memory_space<vmem>>, vector<1x16x32xbf16>
    %139 = vector.shape_cast %138 : vector<1x16x32xbf16> to vector<16x32xbf16>
    %cst_111 = arith.constant dense<0.000000e+00> : vector<16x256xf32>
    %140 = tpu.matmul %139, %112, %cst_111 {dimension_numbers = #tpu.dot_dimension_numbers<[1], [0], [0], [1], [0, 0, 1, 1], [], []>} : vector<16x32xbf16>, vector<32x256xbf16>, vector<16x256xf32> -> vector<16x256xf32>
    %141 = arith.truncf %140 : vector<16x256xf32> to vector<16x256xbf16>
    %c3_112 = arith.constant 3 : index
    %c0_113 = arith.constant 0 : index
    %c0_114 = arith.constant 0 : index
    %142 = vector.load %arg11[%c3_112, %c0_113, %c0_114] : memref<4x256x256xbf16, #tpu.memory_space<vmem>>, vector<1x256x256xbf16>
    %143 = vector.shape_cast %142 : vector<1x256x256xbf16> to vector<256x256xbf16>
    %cst_115 = arith.constant dense<0.000000e+00> : vector<16x256xf32>
    %144 = tpu.matmul %141, %143, %cst_115 {dimension_numbers = #tpu.dot_dimension_numbers<[1], [0], [0], [1], [0, 0, 1, 1], [], []>} : vector<16x256xbf16>, vector<256x256xbf16>, vector<16x256xf32> -> vector<16x256xf32>
    %145 = arith.addf %137, %144 : vector<16x256xf32>
    %c0_116 = arith.constant 0 : index
    %c0_117 = arith.constant 0 : index
    %146 = vector.load %arg12[%c0_116, %c0_117] : memref<1x256xf32, #tpu.memory_space<vmem>>, vector<1x256xf32>
    %147 = vector.broadcast %146 : vector<1x256xf32> to vector<16x256xf32>
    %148 = arith.addf %145, %147 : vector<16x256xf32>
    %c0_118 = arith.constant 0 : index
    %c0_119 = arith.constant 0 : index
    %149 = vector.load %arg15[%c0_118, %c0_119] : memref<256x256xf32, #tpu.memory_space<vmem>>, vector<256x256xf32>
    %cst_120 = arith.constant dense<0.000000e+00> : vector<256xf32>
    %150 = vector.multi_reduction <add>, %148, %cst_120 [0] : vector<16x256xf32> to vector<256xf32>
    %151 = vector.shape_cast %150 : vector<256xf32> to vector<1x256xf32>
    %152 = vector.shape_cast %151 : vector<1x256xf32> to vector<1x256xf32>
    %153 = vector.broadcast %152 : vector<1x256xf32> to vector<8x256xf32>
    %cst_121 = arith.constant dense<0.000000e+00> : vector<8x256xf32>
    %154 = tpu.matmul %153, %149, %cst_121 {dimension_numbers = #tpu.dot_dimension_numbers<[1], [0], [0], [1], [0, 0, 1, 1], [], []>} : vector<8x256xf32>, vector<256x256xf32>, vector<8x256xf32> -> vector<8x256xf32>
    %155 = vector.extract_strided_slice %154 {offsets = [0, 0], sizes = [1, 256], strides = [1, 1]} : vector<8x256xf32> to vector<1x256xf32>
    %cst_122 = arith.constant 7.812500e-03 : f32
    %156 = vector.broadcast %cst_122 : f32 to vector<1x256xf32>
    %157 = arith.mulf %155, %156 : vector<1x256xf32>
    %158 = vector.broadcast %157 : vector<1x256xf32> to vector<16x256xf32>
    %159 = arith.subf %148, %158 : vector<16x256xf32>
    %160 = arith.mulf %159, %159 : vector<16x256xf32>
    %cst_123 = arith.constant dense<0.000000e+00> : vector<256xf32>
    %161 = vector.multi_reduction <add>, %160, %cst_123 [0] : vector<16x256xf32> to vector<256xf32>
    %162 = vector.shape_cast %161 : vector<256xf32> to vector<1x256xf32>
    %163 = vector.shape_cast %162 : vector<1x256xf32> to vector<1x256xf32>
    %164 = vector.broadcast %163 : vector<1x256xf32> to vector<8x256xf32>
    %cst_124 = arith.constant dense<0.000000e+00> : vector<8x256xf32>
    %165 = tpu.matmul %164, %149, %cst_124 {dimension_numbers = #tpu.dot_dimension_numbers<[1], [0], [0], [1], [0, 0, 1, 1], [], []>} : vector<8x256xf32>, vector<256x256xf32>, vector<8x256xf32> -> vector<8x256xf32>
    %166 = vector.extract_strided_slice %165 {offsets = [0, 0], sizes = [1, 256], strides = [1, 1]} : vector<8x256xf32> to vector<1x256xf32>
    %cst_125 = arith.constant 7.812500e-03 : f32
    %167 = vector.broadcast %cst_125 : f32 to vector<1x256xf32>
    %168 = arith.mulf %166, %167 : vector<1x256xf32>
    %cst_126 = arith.constant 0.000000e+00 : f32
    %169 = vector.broadcast %cst_126 : f32 to vector<1x256xf32>
    %170 = arith.maximumf %168, %169 : vector<1x256xf32>
    %cst_127 = arith.constant 9.99999974E-6 : f32
    %171 = vector.broadcast %cst_127 : f32 to vector<1x256xf32>
    %172 = arith.addf %170, %171 : vector<1x256xf32>
    %173 = math.rsqrt %172 : vector<1x256xf32>
    %c0_128 = arith.constant 0 : index
    %c0_129 = arith.constant 0 : index
    %174 = vector.load %arg13[%c0_128, %c0_129] : memref<1x256xf32, #tpu.memory_space<vmem>>, vector<1x256xf32>
    %175 = arith.mulf %173, %174 : vector<1x256xf32>
    %176 = vector.broadcast %175 : vector<1x256xf32> to vector<16x256xf32>
    %177 = arith.mulf %159, %176 : vector<16x256xf32>
    %c0_130 = arith.constant 0 : index
    %c0_131 = arith.constant 0 : index
    %178 = vector.load %arg14[%c0_130, %c0_131] : memref<1x256xf32, #tpu.memory_space<vmem>>, vector<1x256xf32>
    %179 = vector.broadcast %178 : vector<1x256xf32> to vector<16x256xf32>
    %180 = arith.addf %177, %179 : vector<16x256xf32>
    %cst_132 = arith.constant 2.000000e-01 : f32
    %181 = vector.broadcast %cst_132 : f32 to vector<16x256xf32>
    %182 = arith.mulf %181, %180 : vector<16x256xf32>
    %183 = arith.maximumf %180, %182 : vector<16x256xf32>
    %184 = arith.truncf %183 : vector<16x256xf32> to vector<16x256xbf16>
    %cst_133 = arith.constant 0.000000e+00 : f32
    %185 = vector.broadcast %cst_133 : f32 to vector<8x256xf32>
    %c0_134 = arith.constant 0 : index
    %c0_135 = arith.constant 0 : index
    %c0_136 = arith.constant 0 : index
    %186 = vector.load %arg16[%c0_134, %c0_135, %c0_136] : memref<4x8x16xbf16, #tpu.memory_space<vmem>>, vector<1x8x16xbf16>
    %187 = vector.shape_cast %186 : vector<1x8x16xbf16> to vector<8x16xbf16>
    %cst_137 = arith.constant dense<0.000000e+00> : vector<8x256xf32>
    %188 = tpu.matmul %187, %184, %cst_137 {dimension_numbers = #tpu.dot_dimension_numbers<[1], [0], [0], [1], [0, 0, 1, 1], [], []>} : vector<8x16xbf16>, vector<16x256xbf16>, vector<8x256xf32> -> vector<8x256xf32>
    %189 = arith.truncf %188 : vector<8x256xf32> to vector<8x256xbf16>
    %c0_138 = arith.constant 0 : index
    %c0_139 = arith.constant 0 : index
    %c0_140 = arith.constant 0 : index
    %190 = vector.load %arg17[%c0_138, %c0_139, %c0_140] : memref<4x256x256xbf16, #tpu.memory_space<vmem>>, vector<1x256x256xbf16>
    %191 = vector.shape_cast %190 : vector<1x256x256xbf16> to vector<256x256xbf16>
    %cst_141 = arith.constant dense<0.000000e+00> : vector<8x256xf32>
    %192 = tpu.matmul %189, %191, %cst_141 {dimension_numbers = #tpu.dot_dimension_numbers<[1], [0], [0], [1], [0, 0, 1, 1], [], []>} : vector<8x256xbf16>, vector<256x256xbf16>, vector<8x256xf32> -> vector<8x256xf32>
    %193 = arith.addf %185, %192 : vector<8x256xf32>
    %c1_142 = arith.constant 1 : index
    %c0_143 = arith.constant 0 : index
    %c0_144 = arith.constant 0 : index
    %194 = vector.load %arg16[%c1_142, %c0_143, %c0_144] : memref<4x8x16xbf16, #tpu.memory_space<vmem>>, vector<1x8x16xbf16>
    %195 = vector.shape_cast %194 : vector<1x8x16xbf16> to vector<8x16xbf16>
    %cst_145 = arith.constant dense<0.000000e+00> : vector<8x256xf32>
    %196 = tpu.matmul %195, %184, %cst_145 {dimension_numbers = #tpu.dot_dimension_numbers<[1], [0], [0], [1], [0, 0, 1, 1], [], []>} : vector<8x16xbf16>, vector<16x256xbf16>, vector<8x256xf32> -> vector<8x256xf32>
    %197 = arith.truncf %196 : vector<8x256xf32> to vector<8x256xbf16>
    %c1_146 = arith.constant 1 : index
    %c0_147 = arith.constant 0 : index
    %c0_148 = arith.constant 0 : index
    %198 = vector.load %arg17[%c1_146, %c0_147, %c0_148] : memref<4x256x256xbf16, #tpu.memory_space<vmem>>, vector<1x256x256xbf16>
    %199 = vector.shape_cast %198 : vector<1x256x256xbf16> to vector<256x256xbf16>
    %cst_149 = arith.constant dense<0.000000e+00> : vector<8x256xf32>
    %200 = tpu.matmul %197, %199, %cst_149 {dimension_numbers = #tpu.dot_dimension_numbers<[1], [0], [0], [1], [0, 0, 1, 1], [], []>} : vector<8x256xbf16>, vector<256x256xbf16>, vector<8x256xf32> -> vector<8x256xf32>
    %201 = arith.addf %193, %200 : vector<8x256xf32>
    %c2_150 = arith.constant 2 : index
    %c0_151 = arith.constant 0 : index
    %c0_152 = arith.constant 0 : index
    %202 = vector.load %arg16[%c2_150, %c0_151, %c0_152] : memref<4x8x16xbf16, #tpu.memory_space<vmem>>, vector<1x8x16xbf16>
    %203 = vector.shape_cast %202 : vector<1x8x16xbf16> to vector<8x16xbf16>
    %cst_153 = arith.constant dense<0.000000e+00> : vector<8x256xf32>
    %204 = tpu.matmul %203, %184, %cst_153 {dimension_numbers = #tpu.dot_dimension_numbers<[1], [0], [0], [1], [0, 0, 1, 1], [], []>} : vector<8x16xbf16>, vector<16x256xbf16>, vector<8x256xf32> -> vector<8x256xf32>
    %205 = arith.truncf %204 : vector<8x256xf32> to vector<8x256xbf16>
    %c2_154 = arith.constant 2 : index
    %c0_155 = arith.constant 0 : index
    %c0_156 = arith.constant 0 : index
    %206 = vector.load %arg17[%c2_154, %c0_155, %c0_156] : memref<4x256x256xbf16, #tpu.memory_space<vmem>>, vector<1x256x256xbf16>
    %207 = vector.shape_cast %206 : vector<1x256x256xbf16> to vector<256x256xbf16>
    %cst_157 = arith.constant dense<0.000000e+00> : vector<8x256xf32>
    %208 = tpu.matmul %205, %207, %cst_157 {dimension_numbers = #tpu.dot_dimension_numbers<[1], [0], [0], [1], [0, 0, 1, 1], [], []>} : vector<8x256xbf16>, vector<256x256xbf16>, vector<8x256xf32> -> vector<8x256xf32>
    %209 = arith.addf %201, %208 : vector<8x256xf32>
    %c3_158 = arith.constant 3 : index
    %c0_159 = arith.constant 0 : index
    %c0_160 = arith.constant 0 : index
    %210 = vector.load %arg16[%c3_158, %c0_159, %c0_160] : memref<4x8x16xbf16, #tpu.memory_space<vmem>>, vector<1x8x16xbf16>
    %211 = vector.shape_cast %210 : vector<1x8x16xbf16> to vector<8x16xbf16>
    %cst_161 = arith.constant dense<0.000000e+00> : vector<8x256xf32>
    %212 = tpu.matmul %211, %184, %cst_161 {dimension_numbers = #tpu.dot_dimension_numbers<[1], [0], [0], [1], [0, 0, 1, 1], [], []>} : vector<8x16xbf16>, vector<16x256xbf16>, vector<8x256xf32> -> vector<8x256xf32>
    %213 = arith.truncf %212 : vector<8x256xf32> to vector<8x256xbf16>
    %c3_162 = arith.constant 3 : index
    %c0_163 = arith.constant 0 : index
    %c0_164 = arith.constant 0 : index
    %214 = vector.load %arg17[%c3_162, %c0_163, %c0_164] : memref<4x256x256xbf16, #tpu.memory_space<vmem>>, vector<1x256x256xbf16>
    %215 = vector.shape_cast %214 : vector<1x256x256xbf16> to vector<256x256xbf16>
    %cst_165 = arith.constant dense<0.000000e+00> : vector<8x256xf32>
    %216 = tpu.matmul %213, %215, %cst_165 {dimension_numbers = #tpu.dot_dimension_numbers<[1], [0], [0], [1], [0, 0, 1, 1], [], []>} : vector<8x256xbf16>, vector<256x256xbf16>, vector<8x256xf32> -> vector<8x256xf32>
    %217 = arith.addf %209, %216 : vector<8x256xf32>
    %c0_166 = arith.constant 0 : index
    %c0_167 = arith.constant 0 : index
    %218 = vector.load %arg18[%c0_166, %c0_167] : memref<1x256xf32, #tpu.memory_space<vmem>>, vector<1x256xf32>
    %219 = vector.broadcast %218 : vector<1x256xf32> to vector<8x256xf32>
    %220 = arith.addf %217, %219 : vector<8x256xf32>
    %c0_168 = arith.constant 0 : index
    %c0_169 = arith.constant 0 : index
    %221 = vector.load %arg21[%c0_168, %c0_169] : memref<256x256xf32, #tpu.memory_space<vmem>>, vector<256x256xf32>
    %cst_170 = arith.constant dense<0.000000e+00> : vector<256xf32>
    %222 = vector.multi_reduction <add>, %220, %cst_170 [0] : vector<8x256xf32> to vector<256xf32>
    %223 = vector.shape_cast %222 : vector<256xf32> to vector<1x256xf32>
    %224 = vector.shape_cast %223 : vector<1x256xf32> to vector<1x256xf32>
    %225 = vector.broadcast %224 : vector<1x256xf32> to vector<8x256xf32>
    %cst_171 = arith.constant dense<0.000000e+00> : vector<8x256xf32>
    %226 = tpu.matmul %225, %221, %cst_171 {dimension_numbers = #tpu.dot_dimension_numbers<[1], [0], [0], [1], [0, 0, 1, 1], [], []>} : vector<8x256xf32>, vector<256x256xf32>, vector<8x256xf32> -> vector<8x256xf32>
    %227 = vector.extract_strided_slice %226 {offsets = [0, 0], sizes = [1, 256], strides = [1, 1]} : vector<8x256xf32> to vector<1x256xf32>
    %cst_172 = arith.constant 3.125000e-02 : f32
    %228 = vector.broadcast %cst_172 : f32 to vector<1x256xf32>
    %229 = arith.mulf %227, %228 : vector<1x256xf32>
    %230 = vector.broadcast %229 : vector<1x256xf32> to vector<8x256xf32>
    %231 = arith.subf %220, %230 : vector<8x256xf32>
    %232 = arith.mulf %231, %231 : vector<8x256xf32>
    %cst_173 = arith.constant dense<0.000000e+00> : vector<256xf32>
    %233 = vector.multi_reduction <add>, %232, %cst_173 [0] : vector<8x256xf32> to vector<256xf32>
    %234 = vector.shape_cast %233 : vector<256xf32> to vector<1x256xf32>
    %235 = vector.shape_cast %234 : vector<1x256xf32> to vector<1x256xf32>
    %236 = vector.broadcast %235 : vector<1x256xf32> to vector<8x256xf32>
    %cst_174 = arith.constant dense<0.000000e+00> : vector<8x256xf32>
    %237 = tpu.matmul %236, %221, %cst_174 {dimension_numbers = #tpu.dot_dimension_numbers<[1], [0], [0], [1], [0, 0, 1, 1], [], []>} : vector<8x256xf32>, vector<256x256xf32>, vector<8x256xf32> -> vector<8x256xf32>
    %238 = vector.extract_strided_slice %237 {offsets = [0, 0], sizes = [1, 256], strides = [1, 1]} : vector<8x256xf32> to vector<1x256xf32>
    %cst_175 = arith.constant 3.125000e-02 : f32
    %239 = vector.broadcast %cst_175 : f32 to vector<1x256xf32>
    %240 = arith.mulf %238, %239 : vector<1x256xf32>
    %cst_176 = arith.constant 0.000000e+00 : f32
    %241 = vector.broadcast %cst_176 : f32 to vector<1x256xf32>
    %242 = arith.maximumf %240, %241 : vector<1x256xf32>
    %cst_177 = arith.constant 9.99999974E-6 : f32
    %243 = vector.broadcast %cst_177 : f32 to vector<1x256xf32>
    %244 = arith.addf %242, %243 : vector<1x256xf32>
    %245 = math.rsqrt %244 : vector<1x256xf32>
    %c0_178 = arith.constant 0 : index
    %c0_179 = arith.constant 0 : index
    %246 = vector.load %arg19[%c0_178, %c0_179] : memref<1x256xf32, #tpu.memory_space<vmem>>, vector<1x256xf32>
    %247 = arith.mulf %245, %246 : vector<1x256xf32>
    %248 = vector.broadcast %247 : vector<1x256xf32> to vector<8x256xf32>
    %249 = arith.mulf %231, %248 : vector<8x256xf32>
    %c0_180 = arith.constant 0 : index
    %c0_181 = arith.constant 0 : index
    %250 = vector.load %arg20[%c0_180, %c0_181] : memref<1x256xf32, #tpu.memory_space<vmem>>, vector<1x256xf32>
    %251 = vector.broadcast %250 : vector<1x256xf32> to vector<8x256xf32>
    %252 = arith.addf %249, %251 : vector<8x256xf32>
    %cst_182 = arith.constant 2.000000e-01 : f32
    %253 = vector.broadcast %cst_182 : f32 to vector<8x256xf32>
    %254 = arith.mulf %253, %252 : vector<8x256xf32>
    %255 = arith.maximumf %252, %254 : vector<8x256xf32>
    %256 = arith.truncf %255 : vector<8x256xf32> to vector<8x256xbf16>
    %cst_183 = arith.constant 0.000000e+00 : f32
    %257 = vector.broadcast %cst_183 : f32 to vector<2x128xf32>
    %c0_184 = arith.constant 0 : index
    %c0_185 = arith.constant 0 : index
    %c0_186 = arith.constant 0 : index
    %258 = vector.load %arg22[%c0_184, %c0_185, %c0_186] : memref<4x2x8xbf16, #tpu.memory_space<vmem>>, vector<1x2x8xbf16>
    %259 = vector.shape_cast %258 : vector<1x2x8xbf16> to vector<2x8xbf16>
    %cst_187 = arith.constant dense<0.000000e+00> : vector<2x256xf32>
    %260 = tpu.matmul %259, %256, %cst_187 {dimension_numbers = #tpu.dot_dimension_numbers<[1], [0], [0], [1], [0, 0, 1, 1], [], []>} : vector<2x8xbf16>, vector<8x256xbf16>, vector<2x256xf32> -> vector<2x256xf32>
    %261 = arith.truncf %260 : vector<2x256xf32> to vector<2x256xbf16>
    %c0_188 = arith.constant 0 : index
    %c0_189 = arith.constant 0 : index
    %c0_190 = arith.constant 0 : index
    %262 = vector.load %arg23[%c0_188, %c0_189, %c0_190] : memref<4x256x128xbf16, #tpu.memory_space<vmem>>, vector<1x256x128xbf16>
    %263 = vector.shape_cast %262 : vector<1x256x128xbf16> to vector<256x128xbf16>
    %cst_191 = arith.constant dense<0.000000e+00> : vector<2x128xf32>
    %264 = tpu.matmul %261, %263, %cst_191 {dimension_numbers = #tpu.dot_dimension_numbers<[1], [0], [0], [1], [0, 0, 1, 1], [], []>} : vector<2x256xbf16>, vector<256x128xbf16>, vector<2x128xf32> -> vector<2x128xf32>
    %265 = arith.addf %257, %264 : vector<2x128xf32>
    %c1_192 = arith.constant 1 : index
    %c0_193 = arith.constant 0 : index
    %c0_194 = arith.constant 0 : index
    %266 = vector.load %arg22[%c1_192, %c0_193, %c0_194] : memref<4x2x8xbf16, #tpu.memory_space<vmem>>, vector<1x2x8xbf16>
    %267 = vector.shape_cast %266 : vector<1x2x8xbf16> to vector<2x8xbf16>
    %cst_195 = arith.constant dense<0.000000e+00> : vector<2x256xf32>
    %268 = tpu.matmul %267, %256, %cst_195 {dimension_numbers = #tpu.dot_dimension_numbers<[1], [0], [0], [1], [0, 0, 1, 1], [], []>} : vector<2x8xbf16>, vector<8x256xbf16>, vector<2x256xf32> -> vector<2x256xf32>
    %269 = arith.truncf %268 : vector<2x256xf32> to vector<2x256xbf16>
    %c1_196 = arith.constant 1 : index
    %c0_197 = arith.constant 0 : index
    %c0_198 = arith.constant 0 : index
    %270 = vector.load %arg23[%c1_196, %c0_197, %c0_198] : memref<4x256x128xbf16, #tpu.memory_space<vmem>>, vector<1x256x128xbf16>
    %271 = vector.shape_cast %270 : vector<1x256x128xbf16> to vector<256x128xbf16>
    %cst_199 = arith.constant dense<0.000000e+00> : vector<2x128xf32>
    %272 = tpu.matmul %269, %271, %cst_199 {dimension_numbers = #tpu.dot_dimension_numbers<[1], [0], [0], [1], [0, 0, 1, 1], [], []>} : vector<2x256xbf16>, vector<256x128xbf16>, vector<2x128xf32> -> vector<2x128xf32>
    %273 = arith.addf %265, %272 : vector<2x128xf32>
    %c2_200 = arith.constant 2 : index
    %c0_201 = arith.constant 0 : index
    %c0_202 = arith.constant 0 : index
    %274 = vector.load %arg22[%c2_200, %c0_201, %c0_202] : memref<4x2x8xbf16, #tpu.memory_space<vmem>>, vector<1x2x8xbf16>
    %275 = vector.shape_cast %274 : vector<1x2x8xbf16> to vector<2x8xbf16>
    %cst_203 = arith.constant dense<0.000000e+00> : vector<2x256xf32>
    %276 = tpu.matmul %275, %256, %cst_203 {dimension_numbers = #tpu.dot_dimension_numbers<[1], [0], [0], [1], [0, 0, 1, 1], [], []>} : vector<2x8xbf16>, vector<8x256xbf16>, vector<2x256xf32> -> vector<2x256xf32>
    %277 = arith.truncf %276 : vector<2x256xf32> to vector<2x256xbf16>
    %c2_204 = arith.constant 2 : index
    %c0_205 = arith.constant 0 : index
    %c0_206 = arith.constant 0 : index
    %278 = vector.load %arg23[%c2_204, %c0_205, %c0_206] : memref<4x256x128xbf16, #tpu.memory_space<vmem>>, vector<1x256x128xbf16>
    %279 = vector.shape_cast %278 : vector<1x256x128xbf16> to vector<256x128xbf16>
    %cst_207 = arith.constant dense<0.000000e+00> : vector<2x128xf32>
    %280 = tpu.matmul %277, %279, %cst_207 {dimension_numbers = #tpu.dot_dimension_numbers<[1], [0], [0], [1], [0, 0, 1, 1], [], []>} : vector<2x256xbf16>, vector<256x128xbf16>, vector<2x128xf32> -> vector<2x128xf32>
    %281 = arith.addf %273, %280 : vector<2x128xf32>
    %c3_208 = arith.constant 3 : index
    %c0_209 = arith.constant 0 : index
    %c0_210 = arith.constant 0 : index
    %282 = vector.load %arg22[%c3_208, %c0_209, %c0_210] : memref<4x2x8xbf16, #tpu.memory_space<vmem>>, vector<1x2x8xbf16>
    %283 = vector.shape_cast %282 : vector<1x2x8xbf16> to vector<2x8xbf16>
    %cst_211 = arith.constant dense<0.000000e+00> : vector<2x256xf32>
    %284 = tpu.matmul %283, %256, %cst_211 {dimension_numbers = #tpu.dot_dimension_numbers<[1], [0], [0], [1], [0, 0, 1, 1], [], []>} : vector<2x8xbf16>, vector<8x256xbf16>, vector<2x256xf32> -> vector<2x256xf32>
    %285 = arith.truncf %284 : vector<2x256xf32> to vector<2x256xbf16>
    %c3_212 = arith.constant 3 : index
    %c0_213 = arith.constant 0 : index
    %c0_214 = arith.constant 0 : index
    %286 = vector.load %arg23[%c3_212, %c0_213, %c0_214] : memref<4x256x128xbf16, #tpu.memory_space<vmem>>, vector<1x256x128xbf16>
    %287 = vector.shape_cast %286 : vector<1x256x128xbf16> to vector<256x128xbf16>
    %cst_215 = arith.constant dense<0.000000e+00> : vector<2x128xf32>
    %288 = tpu.matmul %285, %287, %cst_215 {dimension_numbers = #tpu.dot_dimension_numbers<[1], [0], [0], [1], [0, 0, 1, 1], [], []>} : vector<2x256xbf16>, vector<256x128xbf16>, vector<2x128xf32> -> vector<2x128xf32>
    %289 = arith.addf %281, %288 : vector<2x128xf32>
    %c0_216 = arith.constant 0 : index
    %c0_217 = arith.constant 0 : index
    %290 = vector.load %arg24[%c0_216, %c0_217] : memref<1x128xf32, #tpu.memory_space<vmem>>, vector<1x128xf32>
    %291 = vector.broadcast %290 : vector<1x128xf32> to vector<2x128xf32>
    %292 = arith.addf %289, %291 : vector<2x128xf32>
    %c0_218 = arith.constant 0 : index
    %c0_219 = arith.constant 0 : index
    %293 = vector.load %arg25[%c0_218, %c0_219] : memref<2x128xf32, #tpu.memory_space<vmem>>, vector<2x128xf32>
    tpu.vector_store %arg25[%c0_218, %c0_219], %292 {strides = array<i32>} : memref<2x128xf32, #tpu.memory_space<vmem>>, vector<2x128xf32>,
    return
  }
}

</mosaic_0001>

<bundles_post_ra>
// kernel: discriminator_forward.1
= control target key start
LH: loop header
LB: loop body
LE: loop exit
PB: predicated region body
PF: predicated region fallthrough
CT: control target
= control target key end

     0   :  { %s13441_s0 = inlined_call_operand.vmem [shape: bf16[128,192], index: 0, kind: input, shape index: {}]   ;;  %s13442_s1 = inlined_call_operand.vmem [shape: bf16[4,64,128], index: 1, kind: input, shape index: {}]   ;;  %s13443_s2 = inlined_call_operand.hbm [shape: bf16[4,192,256], index: 2, kind: input, shape index: {}]   ;;  %s13444_s3 = inlined_call_operand.vmem [shape: f32[1,256], index: 3, kind: input, shape index: {}]   ;;  %s13445_s4 = inlined_call_operand.vmem [shape: bf16[4,32,64], index: 4, kind: input, shape index: {}]   ;;  %s13446_s5 = inlined_call_operand.vmem [shape: bf16[4,256,256], index: 5, kind: input, shape index: {}]   ;;  %s13447_s6 = inlined_call_operand.vmem [shape: f32[1,256], index: 6, kind: input, shape index: {}]   ;;  %s13448_s7 = inlined_call_operand.vmem [shape: f32[1,256], index: 7, kind: input, shape index: {}]   ;;  %s13449_s8 = inlined_call_operand.vmem [shape: f32[1,256], index: 8, kind: input, shape index: {}]   ;;  %s13450_s9 = inlined_call_operand.hbm [shape: f32[256,256], index: 9, kind: input, shape index: {}]   ;;  %s13451_s10 = inlined_call_operand.vmem [shape: bf16[4,16,32], index: 10, kind: input, shape index: {}]   ;;  %s13452_s11 = inlined_call_operand.hbm [shape: bf16[4,256,256], index: 11, kind: input, shape index: {}]   ;;  %s13453_s12 = inlined_call_operand.vmem [shape: f32[1,256], index: 12, kind: input, shape index: {}]   ;;  %s13454_s13 = inlined_call_operand.vmem [shape: f32[1,256], index: 13, kind: input, shape index: {}]   ;;  %s13455_s14 = inlined_call_operand.vmem [shape: f32[1,256], index: 14, kind: input, shape index: {}]   ;;  %s13456_s15 = inlined_call_operand.hbm [shape: f32[256,256], index: 15, kind: input, shape index: {}]   ;;  %s13457_s16 = inlined_call_operand.vmem [shape: bf16[4,8,16], index: 16, kind: input, shape index: {}]   ;;  %s13458_s17 = inlined_call_operand.hbm [shape: bf16[4,256,256], index: 17, kind: input, shape index: {}]   ;;  %s13459_s18 = inlined_call_operand.vmem [shape: f32[1,256], index: 18, kind: input, shape index: {}]   ;;  %s13460_s19 = inlined_call_operand.vmem [shape: f32[1,256], index: 19, kind: input, shape index: {}]   ;;  %s13461_s20 = inlined_call_operand.vmem [shape: f32[1,256], index: 20, kind: input, shape index: {}]   ;;  %s13462_s21 = inlined_call_operand.hbm [shape: f32[256,256], index: 21, kind: input, shape index: {}]   ;;  %s13463_s22 = inlined_call_operand.vmem [shape: bf16[4,2,8], index: 22, kind: input, shape index: {}]   ;;  %s13464_s23 = inlined_call_operand.hbm [shape: bf16[4,256,128], index: 23, kind: input, shape index: {}]   ;;  %s13465_s24 = inlined_call_operand.vmem [shape: f32[1,128], index: 24, kind: input, shape index: {}]   ;;  %s13466_s25 = inlined_call_operand.vmem [shape: f32[2,128], index: 25, kind: output, shape index: {}]  }
   0x1   :  { %13533 = sst [smem:[#allocation59_spill]] %s13441_s0 }
   0x2   :  { %13534 = sst [smem:[#allocation60_spill]] %s13442_s1 }
   0x3   :  { %13535 = sst [smem:[#allocation61_spill]] %s13443_s2 }
   0x4   :  { %13536 = sst [smem:[#allocation62_spill]] %s13444_s3 }
   0x5   :  { %13537 = sst [smem:[#allocation63_spill]] %s13445_s4 }
   0x6   :  { %13538 = sst [smem:[#allocation64_spill]] %s13446_s5 }
   0x7   :  { %13539 = sst [smem:[#allocation65_spill]] %s13447_s6 }
   0x8   :  { %13540 = sst [smem:[#allocation66_spill]] %s13448_s7 }
   0x9   :  { %13541 = sst [smem:[#allocation67_spill]] %s13449_s8 }
   0xa   :  { %13542 = sst [smem:[#allocation68_spill]] %s13450_s9 }
   0xb   :  { %13543 = sst [smem:[#allocation69_spill]] %s13465_s24 }
   0xc   :  { %13544 = sst [smem:[#allocation70_spill]] %s13466_s25 }
   0xd   :  { %30 = vsyncpa [#allocation3], 0 }
   0xe   :  { %31 = vsyncpa [#allocation5], 0 }
   0xf   :  { %32 = vsyncpa [#allocation8], 0  ;;  %s13545_s6 = sld [smem:[#allocation68_spill]] }
  0x15   :  { %s67_s30 = sshll.u32 %s13545_s6, 4  ;;  %s68_s30 = int_to_ptr.hbm [resolvable:$true] %s67_s30 }
  0x16   :  { %33 = vsyncpa [#allocation11], 0  ;;  %s10649_s7 = smov [#allocation4]   ;;  %s101_s8 = sshll.u32 %s13456_s15, 4  ;;  %s102_s8 = int_to_ptr.hbm [resolvable:$true] %s101_s8 }
  0x17   :  { %s69_s3 = sshll.u32 %s10649_s7, 4  ;;  %s10650_s27 = smov 256   ;;  %s70_s3 = int_to_ptr.vmem [resolvable:$true] %s69_s3 }
  0x18   :  { %s10651_s4 = smov 16   ;;  %s10652_s28 = smov [#allocation7]  }
  0x19   :  { %75 = dma.hbm_to_vmem [thread:$0]  %s68_s30, 8192, %s70_s3, [#allocation5], %s10650_s27, %s10650_s27, %s10651_s4  }
  0x1a   :  { %s103_s9 = sshll.u32 %s10652_s28, 4  ;;  %s135_s29 = sshll.u32 %s13462_s21, 4  ;;  %s104_s9 = int_to_ptr.vmem [resolvable:$true] %s103_s9  ;;  %s136_s29 = int_to_ptr.hbm [resolvable:$true] %s135_s29 }
  0x1b   :  { %109 = dma.hbm_to_vmem [thread:$0]  %s102_s8, 8192, %s104_s9, [#allocation8], %s10650_s27, %s10650_s27, %s10651_s4  }
  0x1c   :  { %s13546_s7 = sld [smem:[#allocation61_spill]]  ;;  %s10653_s24 = smov [#allocation10]  }
  0x1d   :  { %s137_s26 = sshll.u32 %s10653_s24, 4  ;;  %s10654_s15 = smov [#allocation2]   ;;  %s138_s26 = int_to_ptr.vmem [resolvable:$true] %s137_s26 }
  0x1e   :  { %143 = dma.hbm_to_vmem [thread:$0]  %s136_s29, 8192, %s138_s26, [#allocation11], %s10650_s27, %s10650_s27, %s10651_s4  }
  0x1f   :  { %s44_s30 = sshll.u32 %s10654_s15, 4  ;;  %s10655_s3 = smov 128   ;;  %s45_s30 = int_to_ptr.vmem [resolvable:$true] %s44_s30 }
  0x20   :  { %s10656_s1 = smov 8   ;;  %s82_s5 = sshll.u32 %s13452_s11, 4  ;;  %s83_s5 = int_to_ptr.hbm [resolvable:$true] %s82_s5 }
  0x21   :  { %s10657_s8 = smov [#allocation6]   ;;  %s116_s24 = sshll.u32 %s13458_s17, 4  ;;  %s117_s24 = int_to_ptr.hbm [resolvable:$true] %s116_s24 }
  0x22   :  { %s42_s25 = sshll.u32 %s13546_s7, 4  ;;  %s84_s9 = sshll.u32 %s10657_s8, 4  ;;  %s43_s25 = int_to_ptr.hbm [resolvable:$true] %s42_s25  ;;  %s85_s9 = int_to_ptr.vmem [resolvable:$true] %s84_s9 }
  0x23   :  { %50 = dma.hbm_to_vmem [thread:$0]  %s43_s25, 12288, %s45_s30, [#allocation3], %s10655_s3, %s10655_s3, %s10656_s1  }
  0x24   :  { %90 = dma.hbm_to_vmem [thread:$0]  %s83_s5, 16384, %s85_s9, [#allocation5], %s10655_s3, %s10655_s3, %s10656_s1  }
  0x25   :  { %s10658_s27 = smov [#allocation9]   ;;  %s150_s25 = sshll.u32 %s13464_s23, 4  ;;  %s151_s25 = int_to_ptr.hbm [resolvable:$true] %s150_s25 }
  0x26   :  { %s118_s4 = sshll.u32 %s10658_s27, 4  ;;  %s10659_s11 = smov [#allocation12]   ;;  %s119_s4 = int_to_ptr.vmem [resolvable:$true] %s118_s4 }
  0x27   :  { %124 = dma.hbm_to_vmem [thread:$0]  %s117_s24, 16384, %s119_s4, [#allocation8], %s10655_s3, %s10655_s3, %s10656_s1  }
  0x28   :  { %s152_s7 = sshll.u32 %s10659_s11, 4  ;;  %s10660_s26 = smov 64   ;;  %s153_s7 = int_to_ptr.vmem [resolvable:$true] %s152_s7 }
  0x29   :  { %s10661_s15 = smov 4  }
  0x2a   :  { %158 = dma.hbm_to_vmem [thread:$0]  %s151_s25, 8192, %s153_s7, [#allocation11], %s10660_s26, %s10660_s26, %s10661_s15  }
  0x2b   :  { %10641 = dma.done.wait [#allocation3], 12288  }
  0x2c   :  { %10642 = vsyncadd [#allocation3], 4294955008 }
  0x2d   :  { %10643 = dma.done.wait [#allocation5], 24576  }
  0x2e   :  { %10644 = vsyncadd [#allocation5], 4294942720 }
  0x2f   :  { %10645 = dma.done.wait [#allocation8], 24576  }
  0x30   :  { %10646 = vsyncadd [#allocation8], 4294942720 }
  0x31   :  { %10647 = dma.done.wait [#allocation11], 16384  }
  0x32   :  { %10648 = vsyncadd [#allocation11], 4294950912  ;;  %s13547_s23 = sld [smem:[#allocation59_spill]]  ;;  %v7449_v53 = vld [vmem:[#allocation2 + $0x130] sm:$0xf]  ;;  %vm652_vm0 = vcmask 523264  }
  0x33   :  { %s13548_s3 = sld [smem:[#allocation60_spill]]  ;;  %v9918_v54 = vld [vmem:[#allocation2 + $0x134] sm:$0xf0]  ;;  %v9917_v55 = vld [vmem:[#allocation2 + $0x134] sm:$0xf]  ;;  %vm3588_vm7 = vcmask 261120  }
  0x34   :  { %v7450_v56 = vor.u32 %v9918_v54, %v7449_v53  ;;  %v7451_v57 = vld [vmem:[#allocation2 + $0x138] sm:$0xf0]  ;;  %v7441_v58 = vld [vmem:[#allocation2 + $0x120] sm:$0xf]  ;;  %v9916_v59 = vld [vmem:[#allocation2 + $0x124] sm:$0xf0] }
  0x35   :  { %v7454_v60 = vor.u32 %v9917_v55, %v7451_v57  ;;  %v9915_v61 = vld [vmem:[#allocation2 + $0x124] sm:$0xf]  ;;  %v7443_v62 = vld [vmem:[#allocation2 + $0x128] sm:$0xf0]  ;;  %v7442_v63 = vor.u32 %v9916_v59, %v7441_v58  ;;  %v9922_v54 = vld [vmem:[#allocation2 + $0x154] sm:$0xf0] }
  0x36   :  { %v9905_v55 = vld [vmem:[#allocation2 + $0xd4] sm:$0xf]  ;;  %v7393_v59 = vld [vmem:[#allocation2 + $0xc0] sm:$0xf]  ;;  %s13569_s4 = sld [smem:[#allocation62_spill]]  ;;  %vm5083_vm14 = vcmask 130048  }
  0x37   :  { %s13586_s25 = sld [smem:[#allocation64_spill]] }
  0x38   :  { %v7361_v0 = vld [vmem:[%s13547_s23 + $0x70] sm:$0xf]  ;;  %v9870_v1 = vld [vmem:[%s13547_s23 + $0x74] sm:$0xf0]  ;;  %v9869_v2 = vld [vmem:[%s13547_s23 + $0x74] sm:$0xf] }
  0x39   :  { %v10822_v3 = vor.u32 %v9870_v1, %v7361_v0  ;;  %v7363_v4 = vld [vmem:[%s13547_s23 + $0x78] sm:$0xf0]  ;;  %v7353_v5 = vld [vmem:[%s13547_s23 + $0x60] sm:$0xf]  ;;  %v9868_v6 = vld [vmem:[%s13547_s23 + $0x64] sm:$0xf0]  ;;  %v7446_v0 = vor.u32 %v9915_v61, %v7443_v62 }
  0x3a   :  { %v10833_v7 = vor.u32 %v9869_v2, %v7363_v4  ;;  %v9867_v8 = vld [vmem:[%s13547_s23 + $0x64] sm:$0xf]  ;;  %v7355_v9 = vld [vmem:[%s13547_s23 + $0x68] sm:$0xf0]  ;;  %v10842_v10 = vor.u32 %v9868_v6, %v7353_v5  ;;  %v7345_v12 = vld [vmem:[%s13547_s23 + $0x50] sm:$0xf] }
  0x3b   :  { %441 = vmatpush.bf16.msra.mxu2 %v10822_v3  ;;  %318 = vmatpush.bf16.msra.mxu0 %v10822_v3  ;;  %v10846_v11 = vor.u32 %v9867_v8, %v7355_v9  ;;  %v9866_v13 = vld [vmem:[%s13547_s23 + $0x54] sm:$0xf0]  ;;  %v9865_v14 = vld [vmem:[%s13547_s23 + $0x54] sm:$0xf]  ;;  %v7347_v15 = vld [vmem:[%s13547_s23 + $0x58] sm:$0xf0] }
  0x3c   :  { %470 = vmatpush.bf16.msra.mxu3 %v10833_v7  ;;  %347 = vmatpush.bf16.msra.mxu1 %v10833_v7  ;;  %v10862_v16 = vor.u32 %v9866_v13, %v7345_v12  ;;  %v10866_v17 = vor.u32 %v9865_v14, %v7347_v15  ;;  %v7337_v18 = vld [vmem:[%s13547_s23 + $0x40] sm:$0xf]  ;;  %v9864_v19 = vld [vmem:[%s13547_s23 + $0x44] sm:$0xf0]  ;;  %v9863_v20 = vld [vmem:[%s13547_s23 + $0x44] sm:$0xf] }
  0x3d   :  { %v7339_v21 = vld [vmem:[%s13547_s23 + $0x48] sm:$0xf0]  ;;  %v10882_v22 = vor.u32 %v9864_v19, %v7337_v18  ;;  %v7329_v24 = vld [vmem:[%s13547_s23 + $0x30] sm:$0xf]  ;;  %v9862_v25 = vld [vmem:[%s13547_s23 + $0x34] sm:$0xf0] }
  0x3e   :  { %v10886_v23 = vor.u32 %v9863_v20, %v7339_v21  ;;  %v9861_v26 = vld [vmem:[%s13547_s23 + $0x34] sm:$0xf]  ;;  %v7331_v27 = vld [vmem:[%s13547_s23 + $0x38] sm:$0xf0]  ;;  %v10902_v28 = vor.u32 %v9862_v25, %v7329_v24  ;;  %v7321_v30 = vld [vmem:[%s13547_s23 + $0x20] sm:$0xf] }
  0x3f   :  { %442 = vmatpush.bf16.msra.mxu2 %v10842_v10  ;;  %319 = vmatpush.bf16.msra.mxu0 %v10842_v10  ;;  %v10906_v29 = vor.u32 %v9861_v26, %v7331_v27  ;;  %v9860_v31 = vld [vmem:[%s13547_s23 + $0x24] sm:$0xf0]  ;;  %v9859_v32 = vld [vmem:[%s13547_s23 + $0x24] sm:$0xf]  ;;  %v7323_v33 = vld [vmem:[%s13547_s23 + $0x28] sm:$0xf0] }
  0x40   :  { %471 = vmatpush.bf16.msra.mxu3 %v10846_v11  ;;  %348 = vmatpush.bf16.msra.mxu1 %v10846_v11  ;;  %v10922_v34 = vor.u32 %v9860_v31, %v7321_v30  ;;  %v10926_v35 = vor.u32 %v9859_v32, %v7323_v33  ;;  %v7313_v36 = vld [vmem:[%s13547_s23 + $0x10] sm:$0xf]  ;;  %v9858_v37 = vld [vmem:[%s13547_s23 + $0x14] sm:$0xf0]  ;;  %v9857_v38 = vld [vmem:[%s13547_s23 + $0x14] sm:$0xf] }
  0x41   :  { %v7315_v39 = vld [vmem:[%s13547_s23 + $0x18] sm:$0xf0]  ;;  %v10942_v40 = vor.u32 %v9858_v37, %v7313_v36  ;;  %v7305_v42 = vld [vmem:[%s13547_s23] sm:$0xf]  ;;  %v9856_v43 = vld [vmem:[%s13547_s23 + $0x4] sm:$0xf0] }
  0x42   :  { %v10946_v41 = vor.u32 %v9857_v38, %v7315_v39  ;;  %v9855_v44 = vld [vmem:[%s13547_s23 + $0x4] sm:$0xf]  ;;  %v7307_v45 = vld [vmem:[%s13547_s23 + $0x8] sm:$0xf0]  ;;  %v10962_v46 = vor.u32 %v9856_v43, %v7305_v42  ;;  %v9901_v51 = vld [vmem:[%s13548_s3 + $0x30] sm:$0xff]  ;;  %s13630_s7 = sld [smem:[#allocation65_spill]] }
  0x43   :  { %443 = vmatpush.bf16.msra.mxu2 %v10862_v16  ;;  %320 = vmatpush.bf16.msra.mxu0 %v10862_v16  ;;  %v10966_v47 = vor.u32 %v9855_v44, %v7307_v45  ;;  %v9899_v48 = vld [vmem:[%s13548_s3 + $0x20] sm:$0xff]  ;;  %v9900_v49 = vld [vmem:[%s13548_s3 + $0x28] sm:$0xff]  ;;  %v7433_v1 = vld [vmem:[#allocation2 + $0x110] sm:$0xf]  ;;  %s13673_s17 = sld [smem:[#allocation66_spill]] }
  0x44   :  { %472 = vmatpush.bf16.msra.mxu3 %v10866_v17  ;;  %349 = vmatpush.bf16.msra.mxu1 %v10866_v17  ;;  %v9871_v50 = vld [vmem:[%s13548_s3] sm:$0xff]  ;;  %v9872_v52 = vld [vmem:[%s13548_s3 + $0x8] sm:$0xff]  ;;  %v9914_v2 = vld [vmem:[#allocation2 + $0x114] sm:$0xf0]  ;;  %s13674_s28 = sld [smem:[#allocation67_spill]] }
  0x45   :  { %v9913_v4 = vld [vmem:[#allocation2 + $0x114] sm:$0xf]  ;;  %v7435_v5 = vld [vmem:[#allocation2 + $0x118] sm:$0xf0]  ;;  %v7481_v6 = vld [vmem:[#allocation2 + $0x170] sm:$0xf]  ;;  %v7434_v9 = vor.u32 %v9914_v2, %v7433_v1 }
  0x46   :  { %v9926_v8 = vld [vmem:[#allocation2 + $0x174] sm:$0xf0]  ;;  %v7438_v13 = vor.u32 %v9913_v4, %v7435_v5  ;;  %v7425_v14 = vld [vmem:[#allocation2 + $0x100] sm:$0xf]  ;;  %v9912_v15 = vld [vmem:[#allocation2 + $0x104] sm:$0xf0] }
  0x47   :  { %444 = vmatpush.bf16.msra.mxu2 %v10882_v22  ;;  %321 = vmatpush.bf16.msra.mxu0 %v10882_v22  ;;  %v7482_v12 = vor.u32 %v9926_v8, %v7481_v6  ;;  %v9902_v18 = vld [vmem:[%s13548_s3 + $0x38] sm:$0xff]  ;;  %v9911_v19 = vld [vmem:[#allocation2 + $0x104] sm:$0xf]  ;;  %v7427_v20 = vld [vmem:[#allocation2 + $0x108] sm:$0xf0]  ;;  %v7426_v21 = vor.u32 %v9912_v15, %v7425_v14  ;;  %s13717_s2 = sld [smem:[#allocation69_spill]] }
  0x48   :  { %473 = vmatpush.bf16.msra.mxu3 %v10886_v23  ;;  %350 = vmatpush.bf16.msra.mxu1 %v10886_v23  ;;  %v9873_v24 = vld [vmem:[%s13548_s3 + $0x10] sm:$0xff]  ;;  %v9910_v26 = vld [vmem:[#allocation2 + $0xf4] sm:$0xf0]  ;;  %v7430_v27 = vor.u32 %v9911_v19, %v7427_v20  ;;  %v7419_v31 = vld [vmem:[#allocation2 + $0xf8] sm:$0xf0] }
  0x49   :  { %v7417_v25 = vld [vmem:[#allocation2 + $0xf0] sm:$0xf]  ;;  %v9909_v30 = vld [vmem:[#allocation2 + $0xf4] sm:$0xf]  ;;  %v9874_v36 = vld [vmem:[%s13548_s3 + $0x18] sm:$0xff] }
  0x4a   :  { %v7418_v32 = vor.u32 %v9910_v26, %v7417_v25  ;;  %v7422_v33 = vor.u32 %v9909_v30, %v7419_v31  ;;  %v7409_v37 = vld [vmem:[#allocation2 + $0xe0] sm:$0xf]  ;;  %v9908_v38 = vld [vmem:[#allocation2 + $0xe4] sm:$0xf0]  ;;  %v9907_v44 = vld [vmem:[#allocation2 + $0xe4] sm:$0xf] }
  0x4b   :  { %445 = vmatpush.bf16.msra.mxu2 %v10902_v28  ;;  %322 = vmatpush.bf16.msra.mxu0 %v10902_v28  ;;  %v7473_v39 = vld [vmem:[#allocation2 + $0x160] sm:$0xf]  ;;  %v7410_v42 = vor.u32 %v9908_v38, %v7409_v37  ;;  %v9924_v43 = vld [vmem:[#allocation2 + $0x164] sm:$0xf0]  ;;  %v7411_v45 = vld [vmem:[#allocation2 + $0xe8] sm:$0xf0] }
  0x4c   :  { %474 = vmatpush.bf16.msra.mxu3 %v10906_v29  ;;  %351 = vmatpush.bf16.msra.mxu1 %v10906_v29  ;;  %v7457_v61 = vld [vmem:[#allocation2 + $0x140] sm:$0xf]  ;;  %v7395_v1 = vld [vmem:[#allocation2 + $0xc8] sm:$0xf0]  ;;  %v7553_v14 = vld [vmem:[#allocation2 + $0x70] sm:$0xf] }
  0x4d   :  { %v9890_v15 = vld [vmem:[#allocation2 + $0x74] sm:$0xf0]  ;;  %v9888_v30 = vld [vmem:[#allocation2 + $0x64] sm:$0xf0]  ;;  %v7577_v31 = vld [vmem:[#allocation2 + $0xa0] sm:$0xf] }
  0x4e   :  { %v7554_v19 = vor.u32 %v9890_v15, %v7553_v14  ;;  %v9898_v20 = vld [vmem:[#allocation2 + $0xb4] sm:$0xf0]  ;;  %v7547_v37 = vld [vmem:[#allocation2 + $0x68] sm:$0xf0]  ;;  %v9881_v14 = vld [vmem:[#allocation2 + $0x34] sm:$0xf] }
  0x4f   :  { %446 = vmatpush.bf16.msra.mxu2 %v10922_v34  ;;  %323 = vmatpush.bf16.msra.mxu0 %v10922_v34  ;;  %v7523_v15 = vld [vmem:[#allocation2 + $0x38] sm:$0xf0] }
  0x50   :  { %475 = vmatpush.bf16.msra.mxu3 %v10926_v35  ;;  %352 = vmatpush.bf16.msra.mxu1 %v10926_v35 }
  0x53   :  { %447 = vmatpush.bf16.msra.mxu2 %v10942_v40  ;;  %324 = vmatpush.bf16.msra.mxu0 %v10942_v40 }
  0x54   :  { %476 = vmatpush.bf16.msra.mxu3 %v10946_v41  ;;  %353 = vmatpush.bf16.msra.mxu1 %v10946_v41 }
  0x57   :  { %448 = vmatpush.bf16.msra.mxu2 %v10962_v46  ;;  %325 = vmatpush.bf16.msra.mxu0 %v10962_v46 }
  0x58   :  { %477 = vmatpush.bf16.msra.mxu3 %v10966_v47  ;;  %354 = vmatpush.bf16.msra.mxu1 %v10966_v47 }
  0x5a   :  { %449 = vmatmul.bf16.vlgmr.msra.gmra.mxu2 %v9899_v48  ;;  %326 = vmatmul.bf16.vlgmr.msra.gmra.mxu0 %v9871_v50 }
  0x5b   :  { %478 = vmatmul.bf16.vlgmr.msra.gmra.mxu3 %v9899_v48  ;;  %355 = vmatmul.bf16.vlgmr.msra.gmra.mxu1 %v9871_v50  ;;  %v7474_v48 = vor.u32 %v9924_v43, %v7473_v39  ;;  %v7401_v50 = vld [vmem:[#allocation2 + $0xd0] sm:$0xf] }
  0x5c   :  { %665 = vmatpush.bf16.msrb.mxu0 %v7450_v56  ;;  %723 = vmatpush.bf16.msrb.mxu2 %v7454_v60  ;;  %v7403_v56 = vld [vmem:[#allocation2 + $0xd8] sm:$0xf0]  ;;  %v9904_v60 = vld [vmem:[#allocation2 + $0xc4] sm:$0xf0] }
  0x5d   :  { %698 = vmatpush.bf16.msrb.mxu1 %v7482_v12  ;;  %10443 = vmatpush.bf16.msrb.mxu3 %v7482_v12  ;;  %v7406_v58 = vor.u32 %v9905_v55, %v7403_v56  ;;  %v7394_v62 = vor.u32 %v9904_v60, %v7393_v59  ;;  %v7529_v55 = vld [vmem:[#allocation2 + $0x40] sm:$0xf]  ;;  %v9884_v56 = vld [vmem:[#allocation2 + $0x44] sm:$0xf0]  ;;  %v9883_v60 = vld [vmem:[#allocation2 + $0x44] sm:$0xf] }
  0x5e   :  { %v9892_v59 = vld [vmem:[#allocation2 + $0x84] sm:$0xf0] }
  0x60   :  { %666 = vmatpush.bf16.msrb.mxu0 %v7442_v63  ;;  %724 = vmatpush.bf16.msrb.mxu2 %v7446_v0  ;;  %v9920_v63 = vld [vmem:[#allocation2 + $0x144] sm:$0xf0]  ;;  %v9903_v0 = vld [vmem:[#allocation2 + $0xc4] sm:$0xf] }
  0x61   :  { %699 = vmatpush.bf16.msrb.mxu1 %v7474_v48  ;;  %10444 = vmatpush.bf16.msrb.mxu3 %v7474_v48  ;;  %v7458_v2 = vor.u32 %v9920_v63, %v7457_v61  ;;  %v7398_v4 = vor.u32 %v9903_v0, %v7395_v1  ;;  %v7569_v48 = vld [vmem:[#allocation2 + $0x90] sm:$0xf]  ;;  %v7531_v61 = vld [vmem:[#allocation2 + $0x48] sm:$0xf0] }
  0x62   :  { %v7534_v0 = vor.u32 %v9883_v60, %v7531_v61 }
  0x64   :  { %667 = vmatpush.bf16.msrb.mxu0 %v7434_v9  ;;  %725 = vmatpush.bf16.msrb.mxu2 %v7438_v13 }
  0x68   :  { %668 = vmatpush.bf16.msrb.mxu0 %v7426_v21  ;;  %726 = vmatpush.bf16.msrb.mxu2 %v7430_v27  ;;  %v9889_v21 = vld [vmem:[#allocation2 + $0x74] sm:$0xf]  ;;  %v7545_v27 = vld [vmem:[#allocation2 + $0x60] sm:$0xf] }
  0x6a   :  { %454 = vmatmul.bf16.gmra.mxu2 %v9900_v49  ;;  %331 = vmatmul.bf16.gmra.mxu0 %v9872_v52 }
  0x6b   :  { %483 = vmatmul.bf16.gmra.mxu3 %v9900_v49  ;;  %360 = vmatmul.bf16.gmra.mxu1 %v9872_v52  ;;  %v7414_v49 = vor.u32 %v9907_v44, %v7411_v45  ;;  %v7465_v52 = vld [vmem:[#allocation2 + $0x150] sm:$0xf]  ;;  %v9886_v45 = vld [vmem:[#allocation2 + $0x54] sm:$0xf0] }
  0x6c   :  { %669 = vmatpush.bf16.msrb.mxu0 %v7418_v32  ;;  %727 = vmatpush.bf16.msrb.mxu2 %v7422_v33  ;;  %v7466_v57 = vor.u32 %v9922_v54, %v7465_v52  ;;  %v7546_v32 = vor.u32 %v9888_v30, %v7545_v27  ;;  %v9896_v33 = vld [vmem:[#allocation2 + $0xa4] sm:$0xf0]  ;;  %v7537_v44 = vld [vmem:[#allocation2 + $0x50] sm:$0xf]  ;;  %v7539_v52 = vld [vmem:[#allocation2 + $0x58] sm:$0xf0] }
  0x6d   :  { %v7578_v39 = vor.u32 %v9896_v33, %v7577_v31  ;;  %v9879_v27 = vld [vmem:[#allocation2 + $0x24] sm:$0xf]  ;;  %v7515_v30 = vld [vmem:[#allocation2 + $0x28] sm:$0xf0]  ;;  %v9921_v33 = vld [vmem:[#allocation2 + $0x154] sm:$0xf] }
  0x6e   :  { %700 = vmatpush.bf16.msrb.mxu1 %v7466_v57  ;;  %10445 = vmatpush.bf16.msrb.mxu3 %v7466_v57  ;;  %v7561_v57 = vld [vmem:[#allocation2 + $0x80] sm:$0xf] }
  0x6f   :  { %v7562_v63 = vor.u32 %v9892_v59, %v7561_v57 }
  0x70   :  { %670 = vmatpush.bf16.msrb.mxu0 %v7410_v42  ;;  %728 = vmatpush.bf16.msrb.mxu2 %v7414_v49  ;;  %v7538_v49 = vor.u32 %v9886_v45, %v7537_v44 }
  0x72   :  { %701 = vmatpush.bf16.msrb.mxu1 %v7458_v2  ;;  %10446 = vmatpush.bf16.msrb.mxu3 %v7458_v2 }
  0x74   :  { %729 = vmatpush.bf16.msrb.mxu2 %v7406_v58  ;;  %v7530_v58 = vor.u32 %v9884_v56, %v7529_v55  ;;  %v9875_v55 = vld [vmem:[#allocation2 + $0x4] sm:$0xf]  ;;  %v7499_v56 = vld [vmem:[#allocation2 + $0x8] sm:$0xf0] }
  0x75   :  { %v7502_v59 = vor.u32 %v9875_v55, %v7499_v56  ;;  %v9927_v56 = vld [vmem:[%s13548_s3 + $0x40] sm:$0xff] }
  0x78   :  { %730 = vmatpush.bf16.msrb.mxu2 %v7398_v4 }
  0x7a   :  { %459 = vmatmul.bf16.gmra.mxu2 %v9901_v51  ;;  %336 = vmatmul.bf16.gmra.mxu0 %v9873_v24 }
  0x7b   :  { %488 = vmatmul.bf16.gmra.mxu3 %v9901_v51  ;;  %365 = vmatmul.bf16.gmra.mxu1 %v9873_v24  ;;  %v9906_v51 = vld [vmem:[#allocation2 + $0xd4] sm:$0xf0]  ;;  %v7555_v24 = vld [vmem:[#allocation2 + $0x78] sm:$0xf0] }
  0x7c   :  { %v7402_v53 = vor.u32 %v9906_v51, %v7401_v50  ;;  %v7558_v26 = vor.u32 %v9889_v21, %v7555_v24  ;;  %v9894_v50 = vld [vmem:[#allocation2 + $0x94] sm:$0xf0]  ;;  %v9885_v51 = vld [vmem:[#allocation2 + $0x54] sm:$0xf]  ;;  %v7475_v21 = vld [vmem:[#allocation2 + $0x168] sm:$0xf0] }
  0x7d   :  { %v7542_v54 = vor.u32 %v9885_v51, %v7539_v52  ;;  %v7513_v24 = vld [vmem:[#allocation2 + $0x20] sm:$0xf]  ;;  %v9919_v51 = vld [vmem:[#allocation2 + $0x144] sm:$0xf]  ;;  %v7459_v52 = vld [vmem:[#allocation2 + $0x148] sm:$0xf0] }
  0x7e   :  { %671 = vmatpush.bf16.msrb.mxu0 %v7402_v53  ;;  %971 = vmatpush.bf16.msra.mxu2 %v7558_v26  ;;  %v7570_v53 = vor.u32 %v9894_v50, %v7569_v48  ;;  %v9880_v26 = vld [vmem:[#allocation2 + $0x24] sm:$0xf0]  ;;  %v7462_v57 = vor.u32 %v9919_v51, %v7459_v52  ;;  %v7563_v51 = vld [vmem:[#allocation2 + $0x88] sm:$0xf0] }
  0x7f   :  { %v7514_v31 = vor.u32 %v9880_v26, %v7513_v24 }
  0x82   :  { %672 = vmatpush.bf16.msrb.mxu0 %v7394_v62 }
  0x86   :  { %913 = vmatpush.bf16.msra.mxu0 %v7554_v19  ;;  %v7526_v19 = vor.u32 %v9881_v14, %v7523_v15 }
  0x8a   :  { %464 = vmatmul.bf16.gmra.mxu2 %v9902_v18  ;;  %341 = vmatmul.bf16.gmra.mxu0 %v9874_v36 }
  0x8b   :  { %493 = vmatmul.bf16.gmra.mxu3 %v9902_v18  ;;  %370 = vmatmul.bf16.gmra.mxu1 %v9874_v36  ;;  %v7585_v18 = vld [vmem:[#allocation2 + $0xb0] sm:$0xf]  ;;  %v9887_v36 = vld [vmem:[#allocation2 + $0x64] sm:$0xf] }
  0x8c   :  { %v7586_v25 = vor.u32 %v9898_v20, %v7585_v18  ;;  %v7550_v42 = vor.u32 %v9887_v36, %v7547_v37  ;;  %914 = vmatpush.bf16.msra.mxu0 %v7546_v32  ;;  %v9923_v20 = vld [vmem:[#allocation2 + $0x164] sm:$0xf]  ;;  %v7518_v32 = vor.u32 %v9879_v27, %v7515_v30  ;;  %v7467_v36 = vld [vmem:[#allocation2 + $0x158] sm:$0xf0]  ;;  %v7505_v37 = vld [vmem:[#allocation2 + $0x10] sm:$0xf] }
  0x8d   :  { %v7470_v48 = vor.u32 %v9921_v33, %v7467_v36  ;;  %v9897_v33 = vld [vmem:[#allocation2 + $0xb4] sm:$0xf]  ;;  %v7587_v36 = vld [vmem:[#allocation2 + $0xb8] sm:$0xf0] }
  0x8e   :  { %946 = vmatpush.bf16.msra.mxu1 %v7586_v25  ;;  %972 = vmatpush.bf16.msra.mxu2 %v7550_v42  ;;  %v7478_v25 = vor.u32 %v9923_v20, %v7475_v21  ;;  %v9877_v42 = vld [vmem:[#allocation2 + $0x14] sm:$0xf] }
  0x90   :  { %915 = vmatpush.bf16.msra.mxu0 %v7538_v49 }
  0x92   :  { %947 = vmatpush.bf16.msra.mxu1 %v7578_v39  ;;  %973 = vmatpush.bf16.msra.mxu2 %v7542_v54  ;;  %v9878_v39 = vld [vmem:[#allocation2 + $0x14] sm:$0xf0]  ;;  %v9876_v54 = vld [vmem:[#allocation2 + $0x4] sm:$0xf0] }
  0x93   :  { %v7506_v49 = vor.u32 %v9878_v39, %v7505_v37  ;;  %v7579_v39 = vld [vmem:[#allocation2 + $0xa8] sm:$0xf0] }
  0x94   :  { %916 = vmatpush.bf16.msra.mxu0 %v7530_v58 }
  0x96   :  { %948 = vmatpush.bf16.msra.mxu1 %v7570_v53  ;;  %974 = vmatpush.bf16.msra.mxu2 %v7534_v0  ;;  %v7497_v53 = vld [vmem:[#allocation2] sm:$0xf] }
  0x97   :  { %v7498_v58 = vor.u32 %v9876_v54, %v7497_v53 }
  0x9a   :  { %949 = vmatpush.bf16.msra.mxu1 %v7562_v63  ;;  %975 = vmatpush.bf16.msra.mxu2 %v7526_v19 }
  0x9e   :  { %976 = vmatpush.bf16.msra.mxu2 %v7518_v32 }
  0xdd   :  { %v450_v5 = vpop.f32.mrf.mxu2 }
  0xde   :  { %v479_v6 = vpop.f32.mrf.mxu3 }
  0xe5   :  { %v452_v8 = vpop.f32.mrf.mxu2 }
  0xe6   :  { %v499_v9 = vpack.c.bf16 %v452_v8, %v450_v5  ;;  %v481_v12 = vpop.f32.mrf.mxu3  ;;  %v9925_v5 = vld [vmem:[#allocation2 + $0x174] sm:$0xf]  ;;  %v7521_v8 = vld [vmem:[#allocation2 + $0x30] sm:$0xf] }
  0xe7   :  { %v10997_v13 = vpack.c.bf16 %v481_v12, %v479_v6  ;;  %v7483_v6 = vld [vmem:[#allocation2 + $0x178] sm:$0xf0]  ;;  %v9882_v12 = vld [vmem:[#allocation2 + $0x34] sm:$0xf0] }
  0xe8   :  { %673 = vmatmul.bf16.vlgmr.msrb.gmra.mxu0 %v499_v9  ;;  %731 = vmatmul.bf16.vlgmr.msrb.gmra.mxu2 %v499_v9  ;;  %v7486_v9 = vor.u32 %v9925_v5, %v7483_v6  ;;  %v7522_v18 = vor.u32 %v9882_v12, %v7521_v8 }
  0xe9   :  { %7487 = vmatmul.msk.bf16.vlgmr.msrb.gmra.mxu1 %vm652_vm0, %v10997_v13 }
  0xea   :  { %756 = vmatpush.bf16.msra.mxu3 %v7486_v9  ;;  %1091 = vmatpush.bf16.msrb.mxu1 %v10833_v7 }
  0xeb   :  { %917 = vmatpush.bf16.msra.mxu0 %v7522_v18 }
  0xed   :  { %v455_v38 = vpop.f32.mrf.mxu2 }
  0xee   :  { %v484_v43 = vpop.f32.mrf.mxu3  ;;  %757 = vmatpush.bf16.msra.mxu3 %v7478_v25  ;;  %1092 = vmatpush.bf16.msrb.mxu1 %v10846_v11 }
  0xef   :  { %918 = vmatpush.bf16.msra.mxu0 %v7514_v31 }
  0xf2   :  { %758 = vmatpush.bf16.msra.mxu3 %v7470_v48  ;;  %1093 = vmatpush.bf16.msrb.mxu1 %v10866_v17 }
  0xf3   :  { %919 = vmatpush.bf16.msra.mxu0 %v7506_v49 }
  0xf5   :  { %v457_v62 = vpop.f32.mrf.mxu2 }
  0xf6   :  { %v486_v1 = vpop.f32.mrf.mxu3  ;;  %v501_v2 = vpack.c.bf16 %v457_v62, %v455_v38  ;;  %v356_v38 = vpop.f32.mrf.mxu1  ;;  %759 = vmatpush.bf16.msra.mxu3 %v7462_v57  ;;  %1094 = vmatpush.bf16.msrb.mxu1 %v10886_v23 }
  0xf7   :  { %v11001_v4 = vpack.c.bf16 %v486_v1, %v484_v43  ;;  %v7507_v43 = vld [vmem:[#allocation2 + $0x18] sm:$0xf0]  ;;  %920 = vmatpush.bf16.msra.mxu0 %v7498_v58 }
  0xf8   :  { %678 = vmatmul.bf16.gmra.mxu0 %v501_v2  ;;  %736 = vmatmul.bf16.gmra.mxu2 %v501_v2  ;;  %v7510_v50 = vor.u32 %v9877_v42, %v7507_v43  ;;  %v327_v2 = vpop.f32.mrf.mxu0  ;;  %v9893_v43 = vld [vmem:[#allocation2 + $0x94] sm:$0xf] }
  0xf9   :  { %7488 = vmatmul.msk.bf16.gmra.mxu1 %vm652_vm0, %v11001_v4 }
  0xfa   :  { %977 = vmatpush.bf16.msra.mxu2 %v7510_v50  ;;  %1095 = vmatpush.bf16.msrb.mxu1 %v10906_v29  ;;  %v9891_v50 = vld [vmem:[#allocation2 + $0x84] sm:$0xf] }
  0xfb   :  { %1062 = vmatpush.bf16.msrb.mxu0 %v10822_v3  ;;  %v7566_v52 = vor.u32 %v9891_v50, %v7563_v51 }
  0xfd   :  { %v460_v44 = vpop.f32.mrf.mxu2 }
  0xfe   :  { %v489_v45 = vpop.f32.mrf.mxu3  ;;  %v358_v63 = vpop.f32.mrf.mxu1  ;;  %978 = vmatpush.bf16.msra.mxu2 %v7502_v59  ;;  %1096 = vmatpush.bf16.msrb.mxu1 %v10926_v35  ;;  %v9928_v59 = vld [vmem:[%s13548_s3 + $0x48] sm:$0xff] }
  0xff   :  { %1063 = vmatpush.bf16.msrb.mxu0 %v10842_v10  ;;  %v11019_v8 = vpack.c.bf16 %v358_v63, %v356_v38  ;;  %v7590_v38 = vor.u32 %v9897_v33, %v7587_v36 }
 0x100   :  { %v329_v18 = vpop.f32.mrf.mxu0 }
 0x101   :  { %v376_v25 = vpack.c.bf16 %v329_v18, %v327_v2 }
 0x102   :  { %1097 = vmatpush.bf16.msrb.mxu1 %v10946_v41 }
 0x103   :  { %1064 = vmatpush.bf16.msrb.mxu0 %v10862_v16 }
 0x105   :  { %v462_v60 = vpop.f32.mrf.mxu2 }
 0x106   :  { %v491_v61 = vpop.f32.mrf.mxu3  ;;  %v503_v62 = vpack.c.bf16 %v462_v60, %v460_v44  ;;  %v361_v6 = vpop.f32.mrf.mxu1  ;;  %1098 = vmatpush.bf16.msrb.mxu1 %v10966_v47  ;;  %v7571_v44 = vld [vmem:[#allocation2 + $0x98] sm:$0xf0] }
 0x107   :  { %v11009_v0 = vpack.c.bf16 %v491_v61, %v489_v45  ;;  %1065 = vmatpush.bf16.msrb.mxu0 %v10882_v22  ;;  %v7574_v45 = vor.u32 %v9893_v43, %v7571_v44 }
 0x108   :  { %683 = vmatmul.bf16.gmra.mxu0 %v503_v62  ;;  %741 = vmatmul.bf16.gmra.mxu2 %v503_v62  ;;  %v332_v20 = vpop.f32.mrf.mxu0 }
 0x109   :  { %7489 = vmatmul.msk.bf16.gmra.mxu1 %vm652_vm0, %v11009_v0 }
 0x10b   :  { %1066 = vmatpush.bf16.msrb.mxu0 %v10902_v28 }
 0x10d   :  { %v465_v1 = vpop.f32.mrf.mxu2 }
 0x10e   :  { %v494_v5 = vpop.f32.mrf.mxu3  ;;  %v363_v19 = vpop.f32.mrf.mxu1 }
 0x10f   :  { %1067 = vmatpush.bf16.msrb.mxu0 %v10922_v34  ;;  %v11029_v24 = vpack.c.bf16 %v363_v19, %v361_v6  ;;  %v9930_v19 = vld [vmem:[%s13548_s3 + $0x58] sm:$0xff] }
 0x110   :  { %v334_v26 = vpop.f32.mrf.mxu0 }
 0x111   :  { %v378_v32 = vpack.c.bf16 %v334_v26, %v332_v20 }
 0x113   :  { %1068 = vmatpush.bf16.msrb.mxu0 %v10942_v40 }
 0x115   :  { %v467_v9 = vpop.f32.mrf.mxu2 }
 0x116   :  { %v496_v12 = vpop.f32.mrf.mxu3  ;;  %v505_v14 = vpack.c.bf16 %v467_v9, %v465_v1  ;;  %v366_v21 = vpop.f32.mrf.mxu1 }
 0x117   :  { %v506_v15 = vpack.c.bf16 %v496_v12, %v494_v5  ;;  %1069 = vmatpush.bf16.msrb.mxu0 %v10962_v46  ;;  %v9929_v5 = vld [vmem:[%s13548_s3 + $0x50] sm:$0xff] }
 0x118   :  { %688 = vmatmul.bf16.gmra.mxu0 %v505_v14  ;;  %746 = vmatmul.bf16.gmra.mxu2 %v505_v14  ;;  %v337_v30 = vpop.f32.mrf.mxu0 }
 0x119   :  { %7490 = vmatmul.msk.bf16.vlgmr.msrb.gmra.mxu3 %vm652_vm0, %v506_v15  ;;  %7591 = vmatmul.msk.bf16.vlgmr.msra.gmra.mxu1 %vm652_vm0, %v11019_v8 }
 0x11a   :  { %1004 = vmatpush.bf16.msrb.mxu3 %v7590_v38 }
 0x11e   :  { %v368_v27 = vpop.f32.mrf.mxu1 }
 0x11f   :  { %v11036_v31 = vpack.c.bf16 %v368_v27, %v366_v21 }
 0x120   :  { %v339_v48 = vpop.f32.mrf.mxu0 }
 0x121   :  { %v380_v54 = vpack.c.bf16 %v339_v48, %v337_v30 }
 0x126   :  { %v371_v37 = vpop.f32.mrf.mxu1 }
 0x128   :  { %921 = vmatmul.bf16.vlgmr.msra.gmra.mxu0 %v376_v25  ;;  %979 = vmatmul.bf16.vlgmr.msra.gmra.mxu2 %v376_v25 }
 0x129   :  { %7491 = vmatmul.msk.bf16.vlgmr.msra.gmra.mxu3 %vm652_vm0, %v10997_v13  ;;  %7592 = vmatmul.msk.bf16.gmra.mxu1 %vm652_vm0, %v11029_v24  ;;  %v9895_v13 = vld [vmem:[#allocation2 + $0xa4] sm:$0xf] }
 0x12a   :  { %v7582_v42 = vor.u32 %v9895_v13, %v7579_v39 }
 0x12c   :  { %1005 = vmatpush.bf16.msrb.mxu3 %v7582_v42 }
 0x12e   :  { %v373_v49 = vpop.f32.mrf.mxu1 }
 0x12f   :  { %v383_v53 = vpack.c.bf16 %v373_v49, %v371_v37 }
 0x130   :  { %1006 = vmatpush.bf16.msrb.mxu3 %v7574_v45 }
 0x134   :  { %1007 = vmatpush.bf16.msrb.mxu3 %v7566_v52 }
 0x138   :  { %926 = vmatmul.bf16.gmra.mxu0 %v378_v32  ;;  %984 = vmatmul.bf16.gmra.mxu2 %v378_v32 }
 0x139   :  { %7492 = vmatmul.msk.bf16.gmra.mxu3 %vm652_vm0, %v11001_v4  ;;  %7593 = vmatmul.msk.bf16.gmra.mxu1 %vm652_vm0, %v11036_v31  ;;  %v342_v4 = vpop.f32.mrf.mxu0 }
 0x141   :  { %v344_v55 = vpop.f32.mrf.mxu0 }
 0x142   :  { %v382_v57 = vpack.c.bf16 %v344_v55, %v342_v4  ;;  %v9946_v4 = vld [vmem:[#allocation2 + $0x1f4] sm:$0xf0]  ;;  %v7713_v55 = vld [vmem:[#allocation2 + $0x230] sm:$0xf] }
 0x148   :  { %931 = vmatmul.bf16.gmra.mxu0 %v380_v54  ;;  %989 = vmatmul.bf16.gmra.mxu2 %v380_v54  ;;  %v7681_v54 = vld [vmem:[#allocation2 + $0x1f0] sm:$0xf] }
 0x149   :  { %7493 = vmatmul.msk.bf16.gmra.mxu3 %vm652_vm0, %v11009_v0  ;;  %7594 = vmatmul.msk.bf16.gmra.mxu1 %vm652_vm0, %v383_v53 }
 0x158   :  { %936 = vmatmul.bf16.gmra.mxu0 %v382_v57  ;;  %994 = vmatmul.bf16.gmra.mxu2 %v382_v57  ;;  %v9954_v57 = vld [vmem:[#allocation2 + $0x234] sm:$0xf0] }
 0x159   :  { %7494 = vmatmul.msk.bf16.gmra.mxu3 %vm652_vm0, %v506_v15  ;;  %1099 = vmatmul.bf16.vlgmr.msrb.gmra.mxu1 %v9927_v56 }
 0x165   :  { %v674_v58 = vpop.f32.mrf.mxu0 }
 0x166   :  { %v703_v60 = vpop.f32.mrf.mxu1 }
 0x167   :  { %v704_v61 = vadd.f32 %v703_v60, %v674_v58  ;;  %v9945_v58 = vld [vmem:[#allocation2 + $0x1f4] sm:$0xf]  ;;  %v7714_v60 = vor.u32 %v9954_v57, %v7713_v55 }
 0x168   :  { %1070 = vmatmul.bf16.vlgmr.msrb.gmra.mxu0 %v9927_v56  ;;  %v7682_v56 = vor.u32 %v9946_v4, %v7681_v54  ;;  %v9951_v54 = vld [vmem:[#allocation2 + $0x224] sm:$0xf]  ;;  %v7707_v4 = vld [vmem:[#allocation2 + $0x228] sm:$0xf0] }
 0x169   :  { %7595 = vmatmul.msk.bf16.vlgmr.msrb.gmra.mxu3 %vm652_vm0, %v11019_v8  ;;  %1104 = vmatmul.bf16.gmra.mxu1 %v9928_v59  ;;  %v7710_v57 = vor.u32 %v9951_v54, %v7707_v4  ;;  %v9948_v54 = vld [vmem:[#allocation2 + $0x204] sm:$0xf0]  ;;  %v9939_v4 = vld [vmem:[#allocation2 + $0x1c4] sm:$0xf] }
 0x16a   :  { %1285 = vmatpush.bf16.msrb.mxu2 %v7682_v56  ;;  %1318 = vmatpush.bf16.msra.mxu3 %v7714_v60  ;;  %v7697_v60 = vld [vmem:[#allocation2 + $0x210] sm:$0xf] }
 0x16b   :  { %v732_v62 = vpop.f32.mrf.mxu2 }
 0x16d   :  { %v11054_v63 = vpop.f32.mrf.mxu0 }
 0x16e   :  { %v11056_v0 = vpop.f32.mrf.mxu1 }
 0x173   :  { %v11058_v1 = vpop.f32.mrf.mxu2 }
 0x175   :  { %v679_v2 = vpop.f32.mrf.mxu0 }
 0x176   :  { %v708_v6 = vpop.f32.mrf.mxu1 }
 0x177   :  { %v11063_v9 = vadd.f32 %v708_v6, %v679_v2  ;;  %v9953_v2 = vld [vmem:[#allocation2 + $0x234] sm:$0xf] }
 0x178   :  { %1075 = vmatmul.bf16.gmra.mxu0 %v9928_v59  ;;  %v7683_v59 = vld [vmem:[#allocation2 + $0x1f8] sm:$0xf0] }
 0x179   :  { %7596 = vmatmul.msk.bf16.gmra.mxu3 %vm652_vm0, %v11029_v24  ;;  %1109 = vmatmul.bf16.gmra.mxu1 %v9929_v5 }
 0x17b   :  { %v11067_v8 = vpop.f32.mrf.mxu2 }
 0x17d   :  { %v11069_v12 = vpop.f32.mrf.mxu0 }
 0x17e   :  { %v11071_v14 = vpop.f32.mrf.mxu1 }
 0x183   :  { %v11073_v15 = vpop.f32.mrf.mxu2 }
 0x185   :  { %v684_v18 = vpop.f32.mrf.mxu0 }
 0x186   :  { %v713_v20 = vpop.f32.mrf.mxu1 }
 0x187   :  { %v11078_v21 = vadd.f32 %v713_v20, %v684_v18  ;;  %v7673_v18 = vld [vmem:[#allocation2 + $0x1e0] sm:$0xf] }
 0x188   :  { %1080 = vmatmul.bf16.gmra.mxu0 %v9929_v5  ;;  %v7715_v5 = vld [vmem:[#allocation2 + $0x238] sm:$0xf0]  ;;  %v7705_v20 = vld [vmem:[#allocation2 + $0x220] sm:$0xf] }
 0x189   :  { %7597 = vmatmul.msk.bf16.gmra.mxu3 %vm652_vm0, %v11036_v31  ;;  %1114 = vmatmul.bf16.gmra.mxu1 %v9930_v19  ;;  %v7718_v6 = vor.u32 %v9953_v2, %v7715_v5  ;;  %v9950_v5 = vld [vmem:[#allocation2 + $0x214] sm:$0xf0] }
 0x18b   :  { %v11082_v24 = vpop.f32.mrf.mxu2  ;;  %1376 = vmatpush.bf16.msra.mxu1 %v7718_v6  ;;  %v9941_v6 = vld [vmem:[#allocation2 + $0x1d4] sm:$0xf] }
 0x18d   :  { %v11084_v25 = vpop.f32.mrf.mxu0 }
 0x18e   :  { %v11086_v26 = vpop.f32.mrf.mxu1 }
 0x18f   :  { %1377 = vmatpush.bf16.msra.mxu1 %v7710_v57 }
 0x193   :  { %v11088_v27 = vpop.f32.mrf.mxu2 }
 0x195   :  { %v689_v30 = vpop.f32.mrf.mxu0 }
 0x196   :  { %v951_v32 = vpop.f32.mrf.mxu1 }
 0x198   :  { %1085 = vmatmul.bf16.gmra.mxu0 %v9930_v19  ;;  %v9944_v19 = vld [vmem:[#allocation2 + $0x1e4] sm:$0xf0] }
 0x199   :  { %7598 = vmatmul.msk.bf16.gmra.mxu3 %vm652_vm0, %v383_v53 }
 0x19b   :  { %v11091_v33 = vpop.f32.mrf.mxu2 }
 0x19c   :  { %v718_v36 = vpop.f32.mrf.mxu3 }
 0x19d   :  { %v11093_v37 = vadd.f32 %v718_v36, %v689_v30  ;;  %v11095_v31 = vpop.f32.mrf.mxu0  ;;  %v9952_v36 = vld [vmem:[#allocation2 + $0x224] sm:$0xf0] }
 0x19e   :  { %v11097_v38 = vpop.f32.mrf.mxu1 }
 0x1a3   :  { %v11099_v13 = vpop.f32.mrf.mxu2 }
 0x1a4   :  { %v11101_v39 = vpop.f32.mrf.mxu3 }
 0x1a5   :  { %v922_v42 = vpop.f32.mrf.mxu0 }
 0x1a6   :  { %v923_v43 = vadd.f32 %v922_v42, %v704_v61  ;;  %v956_v44 = vpop.f32.mrf.mxu1  ;;  %v7686_v61 = vor.u32 %v9945_v58, %v7683_v59  ;;  %v9943_v42 = vld [vmem:[#allocation2 + $0x1e4] sm:$0xf]  ;;  %v7665_v58 = vld [vmem:[#allocation2 + $0x1d0] sm:$0xf]  ;;  %v9942_v59 = vld [vmem:[#allocation2 + $0x1d4] sm:$0xf0] }
 0x1a7   :  { %v7666_v2 = vor.u32 %v9942_v59, %v7665_v58 }
 0x1a8   :  { %v11103_v45 = vadd.f32 %v951_v32, %v923_v43  ;;  %1343 = vmatpush.bf16.msra.mxu0 %v7686_v61  ;;  %v7674_v32 = vor.u32 %v9944_v19, %v7673_v18  ;;  %v7675_v43 = vld [vmem:[#allocation2 + $0x1e8] sm:$0xf0]  ;;  %v7667_v18 = vld [vmem:[#allocation2 + $0x1d8] sm:$0xf0]  ;;  %v7698_v19 = vor.u32 %v9950_v5, %v7697_v60 }
 0x1a9   :  { %v7691_v5 = vld [vmem:[#allocation2 + $0x208] sm:$0xf0] }
 0x1aa   :  { %1286 = vmatpush.bf16.msrb.mxu2 %v7674_v32 }
 0x1ab   :  { %v980_v48 = vpop.f32.mrf.mxu2 }
 0x1ac   :  { %v761_v49 = vpop.f32.mrf.mxu3 }
 0x1ad   :  { %v762_v50 = vadd.f32 %v761_v49, %v732_v62  ;;  %v11105_v51 = vpop.f32.mrf.mxu0  ;;  %v7706_v49 = vor.u32 %v9952_v36, %v7705_v20  ;;  %v7670_v20 = vor.u32 %v9941_v6, %v7667_v18  ;;  %v9949_v36 = vld [vmem:[#allocation2 + $0x214] sm:$0xf] }
 0x1ae   :  { %v11107_v52 = vpop.f32.mrf.mxu1  ;;  %1287 = vmatpush.bf16.msrb.mxu2 %v7666_v2  ;;  %v9947_v2 = vld [vmem:[#allocation2 + $0x204] sm:$0xf] }
 0x1af   :  { %v11109_v53 = vadd.f32 %v980_v48, %v762_v50  ;;  %v7678_v50 = vor.u32 %v9943_v42, %v7675_v43  ;;  %1319 = vmatpush.bf16.msra.mxu3 %v7706_v49  ;;  %v7657_v43 = vld [vmem:[#allocation2 + $0x1c0] sm:$0xf]  ;;  %v7694_v18 = vor.u32 %v9947_v2, %v7691_v5  ;;  %v9934_v2 = vld [vmem:[#allocation2 + $0x194] sm:$0xf0]  ;;  %v9933_v5 = vld [vmem:[#allocation2 + $0x194] sm:$0xf] }
 0x1b0   :  { %v7689_v49 = vld [vmem:[#allocation2 + $0x200] sm:$0xf] }
 0x1b1   :  { %1344 = vmatpush.bf16.msra.mxu0 %v7678_v50  ;;  %v7690_v59 = vor.u32 %v9948_v54, %v7689_v49  ;;  %v7641_v49 = vld [vmem:[#allocation2 + $0x1a0] sm:$0xf] }
 0x1b3   :  { %v11111_v62 = vpop.f32.mrf.mxu2  ;;  %1320 = vmatpush.bf16.msra.mxu3 %v7698_v19 }
 0x1b4   :  { %v11113_v30 = vpop.f32.mrf.mxu3 }
 0x1b5   :  { %v927_v48 = vpop.f32.mrf.mxu0  ;;  %1345 = vmatpush.bf16.msra.mxu0 %v7670_v20  ;;  %v7649_v20 = vld [vmem:[#allocation2 + $0x1b0] sm:$0xf] }
 0x1b6   :  { %v928_v55 = vadd.f32 %v927_v48, %v11063_v9  ;;  %v11116_v56 = vpop.f32.mrf.mxu1  ;;  %v7699_v9 = vld [vmem:[#allocation2 + $0x218] sm:$0xf0]  ;;  %v9940_v48 = vld [vmem:[#allocation2 + $0x1c4] sm:$0xf0] }
 0x1b7   :  { %v7702_v42 = vor.u32 %v9949_v36, %v7699_v9  ;;  %1321 = vmatpush.bf16.msra.mxu3 %v7690_v59  ;;  %v9938_v36 = vld [vmem:[#allocation2 + $0x1b4] sm:$0xf0]  ;;  %v9937_v9 = vld [vmem:[#allocation2 + $0x1b4] sm:$0xf] }
 0x1b8   :  { %v11118_v61 = vadd.f32 %v956_v44, %v928_v55  ;;  %v7658_v44 = vor.u32 %v9940_v48, %v7657_v43  ;;  %v7659_v55 = vld [vmem:[#allocation2 + $0x1c8] sm:$0xf0] }
 0x1b9   :  { %1378 = vmatpush.bf16.msra.mxu1 %v7702_v42  ;;  %v7662_v60 = vor.u32 %v9939_v4, %v7659_v55  ;;  %v7650_v42 = vor.u32 %v9938_v36, %v7649_v20  ;;  %v7643_v4 = vld [vmem:[#allocation2 + $0x1a8] sm:$0xf0]  ;;  %v7635_v36 = vld [vmem:[#allocation2 + $0x198] sm:$0xf0] }
 0x1ba   :  { %1288 = vmatpush.bf16.msrb.mxu2 %v7658_v44  ;;  %v9935_v44 = vld [vmem:[#allocation2 + $0x1a4] sm:$0xf] }
 0x1bb   :  { %v985_v32 = vpop.f32.mrf.mxu2  ;;  %1346 = vmatpush.bf16.msra.mxu0 %v7662_v60  ;;  %1479 = vmatpush.bf16.msrb.mxu3 %v10833_v7  ;;  %v7633_v7 = vld [vmem:[#allocation2 + $0x190] sm:$0xf] }
 0x1bc   :  { %v766_v50 = vpop.f32.mrf.mxu3  ;;  %v7634_v20 = vor.u32 %v9934_v2, %v7633_v7 }
 0x1bd   :  { %v767_v57 = vadd.f32 %v766_v50, %v11067_v8  ;;  %v11121_v58 = vpop.f32.mrf.mxu0  ;;  %1379 = vmatpush.bf16.msra.mxu1 %v7694_v18  ;;  %v7651_v8 = vld [vmem:[#allocation2 + $0x1b8] sm:$0xf0]  ;;  %v9936_v50 = vld [vmem:[#allocation2 + $0x1a4] sm:$0xf0] }
 0x1be   :  { %v11123_v6 = vpop.f32.mrf.mxu1  ;;  %v7654_v43 = vor.u32 %v9937_v9, %v7651_v8  ;;  %1289 = vmatpush.bf16.msrb.mxu2 %v7650_v42  ;;  %v7642_v54 = vor.u32 %v9936_v50, %v7641_v49  ;;  %v7638_v9 = vor.u32 %v9933_v5, %v7635_v36  ;;  %v7625_v42 = vld [vmem:[#allocation2 + $0x180] sm:$0xf]  ;;  %v9932_v8 = vld [vmem:[#allocation2 + $0x184] sm:$0xf0]  ;;  %v7627_v50 = vld [vmem:[#allocation2 + $0x188] sm:$0xf0] }
 0x1bf   :  { %v11125_v19 = vadd.f32 %v985_v32, %v767_v57  ;;  %1480 = vmatpush.bf16.msrb.mxu3 %v10846_v11  ;;  %v7646_v57 = vor.u32 %v9935_v44, %v7643_v4  ;;  %v7626_v49 = vor.u32 %v9932_v8, %v7625_v42 }
 0x1c0   :  { %1347 = vmatpush.bf16.msra.mxu0 %v7654_v43 }
 0x1c2   :  { %1290 = vmatpush.bf16.msrb.mxu2 %v7642_v54 }
 0x1c3   :  { %v11128_v48 = vpop.f32.mrf.mxu2  ;;  %1481 = vmatpush.bf16.msrb.mxu3 %v10866_v17 }
 0x1c4   :  { %v11130_v32 = vpop.f32.mrf.mxu3  ;;  %1348 = vmatpush.bf16.msra.mxu0 %v7646_v57 }
 0x1c5   :  { %v932_v55 = vpop.f32.mrf.mxu0 }
 0x1c6   :  { %v933_v59 = vadd.f32 %v932_v55, %v11078_v21  ;;  %v966_v60 = vpop.f32.mrf.mxu1  ;;  %1291 = vmatpush.bf16.msrb.mxu2 %v7634_v20  ;;  %v9931_v21 = vld [vmem:[#allocation2 + $0x184] sm:$0xf] }
 0x1c7   :  { %1482 = vmatpush.bf16.msrb.mxu3 %v10886_v23  ;;  %v7630_v54 = vor.u32 %v9931_v21, %v7627_v50 }
 0x1c8   :  { %v11135_v18 = vadd.f32 %v11116_v56, %v933_v59  ;;  %1349 = vmatpush.bf16.msra.mxu0 %v7638_v9 }
 0x1ca   :  { %1292 = vmatpush.bf16.msrb.mxu2 %v7626_v49 }
 0x1cb   :  { %v990_v11 = vpop.f32.mrf.mxu2  ;;  %1483 = vmatpush.bf16.msrb.mxu3 %v10906_v29 }
 0x1cc   :  { %v771_v43 = vpop.f32.mrf.mxu3  ;;  %1350 = vmatpush.bf16.msra.mxu0 %v7630_v54 }
 0x1cd   :  { %v772_v44 = vadd.f32 %v771_v43, %v11082_v24  ;;  %v11140_v56 = vpop.f32.mrf.mxu0 }
 0x1ce   :  { %v11142_v4 = vpop.f32.mrf.mxu1  ;;  %1450 = vmatpush.bf16.msra.mxu2 %v10822_v3 }
 0x1cf   :  { %v991_v17 = vadd.f32 %v990_v11, %v772_v44  ;;  %1484 = vmatpush.bf16.msrb.mxu3 %v10926_v35 }
 0x1d2   :  { %1451 = vmatpush.bf16.msra.mxu2 %v10842_v10 }
 0x1d3   :  { %v11149_v57 = vpop.f32.mrf.mxu2  ;;  %1485 = vmatpush.bf16.msrb.mxu3 %v10946_v41 }
 0x1d4   :  { %v11147_v55 = vpop.f32.mrf.mxu3 }
 0x1d5   :  { %v937_v23 = vpop.f32.mrf.mxu0 }
 0x1d6   :  { %v938_v24 = vadd.f32 %v937_v23, %v11093_v37  ;;  %v1100_v59 = vpop.f32.mrf.mxu1  ;;  %1452 = vmatpush.bf16.msra.mxu2 %v10862_v16 }
 0x1d7   :  { %1486 = vmatpush.bf16.msrb.mxu3 %v10966_v47 }
 0x1d8   :  { %v11154_v7 = vadd.f32 %v966_v60, %v938_v24 }
 0x1da   :  { %1453 = vmatpush.bf16.msra.mxu2 %v10882_v22 }
 0x1db   :  { %v995_v35 = vpop.f32.mrf.mxu2 }
 0x1dc   :  { %v776_v3 = vpop.f32.mrf.mxu3 }
 0x1dd   :  { %v777_v10 = vadd.f32 %v776_v3, %v11091_v33  ;;  %v11160_v29 = vpop.f32.mrf.mxu0 }
 0x1de   :  { %v1102_v2 = vpop.f32.mrf.mxu1  ;;  %1454 = vmatpush.bf16.msra.mxu2 %v10902_v28 }
 0x1df   :  { %v996_v5 = vadd.f32 %v995_v35, %v777_v10  ;;  %v1121_v37 = vpack.c.bf16 %v1102_v2, %v1100_v59 }
 0x1e1   :  { %7719 = vmatmul.msk.bf16.vlgmr.msra.gmra.mxu3 %vm652_vm0, %v1121_v37  ;;  %7723 = vmatmul.msk.bf16.vlgmr.msra.gmra.mxu1 %vm652_vm0, %v1121_v37 }
 0x1e2   :  { %1455 = vmatpush.bf16.msra.mxu2 %v10922_v34 }
 0x1e4   :  { %v11166_v16 = vpop.f32.mrf.mxu3 }
 0x1e5   :  { %v1071_v22 = vpop.f32.mrf.mxu0 }
 0x1e6   :  { %v1105_v41 = vpop.f32.mrf.mxu1  ;;  %1456 = vmatpush.bf16.msra.mxu2 %v10942_v40 }
 0x1ea   :  { %1457 = vmatpush.bf16.msra.mxu2 %v10962_v46 }
 0x1ec   :  { %v1009_v47 = vpop.f32.mrf.mxu3 }
 0x1ed   :  { %v11171_v33 = vadd.f32 %v1009_v47, %v11109_v53  ;;  %v1073_v60 = vpop.f32.mrf.mxu0  ;;  %v9958_v47 = vld [vmem:[%s13548_s3 + $0x78] sm:$0xff] }
 0x1ee   :  { %v1120_v28 = vpack.c.bf16 %v1073_v60, %v1071_v22  ;;  %v1107_v20 = vpop.f32.mrf.mxu1 }
 0x1ef   :  { %v1123_v36 = vpack.c.bf16 %v1107_v20, %v1105_v41  ;;  %v9956_v41 = vld [vmem:[%s13548_s3 + $0x68] sm:$0xff] }
 0x1f0   :  { %1293 = vmatmul.bf16.vlgmr.msrb.gmra.mxu2 %v1120_v28  ;;  %1351 = vmatmul.bf16.vlgmr.msra.gmra.mxu0 %v1120_v28 }
 0x1f1   :  { %7720 = vmatmul.msk.bf16.gmra.mxu3 %vm652_vm0, %v1123_v36  ;;  %7724 = vmatmul.msk.bf16.gmra.mxu1 %vm652_vm0, %v1123_v36  ;;  %v11206_v36 = vpop.f32.mrf.mxu2 }
 0x1f4   :  { %v11175_v34 = vpop.f32.mrf.mxu3 }
 0x1f5   :  { %v1076_v9 = vpop.f32.mrf.mxu0 }
 0x1f6   :  { %v1110_v40 = vpop.f32.mrf.mxu1 }
 0x1fc   :  { %v1014_v11 = vpop.f32.mrf.mxu3 }
 0x1fd   :  { %v11178_v46 = vadd.f32 %v1014_v11, %v11125_v19  ;;  %v1078_v53 = vpop.f32.mrf.mxu0 }
 0x1fe   :  { %v1122_v42 = vpack.c.bf16 %v1078_v53, %v1076_v9  ;;  %v1112_v8 = vpop.f32.mrf.mxu1 }
 0x1ff   :  { %v1125_v21 = vpack.c.bf16 %v1112_v8, %v1110_v40 }
 0x200   :  { %1298 = vmatmul.bf16.gmra.mxu2 %v1122_v42  ;;  %1356 = vmatmul.bf16.gmra.mxu0 %v1122_v42 }
 0x201   :  { %7721 = vmatmul.msk.bf16.gmra.mxu3 %vm652_vm0, %v1125_v21  ;;  %7725 = vmatmul.msk.bf16.gmra.mxu1 %vm652_vm0, %v1125_v21 }
 0x204   :  { %v11182_v43 = vpop.f32.mrf.mxu3 }
 0x205   :  { %v1081_v49 = vpop.f32.mrf.mxu0 }
 0x206   :  { %v1115_v50 = vpop.f32.mrf.mxu1 }
 0x20c   :  { %v1019_v44 = vpop.f32.mrf.mxu3 }
 0x20d   :  { %v11184_v54 = vadd.f32 %v1019_v44, %v991_v17  ;;  %v1083_v23 = vpop.f32.mrf.mxu0  ;;  %v9955_v17 = vld [vmem:[%s13548_s3 + $0x60] sm:$0xff] }
 0x20e   :  { %v1124_v19 = vpack.c.bf16 %v1083_v23, %v1081_v49  ;;  %v1117_v24 = vpop.f32.mrf.mxu1 }
 0x20f   :  { %v1127_v59 = vpack.c.bf16 %v1117_v24, %v1115_v50 }
 0x210   :  { %1303 = vmatmul.bf16.gmra.mxu2 %v1124_v19  ;;  %1361 = vmatmul.bf16.gmra.mxu0 %v1124_v19 }
 0x211   :  { %7722 = vmatmul.msk.bf16.gmra.mxu3 %vm652_vm0, %v1127_v59  ;;  %7726 = vmatmul.msk.bf16.gmra.mxu1 %vm652_vm0, %v1127_v59 }
 0x214   :  { %v11188_v3 = vpop.f32.mrf.mxu3 }
 0x215   :  { %13549 = vst [vmem:[#allocation17_spill] sm:$0xff] %v11188_v3  ;;  %v1086_v10 = vpop.f32.mrf.mxu0 }
 0x21c   :  { %v1024_v35 = vpop.f32.mrf.mxu3 }
 0x21d   :  { %v11190_v2 = vadd.f32 %v1024_v35, %v996_v5  ;;  %v1088_v37 = vpop.f32.mrf.mxu0  ;;  %v9957_v5 = vld [vmem:[%s13548_s3 + $0x70] sm:$0xff]  ;;  %v9974_v35 = vld [vmem:[#allocation2 + $0x2b4] sm:$0xf0]  ;;  %s13587_s3 = sld [smem:[#allocation63_spill]] }
 0x21e   :  { %v1126_v22 = vpack.c.bf16 %v1088_v37, %v1086_v10  ;;  %v7809_v10 = vld [vmem:[#allocation2 + $0x2b0] sm:$0xf] }
 0x21f   :  { %v7841_v37 = vld [vmem:[#allocation2 + $0x2f0] sm:$0xf] }
 0x220   :  { %1308 = vmatmul.bf16.gmra.mxu2 %v1126_v22  ;;  %1366 = vmatmul.bf16.gmra.mxu0 %v1126_v22  ;;  %v9982_v22 = vld [vmem:[#allocation2 + $0x2f4] sm:$0xf0] }
 0x221   :  { %1487 = vmatmul.bf16.vlgmr.msrb.gmra.mxu3 %v9955_v17 }
 0x224   :  { %v11204_v60 = vpop.f32.mrf.mxu3 }
 0x225   :  { %13550 = vst [vmem:[#allocation18_spill] sm:$0xff] %v11204_v60  ;;  %v9972_v60 = vld [vmem:[#allocation2 + $0x2a4] sm:$0xf0] }
 0x230   :  { %1458 = vmatmul.bf16.vlgmr.msra.gmra.mxu2 %v9955_v17 }
 0x231   :  { %1492 = vmatmul.bf16.gmra.mxu3 %v9956_v41 }
 0x240   :  { %1463 = vmatmul.bf16.gmra.mxu2 %v9956_v41  ;;  %v9973_v41 = vld [vmem:[#allocation2 + $0x2b4] sm:$0xf] }
 0x241   :  { %1497 = vmatmul.bf16.gmra.mxu3 %v9957_v5 }
 0x250   :  { %1468 = vmatmul.bf16.gmra.mxu2 %v9957_v5  ;;  %v7811_v5 = vld [vmem:[#allocation2 + $0x2b8] sm:$0xf0] }
 0x251   :  { %1502 = vmatmul.bf16.gmra.mxu3 %v9958_v47 }
 0x25e   :  { %v1381_v28 = vpop.f32.mrf.mxu1 }
 0x260   :  { %1473 = vmatmul.bf16.gmra.mxu2 %v9958_v47 }
 0x264   :  { %v1323_v20 = vpop.f32.mrf.mxu3 }
 0x266   :  { %v11208_v9 = vpop.f32.mrf.mxu1 }
 0x26c   :  { %v11210_v40 = vpop.f32.mrf.mxu3 }
 0x26d   :  { %v1352_v11 = vpop.f32.mrf.mxu0 }
 0x26e   :  { %v1382_v53 = vadd.f32 %v1381_v28, %v1352_v11  ;;  %v1386_v50 = vpop.f32.mrf.mxu1  ;;  %v7842_v28 = vor.u32 %v9982_v22, %v7841_v37  ;;  %v9981_v11 = vld [vmem:[#allocation2 + $0x2f4] sm:$0xf] }
 0x270   :  { %v11213_v42 = vadd.f32 %v1382_v53, %v11171_v33  ;;  %v7810_v33 = vor.u32 %v9974_v35, %v7809_v10  ;;  %1706 = vmatpush.bf16.msrb.mxu1 %v7842_v28  ;;  %v9980_v10 = vld [vmem:[#allocation2 + $0x2e4] sm:$0xf0]  ;;  %v9971_v35 = vld [vmem:[#allocation2 + $0x2a4] sm:$0xf]  ;;  %v7793_v28 = vld [vmem:[#allocation2 + $0x290] sm:$0xf] }
 0x272   :  { %1673 = vmatpush.bf16.msrb.mxu0 %v7810_v33 }
 0x273   :  { %v1294_v8 = vpop.f32.mrf.mxu2 }
 0x274   :  { %v1324_v21 = vadd.f32 %v1323_v20, %v1294_v8  ;;  %v1328_v49 = vpop.f32.mrf.mxu3  ;;  %v7814_v20 = vor.u32 %v9973_v41, %v7811_v5  ;;  %v9979_v41 = vld [vmem:[#allocation2 + $0x2e4] sm:$0xf]  ;;  %v7835_v5 = vld [vmem:[#allocation2 + $0x2e8] sm:$0xf0] }
 0x275   :  { %v11215_v44 = vpop.f32.mrf.mxu0 }
 0x276   :  { %v11218_v23 = vadd.f32 %v1324_v21, %v11103_v45  ;;  %v11224_v47 = vpop.f32.mrf.mxu1  ;;  %v7843_v45 = vld [vmem:[#allocation2 + $0x2f8] sm:$0xf0]  ;;  %1731 = vmatpush.bf16.msrb.mxu2 %v7814_v20  ;;  %v7801_v21 = vld [vmem:[#allocation2 + $0x2a0] sm:$0xf]  ;;  %v9970_v20 = vld [vmem:[#allocation2 + $0x294] sm:$0xf0] }
 0x277   :  { %13552 = vst [vmem:[#allocation20_spill] sm:$0xff] %v11224_v47  ;;  %v7846_v8 = vor.u32 %v9981_v11, %v7843_v45  ;;  %v7825_v11 = vld [vmem:[#allocation2 + $0x2d0] sm:$0xf]  ;;  %v7794_v45 = vor.u32 %v9970_v20, %v7793_v28 }
 0x279   :  { %1764 = vmatpush.bf16.msra.mxu3 %v7846_v8  ;;  %v9978_v8 = vld [vmem:[#allocation2 + $0x2d4] sm:$0xf0] }
 0x27b   :  { %v11220_v19 = vpop.f32.mrf.mxu2 }
 0x27c   :  { %v11222_v24 = vpop.f32.mrf.mxu3 }
 0x27d   :  { %13551 = vst [vmem:[#allocation19_spill] sm:$0xff] %v11222_v24  ;;  %v1357_v59 = vpop.f32.mrf.mxu0  ;;  %v7803_v24 = vld [vmem:[#allocation2 + $0x2a8] sm:$0xf0] }
 0x27e   :  { %v1387_v17 = vadd.f32 %v1386_v50, %v1357_v59  ;;  %v7833_v50 = vld [vmem:[#allocation2 + $0x2e0] sm:$0xf]  ;;  %v7802_v59 = vor.u32 %v9972_v60, %v7801_v21  ;;  %v7806_v22 = vor.u32 %v9971_v35, %v7803_v24  ;;  %v9969_v24 = vld [vmem:[#allocation2 + $0x294] sm:$0xf]  ;;  %v7795_v21 = vld [vmem:[#allocation2 + $0x298] sm:$0xf0]  ;;  %v1391_v35 = vpop.f32.mrf.mxu1 }
 0x27f   :  { %v7834_v37 = vor.u32 %v9980_v10, %v7833_v50  ;;  %v7826_v50 = vor.u32 %v9978_v8, %v7825_v11  ;;  %v9975_v8 = vld [vmem:[#allocation2 + $0x2c4] sm:$0xf] }
 0x280   :  { %v11227_v53 = vadd.f32 %v1387_v17, %v11178_v46  ;;  %1674 = vmatpush.bf16.msrb.mxu0 %v7802_v59  ;;  %v7838_v17 = vor.u32 %v9979_v41, %v7835_v5  ;;  %1732 = vmatpush.bf16.msrb.mxu2 %v7806_v22  ;;  %v7827_v59 = vld [vmem:[#allocation2 + $0x2d8] sm:$0xf0]  ;;  %v9968_v22 = vld [vmem:[#allocation2 + $0x284] sm:$0xf0]  ;;  %v7817_v41 = vld [vmem:[#allocation2 + $0x2c0] sm:$0xf] }
 0x281   :  { %1707 = vmatpush.bf16.msrb.mxu1 %v7834_v37  ;;  %v7785_v37 = vld [vmem:[#allocation2 + $0x280] sm:$0xf]  ;;  %v9967_v5 = vld [vmem:[#allocation2 + $0x284] sm:$0xf] }
 0x282   :  { %13553 = vst [vmem:[#allocation21_spill] sm:$0xff] %v11227_v53  ;;  %1765 = vmatpush.bf16.msra.mxu3 %v7838_v17  ;;  %v7787_v17 = vld [vmem:[#allocation2 + $0x288] sm:$0xf0] }
 0x283   :  { %v1299_v47 = vpop.f32.mrf.mxu2  ;;  %v7790_v11 = vor.u32 %v9967_v5, %v7787_v17  ;;  %v9964_v5 = vld [vmem:[#allocation2 + $0x264] sm:$0xf0] }
 0x284   :  { %v1329_v3 = vadd.f32 %v1328_v49, %v1299_v47  ;;  %v1333_v46 = vpop.f32.mrf.mxu3  ;;  %v7798_v49 = vor.u32 %v9969_v24, %v7795_v21  ;;  %v9977_v47 = vld [vmem:[#allocation2 + $0x2d4] sm:$0xf]  ;;  %1675 = vmatpush.bf16.msrb.mxu0 %v7794_v45  ;;  %v7819_v24 = vld [vmem:[#allocation2 + $0x2c8] sm:$0xf0] }
 0x285   :  { %v11229_v33 = vpop.f32.mrf.mxu0  ;;  %v7830_v10 = vor.u32 %v9977_v47, %v7827_v59  ;;  %1708 = vmatpush.bf16.msrb.mxu1 %v7826_v50  ;;  %v7822_v45 = vor.u32 %v9975_v8, %v7819_v24  ;;  %v9966_v47 = vld [vmem:[#allocation2 + $0x274] sm:$0xf0]  ;;  %v9965_v59 = vld [vmem:[#allocation2 + $0x274] sm:$0xf]  ;;  %v7771_v8 = vld [vmem:[#allocation2 + $0x268] sm:$0xf0] }
 0x286   :  { %v11232_v60 = vadd.f32 %v1329_v3, %v11118_v61  ;;  %1733 = vmatpush.bf16.msrb.mxu2 %v7798_v49  ;;  %v7786_v61 = vor.u32 %v9968_v22, %v7785_v37  ;;  %v9976_v3 = vld [vmem:[#allocation2 + $0x2c4] sm:$0xf0]  ;;  %v7777_v49 = vld [vmem:[#allocation2 + $0x270] sm:$0xf]  ;;  %v7779_v22 = vld [vmem:[#allocation2 + $0x278] sm:$0xf0] }
 0x287   :  { %1766 = vmatpush.bf16.msra.mxu3 %v7830_v10  ;;  %v7818_v20 = vor.u32 %v9976_v3, %v7817_v41  ;;  %v7778_v37 = vor.u32 %v9966_v47, %v7777_v49  ;;  %v7782_v53 = vor.u32 %v9965_v59, %v7779_v22  ;;  %v7769_v3 = vld [vmem:[#allocation2 + $0x260] sm:$0xf]  ;;  %v9961_v49 = vld [vmem:[#allocation2 + $0x254] sm:$0xf]  ;;  %v9960_v22 = vld [vmem:[#allocation2 + $0x244] sm:$0xf0] }
 0x288   :  { %13554 = vst [vmem:[#allocation22_spill] sm:$0xff] %v11232_v60  ;;  %1676 = vmatpush.bf16.msrb.mxu0 %v7786_v61  ;;  %v9963_v61 = vld [vmem:[#allocation2 + $0x264] sm:$0xf]  ;;  %v7770_v17 = vor.u32 %v9964_v5, %v7769_v3  ;;  %v7755_v5 = vld [vmem:[#allocation2 + $0x248] sm:$0xf0] }
 0x289   :  { %1709 = vmatpush.bf16.msrb.mxu1 %v7818_v20  ;;  %v11241_v20 = vpop.f32.mrf.mxu1  ;;  %v7774_v24 = vor.u32 %v9963_v61, %v7771_v8  ;;  %v9959_v3 = vld [vmem:[#allocation2 + $0x244] sm:$0xf] }
 0x28a   :  { %1734 = vmatpush.bf16.msrb.mxu2 %v7790_v11 }
 0x28b   :  { %v11234_v28 = vpop.f32.mrf.mxu2  ;;  %1767 = vmatpush.bf16.msra.mxu3 %v7822_v45  ;;  %v7761_v45 = vld [vmem:[#allocation2 + $0x250] sm:$0xf] }
 0x28c   :  { %v11236_v21 = vpop.f32.mrf.mxu3  ;;  %1677 = vmatpush.bf16.msrb.mxu0 %v7778_v37  ;;  %v7753_v37 = vld [vmem:[#allocation2 + $0x240] sm:$0xf] }
 0x28d   :  { %v1362_v50 = vpop.f32.mrf.mxu0 }
 0x28e   :  { %v1392_v10 = vadd.f32 %v1391_v35, %v1362_v50  ;;  %1735 = vmatpush.bf16.msrb.mxu2 %v7782_v53  ;;  %v9962_v50 = vld [vmem:[#allocation2 + $0x254] sm:$0xf0]  ;;  %v7763_v53 = vld [vmem:[#allocation2 + $0x258] sm:$0xf0] }
 0x290   :  { %v11239_v41 = vadd.f32 %v1392_v10, %v11184_v54  ;;  %1678 = vmatpush.bf16.msrb.mxu0 %v7770_v17  ;;  %v7762_v54 = vor.u32 %v9962_v50, %v7761_v45  ;;  %v7766_v10 = vor.u32 %v9961_v49, %v7763_v53  ;;  %v7758_v17 = vor.u32 %v9959_v3, %v7755_v5 }
 0x292   :  { %13555 = vst [vmem:[#allocation23_spill] sm:$0xff] %v11239_v41  ;;  %1736 = vmatpush.bf16.msrb.mxu2 %v7774_v24 }
 0x293   :  { %v1304_v11 = vpop.f32.mrf.mxu2 }
 0x294   :  { %v1334_v60 = vadd.f32 %v1333_v46, %v1304_v11  ;;  %v1338_v35 = vpop.f32.mrf.mxu3  ;;  %1679 = vmatpush.bf16.msrb.mxu0 %v7762_v54  ;;  %v7754_v46 = vor.u32 %v9960_v22, %v7753_v37  ;;  %v1396_v11 = vpop.f32.mrf.mxu1 }
 0x295   :  { %v11243_v47 = vpop.f32.mrf.mxu0 }
 0x296   :  { %v11246_v59 = vadd.f32 %v1334_v60, %v11135_v18  ;;  %1737 = vmatpush.bf16.msrb.mxu2 %v7766_v10 }
 0x298   :  { %1680 = vmatpush.bf16.msrb.mxu0 %v7754_v46 }
 0x29a   :  { %1738 = vmatpush.bf16.msrb.mxu2 %v7758_v17 }
 0x29b   :  { %v11248_v61 = vpop.f32.mrf.mxu2 }
 0x29c   :  { %v11250_v8 = vpop.f32.mrf.mxu3 }
 0x29d   :  { %v1367_v24 = vpop.f32.mrf.mxu0 }
 0x29e   :  { %v1397_v45 = vadd.f32 %v1396_v11, %v1367_v24 }
 0x2a0   :  { %v11253_v18 = vadd.f32 %v1397_v45, %v11190_v2 }
 0x2a2   :  { %13556 = vst [vmem:[#allocation24_spill] sm:$0xff] %v11253_v18 }
 0x2a3   :  { %v1309_v60 = vpop.f32.mrf.mxu2 }
 0x2a4   :  { %v1339_v50 = vadd.f32 %v1338_v35, %v1309_v60  ;;  %v1488_v49 = vpop.f32.mrf.mxu3 }
 0x2a6   :  { %v11256_v54 = vadd.f32 %v1339_v50, %v11154_v7 }
 0x2ab   :  { %v11258_v53 = vpop.f32.mrf.mxu2 }
 0x2ac   :  { %v1490_v10 = vpop.f32.mrf.mxu3 }
 0x2ad   :  { %v1509_v37 = vpack.c.bf16 %v1490_v10, %v1488_v49 }
 0x2af   :  { %7847 = vmatmul.msk.bf16.vlgmr.msrb.gmra.mxu1 %vm652_vm0, %v1509_v37  ;;  %7851 = vmatmul.msk.bf16.vlgmr.msra.gmra.mxu3 %vm652_vm0, %v1509_v37 }
 0x2b3   :  { %v1459_v22 = vpop.f32.mrf.mxu2 }
 0x2b4   :  { %v1493_v3 = vpop.f32.mrf.mxu3 }
 0x2bb   :  { %v1461_v46 = vpop.f32.mrf.mxu2 }
 0x2bc   :  { %v1508_v5 = vpack.c.bf16 %v1461_v46, %v1459_v22  ;;  %v1495_v2 = vpop.f32.mrf.mxu3 }
 0x2bd   :  { %v1511_v17 = vpack.c.bf16 %v1495_v2, %v1493_v3 }
 0x2be   :  { %1681 = vmatmul.bf16.vlgmr.msrb.gmra.mxu0 %v1508_v5  ;;  %1739 = vmatmul.bf16.vlgmr.msrb.gmra.mxu2 %v1508_v5 }
 0x2bf   :  { %7848 = vmatmul.msk.bf16.gmra.mxu1 %vm652_vm0, %v1511_v17  ;;  %7852 = vmatmul.msk.bf16.gmra.mxu3 %vm652_vm0, %v1511_v17  ;;  %v11268_v17 = vpop.f32.mrf.mxu1 }
 0x2c3   :  { %v1464_v7 = vpop.f32.mrf.mxu2 }
 0x2c4   :  { %v1498_v35 = vpop.f32.mrf.mxu3 }
 0x2cb   :  { %v1466_v11 = vpop.f32.mrf.mxu2 }
 0x2cc   :  { %v1510_v24 = vpack.c.bf16 %v1466_v11, %v1464_v7  ;;  %v1500_v45 = vpop.f32.mrf.mxu3 }
 0x2cd   :  { %v1513_v60 = vpack.c.bf16 %v1500_v45, %v1498_v35  ;;  %v11270_v35 = vpop.f32.mrf.mxu0 }
 0x2ce   :  { %1686 = vmatmul.bf16.gmra.mxu0 %v1510_v24  ;;  %1744 = vmatmul.bf16.gmra.mxu2 %v1510_v24 }
 0x2cf   :  { %7849 = vmatmul.msk.bf16.gmra.mxu1 %vm652_vm0, %v1513_v60  ;;  %7853 = vmatmul.msk.bf16.gmra.mxu3 %vm652_vm0, %v1513_v60 }
 0x2d3   :  { %v1469_v50 = vpop.f32.mrf.mxu2 }
 0x2d4   :  { %v1503_v49 = vpop.f32.mrf.mxu3 }
 0x2db   :  { %v1471_v10 = vpop.f32.mrf.mxu2 }
 0x2dc   :  { %v1512_v37 = vpack.c.bf16 %v1471_v10, %v1469_v50  ;;  %v1505_v22 = vpop.f32.mrf.mxu3 }
 0x2dd   :  { %v1515_v3 = vpack.c.bf16 %v1505_v22, %v1503_v49 }
 0x2de   :  { %1691 = vmatmul.bf16.gmra.mxu0 %v1512_v37  ;;  %1749 = vmatmul.bf16.gmra.mxu2 %v1512_v37 }
 0x2df   :  { %7850 = vmatmul.msk.bf16.gmra.mxu1 %vm652_vm0, %v1515_v3  ;;  %7854 = vmatmul.msk.bf16.gmra.mxu3 %vm652_vm0, %v1515_v3 }
 0x2e3   :  { %v1474_v46 = vpop.f32.mrf.mxu2 }
 0x2eb   :  { %v1476_v5 = vpop.f32.mrf.mxu2 }
 0x2ec   :  { %v1514_v2 = vpack.c.bf16 %v1476_v5, %v1474_v46 }
 0x2ee   :  { %1696 = vmatmul.bf16.gmra.mxu0 %v1514_v2  ;;  %1754 = vmatmul.bf16.gmra.mxu2 %v1514_v2 }
 0x32c   :  { %v1711_v7 = vpop.f32.mrf.mxu1 }
 0x332   :  { %v1769_v11 = vpop.f32.mrf.mxu3 }
 0x334   :  { %v11272_v24 = vpop.f32.mrf.mxu1 }
 0x33a   :  { %v11274_v50 = vpop.f32.mrf.mxu3 }
 0x33b   :  { %v1682_v45 = vpop.f32.mrf.mxu0  ;;  %13557 = vst [vmem:[#allocation25_spill] sm:$0xff] %v11274_v50 }
 0x33c   :  { %v1712_v60 = vadd.f32 %v1711_v7, %v1682_v45  ;;  %v11279_v10 = vpop.f32.mrf.mxu1 }
 0x33e   :  { %v11277_v49 = vadd.f32 %v1712_v60, %v11218_v23 }
 0x340   :  { %13558 = vst [vmem:[#allocation26_spill] sm:$0xff] %v11277_v49 }
 0x341   :  { %v1740_v37 = vpop.f32.mrf.mxu2 }
 0x342   :  { %v1770_v22 = vadd.f32 %v1769_v11, %v1740_v37  ;;  %v11286_v5 = vpop.f32.mrf.mxu3 }
 0x343   :  { %v11281_v3 = vpop.f32.mrf.mxu0  ;;  %13560 = vst [vmem:[#allocation28_spill] sm:$0xff] %v11286_v5  ;;  %v711_v5 = vadd.f32 %v11071_v14, %v11069_v12  ;;  %v774_v12 = vadd.f32 %v11147_v55, %v11088_v27 }
 0x344   :  { %v11284_v46 = vadd.f32 %v1770_v22, %v11213_v42  ;;  %v1718_v41 = vpop.f32.mrf.mxu1 }
 0x346   :  { %13559 = vst [vmem:[#allocation27_spill] sm:$0xff] %v11284_v46  ;;  %v706_v46 = vadd.f32 %v11056_v0, %v11054_v63  ;;  %v769_v63 = vadd.f32 %v11130_v32, %v11073_v15 }
 0x348   :  { %v988_v15 = vadd.f32 %v11128_v48, %v769_v63 }
 0x349   :  { %v11288_v2 = vpop.f32.mrf.mxu2 }
 0x34a   :  { %13561 = vst [vmem:[#allocation29_spill] sm:$0xff] %v11288_v2  ;;  %v11290_v45 = vpop.f32.mrf.mxu3 }
 0x34b   :  { %v1687_v7 = vpop.f32.mrf.mxu0  ;;  %13562 = vst [vmem:[#allocation30_spill] sm:$0xff] %v11290_v45  ;;  %v925_v45 = vadd.f32 %v11105_v51, %v706_v46 }
 0x34c   :  { %v1721_v60 = vpop.f32.mrf.mxu1 }
 0x34d   :  { %v954_v51 = vadd.f32 %v11097_v38, %v925_v45  ;;  %v1326_v38 = vadd.f32 %v11210_v40, %v11220_v19  ;;  %v13570_v19 = vld [vmem:[#allocation18_spill] sm:$0xff] }
 0x351   :  { %v11292_v50 = vpop.f32.mrf.mxu2 }
 0x352   :  { %13563 = vst [vmem:[#allocation31_spill] sm:$0xff] %v11292_v50  ;;  %v11296_v11 = vpop.f32.mrf.mxu3  ;;  %v716_v50 = vadd.f32 %v11086_v26, %v11084_v25 }
 0x353   :  { %v1689_v23 = vpop.f32.mrf.mxu0  ;;  %13565 = vst [vmem:[#allocation33_spill] sm:$0xff] %v11296_v11  ;;  %v721_v11 = vadd.f32 %v11101_v39, %v11095_v31 }
 0x354   :  { %v1723_v18 = vpop.f32.mrf.mxu1  ;;  %v935_v0 = vadd.f32 %v11140_v56, %v716_v50  ;;  %v993_v56 = vadd.f32 %v11149_v57, %v774_v12  ;;  %v13571_v50 = vld [vmem:[#allocation20_spill] sm:$0xff] }
 0x355   :  { %v940_v26 = vadd.f32 %v11160_v29, %v721_v11  ;;  %v1017_v29 = vadd.f32 %v11182_v43, %v988_v15 }
 0x356   :  { %v964_v32 = vadd.f32 %v11123_v6, %v935_v0  ;;  %v13568_v6 = vld [vmem:[#allocation19_spill] sm:$0xff] }
 0x357   :  { %v1331_v57 = vadd.f32 %v13568_v6, %v11234_v28  ;;  %v1719_v28 = vadd.f32 %v1718_v41, %v1689_v23 }
 0x359   :  { %v11294_v49 = vpop.f32.mrf.mxu2 }
 0x35a   :  { %13564 = vst [vmem:[#allocation32_spill] sm:$0xff] %v11294_v49  ;;  %v1781_v2 = vpop.f32.mrf.mxu3  ;;  %v764_v49 = vadd.f32 %v11113_v30, %v11058_v1  ;;  %v779_v1 = vadd.f32 %v11166_v16, %v11099_v13  ;;  %v1384_v13 = vadd.f32 %v11208_v9, %v11215_v44  ;;  %v13567_v16 = vld [vmem:[#allocation17_spill] sm:$0xff] }
 0x35b   :  { %v1692_v37 = vpop.f32.mrf.mxu0  ;;  %v1805_v9 = vld [vmem:[%s13569_s4] sm:$0x3] }
 0x35c   :  { %v1726_v14 = vpop.f32.mrf.mxu1  ;;  %v983_v31 = vadd.f32 %v11111_v62, %v764_v49  ;;  %v969_v62 = vadd.f32 %v11142_v4, %v940_v26  ;;  %v1722_v44 = vadd.f32 %v1721_v60, %v1692_v37  ;;  %v1389_v49 = vadd.f32 %v13571_v50, %v11229_v33 }
 0x35d   :  { %v1807_v45 = vperm.slane %v1805_v9, 0  ;;  %v1808_v15 = vperm.slane %v1805_v9, 1 }
 0x35e   :  { %v1012_v48 = vadd.f32 %v11175_v34, %v983_v31  ;;  %v1341_v34 = vadd.f32 %v11250_v8, %v11258_v53  ;;  %v1717_v8 = vadd.f32 %v11279_v10, %v1687_v7  ;;  %v1408_v0 = vadd.f32 %v1389_v49, %v1017_v29  ;;  %v13583_v49 = vld [vmem:[#allocation21_spill] sm:$0xff] }
 0x360   :  { %v1404_v43 = vadd.f32 %v1384_v13, %v1012_v48  ;;  %v1415_v63 = vadd.f32 %v1341_v34, %v969_v62  ;;  %v13580_v62 = vld [vmem:[#allocation23_spill] sm:$0xff] }
 0x361   :  { %v11298_v42 = vpop.f32.mrf.mxu2 }
 0x362   :  { %13566 = vst [vmem:[#allocation34_spill] sm:$0xff] %v11298_v42  ;;  %v930_v42 = vadd.f32 %v11121_v58, %v711_v5  ;;  %v1336_v58 = vadd.f32 %v11236_v21, %v11248_v61  ;;  %v1022_v21 = vadd.f32 %v13567_v16, %v993_v56  ;;  %v1784_v40 = vpop.f32.mrf.mxu3  ;;  %v1394_v5 = vadd.f32 %v11241_v20, %v11243_v47  ;;  %v13579_v56 = vld [vmem:[#allocation28_spill] sm:$0xff] }
 0x363   :  { %v1694_v22 = vpop.f32.mrf.mxu0  ;;  %v1714_v20 = vadd.f32 %v11272_v24, %v11281_v3 }
 0x364   :  { %v959_v30 = vadd.f32 %v11107_v52, %v930_v42  ;;  %v998_v52 = vadd.f32 %v11206_v36, %v779_v1  ;;  %v1724_v55 = vadd.f32 %v1723_v18, %v1694_v22  ;;  %v1411_v61 = vadd.f32 %v1336_v58, %v964_v32  ;;  %v1728_v53 = vpop.f32.mrf.mxu1  ;;  %v13578_v32 = vld [vmem:[#allocation31_spill] sm:$0xff] }
 0x365   :  { %v1403_v18 = vadd.f32 %v1326_v38, %v954_v51  ;;  %v1399_v42 = vadd.f32 %v11268_v17, %v11270_v35  ;;  %v1412_v1 = vadd.f32 %v1394_v5, %v1022_v21  ;;  %v13574_v35 = vld [vmem:[#allocation24_spill] sm:$0xff]  ;;  %v13575_v51 = vld [vmem:[#allocation22_spill] sm:$0xff]  ;;  %v1775_v13 = vadd.f32 %v13579_v56, %v13578_v32 }
 0x366   :  { %v1027_v4 = vadd.f32 %v13570_v19, %v998_v52  ;;  %v1799_v60 = vadd.f32 %v1724_v55, %v1411_v61  ;;  %v1407_v37 = vadd.f32 %v1331_v57, %v959_v30  ;;  %v1793_v31 = vadd.f32 %v1717_v8, %v13575_v51  ;;  %v13581_v57 = vld [vmem:[#allocation29_spill] sm:$0xff]  ;;  %v13584_v8 = vld [vmem:[#allocation26_spill] sm:$0xff] }
 0x367   :  { %v1791_v3 = vadd.f32 %v1714_v20, %v1403_v18 }
 0x368   :  { %v1795_v47 = vadd.f32 %v1719_v28, %v1407_v37  ;;  %v1821_v17 = vadd.f32 %v1807_v45, %v1799_v60  ;;  %v1815_v9 = vadd.f32 %v1807_v45, %v1793_v31  ;;  %v1794_v28 = vadd.f32 %v1775_v13, %v13583_v49  ;;  %v10030_v49 = vld [vmem:[%s13586_s25 + $0x154] sm:$0xf0] }
 0x369   :  { %v1752_v25 = vpop.f32.mrf.mxu2  ;;  %v13572_v12 = vld [vmem:[#allocation34_spill] sm:$0xff]  ;;  %v1813_v50 = vadd.f32 %v1807_v45, %v1791_v3 }
 0x36a   :  { %v1782_v33 = vadd.f32 %v1781_v2, %v1752_v25  ;;  %v13577_v2 = vld [vmem:[#allocation30_spill] sm:$0xff]  ;;  %v1817_v38 = vadd.f32 %v1807_v45, %v1795_v47  ;;  %v1786_v48 = vpop.f32.mrf.mxu3  ;;  %v1837_v29 = vmul.f32 0.2, %v1821_v17  ;;  %v1816_v20 = vadd.f32 %v1808_v15, %v1794_v28 }
 0x36b   :  { %v1697_v39 = vpop.f32.mrf.mxu0 }
 0x36c   :  { %v1727_v27 = vadd.f32 %v1726_v14, %v1697_v39  ;;  %v13573_v14 = vld [vmem:[#allocation33_spill] sm:$0xff]  ;;  %v13576_v39 = vld [vmem:[#allocation32_spill] sm:$0xff]  ;;  %v1800_v58 = vadd.f32 %v1782_v33, %v1412_v1  ;;  %v1853_v60 = vmax.f32 %v1821_v17, %v1837_v29  ;;  %v1832_v31 = vmul.f32 0.2, %v1816_v20  ;;  %v10032_v29 = vld [vmem:[%s13586_s25 + $0x164] sm:$0xf0] }
 0x36d   :  { %v1780_v26 = vadd.f32 %v13573_v14, %v13572_v12  ;;  %v1777_v25 = vadd.f32 %v13577_v2, %v13576_v39  ;;  %v7973_v39 = vld [vmem:[%s13586_s25 + $0x170] sm:$0xf] }
 0x36e   :  { %v1801_v36 = vadd.f32 %v1727_v27, %v11256_v54  ;;  %v1797_v54 = vadd.f32 %v1722_v44, %v11246_v59  ;;  %v1416_v59 = vadd.f32 %v1399_v42, %v1027_v4  ;;  %v13582_v44 = vld [vmem:[#allocation25_spill] sm:$0xff]  ;;  %v1822_v61 = vadd.f32 %v1808_v15, %v1800_v58  ;;  %v10034_v58 = vld [vmem:[%s13586_s25 + $0x174] sm:$0xf0] }
 0x36f   :  { %v1798_v52 = vadd.f32 %v1780_v26, %v13580_v62  ;;  %v1796_v19 = vadd.f32 %v1777_v25, %v1408_v0  ;;  %v1829_v0 = vmul.f32 0.2, %v1813_v50 }
 0x370   :  { %v1823_v41 = vadd.f32 %v1807_v45, %v1801_v36  ;;  %v1819_v30 = vadd.f32 %v1807_v45, %v1797_v54  ;;  %v1811_v54 = vadd.f32 %v1807_v45, %v13584_v8  ;;  %v10048_v8 = vld [vmem:[%s13586_s25 + $0x1e4] sm:$0xf0] }
 0x371   :  { %v1755_v46 = vpop.f32.mrf.mxu2  ;;  %v1820_v5 = vadd.f32 %v1808_v15, %v1798_v52  ;;  %v1845_v2 = vmax.f32 %v1813_v50, %v1829_v0  ;;  %v7965_v52 = vld [vmem:[%s13586_s25 + $0x160] sm:$0xf]  ;;  %v7957_v50 = vld [vmem:[%s13586_s25 + $0x150] sm:$0xf] }
 0x372   :  { %v1785_v11 = vadd.f32 %v1784_v40, %v1755_v46  ;;  %v1839_v27 = vmul.f32 0.2, %v1823_v41  ;;  %v1772_v40 = vadd.f32 %v13582_v44, %v13581_v57  ;;  %v1835_v4 = vmul.f32 0.2, %v1819_v30  ;;  %v9983_v57 = vld [vmem:[%s13587_s3] sm:$0xff] }
 0x373   :  { %v1699_v22 = vpop.f32.mrf.mxu0  ;;  %v1833_v46 = vmul.f32 0.2, %v1817_v38  ;;  %v1836_v12 = vmul.f32 0.2, %v1820_v5  ;;  %v1827_v17 = vmul.f32 0.2, %v1811_v54 }
 0x374   :  { %v1729_v23 = vadd.f32 %v1728_v53, %v1699_v22  ;;  %v1802_v10 = vadd.f32 %v1785_v11, %v13574_v35  ;;  %v1855_v34 = vmax.f32 %v1823_v41, %v1839_v27  ;;  %v1792_v53 = vadd.f32 %v1772_v40, %v1404_v43  ;;  %v7975_v27 = vld [vmem:[%s13586_s25 + $0x178] sm:$0xf0]  ;;  %v8037_v44 = vld [vmem:[%s13586_s25 + $0x1f0] sm:$0xf] }
 0x375   :  { %v1831_v22 = vmul.f32 0.2, %v1815_v9  ;;  %v1851_v33 = vmax.f32 %v1819_v30, %v1835_v4  ;;  %v1849_v47 = vmax.f32 %v1817_v38, %v1833_v46  ;;  %v1852_v25 = vmax.f32 %v1820_v5, %v1836_v12  ;;  %v10049_v4 = vld [vmem:[%s13586_s25 + $0x1f4] sm:$0xf]  ;;  %v8029_v5 = vld [vmem:[%s13586_s25 + $0x1e0] sm:$0xf] }
 0x376   :  { %v1803_v7 = vadd.f32 %v1729_v23, %v1415_v63  ;;  %v1824_v16 = vadd.f32 %v1808_v15, %v1802_v10  ;;  %v1818_v63 = vadd.f32 %v1808_v15, %v1796_v19  ;;  %v1838_v23 = vmul.f32 0.2, %v1822_v61  ;;  %v10050_v19 = vld [vmem:[%s13586_s25 + $0x1f4] sm:$0xf0]  ;;  %v7951_v12 = vld [vmem:[%s13586_s25 + $0x148] sm:$0xf0] }
 0x377   :  { %v11373_v1 = vpack.c.bf16 %v1853_v60, %v1851_v33  ;;  %v1847_v43 = vmax.f32 %v1815_v9, %v1831_v22  ;;  %v7974_v38 = vor.u32 %v10034_v58, %v7973_v39  ;;  %v8038_v28 = vor.u32 %v10050_v19, %v8037_v44  ;;  %v10029_v60 = vld [vmem:[%s13586_s25 + $0x154] sm:$0xf]  ;;  %v7949_v33 = vld [vmem:[%s13586_s25 + $0x140] sm:$0xf]  ;;  %v7943_v39 = vld [vmem:[%s13586_s25 + $0x138] sm:$0xf0] }
 0x378   :  { %v1825_v24 = vadd.f32 %v1807_v45, %v1803_v7  ;;  %v1840_v11 = vmul.f32 0.2, %v1824_v16  ;;  %v1814_v45 = vadd.f32 %v1808_v15, %v1792_v53  ;;  %v1834_v35 = vmul.f32 0.2, %v1818_v63  ;;  %v8031_v53 = vld [vmem:[%s13586_s25 + $0x1e8] sm:$0xf0] }
 0x379   :  { %v1757_v55 = vpop.f32.mrf.mxu2  ;;  %v1854_v10 = vmax.f32 %v1822_v61, %v1838_v23  ;;  %v11385_v30 = vpack.c.bf16 %v1849_v47, %v1847_v43  ;;  %v8039_v61 = vld [vmem:[%s13586_s25 + $0x1f8] sm:$0xf0]  ;;  %v7958_v22 = vor.u32 %v10030_v49, %v7957_v50  ;;  %v10028_v23 = vld [vmem:[%s13586_s25 + $0x144] sm:$0xf0]  ;;  %v10027_v47 = vld [vmem:[%s13586_s25 + $0x144] sm:$0xf] }
 0x37a   :  { %v1841_v21 = vmul.f32 0.2, %v1825_v24  ;;  %v1787_v6 = vadd.f32 %v1786_v48, %v1757_v55  ;;  %v1856_v14 = vmax.f32 %v1824_v16, %v1840_v11  ;;  %v1830_v3 = vmul.f32 0.2, %v1814_v45  ;;  %v10031_v16 = vld [vmem:[%s13586_s25 + $0x164] sm:$0xf] }
 0x37b   :  { %v1850_v32 = vmax.f32 %v1818_v63, %v1834_v35  ;;  %v11398_v56 = vpack.c.bf16 %v1854_v10, %v1852_v25  ;;  %v1848_v48 = vmax.f32 %v1816_v20, %v1832_v31  ;;  %v8042_v46 = vor.u32 %v10049_v4, %v8039_v61  ;;  %v7959_v11 = vld [vmem:[%s13586_s25 + $0x158] sm:$0xf0]  ;;  %v8021_v20 = vld [vmem:[%s13586_s25 + $0x1d0] sm:$0xf]  ;;  %v10025_v31 = vld [vmem:[%s13586_s25 + $0x134] sm:$0xf] }
 0x37c   :  { %v1857_v36 = vmax.f32 %v1825_v24, %v1841_v21  ;;  %v1804_v18 = vadd.f32 %v1787_v6, %v1416_v59  ;;  %v13585_v59 = vld [vmem:[#allocation27_spill] sm:$0xff]  ;;  %v1843_v24 = vmax.f32 %v1811_v54, %v1827_v17  ;;  %v7967_v21 = vld [vmem:[%s13586_s25 + $0x168] sm:$0xf0]  ;;  %v1846_v40 = vmax.f32 %v1814_v45, %v1830_v3  ;;  %v10047_v54 = vld [vmem:[%s13586_s25 + $0x1e4] sm:$0xf] }
 0x37d   :  { %v1812_v51 = vadd.f32 %v1808_v15, %v13585_v59  ;;  %v10017_v6 = vld [vmem:[%s13587_s3 + $0x10] sm:$0xff]  ;;  %v11427_v9 = vpack.c.bf16 %v1850_v32, %v1848_v48  ;;  %v7962_v63 = vor.u32 %v10029_v60, %v7959_v11  ;;  %v8034_v0 = vor.u32 %v10047_v54, %v8031_v53  ;;  %v8023_v17 = vld [vmem:[%s13586_s25 + $0x1d8] sm:$0xf0]  ;;  %v10026_v59 = vld [vmem:[%s13586_s25 + $0x134] sm:$0xf0] }
 0x37e   :  { %v1826_v37 = vadd.f32 %v1808_v15, %v1804_v18  ;;  %v11368_v42 = vpack.c.bf16 %v1857_v36, %v1855_v34  ;;  %v10033_v15 = vld [vmem:[%s13586_s25 + $0x174] sm:$0xf]  ;;  %v11405_v55 = vpack.c.bf16 %v1845_v2, %v1843_v24  ;;  %v7966_v34 = vor.u32 %v10032_v29, %v7965_v52  ;;  %v7941_v35 = vld [vmem:[%s13586_s25 + $0x130] sm:$0xf]  ;;  %v8013_v2 = vld [vmem:[%s13586_s25 + $0x1c0] sm:$0xf] }
 0x37f   :  { %v1828_v13 = vmul.f32 0.2, %v1812_v51  ;;  %v7978_v62 = vor.u32 %v10033_v15, %v7975_v27  ;;  %v7970_v36 = vor.u32 %v10031_v16, %v7967_v21  ;;  %v7950_v45 = vor.u32 %v10028_v23, %v7949_v33  ;;  %v10044_v25 = vld [vmem:[%s13586_s25 + $0x1c4] sm:$0xf0]  ;;  %v10043_v58 = vld [vmem:[%s13586_s25 + $0x1c4] sm:$0xf] }
 0x380   :  { %v1842_v41 = vmul.f32 0.2, %v1826_v37  ;;  %1891 = vmatpush.bf16.msra.mxu0 %v11368_v42  ;;  %1986 = vmatpush.bf16.msra.mxu2 %v11368_v42  ;;  %v7954_v43 = vor.u32 %v10027_v47, %v7951_v12  ;;  %v8015_v15 = vld [vmem:[%s13586_s25 + $0x1c8] sm:$0xf0]  ;;  %v10018_v27 = vld [vmem:[%s13587_s3 + $0x18] sm:$0xff]  ;;  %v7942_v3 = vor.u32 %v10026_v59, %v7941_v35  ;;  %v7946_v32 = vor.u32 %v10025_v31, %v7943_v39 }
 0x381   :  { %v1844_v18 = vmax.f32 %v1812_v51, %v1828_v13  ;;  %v9984_v24 = vld [vmem:[%s13587_s3 + $0x8] sm:$0xff]  ;;  %v7933_v13 = vld [vmem:[%s13586_s25 + $0x120] sm:$0xf]  ;;  %v8014_v48 = vor.u32 %v10044_v25, %v8013_v2  ;;  %v8018_v29 = vor.u32 %v10043_v58, %v8015_v15  ;;  %v8005_v16 = vld [vmem:[%s13586_s25 + $0x1b0] sm:$0xf] }
 0x382   :  { %v1858_v26 = vmax.f32 %v1826_v37, %v1842_v41  ;;  %v8030_v41 = vor.u32 %v10048_v8, %v8029_v5  ;;  %v7935_v52 = vld [vmem:[%s13586_s25 + $0x128] sm:$0xf0]  ;;  %v10042_v21 = vld [vmem:[%s13586_s25 + $0x1b4] sm:$0xf0]  ;;  %v7925_v19 = vld [vmem:[%s13586_s25 + $0x110] sm:$0xf] }
 0x383   :  { %v11457_v37 = vpack.c.bf16 %v1846_v40, %v1844_v18  ;;  %v10022_v4 = vld [vmem:[%s13586_s25 + $0x114] sm:$0xf0]  ;;  %v10021_v61 = vld [vmem:[%s13586_s25 + $0x114] sm:$0xf]  ;;  %v7997_v50 = vld [vmem:[%s13586_s25 + $0x1a0] sm:$0xf] }
 0x384   :  { %1892 = vmatpush.bf16.msra.mxu0 %v11373_v1  ;;  %1987 = vmatpush.bf16.msra.mxu2 %v11373_v1  ;;  %v11377_v7 = vpack.c.bf16 %v1858_v26, %v1856_v14  ;;  %v10046_v14 = vld [vmem:[%s13586_s25 + $0x1d4] sm:$0xf0]  ;;  %v10045_v26 = vld [vmem:[%s13586_s25 + $0x1d4] sm:$0xf]  ;;  %v10040_v49 = vld [vmem:[%s13586_s25 + $0x1a4] sm:$0xf0]  ;;  %v7926_v5 = vor.u32 %v10022_v4, %v7925_v19 }
 0x385   :  { %v8022_v10 = vor.u32 %v10046_v14, %v8021_v20  ;;  %v8026_v51 = vor.u32 %v10045_v26, %v8023_v17  ;;  %v7917_v11 = vld [vmem:[%s13586_s25 + $0x100] sm:$0xf]  ;;  %v10020_v8 = vld [vmem:[%s13586_s25 + $0x104] sm:$0xf0]  ;;  %v8101_v54 = vld [vmem:[%s13586_s25 + $0x70] sm:$0xf]  ;;  %v7998_v33 = vor.u32 %v10040_v49, %v7997_v50 }
 0x386   :  { %1910 = vmatpush.bf16.msra.mxu1 %v11377_v7  ;;  %2005 = vmatpush.bf16.msrb.mxu3 %v11377_v7  ;;  %v10000_v53 = vld [vmem:[%s13586_s25 + $0x74] sm:$0xf0]  ;;  %v8103_v20 = vld [vmem:[%s13586_s25 + $0x78] sm:$0xf0]  ;;  %v10037_v12 = vld [vmem:[%s13586_s25 + $0x194] sm:$0xf]  ;;  %v7918_v26 = vor.u32 %v10020_v8, %v7917_v11 }
 0x387   :  { %v10038_v47 = vld [vmem:[%s13586_s25 + $0x194] sm:$0xf0]  ;;  %v7991_v14 = vld [vmem:[%s13586_s25 + $0x198] sm:$0xf0]  ;;  %v8093_v35 = vld [vmem:[%s13586_s25 + $0x60] sm:$0xf] }
 0x388   :  { %1893 = vmatpush.bf16.msra.mxu0 %v11385_v30  ;;  %1988 = vmatpush.bf16.msra.mxu2 %v11385_v30  ;;  %v7981_v59 = vld [vmem:[%s13586_s25 + $0x180] sm:$0xf]  ;;  %v7994_v31 = vor.u32 %v10037_v12, %v7991_v14  ;;  %v10036_v39 = vld [vmem:[%s13586_s25 + $0x184] sm:$0xf0]  ;;  %v9997_v2 = vld [vmem:[%s13586_s25 + $0x64] sm:$0xf] }
 0x389   :  { %v8095_v25 = vld [vmem:[%s13586_s25 + $0x68] sm:$0xf0]  ;;  %v8165_v58 = vld [vmem:[%s13586_s25 + $0xf0] sm:$0xf]  ;;  %v10035_v15 = vld [vmem:[%s13586_s25 + $0x184] sm:$0xf] }
 0x38a   :  { %1911 = vmatpush.bf16.msra.mxu1 %v11398_v56  ;;  %2006 = vmatpush.bf16.msrb.mxu3 %v11398_v56  ;;  %v10013_v19 = vld [vmem:[%s13586_s25 + $0xe4] sm:$0xf]  ;;  %v8159_v4 = vld [vmem:[%s13586_s25 + $0xe8] sm:$0xf0]  ;;  %v10011_v11 = vld [vmem:[%s13586_s25 + $0xd4] sm:$0xf] }
 0x38b   :  { %v9993_v50 = vld [vmem:[%s13586_s25 + $0x44] sm:$0xf]  ;;  %v8079_v49 = vld [vmem:[%s13586_s25 + $0x48] sm:$0xf0]  ;;  %v8151_v8 = vld [vmem:[%s13586_s25 + $0xd8] sm:$0xf0] }
 0x38c   :  { %1894 = vmatpush.bf16.msra.mxu0 %v11405_v55  ;;  %1989 = vmatpush.bf16.msra.mxu2 %v11405_v55  ;;  %v9991_v12 = vld [vmem:[%s13586_s25 + $0x34] sm:$0xf]  ;;  %v8071_v14 = vld [vmem:[%s13586_s25 + $0x38] sm:$0xf0] }
 0x38e   :  { %1912 = vmatpush.bf16.msra.mxu1 %v11427_v9  ;;  %2007 = vmatpush.bf16.msrb.mxu3 %v11427_v9 }
 0x38f   :  { %7879 = vmatmul.msk.bf16.vlgmr.msra.gmra.mxu2 %vm652_vm0, %v10017_v6  ;;  %7863 = vmatmul.msk.bf16.vlgmr.msra.gmra.mxu0 %vm652_vm0, %v9983_v57 }
 0x390   :  { %2217 = vmatpush.bf16.msrb.mxu0 %v7974_v38  ;;  %2255 = vmatpush.bf16.msrb.mxu2 %v7978_v62  ;;  %v10024_v38 = vld [vmem:[%s13586_s25 + $0x124] sm:$0xf0]  ;;  %v10023_v62 = vld [vmem:[%s13586_s25 + $0x124] sm:$0xf] }
 0x391   :  { %v7934_v44 = vor.u32 %v10024_v38, %v7933_v13  ;;  %v7938_v40 = vor.u32 %v10023_v62, %v7935_v52  ;;  %v8098_v38 = vor.u32 %v9997_v2, %v8095_v25  ;;  %v8085_v62 = vld [vmem:[%s13586_s25 + $0x50] sm:$0xf]  ;;  %v7982_v52 = vor.u32 %v10036_v39, %v7981_v59  ;;  %v9989_v2 = vld [vmem:[%s13586_s25 + $0x24] sm:$0xf]  ;;  %v8063_v25 = vld [vmem:[%s13586_s25 + $0x28] sm:$0xf0] }
 0x392   :  { %1913 = vmatpush.bf16.msra.mxu1 %v11457_v37  ;;  %2008 = vmatpush.bf16.msrb.mxu3 %v11457_v37  ;;  %v8133_v59 = vld [vmem:[%s13586_s25 + $0xb0] sm:$0xf] }
 0x394   :  { %2218 = vmatpush.bf16.msrb.mxu0 %v7966_v34  ;;  %2256 = vmatpush.bf16.msrb.mxu2 %v7970_v36  ;;  %v7927_v34 = vld [vmem:[%s13586_s25 + $0x118] sm:$0xf0]  ;;  %v8006_v36 = vor.u32 %v10042_v21, %v8005_v16  ;;  %v9995_v16 = vld [vmem:[%s13586_s25 + $0x54] sm:$0xf] }
 0x395   :  { %7881 = vmatmul.msk.bf16.vlgmr.msrb.gmra.mxu3 %vm652_vm0, %v10017_v6  ;;  %7865 = vmatmul.msk.bf16.vlgmr.msra.gmra.mxu1 %vm652_vm0, %v9983_v57  ;;  %v10041_v6 = vld [vmem:[%s13586_s25 + $0x1b4] sm:$0xf]  ;;  %v8007_v57 = vld [vmem:[%s13586_s25 + $0x1b8] sm:$0xf0]  ;;  %v7930_v60 = vor.u32 %v10021_v61, %v7927_v34 }
 0x396   :  { %2236 = vmatpush.bf16.msrb.mxu1 %v8038_v28  ;;  %2274 = vmatpush.bf16.msra.mxu3 %v8042_v46  ;;  %v8010_v18 = vor.u32 %v10041_v6, %v8007_v57  ;;  %v10039_v28 = vld [vmem:[%s13586_s25 + $0x1a4] sm:$0xf]  ;;  %v7999_v46 = vld [vmem:[%s13586_s25 + $0x1a8] sm:$0xf0]  ;;  %v8087_v21 = vld [vmem:[%s13586_s25 + $0x58] sm:$0xf0] }
 0x397   :  { %v8002_v23 = vor.u32 %v10039_v28, %v7999_v46  ;;  %v8090_v34 = vor.u32 %v9995_v16, %v8087_v21  ;;  %v8162_v46 = vor.u32 %v10013_v19, %v8159_v4  ;;  %v8045_v21 = vld [vmem:[%s13586_s25] sm:$0xf]  ;;  %v8117_v4 = vld [vmem:[%s13586_s25 + $0x90] sm:$0xf] }
 0x398   :  { %2219 = vmatpush.bf16.msrb.mxu0 %v7958_v22  ;;  %2257 = vmatpush.bf16.msrb.mxu2 %v7962_v63  ;;  %v10019_v22 = vld [vmem:[%s13586_s25 + $0x104] sm:$0xf]  ;;  %v7919_v63 = vld [vmem:[%s13586_s25 + $0x108] sm:$0xf0] }
 0x399   :  { %v7922_v17 = vor.u32 %v10019_v22, %v7919_v63  ;;  %v8069_v22 = vld [vmem:[%s13586_s25 + $0x30] sm:$0xf]  ;;  %v9992_v63 = vld [vmem:[%s13586_s25 + $0x34] sm:$0xf0] }
 0x39a   :  { %2237 = vmatpush.bf16.msrb.mxu1 %v8030_v41  ;;  %2275 = vmatpush.bf16.msra.mxu3 %v8034_v0  ;;  %v7989_v41 = vld [vmem:[%s13586_s25 + $0x190] sm:$0xf]  ;;  %v9999_v0 = vld [vmem:[%s13586_s25 + $0x74] sm:$0xf] }
 0x39c   :  { %2220 = vmatpush.bf16.msrb.mxu0 %v7950_v45  ;;  %2258 = vmatpush.bf16.msrb.mxu2 %v7954_v43  ;;  %v8102_v45 = vor.u32 %v10000_v53, %v8101_v54  ;;  %v8106_v43 = vor.u32 %v9999_v0, %v8103_v20  ;;  %v8082_v53 = vor.u32 %v9993_v50, %v8079_v49  ;;  %v8141_v0 = vld [vmem:[%s13586_s25 + $0xc0] sm:$0xf]  ;;  %v10010_v20 = vld [vmem:[%s13586_s25 + $0xc4] sm:$0xf0]  ;;  %v10003_v49 = vld [vmem:[%s13586_s25 + $0x94] sm:$0xf] }
 0x39e   :  { %2238 = vmatpush.bf16.msrb.mxu1 %v8022_v10  ;;  %2276 = vmatpush.bf16.msra.mxu3 %v8026_v51  ;;  %v9998_v10 = vld [vmem:[%s13586_s25 + $0x64] sm:$0xf0]  ;;  %v7990_v51 = vor.u32 %v10038_v47, %v7989_v41  ;;  %v8070_v41 = vor.u32 %v9992_v63, %v8069_v22  ;;  %v8142_v47 = vor.u32 %v10010_v20, %v8141_v0  ;;  %v8277_v63 = vld [vmem:[%s13586_s25 + $0x270] sm:$0xf] }
 0x39f   :  { %7880 = vmatmul.msk.bf16.gmra.mxu2 %vm652_vm0, %v10018_v27  ;;  %7864 = vmatmul.msk.bf16.gmra.mxu0 %vm652_vm0, %v9984_v24  ;;  %v8094_v13 = vor.u32 %v9998_v10, %v8093_v35  ;;  %v8143_v10 = vld [vmem:[%s13586_s25 + $0xc8] sm:$0xf0] }
 0x3a0   :  { %2221 = vmatpush.bf16.msrb.mxu0 %v7942_v3  ;;  %2259 = vmatpush.bf16.msrb.mxu2 %v7946_v32  ;;  %v10015_v3 = vld [vmem:[%s13586_s25 + $0xf4] sm:$0xf]  ;;  %v8167_v32 = vld [vmem:[%s13586_s25 + $0xf8] sm:$0xf0] }
 0x3a1   :  { %v8170_v57 = vor.u32 %v10015_v3, %v8167_v32  ;;  %v10007_v3 = vld [vmem:[%s13586_s25 + $0xb4] sm:$0xf]  ;;  %v8135_v32 = vld [vmem:[%s13586_s25 + $0xb8] sm:$0xf0] }
 0x3a2   :  { %2239 = vmatpush.bf16.msrb.mxu1 %v8014_v48  ;;  %2277 = vmatpush.bf16.msra.mxu3 %v8018_v29  ;;  %v9996_v29 = vld [vmem:[%s13586_s25 + $0x54] sm:$0xf0] }
 0x3a3   :  { %v8086_v61 = vor.u32 %v9996_v29, %v8085_v62  ;;  %v10006_v62 = vld [vmem:[%s13586_s25 + $0xa4] sm:$0xf0]  ;;  %v8055_v29 = vld [vmem:[%s13586_s25 + $0x18] sm:$0xf0] }
 0x3a4   :  { %2222 = vmatpush.bf16.msrb.mxu0 %v7934_v44  ;;  %2260 = vmatpush.bf16.msrb.mxu2 %v7938_v40  ;;  %v8157_v44 = vld [vmem:[%s13586_s25 + $0xe0] sm:$0xf]  ;;  %v10014_v40 = vld [vmem:[%s13586_s25 + $0xe4] sm:$0xf0] }
 0x3a5   :  { %7882 = vmatmul.msk.bf16.gmra.mxu3 %vm652_vm0, %v10018_v27  ;;  %7866 = vmatmul.msk.bf16.gmra.mxu1 %vm652_vm0, %v9984_v24  ;;  %v7983_v27 = vld [vmem:[%s13586_s25 + $0x188] sm:$0xf0]  ;;  %v10016_v24 = vld [vmem:[%s13586_s25 + $0xf4] sm:$0xf0]  ;;  %v8158_v28 = vor.u32 %v10014_v40, %v8157_v44  ;;  %v10005_v44 = vld [vmem:[%s13586_s25 + $0xa4] sm:$0xf] }
 0x3a6   :  { %2240 = vmatpush.bf16.msrb.mxu1 %v8006_v36  ;;  %2278 = vmatpush.bf16.msra.mxu3 %v8010_v18  ;;  %v7986_v48 = vor.u32 %v10035_v15, %v7983_v27  ;;  %v8166_v6 = vor.u32 %v10016_v24, %v8165_v58  ;;  %v8077_v36 = vld [vmem:[%s13586_s25 + $0x40] sm:$0xf]  ;;  %v9994_v18 = vld [vmem:[%s13586_s25 + $0x44] sm:$0xf0]  ;;  %v8066_v58 = vor.u32 %v9989_v2, %v8063_v25  ;;  %v8053_v15 = vld [vmem:[%s13586_s25 + $0x10] sm:$0xf] }
 0x3a7   :  { %v8078_v54 = vor.u32 %v9994_v18, %v8077_v36  ;;  %v9988_v27 = vld [vmem:[%s13586_s25 + $0x14] sm:$0xf0]  ;;  %v8127_v40 = vld [vmem:[%s13586_s25 + $0xa8] sm:$0xf0]  ;;  %v9985_v36 = vld [vmem:[%s13586_s25 + $0x4] sm:$0xf] }
 0x3a8   :  { %2223 = vmatpush.bf16.msrb.mxu0 %v7926_v5  ;;  %2261 = vmatpush.bf16.msrb.mxu2 %v7930_v60  ;;  %v8149_v5 = vld [vmem:[%s13586_s25 + $0xd0] sm:$0xf]  ;;  %v10012_v60 = vld [vmem:[%s13586_s25 + $0xd4] sm:$0xf0]  ;;  %v8054_v24 = vor.u32 %v9988_v27, %v8053_v15  ;;  %v8130_v19 = vor.u32 %v10005_v44, %v8127_v40  ;;  %v8047_v18 = vld [vmem:[%s13586_s25 + $0x8] sm:$0xf0] }
 0x3a9   :  { %v8050_v50 = vor.u32 %v9985_v36, %v8047_v18  ;;  %v8253_v25 = vld [vmem:[%s13586_s25 + $0x240] sm:$0xf]  ;;  %v8325_v27 = vld [vmem:[%s13586_s25 + $0x2d0] sm:$0xf]  ;;  %v10058_v44 = vld [vmem:[%s13586_s25 + $0x224] sm:$0xf0] }
 0x3aa   :  { %2241 = vmatpush.bf16.msrb.mxu1 %v7998_v33  ;;  %2279 = vmatpush.bf16.msra.mxu3 %v8002_v23  ;;  %v8150_v33 = vor.u32 %v10012_v60, %v8149_v5  ;;  %v8154_v23 = vor.u32 %v10011_v11, %v8151_v8  ;;  %v8109_v5 = vld [vmem:[%s13586_s25 + $0x80] sm:$0xf]  ;;  %v10002_v60 = vld [vmem:[%s13586_s25 + $0x84] sm:$0xf0]  ;;  %v10001_v8 = vld [vmem:[%s13586_s25 + $0x84] sm:$0xf] }
 0x3ab   :  { %v8110_v11 = vor.u32 %v10002_v60, %v8109_v5  ;;  %v10056_v36 = vld [vmem:[%s13586_s25 + $0x214] sm:$0xf0]  ;;  %v10074_v5 = vld [vmem:[%s13586_s25 + $0x2a4] sm:$0xf0] }
 0x3ac   :  { %2224 = vmatpush.bf16.msrb.mxu0 %v7918_v26  ;;  %2262 = vmatpush.bf16.msrb.mxu2 %v7922_v17  ;;  %v8074_v26 = vor.u32 %v9991_v12, %v8071_v14  ;;  %v8061_v17 = vld [vmem:[%s13586_s25 + $0x20] sm:$0xf]  ;;  %v10066_v12 = vld [vmem:[%s13586_s25 + $0x264] sm:$0xf0]  ;;  %v8341_v14 = vld [vmem:[%s13586_s25 + $0x2f0] sm:$0xf] }
 0x3ae   :  { %2242 = vmatpush.bf16.msrb.mxu1 %v7990_v51  ;;  %2280 = vmatpush.bf16.msra.mxu3 %v7994_v31  ;;  %v10008_v51 = vld [vmem:[%s13586_s25 + $0xb4] sm:$0xf0] }
 0x3af   :  { %v8134_v39 = vor.u32 %v10008_v51, %v8133_v59  ;;  %v8333_v51 = vld [vmem:[%s13586_s25 + $0x2e0] sm:$0xf] }
 0x3b0   :  { %2453 = vmatpush.bf16.msra.mxu0 %v8102_v45  ;;  %2491 = vmatpush.bf16.msra.mxu2 %v8106_v43  ;;  %v9990_v45 = vld [vmem:[%s13586_s25 + $0x24] sm:$0xf0]  ;;  %v10009_v43 = vld [vmem:[%s13586_s25 + $0xc4] sm:$0xf] }
 0x3b1   :  { %v8062_v35 = vor.u32 %v9990_v45, %v8061_v17  ;;  %v8146_v31 = vor.u32 %v10009_v43, %v8143_v10  ;;  %v8261_v45 = vld [vmem:[%s13586_s25 + $0x250] sm:$0xf]  ;;  %v10064_v43 = vld [vmem:[%s13586_s25 + $0x254] sm:$0xf0] }
 0x3b2   :  { %2243 = vmatpush.bf16.msrb.mxu1 %v7982_v52  ;;  %2281 = vmatpush.bf16.msra.mxu3 %v7986_v48  ;;  %v9987_v48 = vld [vmem:[%s13586_s25 + $0x14] sm:$0xf]  ;;  %v8262_v2 = vor.u32 %v10064_v43, %v8261_v45 }
 0x3b3   :  { %v8058_v16 = vor.u32 %v9987_v48, %v8055_v29  ;;  %v10078_v48 = vld [vmem:[%s13586_s25 + $0x2c4] sm:$0xf0] }
 0x3b4   :  { %2454 = vmatpush.bf16.msra.mxu0 %v8094_v13  ;;  %2492 = vmatpush.bf16.msra.mxu2 %v8098_v38  ;;  %v8138_v13 = vor.u32 %v10007_v3, %v8135_v32  ;;  %v8125_v38 = vld [vmem:[%s13586_s25 + $0xa0] sm:$0xf]  ;;  %v8245_v32 = vld [vmem:[%s13586_s25 + $0x230] sm:$0xf] }
 0x3b5   :  { %v8126_v52 = vor.u32 %v10006_v62, %v8125_v38 }
 0x3b6   :  { %2472 = vmatpush.bf16.msra.mxu1 %v8166_v6  ;;  %2510 = vmatpush.bf16.msrb.mxu3 %v8170_v57  ;;  %v9986_v6 = vld [vmem:[%s13586_s25 + $0x4] sm:$0xf0] }
 0x3b7   :  { %v8046_v57 = vor.u32 %v9986_v6, %v8045_v21 }
 0x3b8   :  { %2455 = vmatpush.bf16.msra.mxu0 %v8086_v61  ;;  %2493 = vmatpush.bf16.msra.mxu2 %v8090_v34  ;;  %v10004_v61 = vld [vmem:[%s13586_s25 + $0x94] sm:$0xf0] }
 0x3b9   :  { %v8118_v34 = vor.u32 %v10004_v61, %v8117_v4  ;;  %v10076_v4 = vld [vmem:[%s13586_s25 + $0x2b4] sm:$0xf0] }
 0x3ba   :  { %2473 = vmatpush.bf16.msra.mxu1 %v8158_v28  ;;  %2511 = vmatpush.bf16.msrb.mxu3 %v8162_v46  ;;  %v8119_v28 = vld [vmem:[%s13586_s25 + $0x98] sm:$0xf0] }
 0x3bb   :  { %v8122_v46 = vor.u32 %v10003_v49, %v8119_v28 }
 0x3bc   :  { %2456 = vmatpush.bf16.msra.mxu0 %v8078_v54  ;;  %2494 = vmatpush.bf16.msra.mxu2 %v8082_v53  ;;  %v8111_v54 = vld [vmem:[%s13586_s25 + $0x88] sm:$0xf0] }
 0x3bd   :  { %v8114_v53 = vor.u32 %v10001_v8, %v8111_v54  ;;  %v10054_v8 = vld [vmem:[%s13586_s25 + $0x204] sm:$0xf0] }
 0x3be   :  { %2474 = vmatpush.bf16.msra.mxu1 %v8150_v33  ;;  %2512 = vmatpush.bf16.msrb.mxu3 %v8154_v23  ;;  %v10068_v33 = vld [vmem:[%s13586_s25 + $0x274] sm:$0xf0] }
 0x3bf   :  { %v8278_v0 = vor.u32 %v10068_v33, %v8277_v63  ;;  %v10072_v63 = vld [vmem:[%s13586_s25 + $0x294] sm:$0xf0] }
 0x3c0   :  { %2457 = vmatpush.bf16.msra.mxu0 %v8070_v41  ;;  %2495 = vmatpush.bf16.msra.mxu2 %v8074_v26  ;;  %v10084_v26 = vld [vmem:[%s13586_s25 + $0x2f4] sm:$0xf0] }
 0x3c1   :  { %v8342_v10 = vor.u32 %v10084_v26, %v8341_v14 }
 0x3c2   :  { %2475 = vmatpush.bf16.msra.mxu1 %v8142_v47  ;;  %2513 = vmatpush.bf16.msrb.mxu3 %v8146_v31  ;;  %v8269_v47 = vld [vmem:[%s13586_s25 + $0x260] sm:$0xf]  ;;  %v10082_v31 = vld [vmem:[%s13586_s25 + $0x2e4] sm:$0xf0] }
 0x3c3   :  { %v8270_v17 = vor.u32 %v10066_v12, %v8269_v47  ;;  %v8334_v15 = vor.u32 %v10082_v31, %v8333_v51 }
 0x3c4   :  { %2458 = vmatpush.bf16.msra.mxu0 %v8062_v35  ;;  %2496 = vmatpush.bf16.msra.mxu2 %v8066_v58  ;;  %v10062_v58 = vld [vmem:[%s13586_s25 + $0x244] sm:$0xf0] }
 0x3c5   :  { %v8254_v3 = vor.u32 %v10062_v58, %v8253_v25  ;;  %v10065_v58 = vld [vmem:[%s13586_s25 + $0x264] sm:$0xf] }
 0x3c6   :  { %2476 = vmatpush.bf16.msra.mxu1 %v8134_v39  ;;  %2514 = vmatpush.bf16.msrb.mxu3 %v8138_v13  ;;  %v10060_v13 = vld [vmem:[%s13586_s25 + $0x234] sm:$0xf0] }
 0x3c8   :  { %2459 = vmatpush.bf16.msra.mxu0 %v8054_v24  ;;  %2497 = vmatpush.bf16.msra.mxu2 %v8058_v16  ;;  %v10080_v24 = vld [vmem:[%s13586_s25 + $0x2d4] sm:$0xf0]  ;;  %v8246_v16 = vor.u32 %v10060_v13, %v8245_v32 }
 0x3c9   :  { %v8326_v62 = vor.u32 %v10080_v24, %v8325_v27  ;;  %v10083_v27 = vld [vmem:[%s13586_s25 + $0x2f4] sm:$0xf]  ;;  %v8343_v24 = vld [vmem:[%s13586_s25 + $0x2f8] sm:$0xf0] }
 0x3ca   :  { %2477 = vmatpush.bf16.msra.mxu1 %v8126_v52  ;;  %2515 = vmatpush.bf16.msrb.mxu3 %v8130_v19  ;;  %v8317_v52 = vld [vmem:[%s13586_s25 + $0x2c0] sm:$0xf]  ;;  %v8309_v19 = vld [vmem:[%s13586_s25 + $0x2b0] sm:$0xf]  ;;  %v8346_v13 = vor.u32 %v10083_v27, %v8343_v24 }
 0x3cb   :  { %v8318_v40 = vor.u32 %v10078_v48, %v8317_v52 }
 0x3cc   :  { %2460 = vmatpush.bf16.msra.mxu0 %v8046_v57  ;;  %2498 = vmatpush.bf16.msra.mxu2 %v8050_v50  ;;  %v8237_v57 = vld [vmem:[%s13586_s25 + $0x220] sm:$0xf]  ;;  %v8310_v50 = vor.u32 %v10076_v4, %v8309_v19  ;;  %v10079_v4 = vld [vmem:[%s13586_s25 + $0x2d4] sm:$0xf] }
 0x3cd   :  { %v8238_v61 = vor.u32 %v10058_v44, %v8237_v57  ;;  %v10061_v44 = vld [vmem:[%s13586_s25 + $0x244] sm:$0xf] }
 0x3ce   :  { %2478 = vmatpush.bf16.msra.mxu1 %v8118_v34  ;;  %2516 = vmatpush.bf16.msrb.mxu3 %v8122_v46  ;;  %v8229_v34 = vld [vmem:[%s13586_s25 + $0x210] sm:$0xf]  ;;  %v8301_v46 = vld [vmem:[%s13586_s25 + $0x2a0] sm:$0xf] }
 0x3cf   :  { %v8230_v60 = vor.u32 %v10056_v36, %v8229_v34 }
 0x3d2   :  { %2479 = vmatpush.bf16.msra.mxu1 %v8110_v11  ;;  %2517 = vmatpush.bf16.msrb.mxu3 %v8114_v53  ;;  %v8221_v11 = vld [vmem:[%s13586_s25 + $0x200] sm:$0xf]  ;;  %v8302_v53 = vor.u32 %v10074_v5, %v8301_v46  ;;  %v10077_v5 = vld [vmem:[%s13586_s25 + $0x2c4] sm:$0xf] }
 0x3d3   :  { %v8222_v33 = vor.u32 %v10054_v8, %v8221_v11 }
 0x40c   :  { %v1896_v21 = vpop.f32.mrf.mxu0 }
 0x412   :  { %v1991_v22 = vpop.f32.mrf.mxu2  ;;  %v1915_v49 = vpop.f32.mrf.mxu1 }
 0x414   :  { %v1898_v54 = vpop.f32.mrf.mxu0 }
 0x415   :  { %v1925_v47 = vpack.c.bf16 %v1898_v54, %v1896_v21 }
 0x418   :  { %v2010_v23 = vpop.f32.mrf.mxu3 }
 0x41a   :  { %v1993_v41 = vpop.f32.mrf.mxu2 }
 0x41b   :  { %v2020_v20 = vpack.c.bf16 %v1993_v41, %v1991_v22  ;;  %v8293_v22 = vld [vmem:[%s13586_s25 + $0x290] sm:$0xf]  ;;  %v8285_v41 = vld [vmem:[%s13586_s25 + $0x280] sm:$0xf] }
 0x41c   :  { %v1901_v14 = vpop.f32.mrf.mxu0 }
 0x41d   :  { %2225 = vmatmul.bf16.vlgmr.msrb.gmra.mxu0 %v2020_v20  ;;  %2263 = vmatmul.bf16.vlgmr.msrb.gmra.mxu2 %v2020_v20  ;;  %v1917_v20 = vpop.f32.mrf.mxu1 }
 0x41e   :  { %2554 = vmatpush.bf16.msrb.mxu0 %v11368_v42  ;;  %2785 = vmatpush.bf16.msrb.mxu2 %v8278_v0  ;;  %v10070_v0 = vld [vmem:[%s13586_s25 + $0x284] sm:$0xf0]  ;;  %v1926_v26 = vpack.c.bf16 %v1917_v20, %v1915_v49  ;;  %v8247_v49 = vld [vmem:[%s13586_s25 + $0x238] sm:$0xf0] }
 0x41f   :  { %v8286_v12 = vor.u32 %v10070_v0, %v8285_v41 }
 0x420   :  { %v2012_v35 = vpop.f32.mrf.mxu3 }
 0x421   :  { %v2021_v59 = vpack.c.bf16 %v2012_v35, %v2010_v23  ;;  %v8294_v23 = vor.u32 %v10072_v63, %v8293_v22  ;;  %v10057_v22 = vld [vmem:[%s13586_s25 + $0x224] sm:$0xf]  ;;  %v8239_v63 = vld [vmem:[%s13586_s25 + $0x228] sm:$0xf0] }
 0x422   :  { %2555 = vmatpush.bf16.msrb.mxu0 %v11373_v1  ;;  %v1996_v39 = vpop.f32.mrf.mxu2  ;;  %2786 = vmatpush.bf16.msrb.mxu2 %v8270_v17  ;;  %v8242_v41 = vor.u32 %v10057_v22, %v8239_v63  ;;  %v10086_v22 = vld [vmem:[%s13587_s3 + $0x38] sm:$0xff]  ;;  %v8453_v63 = vld [vmem:[%s13586_s25 + $0x370] sm:$0xf] }
 0x423   :  { %2244 = vmatmul.bf16.vlgmr.msrb.gmra.mxu1 %v2021_v59  ;;  %2282 = vmatmul.bf16.vlgmr.msra.gmra.mxu3 %v2021_v59  ;;  %v8279_v59 = vld [vmem:[%s13586_s25 + $0x278] sm:$0xf0] }
 0x424   :  { %2573 = vmatpush.bf16.msrb.mxu1 %v11377_v7  ;;  %2804 = vmatpush.bf16.msra.mxu3 %v8342_v10  ;;  %v1903_v45 = vpop.f32.mrf.mxu0  ;;  %v10067_v10 = vld [vmem:[%s13586_s25 + $0x274] sm:$0xf] }
 0x425   :  { %v1920_v17 = vpop.f32.mrf.mxu1  ;;  %v1927_v43 = vpack.c.bf16 %v1903_v45, %v1901_v14  ;;  %v8282_v51 = vor.u32 %v10067_v10, %v8279_v59  ;;  %v8231_v14 = vld [vmem:[%s13586_s25 + $0x218] sm:$0xf0]  ;;  %v10073_v45 = vld [vmem:[%s13586_s25 + $0x2a4] sm:$0xf]  ;;  %v8223_v59 = vld [vmem:[%s13586_s25 + $0x208] sm:$0xf0] }
 0x426   :  { %2556 = vmatpush.bf16.msrb.mxu0 %v11385_v30  ;;  %2787 = vmatpush.bf16.msrb.mxu2 %v8262_v2 }
 0x428   :  { %2574 = vmatpush.bf16.msrb.mxu1 %v11398_v56  ;;  %v2015_v38 = vpop.f32.mrf.mxu3  ;;  %2805 = vmatpush.bf16.msra.mxu3 %v8334_v15  ;;  %v8271_v15 = vld [vmem:[%s13586_s25 + $0x268] sm:$0xf0] }
 0x42a   :  { %2557 = vmatpush.bf16.msrb.mxu0 %v11405_v55  ;;  %v1998_v29 = vpop.f32.mrf.mxu2  ;;  %2788 = vmatpush.bf16.msrb.mxu2 %v8254_v3  ;;  %v8274_v3 = vor.u32 %v10065_v58, %v8271_v15  ;;  %v10069_v15 = vld [vmem:[%s13586_s25 + $0x284] sm:$0xf] }
 0x42b   :  { %v2022_v6 = vpack.c.bf16 %v1998_v29, %v1996_v39  ;;  %v10081_v29 = vld [vmem:[%s13586_s25 + $0x2e4] sm:$0xf] }
 0x42c   :  { %2575 = vmatpush.bf16.msrb.mxu1 %v11427_v9  ;;  %2806 = vmatpush.bf16.msra.mxu3 %v8326_v62  ;;  %v8263_v62 = vld [vmem:[%s13586_s25 + $0x258] sm:$0xf0] }
 0x42d   :  { %2268 = vmatmul.bf16.gmra.mxu2 %v2022_v6  ;;  %2230 = vmatmul.bf16.gmra.mxu0 %v2022_v6 }
 0x42e   :  { %2789 = vmatpush.bf16.msrb.mxu2 %v8246_v16  ;;  %v8335_v16 = vld [vmem:[%s13586_s25 + $0x2e8] sm:$0xf0] }
 0x42f   :  { %v8338_v21 = vor.u32 %v10081_v29, %v8335_v16 }
 0x430   :  { %2576 = vmatpush.bf16.msrb.mxu1 %v11457_v37  ;;  %v2017_v18 = vpop.f32.mrf.mxu3  ;;  %2807 = vmatpush.bf16.msra.mxu3 %v8318_v40  ;;  %v8255_v40 = vld [vmem:[%s13586_s25 + $0x248] sm:$0xf0] }
 0x431   :  { %v2023_v28 = vpack.c.bf16 %v2017_v18, %v2015_v38  ;;  %v10063_v38 = vld [vmem:[%s13586_s25 + $0x254] sm:$0xf]  ;;  %v8258_v34 = vor.u32 %v10061_v44, %v8255_v40 }
 0x432   :  { %2790 = vmatpush.bf16.msrb.mxu2 %v8238_v61  ;;  %v8266_v52 = vor.u32 %v10063_v38, %v8263_v62  ;;  %v8327_v61 = vld [vmem:[%s13586_s25 + $0x2d8] sm:$0xf0] }
 0x433   :  { %2249 = vmatmul.bf16.gmra.mxu1 %v2023_v28  ;;  %2287 = vmatmul.bf16.gmra.mxu3 %v2023_v28  ;;  %v8330_v18 = vor.u32 %v10079_v4, %v8327_v61 }
 0x434   :  { %2808 = vmatpush.bf16.msra.mxu3 %v8310_v50  ;;  %v10059_v50 = vld [vmem:[%s13586_s25 + $0x234] sm:$0xf] }
 0x435   :  { %v8250_v28 = vor.u32 %v10059_v50, %v8247_v49 }
 0x436   :  { %2791 = vmatpush.bf16.msrb.mxu2 %v8230_v60  ;;  %v8319_v60 = vld [vmem:[%s13586_s25 + $0x2c8] sm:$0xf0] }
 0x437   :  { %v8322_v8 = vor.u32 %v10077_v5, %v8319_v60 }
 0x438   :  { %2809 = vmatpush.bf16.msra.mxu3 %v8302_v53 }
 0x43a   :  { %2792 = vmatpush.bf16.msrb.mxu2 %v8222_v33  ;;  %v10075_v33 = vld [vmem:[%s13586_s25 + $0x2b4] sm:$0xf] }
 0x43c   :  { %2810 = vmatpush.bf16.msra.mxu3 %v8294_v23  ;;  %v8311_v23 = vld [vmem:[%s13586_s25 + $0x2b8] sm:$0xf0] }
 0x43d   :  { %2499 = vmatmul.bf16.vlgmr.msra.gmra.mxu2 %v1925_v47  ;;  %2461 = vmatmul.bf16.vlgmr.msra.gmra.mxu0 %v1925_v47  ;;  %v8314_v20 = vor.u32 %v10075_v33, %v8311_v23  ;;  %v10102_v33 = vld [vmem:[%s13586_s25 + $0x374] sm:$0xf0]  ;;  %v10101_v23 = vld [vmem:[%s13586_s25 + $0x374] sm:$0xf] }
 0x43e   :  { %2894 = vmatpush.bf16.msra.mxu2 %v11368_v42  ;;  %v1922_v42 = vpop.f32.mrf.mxu1  ;;  %2823 = vmatpush.bf16.msra.mxu0 %v8282_v51 }
 0x440   :  { %2811 = vmatpush.bf16.msra.mxu3 %v8286_v12  ;;  %v10055_v12 = vld [vmem:[%s13586_s25 + $0x214] sm:$0xf] }
 0x442   :  { %2895 = vmatpush.bf16.msra.mxu2 %v11373_v1  ;;  %v1928_v1 = vpack.c.bf16 %v1922_v42, %v1920_v17  ;;  %2824 = vmatpush.bf16.msra.mxu0 %v8274_v3 }
 0x443   :  { %2480 = vmatmul.bf16.vlgmr.msra.gmra.mxu1 %v1926_v26  ;;  %2518 = vmatmul.bf16.vlgmr.msrb.gmra.mxu3 %v1926_v26  ;;  %v8234_v26 = vor.u32 %v10055_v12, %v8231_v14  ;;  %v10100_v12 = vld [vmem:[%s13586_s25 + $0x364] sm:$0xf0]  ;;  %v10099_v14 = vld [vmem:[%s13586_s25 + $0x364] sm:$0xf] }
 0x444   :  { %2913 = vmatpush.bf16.msrb.mxu3 %v11377_v7  ;;  %v10051_v7 = vld [vmem:[%s13587_s3 + $0x20] sm:$0xff]  ;;  %2842 = vmatpush.bf16.msra.mxu1 %v8346_v13 }
 0x446   :  { %2896 = vmatpush.bf16.msra.mxu2 %v11385_v30  ;;  %v10052_v30 = vld [vmem:[%s13587_s3 + $0x28] sm:$0xff]  ;;  %2825 = vmatpush.bf16.msra.mxu0 %v8266_v52 }
 0x448   :  { %2914 = vmatpush.bf16.msrb.mxu3 %v11398_v56  ;;  %2843 = vmatpush.bf16.msra.mxu1 %v8338_v21 }
 0x44a   :  { %2897 = vmatpush.bf16.msra.mxu2 %v11405_v55  ;;  %2826 = vmatpush.bf16.msra.mxu0 %v8258_v34 }
 0x44c   :  { %2915 = vmatpush.bf16.msrb.mxu3 %v11427_v9  ;;  %2844 = vmatpush.bf16.msra.mxu1 %v8330_v18 }
 0x44d   :  { %2466 = vmatmul.bf16.gmra.mxu0 %v1927_v43  ;;  %2504 = vmatmul.bf16.gmra.mxu2 %v1927_v43  ;;  %v8303_v43 = vld [vmem:[%s13586_s25 + $0x2a8] sm:$0xf0] }
 0x44e   :  { %2827 = vmatpush.bf16.msra.mxu0 %v8250_v28  ;;  %v8306_v42 = vor.u32 %v10073_v45, %v8303_v43  ;;  %v8447_v45 = vld [vmem:[%s13586_s25 + $0x368] sm:$0xf0]  ;;  %v8517_v43 = vld [vmem:[%s13586_s25 + $0x3f0] sm:$0xf] }
 0x450   :  { %2916 = vmatpush.bf16.msrb.mxu3 %v11457_v37  ;;  %2845 = vmatpush.bf16.msra.mxu1 %v8322_v8  ;;  %v10085_v8 = vld [vmem:[%s13587_s3 + $0x30] sm:$0xff] }
 0x452   :  { %2828 = vmatpush.bf16.msra.mxu0 %v8242_v41  ;;  %v8454_v41 = vor.u32 %v10102_v33, %v8453_v63  ;;  %v8423_v33 = vld [vmem:[%s13586_s25 + $0x338] sm:$0xf0] }
 0x453   :  { %2485 = vmatmul.bf16.gmra.mxu1 %v1928_v1  ;;  %2523 = vmatmul.bf16.gmra.mxu3 %v1928_v1 }
 0x454   :  { %2846 = vmatpush.bf16.msra.mxu1 %v8314_v20 }
 0x456   :  { %2829 = vmatpush.bf16.msra.mxu0 %v8234_v26 }
 0x458   :  { %2847 = vmatpush.bf16.msra.mxu1 %v8306_v42  ;;  %v10118_v42 = vld [vmem:[%s13586_s25 + $0x3f4] sm:$0xf0] }
 0x45d   :  { %8183 = vmatmul.msk.bf16.vlgmr.msrb.gmra.mxu0 %vm652_vm0, %v10051_v7 }
 0x463   :  { %8185 = vmatmul.msk.bf16.vlgmr.msrb.gmra.mxu1 %vm652_vm0, %v10051_v7 }
 0x46d   :  { %8184 = vmatmul.msk.bf16.gmra.mxu0 %vm652_vm0, %v10052_v30 }
 0x473   :  { %8186 = vmatmul.msk.bf16.gmra.mxu1 %vm652_vm0, %v10052_v30  ;;  %v10071_v30 = vld [vmem:[%s13586_s25 + $0x294] sm:$0xf] }
 0x49a   :  { %v2226_v56 = vpop.f32.mrf.mxu0 }
 0x4a0   :  { %v2245_v55 = vpop.f32.mrf.mxu1  ;;  %v2264_v9 = vpop.f32.mrf.mxu2 }
 0x4a1   :  { %v2246_v37 = vadd.f32 %v2245_v55, %v2226_v56  ;;  %v8295_v56 = vld [vmem:[%s13586_s25 + $0x298] sm:$0xf0]  ;;  %v10053_v55 = vld [vmem:[%s13586_s25 + $0x204] sm:$0xf] }
 0x4a2   :  { %v11928_v35 = vpop.f32.mrf.mxu0  ;;  %v8298_v10 = vor.u32 %v10071_v30, %v8295_v56  ;;  %v8518_v30 = vor.u32 %v10118_v42, %v8517_v43  ;;  %v8519_v56 = vld [vmem:[%s13586_s25 + $0x3f8] sm:$0xf0]  ;;  %v10092_v43 = vld [vmem:[%s13586_s25 + $0x324] sm:$0xf0]  ;;  %v10091_v42 = vld [vmem:[%s13586_s25 + $0x324] sm:$0xf] }
 0x4a4   :  { %2848 = vmatpush.bf16.msra.mxu1 %v8298_v10  ;;  %v10098_v10 = vld [vmem:[%s13586_s25 + $0x354] sm:$0xf0] }
 0x4a6   :  { %v2283_v31 = vpop.f32.mrf.mxu3 }
 0x4a7   :  { %v11936_v39 = vadd.f32 %v2283_v31, %v2264_v9  ;;  %v8226_v31 = vor.u32 %v10053_v55, %v8223_v59  ;;  %v10097_v59 = vld [vmem:[%s13586_s25 + $0x354] sm:$0xf] }
 0x4a8   :  { %v11938_v2 = vpop.f32.mrf.mxu1  ;;  %v11940_v25 = vpop.f32.mrf.mxu2 }
 0x4a9   :  { %2830 = vmatpush.bf16.msra.mxu0 %v8226_v31 }
 0x4aa   :  { %v2231_v32 = vpop.f32.mrf.mxu0 }
 0x4ad   :  { %3125 = vmatpush.bf16.msrb.mxu0 %v8454_v41  ;;  %v10112_v41 = vld [vmem:[%s13586_s25 + $0x3c4] sm:$0xf0] }
 0x4ae   :  { %v11960_v48 = vpop.f32.mrf.mxu3 }
 0x4b0   :  { %v2250_v6 = vpop.f32.mrf.mxu1  ;;  %v2269_v57 = vpop.f32.mrf.mxu2 }
 0x4b1   :  { %v2251_v19 = vadd.f32 %v2250_v6, %v2231_v32 }
 0x4b2   :  { %v11980_v36 = vpop.f32.mrf.mxu0 }
 0x4b6   :  { %v2288_v46 = vpop.f32.mrf.mxu3 }
 0x4b7   :  { %v2289_v11 = vadd.f32 %v2288_v46, %v2269_v57 }
 0x4b8   :  { %v11994_v54 = vpop.f32.mrf.mxu1  ;;  %v11996_v53 = vpop.f32.mrf.mxu2 }
 0x4ba   :  { %v2462_v0 = vpop.f32.mrf.mxu0 }
 0x4bb   :  { %v2463_v47 = vadd.f32 %v2462_v0, %v2246_v37  ;;  %v8455_v0 = vld [vmem:[%s13586_s25 + $0x378] sm:$0xf0] }
 0x4bc   :  { %v8458_v20 = vor.u32 %v10101_v23, %v8455_v0  ;;  %v8493_v23 = vld [vmem:[%s13586_s25 + $0x3c0] sm:$0xf]  ;;  %v10111_v0 = vld [vmem:[%s13586_s25 + $0x3c4] sm:$0xf] }
 0x4be   :  { %v12016_v17 = vpop.f32.mrf.mxu3 }
 0x4c0   :  { %v2481_v1 = vpop.f32.mrf.mxu1  ;;  %v2500_v7 = vpop.f32.mrf.mxu2 }
 0x4c1   :  { %v12033_v9 = vadd.f32 %v2481_v1, %v2463_v47  ;;  %v2501_v37 = vadd.f32 %v2500_v7, %v11936_v39  ;;  %v8287_v39 = vld [vmem:[%s13586_s25 + $0x288] sm:$0xf0]  ;;  %v8445_v47 = vld [vmem:[%s13586_s25 + $0x360] sm:$0xf]  ;;  %v10117_v1 = vld [vmem:[%s13586_s25 + $0x3f4] sm:$0xf]  ;;  %v8450_v7 = vor.u32 %v10099_v14, %v8447_v45 }
 0x4c2   :  { %v12039_v51 = vpop.f32.mrf.mxu0  ;;  %v8290_v24 = vor.u32 %v10069_v15, %v8287_v39  ;;  %v8446_v26 = vor.u32 %v10100_v12, %v8445_v47  ;;  %v8522_v55 = vor.u32 %v10117_v1, %v8519_v56  ;;  %v8509_v15 = vld [vmem:[%s13586_s25 + $0x3e0] sm:$0xf]  ;;  %v10116_v39 = vld [vmem:[%s13586_s25 + $0x3e4] sm:$0xf0]  ;;  %v8494_v47 = vor.u32 %v10112_v41, %v8493_v23  ;;  %v8495_v12 = vld [vmem:[%s13586_s25 + $0x3c8] sm:$0xf0] }
 0x4c3   :  { %v8413_v45 = vld [vmem:[%s13586_s25 + $0x320] sm:$0xf]  ;;  %v8485_v56 = vld [vmem:[%s13586_s25 + $0x3b0] sm:$0xf]  ;;  %v10087_v23 = vld [vmem:[%s13586_s25 + $0x304] sm:$0xf] }
 0x4c4   :  { %2849 = vmatpush.bf16.msra.mxu1 %v8290_v24  ;;  %3126 = vmatpush.bf16.msrb.mxu0 %v8446_v26  ;;  %v10115_v24 = vld [vmem:[%s13586_s25 + $0x3e4] sm:$0xf]  ;;  %v8498_v26 = vor.u32 %v10111_v0, %v8495_v12  ;;  %v8414_v1 = vor.u32 %v10092_v43, %v8413_v45  ;;  %v8399_v41 = vld [vmem:[%s13586_s25 + $0x308] sm:$0xf0]  ;;  %v10104_v12 = vld [vmem:[%s13586_s25 + $0x384] sm:$0xf0] }
 0x4c6   :  { %v2519_v58 = vpop.f32.mrf.mxu3 }
 0x4c7   :  { %v12047_v27 = vadd.f32 %v2519_v58, %v2501_v37  ;;  %v8437_v37 = vld [vmem:[%s13586_s25 + $0x350] sm:$0xf]  ;;  %v8439_v58 = vld [vmem:[%s13586_s25 + $0x358] sm:$0xf0] }
 0x4c8   :  { %v12049_v3 = vpop.f32.mrf.mxu1  ;;  %v12051_v32 = vpop.f32.mrf.mxu2  ;;  %3144 = vmatpush.bf16.msrb.mxu1 %v8518_v30  ;;  %v8438_v31 = vor.u32 %v10098_v10, %v8437_v37  ;;  %v10109_v37 = vld [vmem:[%s13586_s25 + $0x3b4] sm:$0xf] }
 0x4ca   :  { %v2467_v13 = vpop.f32.mrf.mxu0  ;;  %3127 = vmatpush.bf16.msrb.mxu0 %v8438_v31  ;;  %v8487_v31 = vld [vmem:[%s13586_s25 + $0x3b8] sm:$0xf0] }
 0x4cb   :  { %v2468_v38 = vadd.f32 %v2467_v13, %v2251_v19  ;;  %v8442_v13 = vor.u32 %v10097_v59, %v8439_v58  ;;  %v8490_v58 = vor.u32 %v10109_v37, %v8487_v31 }
 0x4ce   :  { %v12053_v62 = vpop.f32.mrf.mxu3 }
 0x4d0   :  { %v2486_v52 = vpop.f32.mrf.mxu1  ;;  %v2505_v29 = vpop.f32.mrf.mxu2 }
 0x4d1   :  { %v12055_v16 = vadd.f32 %v2486_v52, %v2468_v38  ;;  %v2506_v21 = vadd.f32 %v2505_v29, %v2289_v11  ;;  %v8510_v38 = vor.u32 %v10116_v39, %v8509_v15  ;;  %v8511_v52 = vld [vmem:[%s13586_s25 + $0x3e8] sm:$0xf0]  ;;  %v8405_v15 = vld [vmem:[%s13586_s25 + $0x310] sm:$0xf]  ;;  %v10090_v39 = vld [vmem:[%s13586_s25 + $0x314] sm:$0xf0] }
 0x4d2   :  { %v12057_v6 = vpop.f32.mrf.mxu0  ;;  %v8514_v29 = vor.u32 %v10115_v24, %v8511_v52  ;;  %v10089_v24 = vld [vmem:[%s13586_s25 + $0x314] sm:$0xf]  ;;  %v8477_v52 = vld [vmem:[%s13586_s25 + $0x3a0] sm:$0xf] }
 0x4d3   :  { %3145 = vmatpush.bf16.msrb.mxu1 %v8510_v38  ;;  %v8407_v38 = vld [vmem:[%s13586_s25 + $0x318] sm:$0xf0] }
 0x4d6   :  { %v2524_v57 = vpop.f32.mrf.mxu3 }
 0x4d7   :  { %v12059_v44 = vadd.f32 %v2524_v57, %v2506_v21  ;;  %v8429_v21 = vld [vmem:[%s13586_s25 + $0x340] sm:$0xf]  ;;  %v10096_v57 = vld [vmem:[%s13586_s25 + $0x344] sm:$0xf0] }
 0x4d8   :  { %v12061_v40 = vpop.f32.mrf.mxu1 }
 0x4da   :  { %v2559_v4 = vpop.f32.mrf.mxu0 }
 0x4de   :  { %v12183_v14 = vpop.f32.mrf.mxu3 }
 0x4df   :  { %13588 = vst [vmem:[#allocation17_spill] sm:$0xff] %v12183_v14  ;;  %v12449_v14 = vld [vmem:[#allocation4 + $0x28] sm:$0xff] }
 0x4e0   :  { %v2578_v61 = vpop.f32.mrf.mxu1  ;;  %13620 = vst [vmem:[#allocation49_spill] sm:$0xff] %v12449_v14 }
 0x4e2   :  { %v2561_v34 = vpop.f32.mrf.mxu0 }
 0x4e3   :  { %v2588_v18 = vpack.c.bf16 %v2561_v34, %v2559_v4  ;;  %v10095_v4 = vld [vmem:[%s13586_s25 + $0x344] sm:$0xf]  ;;  %v8431_v34 = vld [vmem:[%s13586_s25 + $0x348] sm:$0xf0] }
 0x4e5   :  { %2793 = vmatmul.bf16.vlgmr.msrb.gmra.mxu2 %v2588_v18  ;;  %2831 = vmatmul.bf16.vlgmr.msra.gmra.mxu0 %v2588_v18  ;;  %v12145_v18 = vpop.f32.mrf.mxu2 }
 0x4e6   :  { %3163 = vmatpush.bf16.msrb.mxu2 %v8458_v20 }
 0x4e8   :  { %v2580_v19 = vpop.f32.mrf.mxu1 }
 0x4e9   :  { %v2589_v50 = vpack.c.bf16 %v2580_v19, %v2578_v61  ;;  %v8430_v61 = vor.u32 %v10096_v57, %v8429_v21  ;;  %v8501_v19 = vld [vmem:[%s13586_s25 + $0x3d0] sm:$0xf]  ;;  %v10107_v21 = vld [vmem:[%s13586_s25 + $0x3a4] sm:$0xf]  ;;  %v8410_v57 = vor.u32 %v10089_v24, %v8407_v38 }
 0x4ea   :  { %v2564_v49 = vpop.f32.mrf.mxu0  ;;  %3164 = vmatpush.bf16.msrb.mxu2 %v8450_v7  ;;  %v8415_v7 = vld [vmem:[%s13586_s25 + $0x328] sm:$0xf0] }
 0x4eb   :  { %2812 = vmatmul.bf16.vlgmr.msra.gmra.mxu3 %v2589_v50  ;;  %2850 = vmatmul.bf16.vlgmr.msra.gmra.mxu1 %v2589_v50  ;;  %v10114_v50 = vld [vmem:[%s13586_s25 + $0x3d4] sm:$0xf0]  ;;  %v8418_v10 = vor.u32 %v10091_v42, %v8415_v7 }
 0x4ec   :  { %3182 = vmatpush.bf16.msra.mxu3 %v8522_v55  ;;  %3128 = vmatpush.bf16.msrb.mxu0 %v8430_v61  ;;  %v10110_v55 = vld [vmem:[%s13586_s25 + $0x3b4] sm:$0xf0]  ;;  %v8479_v61 = vld [vmem:[%s13586_s25 + $0x3a8] sm:$0xf0] }
 0x4ed   :  { %v8486_v59 = vor.u32 %v10110_v55, %v8485_v56 }
 0x4ee   :  { %3165 = vmatpush.bf16.msrb.mxu2 %v8442_v13  ;;  %v8406_v13 = vor.u32 %v10090_v39, %v8405_v15 }
 0x4f0   :  { %v2583_v28 = vpop.f32.mrf.mxu1  ;;  %3183 = vmatpush.bf16.msra.mxu3 %v8514_v29  ;;  %v10108_v29 = vld [vmem:[%s13586_s25 + $0x3a4] sm:$0xf0] }
 0x4f2   :  { %v2566_v46 = vpop.f32.mrf.mxu0 }
 0x4f3   :  { %v2590_v5 = vpack.c.bf16 %v2566_v46, %v2564_v49  ;;  %v10113_v49 = vld [vmem:[%s13586_s25 + $0x3d4] sm:$0xf]  ;;  %v8502_v46 = vor.u32 %v10114_v50, %v8501_v19  ;;  %v8482_v19 = vor.u32 %v10107_v21, %v8479_v61  ;;  %v8469_v50 = vld [vmem:[%s13586_s25 + $0x390] sm:$0xf] }
 0x4f5   :  { %2798 = vmatmul.bf16.gmra.mxu2 %v2590_v5  ;;  %2836 = vmatmul.bf16.gmra.mxu0 %v2590_v5  ;;  %v8503_v5 = vld [vmem:[%s13586_s25 + $0x3d8] sm:$0xf0] }
 0x4f6   :  { %3146 = vmatpush.bf16.msrb.mxu1 %v8502_v46 }
 0x4f8   :  { %v2585_v60 = vpop.f32.mrf.mxu1 }
 0x4f9   :  { %v2591_v11 = vpack.c.bf16 %v2585_v60, %v2583_v28  ;;  %v8434_v28 = vor.u32 %v10095_v4, %v8431_v34  ;;  %v8506_v60 = vor.u32 %v10113_v49, %v8503_v5  ;;  %v8478_v4 = vor.u32 %v10108_v29, %v8477_v52  ;;  %v10106_v49 = vld [vmem:[%s13586_s25 + $0x394] sm:$0xf0] }
 0x4fa   :  { %3147 = vmatpush.bf16.msrb.mxu1 %v8494_v47  ;;  %v8470_v5 = vor.u32 %v10106_v49, %v8469_v50  ;;  %v8461_v47 = vld [vmem:[%s13586_s25 + $0x380] sm:$0xf]  ;;  %v12295_v50 = vld [vmem:[#allocation4 + $0xf0] sm:$0xff]  ;;  %v12297_v49 = vld [vmem:[#allocation4 + $0xf8] sm:$0xff] }
 0x4fb   :  { %2817 = vmatmul.bf16.gmra.mxu3 %v2591_v11  ;;  %2855 = vmatmul.bf16.gmra.mxu1 %v2591_v11  ;;  %v8421_v11 = vld [vmem:[%s13586_s25 + $0x330] sm:$0xf]  ;;  %v8462_v45 = vor.u32 %v10104_v12, %v8461_v47  ;;  %v12331_v47 = vld [vmem:[#allocation4 + $0xb8] sm:$0xff]  ;;  %v12335_v12 = vld [vmem:[#allocation4 + $0x1e8] sm:$0xff] }
 0x4fc   :  { %3166 = vmatpush.bf16.msrb.mxu2 %v8434_v28  ;;  %3184 = vmatpush.bf16.msra.mxu3 %v8506_v60  ;;  %v10105_v28 = vld [vmem:[%s13586_s25 + $0x394] sm:$0xf]  ;;  %v8471_v60 = vld [vmem:[%s13586_s25 + $0x398] sm:$0xf0] }
 0x4fe   :  { %3148 = vmatpush.bf16.msrb.mxu1 %v8486_v59 }
 0x500   :  { %3185 = vmatpush.bf16.msra.mxu3 %v8498_v26  ;;  %v10103_v26 = vld [vmem:[%s13586_s25 + $0x384] sm:$0xf] }
 0x502   :  { %3149 = vmatpush.bf16.msrb.mxu1 %v8478_v4 }
 0x504   :  { %3186 = vmatpush.bf16.msra.mxu3 %v8490_v58 }
 0x505   :  { %8359 = vmatmul.msk.bf16.vlgmr.msra.gmra.mxu2 %vm652_vm0, %v10085_v8 }
 0x506   :  { %3150 = vmatpush.bf16.msrb.mxu1 %v8470_v5 }
 0x508   :  { %3187 = vmatpush.bf16.msra.mxu3 %v8482_v19 }
 0x50a   :  { %3151 = vmatpush.bf16.msrb.mxu1 %v8462_v45  ;;  %v12341_v45 = vld [vmem:[#allocation4 + $0xa0] sm:$0xff] }
 0x50b   :  { %8361 = vmatmul.msk.bf16.vlgmr.msrb.gmra.mxu3 %vm652_vm0, %v10085_v8  ;;  %v10094_v8 = vld [vmem:[%s13586_s25 + $0x334] sm:$0xf0] }
 0x50c   :  { %v8422_v63 = vor.u32 %v10094_v8, %v8421_v11  ;;  %v8397_v11 = vld [vmem:[%s13586_s25 + $0x300] sm:$0xf]  ;;  %v10088_v8 = vld [vmem:[%s13586_s25 + $0x304] sm:$0xf0] }
 0x50e   :  { %3129 = vmatpush.bf16.msrb.mxu0 %v8422_v63  ;;  %v8474_v63 = vor.u32 %v10105_v28, %v8471_v60  ;;  %v12301_v28 = vld [vmem:[#allocation4 + $0xe0] sm:$0xff]  ;;  %v12309_v60 = vld [vmem:[#allocation4 + $0xd0] sm:$0xff] }
 0x510   :  { %3188 = vmatpush.bf16.msra.mxu3 %v8474_v63  ;;  %v12317_v63 = vld [vmem:[#allocation4 + $0x1f0] sm:$0xff] }
 0x511   :  { %3325 = vmatpush.msra.mxu1 %v12317_v63 }
 0x512   :  { %3130 = vmatpush.bf16.msrb.mxu0 %v8414_v1 }
 0x515   :  { %8360 = vmatmul.msk.bf16.gmra.mxu2 %vm652_vm0, %v10086_v22 }
 0x516   :  { %3131 = vmatpush.bf16.msrb.mxu0 %v8406_v13 }
 0x51b   :  { %8362 = vmatmul.msk.bf16.gmra.mxu3 %vm652_vm0, %v10086_v22  ;;  %v10093_v22 = vld [vmem:[%s13586_s25 + $0x334] sm:$0xf] }
 0x51c   :  { %v8426_v20 = vor.u32 %v10093_v22, %v8423_v33  ;;  %v8398_v33 = vor.u32 %v10088_v8, %v8397_v11  ;;  %v12311_v11 = vld [vmem:[#allocation4 + $0xd8] sm:$0xff]  ;;  %v12315_v8 = vld [vmem:[#allocation4 + $0xc0] sm:$0xff] }
 0x51e   :  { %3167 = vmatpush.bf16.msrb.mxu2 %v8426_v20  ;;  %v8402_v20 = vor.u32 %v10087_v23, %v8399_v41  ;;  %3132 = vmatpush.bf16.msrb.mxu0 %v8398_v33  ;;  %v12319_v33 = vld [vmem:[#allocation4 + $0xc8] sm:$0xff]  ;;  %v12323_v23 = vld [vmem:[#allocation4 + $0x1f8] sm:$0xff]  ;;  %v12327_v41 = vld [vmem:[#allocation4 + $0xb0] sm:$0xff] }
 0x522   :  { %3168 = vmatpush.bf16.msrb.mxu2 %v8418_v10  ;;  %3305 = vmatpush.msra.mxu0 %v12295_v50 }
 0x524   :  { %3306 = vmatpush.msra.mxu0 %v12301_v28 }
 0x526   :  { %3169 = vmatpush.bf16.msrb.mxu2 %v8410_v57  ;;  %3307 = vmatpush.msra.mxu0 %v12309_v60 }
 0x528   :  { %3308 = vmatpush.msra.mxu0 %v12315_v8 }
 0x52a   :  { %3170 = vmatpush.bf16.msrb.mxu2 %v8402_v20  ;;  %v12329_v20 = vld [vmem:[#allocation4 + $0x1e0] sm:$0xff]  ;;  %3309 = vmatpush.msra.mxu0 %v12327_v41 }
 0x52b   :  { %3326 = vmatpush.msra.mxu1 %v12329_v20 }
 0x52c   :  { %3310 = vmatpush.msra.mxu0 %v12341_v45 }
 0x52e   :  { %3345 = vmatpush.msra.mxu2 %v12297_v49 }
 0x562   :  { %v12283_v21 = vpop.f32.mrf.mxu0 }
 0x568   :  { %v2794_v30 = vpop.f32.mrf.mxu2  ;;  %v12285_v57 = vpop.f32.mrf.mxu1 }
 0x56a   :  { %v12287_v4 = vpop.f32.mrf.mxu0 }
 0x56e   :  { %v2813_v34 = vpop.f32.mrf.mxu3 }
 0x56f   :  { %v2814_v46 = vadd.f32 %v2813_v34, %v2794_v30 }
 0x570   :  { %v12251_v22 = vpop.f32.mrf.mxu2  ;;  %v12289_v61 = vpop.f32.mrf.mxu1 }
 0x571   :  { %v12260_v0 = vadd.f32 %v2814_v46, %v12033_v9  ;;  %v8463_v9 = vld [vmem:[%s13586_s25 + $0x388] sm:$0xf0] }
 0x572   :  { %v8466_v42 = vor.u32 %v10103_v26, %v8463_v9  ;;  %v12291_v34 = vpop.f32.mrf.mxu0  ;;  %v12303_v46 = vld [vmem:[#allocation4 + $0xe8] sm:$0xff]  ;;  %v12343_v9 = vld [vmem:[#allocation4 + $0x1d0] sm:$0xff] }
 0x573   :  { %3346 = vmatpush.msra.mxu2 %v12303_v46  ;;  %3327 = vmatpush.msra.mxu1 %v12343_v9 }
 0x574   :  { %3189 = vmatpush.bf16.msra.mxu3 %v8466_v42  ;;  %v12345_v42 = vld [vmem:[#allocation4 + $0xa8] sm:$0xff] }
 0x575   :  { %3347 = vmatpush.msra.mxu2 %v12311_v11 }
 0x576   :  { %v12274_v43 = vpop.f32.mrf.mxu3 }
 0x577   :  { %3348 = vmatpush.msra.mxu2 %v12319_v33 }
 0x578   :  { %v2799_v1 = vpop.f32.mrf.mxu2  ;;  %v12293_v19 = vpop.f32.mrf.mxu1  ;;  %3365 = vmatpush.msrb.mxu3 %v12323_v23 }
 0x579   :  { %3349 = vmatpush.msra.mxu2 %v12331_v47 }
 0x57a   :  { %v12307_v5 = vpop.f32.mrf.mxu0  ;;  %3366 = vmatpush.msrb.mxu3 %v12335_v12 }
 0x57b   :  { %3350 = vmatpush.msra.mxu2 %v12345_v42 }
 0x57e   :  { %v2818_v7 = vpop.f32.mrf.mxu3 }
 0x57f   :  { %v2819_v30 = vadd.f32 %v2818_v7, %v2799_v1  ;;  %v12349_v1 = vld [vmem:[#allocation4 + $0x1d8] sm:$0xff] }
 0x580   :  { %v12276_v56 = vpop.f32.mrf.mxu2  ;;  %v12337_v26 = vpop.f32.mrf.mxu1  ;;  %13589 = vst [vmem:[#allocation19_spill] sm:$0xff] %v12349_v1  ;;  %3367 = vmatpush.msrb.mxu3 %v12349_v1 }
 0x581   :  { %v12279_v55 = vadd.f32 %v2819_v30, %v12055_v16  ;;  %v12355_v30 = vld [vmem:[#allocation4 + $0x90] sm:$0xff] }
 0x582   :  { %13590 = vst [vmem:[#allocation18_spill] sm:$0xff] %v12355_v30  ;;  %3311 = vmatpush.msra.mxu0 %v12355_v30  ;;  %v2248_v30 = vadd.f32 %v11938_v2, %v11928_v35  ;;  %v2816_v35 = vadd.f32 %v12274_v43, %v12251_v22  ;;  %v12484_v2 = vld [vmem:[#allocation4 + $0x138] sm:$0xff]  ;;  %v12494_v22 = vld [vmem:[#allocation4 + $0x110] sm:$0xff] }
 0x583   :  { %13629 = vst [vmem:[#allocation58_spill] sm:$0xff] %v12484_v2  ;;  %v12496_v43 = vld [vmem:[#allocation4 + $0x118] sm:$0xff] }
 0x584   :  { %v2465_v1 = vadd.f32 %v12039_v51, %v2248_v30 }
 0x586   :  { %v12281_v37 = vpop.f32.mrf.mxu3  ;;  %v2484_v51 = vadd.f32 %v12049_v3, %v2465_v1  ;;  %v2253_v3 = vadd.f32 %v11994_v54, %v11980_v36  ;;  %v2852_v36 = vadd.f32 %v12285_v57, %v12283_v21 }
 0x588   :  { %v2899_v10 = vpop.f32.mrf.mxu2  ;;  %v2863_v1 = vadd.f32 %v2816_v35, %v2484_v51  ;;  %v2470_v54 = vadd.f32 %v12057_v6, %v2253_v3 }
 0x58e   :  { %v2918_v59 = vpop.f32.mrf.mxu3 }
 0x590   :  { %v2901_v31 = vpop.f32.mrf.mxu2 }
 0x591   :  { %v2928_v58 = vpack.c.bf16 %v2901_v31, %v2899_v10  ;;  %v12357_v10 = vld [vmem:[#allocation4 + $0x1c0] sm:$0xff]  ;;  %v12363_v31 = vld [vmem:[#allocation4 + $0x1c8] sm:$0xff] }
 0x592   :  { %13591 = vst [vmem:[#allocation20_spill] sm:$0xff] %v12357_v10  ;;  %3328 = vmatpush.msra.mxu1 %v12357_v10  ;;  %3368 = vmatpush.msrb.mxu3 %v12363_v31  ;;  %v12463_v10 = vld [vmem:[#allocation4 + $0x18] sm:$0xff] }
 0x593   :  { %3133 = vmatmul.bf16.vlgmr.msrb.gmra.mxu0 %v2928_v58  ;;  %3171 = vmatmul.bf16.vlgmr.msrb.gmra.mxu2 %v2928_v58  ;;  %13593 = vst [vmem:[#allocation33_spill] sm:$0xff] %v12363_v31  ;;  %v12367_v58 = vld [vmem:[#allocation4 + $0x80] sm:$0xff]  ;;  %v12415_v31 = vld [vmem:[#allocation4 + $0x188] sm:$0xff] }
 0x594   :  { %13594 = vst [vmem:[#allocation24_spill] sm:$0xff] %v12367_v58  ;;  %3312 = vmatpush.msra.mxu0 %v12367_v58  ;;  %v12399_v58 = vld [vmem:[#allocation4 + $0x68] sm:$0xff] }
 0x595   :  { %13604 = vst [vmem:[#allocation26_spill] sm:$0xff] %v12399_v58 }
 0x596   :  { %v2920_v15 = vpop.f32.mrf.mxu3  ;;  %13609 = vst [vmem:[#allocation38_spill] sm:$0xff] %v12415_v31 }
 0x597   :  { %v2929_v39 = vpack.c.bf16 %v2920_v15, %v2918_v59  ;;  %v12359_v59 = vld [vmem:[#allocation4 + $0x98] sm:$0xff]  ;;  %v12369_v15 = vld [vmem:[#allocation4 + $0x1b0] sm:$0xff]  ;;  %13624 = vst [vmem:[#allocation53_spill] sm:$0xff] %v12463_v10 }
 0x598   :  { %v2904_v24 = vpop.f32.mrf.mxu2  ;;  %13592 = vst [vmem:[#allocation34_spill] sm:$0xff] %v12359_v59  ;;  %3351 = vmatpush.msra.mxu2 %v12359_v59  ;;  %3329 = vmatpush.msra.mxu1 %v12369_v15  ;;  %v12437_v59 = vld [vmem:[#allocation4 + $0x38] sm:$0xff] }
 0x599   :  { %3152 = vmatmul.bf16.vlgmr.msrb.gmra.mxu1 %v2929_v39  ;;  %3190 = vmatmul.bf16.vlgmr.msra.gmra.mxu3 %v2929_v39  ;;  %13595 = vst [vmem:[#allocation22_spill] sm:$0xff] %v12369_v15  ;;  %v12371_v39 = vld [vmem:[#allocation4 + $0x88] sm:$0xff] }
 0x59a   :  { %13596 = vst [vmem:[#allocation32_spill] sm:$0xff] %v12371_v39  ;;  %3352 = vmatpush.msra.mxu2 %v12371_v39  ;;  %v12397_v39 = vld [vmem:[#allocation4 + $0x190] sm:$0xff] }
 0x59b   :  { %13603 = vst [vmem:[#allocation21_spill] sm:$0xff] %v12397_v39 }
 0x59c   :  { %13616 = vst [vmem:[#allocation45_spill] sm:$0xff] %v12437_v59 }
 0x59e   :  { %v2923_v13 = vpop.f32.mrf.mxu3 }
 0x5a0   :  { %v2906_v38 = vpop.f32.mrf.mxu2 }
 0x5a1   :  { %v2930_v52 = vpack.c.bf16 %v2906_v38, %v2904_v24  ;;  %v12375_v24 = vld [vmem:[#allocation4 + $0x1b8] sm:$0xff]  ;;  %v12381_v38 = vld [vmem:[#allocation4 + $0x1a0] sm:$0xff] }
 0x5a2   :  { %13597 = vst [vmem:[#allocation30_spill] sm:$0xff] %v12375_v24  ;;  %3369 = vmatpush.msrb.mxu3 %v12375_v24  ;;  %3330 = vmatpush.msra.mxu1 %v12381_v38  ;;  %v12395_v24 = vld [vmem:[#allocation4 + $0x60] sm:$0xff]  ;;  %v13639_v51 = vld [vmem:[#allocation32_spill] sm:$0xff] }
 0x5a3   :  { %3138 = vmatmul.bf16.gmra.mxu0 %v2930_v52  ;;  %3176 = vmatmul.bf16.gmra.mxu2 %v2930_v52  ;;  %13599 = vst [vmem:[#allocation28_spill] sm:$0xff] %v12381_v38  ;;  %v12383_v52 = vld [vmem:[#allocation4 + $0x78] sm:$0xff] }
 0x5a4   :  { %13600 = vst [vmem:[#allocation23_spill] sm:$0xff] %v12383_v52  ;;  %3353 = vmatpush.msra.mxu2 %v12383_v52  ;;  %3331 = vmatpush.msra.mxu1 %v12397_v39  ;;  %v12403_v38 = vld [vmem:[#allocation4 + $0x198] sm:$0xff]  ;;  %v12409_v52 = vld [vmem:[#allocation4 + $0x180] sm:$0xff]  ;;  %v12423_v39 = vld [vmem:[#allocation4 + $0x48] sm:$0xff] }
 0x5a5   :  { %13602 = vst [vmem:[#allocation25_spill] sm:$0xff] %v12395_v24 }
 0x5a6   :  { %v2925_v16 = vpop.f32.mrf.mxu3  ;;  %13605 = vst [vmem:[#allocation27_spill] sm:$0xff] %v12403_v38  ;;  %3354 = vmatpush.msra.mxu2 %v12399_v58  ;;  %3332 = vmatpush.msra.mxu1 %v12409_v52  ;;  %v12419_v58 = vld [vmem:[#allocation4 + $0x40] sm:$0xff] }
 0x5a7   :  { %v2931_v29 = vpack.c.bf16 %v2925_v16, %v2923_v13  ;;  %v12379_v13 = vld [vmem:[#allocation4 + $0x70] sm:$0xff]  ;;  %v12387_v16 = vld [vmem:[#allocation4 + $0x1a8] sm:$0xff]  ;;  %13607 = vst [vmem:[#allocation36_spill] sm:$0xff] %v12409_v52 }
 0x5a8   :  { %13598 = vst [vmem:[#allocation31_spill] sm:$0xff] %v12379_v13  ;;  %3313 = vmatpush.msra.mxu0 %v12379_v13  ;;  %3370 = vmatpush.msrb.mxu3 %v12387_v16  ;;  %v12407_v13 = vld [vmem:[#allocation4 + $0x50] sm:$0xff] }
 0x5a9   :  { %3157 = vmatmul.bf16.gmra.mxu1 %v2931_v29  ;;  %3195 = vmatmul.bf16.gmra.mxu3 %v2931_v29  ;;  %13601 = vst [vmem:[#allocation29_spill] sm:$0xff] %v12387_v16  ;;  %v12411_v16 = vld [vmem:[#allocation4 + $0x58] sm:$0xff] }
 0x5aa   :  { %3314 = vmatpush.msra.mxu0 %v12395_v24  ;;  %3371 = vmatpush.msrb.mxu3 %v12403_v38  ;;  %13606 = vst [vmem:[#allocation35_spill] sm:$0xff] %v12407_v13  ;;  %v12421_v38 = vld [vmem:[#allocation4 + $0x170] sm:$0xff] }
 0x5ab   :  { %13608 = vst [vmem:[#allocation37_spill] sm:$0xff] %v12411_v16  ;;  %3355 = vmatpush.msra.mxu2 %v12411_v16  ;;  %3333 = vmatpush.msra.mxu1 %v12421_v38  ;;  %v12433_v16 = vld [vmem:[#allocation4 + $0x30] sm:$0xff] }
 0x5ac   :  { %3315 = vmatpush.msra.mxu0 %v12407_v13  ;;  %3372 = vmatpush.msrb.mxu3 %v12415_v31  ;;  %13610 = vst [vmem:[#allocation39_spill] sm:$0xff] %v12419_v58  ;;  %v12427_v13 = vld [vmem:[#allocation4 + $0x178] sm:$0xff]  ;;  %v12435_v31 = vld [vmem:[#allocation4 + $0x160] sm:$0xff] }
 0x5ad   :  { %13611 = vst [vmem:[#allocation40_spill] sm:$0xff] %v12421_v38  ;;  %3356 = vmatpush.msra.mxu2 %v12423_v39  ;;  %3334 = vmatpush.msra.mxu1 %v12435_v31 }
 0x5ae   :  { %13612 = vst [vmem:[#allocation41_spill] sm:$0xff] %v12423_v39  ;;  %3316 = vmatpush.msra.mxu0 %v12419_v58  ;;  %3373 = vmatpush.msrb.mxu3 %v12427_v13  ;;  %v12441_v58 = vld [vmem:[#allocation4 + $0x168] sm:$0xff]  ;;  %v12445_v39 = vld [vmem:[#allocation4 + $0x20] sm:$0xff] }
 0x5af   :  { %13613 = vst [vmem:[#allocation42_spill] sm:$0xff] %v12427_v13  ;;  %3357 = vmatpush.msra.mxu2 %v12437_v59  ;;  %v12447_v13 = vld [vmem:[#allocation4 + $0x150] sm:$0xff] }
 0x5b0   :  { %13614 = vst [vmem:[#allocation43_spill] sm:$0xff] %v12433_v16  ;;  %3317 = vmatpush.msra.mxu0 %v12433_v16  ;;  %3374 = vmatpush.msrb.mxu3 %v12441_v58  ;;  %v12453_v16 = vld [vmem:[#allocation4 + $0x158] sm:$0xff]  ;;  %v12459_v59 = vld [vmem:[#allocation4 + $0x10] sm:$0xff] }
 0x5b1   :  { %13615 = vst [vmem:[#allocation44_spill] sm:$0xff] %v12435_v31  ;;  %3335 = vmatpush.msra.mxu1 %v12447_v13  ;;  %3358 = vmatpush.msra.mxu2 %v12449_v14  ;;  %v12475_v14 = vld [vmem:[#allocation4 + $0x130] sm:$0xff] }
 0x5b2   :  { %13617 = vst [vmem:[#allocation46_spill] sm:$0xff] %v12441_v58  ;;  %3318 = vmatpush.msra.mxu0 %v12445_v39  ;;  %3375 = vmatpush.msrb.mxu3 %v12453_v16  ;;  %v12461_v58 = vld [vmem:[#allocation4 + $0x140] sm:$0xff] }
 0x5b3   :  { %13618 = vst [vmem:[#allocation47_spill] sm:$0xff] %v12445_v39  ;;  %3336 = vmatpush.msra.mxu1 %v12461_v58  ;;  %3359 = vmatpush.msra.mxu2 %v12463_v10  ;;  %v12477_v39 = vld [vmem:[#allocation4 + $0x8] sm:$0xff] }
 0x5b4   :  { %13619 = vst [vmem:[#allocation48_spill] sm:$0xff] %v12447_v13  ;;  %3319 = vmatpush.msra.mxu0 %v12459_v59  ;;  %v12469_v13 = vld [vmem:[#allocation4 + $0x148] sm:$0xff] }
 0x5b5   :  { %13621 = vst [vmem:[#allocation50_spill] sm:$0xff] %v12453_v16  ;;  %3376 = vmatpush.msrb.mxu3 %v12469_v13  ;;  %v12473_v16 = vld [vmem:[#allocation4] sm:$0xff]  ;;  %3337 = vmatpush.msra.mxu1 %v12475_v14 }
 0x5b6   :  { %13622 = vst [vmem:[#allocation51_spill] sm:$0xff] %v12459_v59  ;;  %3320 = vmatpush.msra.mxu0 %v12473_v16  ;;  %3360 = vmatpush.msra.mxu2 %v12477_v39  ;;  %v12490_v59 = vld [vmem:[#allocation4 + $0x128] sm:$0xff] }
 0x5b7   :  { %13623 = vst [vmem:[#allocation52_spill] sm:$0xff] %v12461_v58  ;;  %3377 = vmatpush.msrb.mxu3 %v12484_v2 }
 0x5b8   :  { %13625 = vst [vmem:[#allocation54_spill] sm:$0xff] %v12469_v13  ;;  %v12488_v13 = vld [vmem:[#allocation4 + $0x120] sm:$0xff]  ;;  %3423 = vmatpush.msrb.mxu0 %v12295_v50  ;;  %3463 = vmatpush.msrb.mxu2 %v12297_v49 }
 0x5b9   :  { %13626 = vst [vmem:[#allocation55_spill] sm:$0xff] %v12473_v16  ;;  %3338 = vmatpush.msra.mxu1 %v12488_v13  ;;  %3378 = vmatpush.msrb.mxu3 %v12490_v59  ;;  %v12504_v16 = vld [vmem:[#allocation4 + $0x100] sm:$0xff] }
 0x5ba   :  { %13627 = vst [vmem:[#allocation56_spill] sm:$0xff] %v12475_v14  ;;  %v3209_v50 = vld [vmem:[%s13630_s7] sm:$0x3]  ;;  %3424 = vmatpush.msrb.mxu0 %v12301_v28  ;;  %3464 = vmatpush.msrb.mxu2 %v12303_v46 }
 0x5bb   :  { %13628 = vst [vmem:[#allocation57_spill] sm:$0xff] %v12477_v39  ;;  %v2286_v39 = vadd.f32 %v11960_v48, %v11940_v25  ;;  %3339 = vmatpush.msra.mxu1 %v12494_v22  ;;  %v12513_v25 = vld [vmem:[#allocation4 + $0x108] sm:$0xff]  ;;  %v2291_v48 = vadd.f32 %v12016_v17, %v11996_v53  ;;  %3379 = vmatpush.msrb.mxu3 %v12496_v43  ;;  %v3211_v21 = vperm.slane %v3209_v50, 0 }
 0x5bc   :  { %3425 = vmatpush.msrb.mxu0 %v12309_v60  ;;  %v2857_v53 = vadd.f32 %v12293_v19, %v12291_v34  ;;  %v2821_v17 = vadd.f32 %v12281_v37, %v12276_v56  ;;  %3465 = vmatpush.msrb.mxu2 %v12311_v11  ;;  %v2489_v56 = vadd.f32 %v12061_v40, %v2470_v54 }
 0x5bd   :  { %v2503_v49 = vadd.f32 %v12051_v32, %v2286_v39  ;;  %3340 = vmatpush.msra.mxu1 %v12504_v16  ;;  %3380 = vmatpush.msrb.mxu3 %v12513_v25  ;;  %v13637_v39 = vld [vmem:[#allocation24_spill] sm:$0xff] }
 0x5be   :  { %3426 = vmatpush.msrb.mxu0 %v12315_v8  ;;  %3466 = vmatpush.msrb.mxu2 %v12319_v33  ;;  %v2866_v40 = vadd.f32 %v2857_v53, %v12059_v44  ;;  %v2867_v28 = vadd.f32 %v2821_v17, %v2489_v56  ;;  %v2508_v33 = vadd.f32 %v12145_v18, %v2291_v48  ;;  %v13642_v48 = vld [vmem:[#allocation28_spill] sm:$0xff]  ;;  %v13645_v53 = vld [vmem:[#allocation25_spill] sm:$0xff] }
 0x5bf   :  { %v2522_v6 = vadd.f32 %v12053_v62, %v2503_v49  ;;  %3443 = vmatpush.msrb.mxu1 %v12317_v63  ;;  %3483 = vmatpush.msra.mxu3 %v12323_v23  ;;  %v2859_v44 = vadd.f32 %v12337_v26, %v12307_v5  ;;  %v13636_v5 = vld [vmem:[#allocation33_spill] sm:$0xff]  ;;  %v13643_v49 = vld [vmem:[#allocation23_spill] sm:$0xff]  ;;  %v13650_v56 = vld [vmem:[#allocation36_spill] sm:$0xff] }
 0x5c0   :  { %3427 = vmatpush.msrb.mxu0 %v12327_v41  ;;  %3467 = vmatpush.msrb.mxu2 %v12331_v47  ;;  %v3212_v41 = vperm.slane %v3209_v50, 1  ;;  %v13646_v17 = vld [vmem:[#allocation21_spill] sm:$0xff] }
 0x5c1   :  { %3444 = vmatpush.msrb.mxu1 %v12329_v20  ;;  %3484 = vmatpush.msra.mxu3 %v12335_v12  ;;  %v13631_v20 = vld [vmem:[#allocation19_spill] sm:$0xff] }
 0x5c2   :  { %3428 = vmatpush.msrb.mxu0 %v12341_v45  ;;  %3468 = vmatpush.msrb.mxu2 %v12345_v42  ;;  %v13633_v45 = vld [vmem:[#allocation20_spill] sm:$0xff] }
 0x5c3   :  { %3445 = vmatpush.msrb.mxu1 %v12343_v9  ;;  %3485 = vmatpush.msra.mxu3 %v13631_v20  ;;  %v13634_v9 = vld [vmem:[#allocation17_spill] sm:$0xff] }
 0x5c4   :  { %v2527_v18 = vadd.f32 %v13634_v9, %v2508_v33  ;;  %v13658_v33 = vld [vmem:[#allocation44_spill] sm:$0xff] }
 0x5c5   :  { %3446 = vmatpush.msrb.mxu1 %v13633_v45  ;;  %3486 = vmatpush.msra.mxu3 %v13636_v5  ;;  %v13667_v5 = vld [vmem:[#allocation53_spill] sm:$0xff] }
 0x610   :  { %v12351_v7 = vpop.f32.mrf.mxu0 }
 0x616   :  { %v12389_v29 = vpop.f32.mrf.mxu1  ;;  %v12391_v15 = vpop.f32.mrf.mxu2 }
 0x617   :  { %v3154_v2 = vadd.f32 %v12389_v29, %v12351_v7 }
 0x618   :  { %v3136_v24 = vpop.f32.mrf.mxu0 }
 0x619   :  { %v3201_v32 = vadd.f32 %v3154_v2, %v12260_v0  ;;  %v2862_v0 = vadd.f32 %v2852_v36, %v12047_v27  ;;  %v13644_v36 = vld [vmem:[#allocation29_spill] sm:$0xff] }
 0x61b   :  { %v12551_v27 = vadd.f32 %v3211_v21, %v3201_v32  ;;  %v13647_v32 = vld [vmem:[#allocation26_spill] sm:$0xff] }
 0x61c   :  { %v12429_v52 = vpop.f32.mrf.mxu3 }
 0x61d   :  { %v3192_v37 = vadd.f32 %v12429_v52, %v12391_v15  ;;  %v2868_v52 = vadd.f32 %v2859_v44, %v2527_v18  ;;  %v13659_v44 = vld [vmem:[#allocation45_spill] sm:$0xff]  ;;  %v13665_v18 = vld [vmem:[#allocation51_spill] sm:$0xff] }
 0x61e   :  { %v3155_v38 = vpop.f32.mrf.mxu1  ;;  %v12455_v31 = vpop.f32.mrf.mxu2 }
 0x61f   :  { %v3156_v30 = vadd.f32 %v3155_v38, %v3136_v24  ;;  %v3202_v23 = vadd.f32 %v3192_v37, %v2862_v0  ;;  %v13638_v38 = vld [vmem:[#allocation22_spill] sm:$0xff]  ;;  %v13651_v0 = vld [vmem:[#allocation37_spill] sm:$0xff] }
 0x620   :  { %v3139_v58 = vpop.f32.mrf.mxu0  ;;  %3447 = vmatpush.msrb.mxu1 %v13638_v38  ;;  %v13652_v37 = vld [vmem:[#allocation38_spill] sm:$0xff]  ;;  %v13669_v38 = vld [vmem:[#allocation55_spill] sm:$0xff] }
 0x621   :  { %v3203_v7 = vadd.f32 %v3156_v30, %v2863_v1  ;;  %v12578_v29 = vadd.f32 %v3212_v41, %v3202_v23  ;;  %v13640_v30 = vld [vmem:[#allocation30_spill] sm:$0xff] }
 0x622   :  { %3487 = vmatpush.msra.mxu3 %v13640_v30  ;;  %3448 = vmatpush.msrb.mxu1 %v13642_v48  ;;  %v13660_v23 = vld [vmem:[#allocation46_spill] sm:$0xff] }
 0x623   :  { %v12546_v19 = vadd.f32 %v3211_v21, %v3203_v7 }
 0x624   :  { %v3193_v10 = vpop.f32.mrf.mxu3  ;;  %3488 = vmatpush.msra.mxu3 %v13644_v36  ;;  %3449 = vmatpush.msrb.mxu1 %v13646_v17 }
 0x625   :  { %v3287_v47 = vadd.f32 %v12546_v19, %v12551_v27 }
 0x626   :  { %v3158_v14 = vpop.f32.mrf.mxu1  ;;  %v3177_v57 = vpop.f32.mrf.mxu2  ;;  %3450 = vmatpush.msrb.mxu1 %v13650_v56 }
 0x627   :  { %v3159_v24 = vadd.f32 %v3158_v14, %v3139_v58  ;;  %v2854_v14 = vadd.f32 %v12289_v61, %v12287_v4  ;;  %v3194_v4 = vadd.f32 %v3193_v10, %v12455_v31  ;;  %v13632_v31 = vld [vmem:[#allocation18_spill] sm:$0xff] }
 0x628   :  { %v3141_v46 = vpop.f32.mrf.mxu0  ;;  %3429 = vmatpush.msrb.mxu0 %v13632_v31  ;;  %v13635_v58 = vld [vmem:[#allocation34_spill] sm:$0xff] }
 0x629   :  { %v3205_v61 = vadd.f32 %v3159_v24, %v12279_v55  ;;  %v2864_v62 = vadd.f32 %v2854_v14, %v2522_v6  ;;  %3469 = vmatpush.msrb.mxu2 %v13635_v58  ;;  %v13641_v24 = vld [vmem:[#allocation31_spill] sm:$0xff]  ;;  %v13664_v31 = vld [vmem:[#allocation50_spill] sm:$0xff]  ;;  %v13666_v58 = vld [vmem:[#allocation52_spill] sm:$0xff] }
 0x62a   :  { %3430 = vmatpush.msrb.mxu0 %v13637_v39 }
 0x62b   :  { %v3204_v11 = vadd.f32 %v3194_v4, %v2864_v62  ;;  %v12555_v8 = vadd.f32 %v3211_v21, %v3205_v61  ;;  %3470 = vmatpush.msrb.mxu2 %v13639_v51  ;;  %v13649_v61 = vld [vmem:[#allocation35_spill] sm:$0xff]  ;;  %v13672_v51 = vld [vmem:[#allocation58_spill] sm:$0xff] }
 0x62c   :  { %v3196_v34 = vpop.f32.mrf.mxu3  ;;  %3431 = vmatpush.msrb.mxu0 %v13641_v24 }
 0x62d   :  { %v3197_v55 = vadd.f32 %v3196_v34, %v3177_v57  ;;  %v12571_v26 = vadd.f32 %v3212_v41, %v3204_v11  ;;  %v3288_v42 = vadd.f32 %v3287_v47, %v12555_v8  ;;  %3471 = vmatpush.msrb.mxu2 %v13643_v49  ;;  %v13661_v47 = vld [vmem:[#allocation47_spill] sm:$0xff] }
 0x62e   :  { %v3160_v60 = vpop.f32.mrf.mxu1  ;;  %v3179_v35 = vpop.f32.mrf.mxu2  ;;  %3432 = vmatpush.msrb.mxu0 %v13645_v53 }
 0x62f   :  { %v3161_v63 = vadd.f32 %v3160_v60, %v3141_v46  ;;  %v3206_v12 = vadd.f32 %v3197_v55, %v2866_v40  ;;  %v3296_v54 = vadd.f32 %v12571_v26, %v12578_v29  ;;  %3472 = vmatpush.msrb.mxu2 %v13647_v32  ;;  %v13653_v55 = vld [vmem:[#allocation39_spill] sm:$0xff]  ;;  %v13654_v40 = vld [vmem:[#allocation40_spill] sm:$0xff]  ;;  %v13656_v46 = vld [vmem:[#allocation42_spill] sm:$0xff] }
 0x630   :  { %3433 = vmatpush.msrb.mxu0 %v13649_v61  ;;  %3451 = vmatpush.msrb.mxu1 %v13654_v40 }
 0x631   :  { %v3207_v10 = vadd.f32 %v3161_v63, %v2867_v28  ;;  %v12582_v3 = vadd.f32 %v3212_v41, %v3206_v12  ;;  %3473 = vmatpush.msrb.mxu2 %v13651_v0  ;;  %v13655_v28 = vld [vmem:[#allocation41_spill] sm:$0xff]  ;;  %v13657_v63 = vld [vmem:[#allocation43_spill] sm:$0xff]  ;;  %v13662_v12 = vld [vmem:[#allocation48_spill] sm:$0xff] }
 0x632   :  { %3434 = vmatpush.msrb.mxu0 %v13653_v55  ;;  %3452 = vmatpush.msrb.mxu1 %v13658_v33 }
 0x633   :  { %v12574_v15 = vadd.f32 %v3211_v21, %v3207_v10  ;;  %v13648_v21 = vld [vmem:[#allocation27_spill] sm:$0xff]  ;;  %v3297_v57 = vadd.f32 %v3296_v54, %v12582_v3  ;;  %3474 = vmatpush.msrb.mxu2 %v13655_v28  ;;  %v13663_v10 = vld [vmem:[#allocation49_spill] sm:$0xff] }
 0x634   :  { %v3198_v2 = vpop.f32.mrf.mxu3  ;;  %3489 = vmatpush.msra.mxu3 %v13648_v21  ;;  %3435 = vmatpush.msrb.mxu0 %v13657_v63 }
 0x635   :  { %v3289_v1 = vadd.f32 %v3288_v42, %v12574_v15  ;;  %v3199_v50 = vadd.f32 %v3198_v2, %v3179_v35  ;;  %3475 = vmatpush.msrb.mxu2 %v13659_v44  ;;  %3453 = vmatpush.msrb.mxu1 %v13662_v12  ;;  %v13668_v42 = vld [vmem:[#allocation54_spill] sm:$0xff]  ;;  %v13671_v2 = vld [vmem:[#allocation57_spill] sm:$0xff] }
 0x636   :  { %3490 = vmatpush.msra.mxu3 %v13652_v37  ;;  %3436 = vmatpush.msrb.mxu0 %v13661_v47 }
 0x637   :  { %v3290_v14 = vrot.slane %v3289_v1, 4  ;;  %v3208_v7 = vadd.f32 %v3199_v50, %v2868_v52  ;;  %3476 = vmatpush.msrb.mxu2 %v13663_v10  ;;  %3454 = vmatpush.msrb.mxu1 %v13666_v58  ;;  %v13670_v52 = vld [vmem:[#allocation56_spill] sm:$0xff] }
 0x638   :  { %3491 = vmatpush.msra.mxu3 %v13656_v46  ;;  %3437 = vmatpush.msrb.mxu0 %v13665_v18 }
 0x639   :  { %v3291_v6 = vadd.f32 %v3290_v14, %v3289_v1  ;;  %v12596_v4 = vadd.f32 %v3212_v41, %v3208_v7  ;;  %3477 = vmatpush.msrb.mxu2 %v13667_v5  ;;  %3455 = vmatpush.msrb.mxu1 %v13670_v52 }
 0x63a   :  { %3492 = vmatpush.msra.mxu3 %v13660_v23  ;;  %3438 = vmatpush.msrb.mxu0 %v13669_v38 }
 0x63b   :  { %v3292_v34 = vrot.slane %v3291_v6, 2  ;;  %v3298_v62 = vadd.f32 %v3297_v57, %v12596_v4  ;;  %3478 = vmatpush.msrb.mxu2 %v13671_v2  ;;  %3456 = vmatpush.msrb.mxu1 %v12488_v13 }
 0x63c   :  { %3493 = vmatpush.msra.mxu3 %v13664_v31 }
 0x63d   :  { %v3293_v60 = vadd.f32 %v3292_v34, %v3291_v6  ;;  %v3299_v11 = vrot.slane %v3298_v62, 4  ;;  %3457 = vmatpush.msrb.mxu1 %v12494_v22 }
 0x63e   :  { %3494 = vmatpush.msra.mxu3 %v13668_v42 }
 0x63f   :  { %v3294_v41 = vrot.slane %v3293_v60, 1  ;;  %v3300_v20 = vadd.f32 %v3299_v11, %v3298_v62  ;;  %3458 = vmatpush.msrb.mxu1 %v12504_v16 }
 0x640   :  { %3495 = vmatpush.msra.mxu3 %v13672_v51 }
 0x641   :  { %v3301_v45 = vrot.slane %v3300_v20, 2  ;;  %v3295_v9 = vadd.f32 %v3294_v41, %v3293_v60 }
 0x642   :  { %3496 = vmatpush.msra.mxu3 %v12490_v59 }
 0x643   :  { %v3302_v39 = vadd.f32 %v3301_v45, %v3300_v20  ;;  %3321 = vmatmul.f32.vlgmr.msra.gmra.mxu0 %v3295_v9  ;;  %3361 = vmatmul.f32.vlgmr.msra.gmra.mxu2 %v3295_v9 }
 0x644   :  { %3497 = vmatpush.msra.mxu3 %v12496_v43 }
 0x645   :  { %v3303_v35 = vrot.slane %v3302_v39, 1 }
 0x646   :  { %3498 = vmatpush.msra.mxu3 %v12513_v25 }
 0x647   :  { %v3304_v30 = vadd.f32 %v3303_v35, %v3302_v39  ;;  %v3529_v35 = vld [vmem:[%s13673_s17] sm:$0x3] }
 0x649   :  { %3341 = vmatmul.f32.vlgmr.msra.gmra.mxu1 %v3304_v30  ;;  %3381 = vmatmul.f32.vlgmr.msrb.gmra.mxu3 %v3304_v30 }
 0x6c0   :  { %v3322_v1 = vpop.f32.mrf.mxu0 }
 0x6c6   :  { %v3342_v50 = vpop.f32.mrf.mxu1  ;;  %v3362_v43 = vpop.f32.mrf.mxu2 }
 0x6c7   :  { %v3343_v24 = vadd.f32 %v3342_v50, %v3322_v1  ;;  %v3531_v1 = vperm.slane %v3529_v35, 0 }
 0x6c9   :  { %v3385_v48 = vmul.f32 0.001953125, %v3343_v24 }
 0x6cb   :  { %v3387_v49 = vperm.slane %v3385_v48, 0 }
 0x6cc   :  { %v3382_v36 = vpop.f32.mrf.mxu3 }
 0x6cd   :  { %v12630_v13 = vsub.f32 %v12551_v27, %v3387_v49  ;;  %v12633_v59 = vsub.f32 %v12546_v19, %v3387_v49  ;;  %v12636_v22 = vsub.f32 %v12555_v8, %v3387_v49  ;;  %v3383_v54 = vadd.f32 %v3382_v36, %v3362_v43  ;;  %v3547_v36 = vld [vmem:[%s13674_s28] sm:$0x3] }
 0x6ce   :  { %v12639_v16 = vsub.f32 %v12574_v15, %v3387_v49 }
 0x6cf   :  { %v3397_v25 = vmul.f32 %v12630_v13, %v12630_v13  ;;  %v3399_v14 = vmul.f32 %v12633_v59, %v12633_v59  ;;  %v3386_v7 = vmul.f32 0.001953125, %v3383_v54  ;;  %v3401_v27 = vmul.f32 %v12636_v22, %v12636_v22 }
 0x6d0   :  { %v3403_v8 = vmul.f32 %v12639_v16, %v12639_v16 }
 0x6d1   :  { %v3405_v19 = vadd.f32 %v3399_v14, %v3397_v25  ;;  %v3388_v53 = vperm.slane %v3386_v7, 0  ;;  %v3532_v14 = vperm.slane %v3529_v35, 1  ;;  %v3549_v7 = vperm.slane %v3547_v36, 0  ;;  %v10183_v35 = vld [vmem:[#allocation6 + $0x1f4] sm:$0xf] }
 0x6d3   :  { %v3406_v17 = vadd.f32 %v3405_v19, %v3401_v27  ;;  %v12650_v32 = vsub.f32 %v12578_v29, %v3388_v53  ;;  %v12653_v15 = vsub.f32 %v12571_v26, %v3388_v53  ;;  %v12656_v21 = vsub.f32 %v12582_v3, %v3388_v53 }
 0x6d4   :  { %v12659_v6 = vsub.f32 %v12596_v4, %v3388_v53 }
 0x6d5   :  { %v3407_v57 = vadd.f32 %v3406_v17, %v3403_v8  ;;  %v3398_v61 = vmul.f32 %v12650_v32, %v12650_v32  ;;  %v3400_v56 = vmul.f32 %v12653_v15, %v12653_v15  ;;  %v3402_v29 = vmul.f32 %v12656_v21, %v12656_v21 }
 0x6d6   :  { %v3404_v3 = vmul.f32 %v12659_v6, %v12659_v6 }
 0x6d7   :  { %v3408_v0 = vrot.slane %v3407_v57, 4  ;;  %v3414_v37 = vadd.f32 %v3400_v56, %v3398_v61 }
 0x6d9   :  { %v3409_v26 = vadd.f32 %v3408_v0, %v3407_v57  ;;  %v3415_v34 = vadd.f32 %v3414_v37, %v3402_v29 }
 0x6db   :  { %v3410_v62 = vrot.slane %v3409_v26, 2  ;;  %v3416_v55 = vadd.f32 %v3415_v34, %v3404_v3 }
 0x6dd   :  { %v3411_v4 = vadd.f32 %v3410_v62, %v3409_v26  ;;  %v3417_v40 = vrot.slane %v3416_v55, 4  ;;  %v3550_v62 = vperm.slane %v3547_v36, 1 }
 0x6df   :  { %v3412_v28 = vrot.slane %v3411_v4, 1  ;;  %v3418_v46 = vadd.f32 %v3417_v40, %v3416_v55 }
 0x6e1   :  { %v3413_v60 = vadd.f32 %v3412_v28, %v3411_v4  ;;  %v3419_v11 = vrot.slane %v3418_v46, 2 }
 0x6e3   :  { %3439 = vmatmul.f32.vlgmr.msrb.gmra.mxu0 %v3413_v60  ;;  %3479 = vmatmul.f32.vlgmr.msrb.gmra.mxu2 %v3413_v60  ;;  %v3420_v63 = vadd.f32 %v3419_v11, %v3418_v46 }
 0x6e5   :  { %v3421_v33 = vrot.slane %v3420_v63, 1 }
 0x6e7   :  { %v3422_v44 = vadd.f32 %v3421_v33, %v3420_v63 }
 0x6e9   :  { %3459 = vmatmul.f32.vlgmr.msrb.gmra.mxu1 %v3422_v44  ;;  %3499 = vmatmul.f32.vlgmr.msra.gmra.mxu3 %v3422_v44  ;;  %v10167_v44 = vld [vmem:[#allocation6 + $0x174] sm:$0xf] }
 0x760   :  { %v3440_v23 = vpop.f32.mrf.mxu0 }
 0x766   :  { %v3460_v41 = vpop.f32.mrf.mxu1  ;;  %v3480_v10 = vpop.f32.mrf.mxu2 }
 0x767   :  { %v3461_v20 = vadd.f32 %v3460_v41, %v3440_v23  ;;  %v8597_v23 = vld [vmem:[#allocation6 + $0x178] sm:$0xf0] }
 0x769   :  { %v3503_v47 = vmul.f32 0.001953125, %v3461_v20 }
 0x76b   :  { %v3505_v12 = vmax.f32 %v3503_v47, 0.0  ;;  %v8595_v47 = vld [vmem:[#allocation6 + $0x170] sm:$0xf] }
 0x76c   :  { %v3500_v31 = vpop.f32.mrf.mxu3 }
 0x76d   :  { %v3507_v45 = vadd.f32 1e-05, %v3505_v12  ;;  %v3501_v9 = vadd.f32 %v3500_v31, %v3480_v10  ;;  %v10168_v12 = vld [vmem:[#allocation6 + $0x174] sm:$0xf0]  ;;  %v8600_v31 = vor.u32 %v10167_v44, %v8597_v23  ;;  %v8563_v44 = vld [vmem:[#allocation6 + $0x130] sm:$0xf] }
 0x76e   :  { %v10160_v23 = vld [vmem:[#allocation6 + $0x134] sm:$0xf0] }
 0x76f   :  { %10461 = vrsqrt.f32 %v3507_v45  ;;  %v3504_v18 = vmul.f32 0.001953125, %v3501_v9  ;;  %vm3515_vm2 = vweird.f32 %v3507_v45 }
 0x771   :  { %v3506_v58 = vmax.f32 %v3504_v18, 0.0 }
 0x773   :  { %v3508_v5 = vadd.f32 1e-05, %v3506_v58 }
 0x775   :  { %v10462_v42 = vpop.eup %10461  ;;  %10463 = vrsqrt.f32 %v3508_v5  ;;  %vm3525_vm5 = vweird.f32 %v3508_v5 }
 0x776   :  { %v3510_v39 = vmul.f32 %v10462_v42, %v3507_v45  ;;  %vm3516_vm1 = vweird.f32 %v10462_v42  ;;  %v8596_v45 = vor.u32 %v10168_v12, %v8595_v47  ;;  %v8557_v12 = vld [vmem:[#allocation6 + $0x128] sm:$0xf0] }
 0x777   :  { %vm3517_vm3 = vmor %vm3515_vm2, %vm3516_vm1 }
 0x778   :  { %v3511_v38 = vmul.f32 %v10462_v42, %v3510_v39  ;;  %v8589_v39 = vld [vmem:[#allocation6 + $0x168] sm:$0xf0] }
 0x77a   :  { %v3512_v52 = vmul.f32 0.5, %v3511_v38  ;;  %v8659_v38 = vld [vmem:[#allocation6 + $0x1f0] sm:$0xf] }
 0x77b   :  { %v10464_v2 = vpop.eup %10463 }
 0x77c   :  { %v3513_v51 = vsub.f32 1.5, %v3512_v52  ;;  %v3520_v30 = vmul.f32 %v10464_v2, %v3508_v5  ;;  %vm3526_vm4 = vweird.f32 %v10464_v2  ;;  %v10119_v5 = vld [vmem:[%s13451_s10] sm:$0xff]  ;;  %v10184_v52 = vld [vmem:[#allocation6 + $0x1f4] sm:$0xf0] }
 0x77d   :  { %vm3527_vm6 = vmor %vm3525_vm5, %vm3526_vm4  ;;  %v8660_v36 = vor.u32 %v10184_v52, %v8659_v38  ;;  %v10174_v38 = vld [vmem:[#allocation6 + $0x1a4] sm:$0xf0]  ;;  %v10173_v52 = vld [vmem:[#allocation6 + $0x1a4] sm:$0xf]  ;;  %vm6518_vm5 = vcmask 1043456  }
 0x77e   :  { %v3514_v50 = vmul.f32 %v10462_v42, %v3513_v51  ;;  %v3521_v24 = vmul.f32 %v10464_v2, %v3520_v30 }
 0x780   :  { %v3518_v48 = vsel %vm3517_vm3, %v10462_v42, %v3514_v50  ;;  %v3522_v49 = vmul.f32 0.5, %v3521_v24  ;;  %v10165_v42 = vld [vmem:[#allocation6 + $0x164] sm:$0xf]  ;;  %v8587_v50 = vld [vmem:[#allocation6 + $0x160] sm:$0xf] }
 0x781   :  { %v3535_v43 = vmul.f32 %v3531_v1, %v3518_v48  ;;  %v8661_v1 = vld [vmem:[#allocation6 + $0x1f8] sm:$0xf0]  ;;  %v10166_v24 = vld [vmem:[#allocation6 + $0x164] sm:$0xf0]  ;;  %v8592_v48 = vor.u32 %v10165_v42, %v8589_v39  ;;  %v8619_v39 = vld [vmem:[#allocation6 + $0x1a0] sm:$0xf] }
 0x782   :  { %v3523_v54 = vsub.f32 1.5, %v3522_v49  ;;  %v8588_v49 = vor.u32 %v10166_v24, %v8587_v50  ;;  %v8549_v42 = vld [vmem:[#allocation6 + $0x118] sm:$0xf0]  ;;  %v10153_v50 = vld [vmem:[#allocation6 + $0x104] sm:$0xf] }
 0x783   :  { %v3537_v25 = vperm.slane %v3535_v43, 0  ;;  %v8664_v43 = vor.u32 %v10183_v35, %v8661_v1  ;;  %v8621_v35 = vld [vmem:[#allocation6 + $0x1a8] sm:$0xf0] }
 0x784   :  { %v3524_v27 = vmul.f32 %v10464_v2, %v3523_v54  ;;  %v10163_v54 = vld [vmem:[#allocation6 + $0x154] sm:$0xf]  ;;  %v8624_v1 = vor.u32 %v10173_v52, %v8621_v35  ;;  %v8541_v24 = vld [vmem:[#allocation6 + $0x108] sm:$0xf0]  ;;  %v10154_v52 = vld [vmem:[#allocation6 + $0x104] sm:$0xf0] }
 0x785   :  { %v3543_v19 = vmul.f32 %v3537_v25, %v12636_v22  ;;  %v3545_v53 = vmul.f32 %v3537_v25, %v12639_v16  ;;  %v3539_v8 = vmul.f32 %v3537_v25, %v12630_v13  ;;  %v3541_v17 = vmul.f32 %v3537_v25, %v12633_v59  ;;  %v8581_v25 = vld [vmem:[#allocation6 + $0x158] sm:$0xf0] }
 0x786   :  { %v3528_v57 = vsel %vm3527_vm6, %v10464_v2, %v3524_v27  ;;  %v10182_v27 = vld [vmem:[#allocation6 + $0x1e4] sm:$0xf0]  ;;  %vm6514_vm6 = vcmask 64512  }
 0x787   :  { %v3536_v61 = vmul.f32 %v3532_v14, %v3528_v57  ;;  %v3557_v56 = vadd.f32 %v3549_v7, %v3543_v19  ;;  %v3559_v0 = vadd.f32 %v3549_v7, %v3545_v53  ;;  %v3553_v29 = vadd.f32 %v3549_v7, %v3539_v8  ;;  %v8651_v14 = vld [vmem:[#allocation6 + $0x1e0] sm:$0xf]  ;;  %v10181_v19 = vld [vmem:[#allocation6 + $0x1e4] sm:$0xf]  ;;  %v8653_v53 = vld [vmem:[#allocation6 + $0x1e8] sm:$0xf0] }
 0x788   :  { %v3555_v37 = vadd.f32 %v3549_v7, %v3541_v17  ;;  %v8579_v8 = vld [vmem:[#allocation6 + $0x150] sm:$0xf]  ;;  %v8584_v17 = vor.u32 %v10163_v54, %v8581_v25  ;;  %v10164_v57 = vld [vmem:[#allocation6 + $0x154] sm:$0xf0]  ;;  %v10171_v54 = vld [vmem:[#allocation6 + $0x194] sm:$0xf] }
 0x789   :  { %v3538_v26 = vperm.slane %v3536_v61, 0  ;;  %v3565_v3 = vmul.f32 0.2, %v3557_v56  ;;  %v3567_v34 = vmul.f32 0.2, %v3559_v0  ;;  %v8652_v61 = vor.u32 %v10182_v27, %v8651_v14 }
 0x78a   :  { %v3561_v55 = vmul.f32 0.2, %v3553_v29  ;;  %v3563_v4 = vmul.f32 0.2, %v3555_v37  ;;  %v8613_v25 = vld [vmem:[#allocation6 + $0x198] sm:$0xf0]  ;;  %v8544_v14 = vor.u32 %v10153_v50, %v8541_v24 }
 0x78b   :  { %v3573_v40 = vmax.f32 %v3557_v56, %v3565_v3  ;;  %v3575_v22 = vmax.f32 %v3559_v0, %v3567_v34  ;;  %v3544_v16 = vmul.f32 %v3538_v26, %v12656_v21  ;;  %v3546_v13 = vmul.f32 %v3538_v26, %v12659_v6  ;;  %v10161_v0 = vld [vmem:[#allocation6 + $0x144] sm:$0xf]  ;;  %v10180_v3 = vld [vmem:[#allocation6 + $0x1d4] sm:$0xf0]  ;;  %v10179_v34 = vld [vmem:[#allocation6 + $0x1d4] sm:$0xf] }
 0x78c   :  { %v3569_v28 = vmax.f32 %v3553_v29, %v3561_v55  ;;  %v3540_v59 = vmul.f32 %v3538_v26, %v12650_v32  ;;  %v3542_v46 = vmul.f32 %v3538_v26, %v12653_v15  ;;  %v3571_v11 = vmax.f32 %v3555_v37, %v3563_v4  ;;  %v10152_v32 = vld [vmem:[%s13451_s10 + $0x8] sm:$0xff]  ;;  %v8643_v37 = vld [vmem:[#allocation6 + $0x1d0] sm:$0xf]  ;;  %v8571_v55 = vld [vmem:[#allocation6 + $0x140] sm:$0xf] }
 0x78d   :  { %v12683_v60 = vpack.c.bf16 %v3575_v22, %v3573_v40  ;;  %v3558_v63 = vadd.f32 %v3550_v62, %v3544_v16  ;;  %v3560_v33 = vadd.f32 %v3550_v62, %v3546_v13  ;;  %v8656_v56 = vor.u32 %v10181_v19, %v8653_v53  ;;  %v8573_v29 = vld [vmem:[#allocation6 + $0x148] sm:$0xf0]  ;;  %v10162_v4 = vld [vmem:[#allocation6 + $0x144] sm:$0xf0]  ;;  %v10132_v53 = vld [vmem:[#allocation6 + $0x64] sm:$0xf] }
 0x78e   :  { %v3554_v41 = vadd.f32 %v3550_v62, %v3540_v59  ;;  %v3556_v20 = vadd.f32 %v3550_v62, %v3542_v46  ;;  %v12690_v9 = vpack.c.bf16 %v3571_v11, %v3569_v28  ;;  %v8580_v26 = vor.u32 %v10164_v57, %v8579_v8  ;;  %v8645_v62 = vld [vmem:[#allocation6 + $0x1d8] sm:$0xf0]  ;;  %v10159_v28 = vld [vmem:[#allocation6 + $0x134] sm:$0xf]  ;;  %v8635_v46 = vld [vmem:[#allocation6 + $0x1c0] sm:$0xf] }
 0x78f   :  { %3598 = vmatpush.bf16.msra.mxu0 %v12683_v60  ;;  %3671 = vmatpush.bf16.msra.mxu2 %v12683_v60  ;;  %v3566_v21 = vmul.f32 0.2, %v3558_v63  ;;  %v3568_v6 = vmul.f32 0.2, %v3560_v33  ;;  %v8576_v40 = vor.u32 %v10161_v0, %v8573_v29  ;;  %v8572_v22 = vor.u32 %v10162_v4, %v8571_v55  ;;  %v8565_v59 = vld [vmem:[#allocation6 + $0x138] sm:$0xf0] }
 0x790   :  { %v3562_v15 = vmul.f32 0.2, %v3554_v41  ;;  %v3564_v10 = vmul.f32 0.2, %v3556_v20  ;;  %v8644_v16 = vor.u32 %v10180_v3, %v8643_v37  ;;  %v8648_v13 = vor.u32 %v10179_v34, %v8645_v62  ;;  %v10178_v11 = vld [vmem:[#allocation6 + $0x1c4] sm:$0xf0] }
 0x791   :  { %v3574_v18 = vmax.f32 %v3558_v63, %v3566_v21  ;;  %v3576_v58 = vmax.f32 %v3560_v33, %v3568_v6  ;;  %v10177_v63 = vld [vmem:[#allocation6 + $0x1c4] sm:$0xf]  ;;  %v8637_v33 = vld [vmem:[#allocation6 + $0x1c8] sm:$0xf0]  ;;  %v8636_v47 = vor.u32 %v10178_v11, %v8635_v46  ;;  %v8603_v57 = vld [vmem:[#allocation6 + $0x180] sm:$0xf] }
 0x792   :  { %v3570_v51 = vmax.f32 %v3554_v41, %v3562_v15  ;;  %v3572_v30 = vmax.f32 %v3556_v20, %v3564_v10  ;;  %v8568_v41 = vor.u32 %v10159_v28, %v8565_v59  ;;  %v8564_v20 = vor.u32 %v10160_v23, %v8563_v44  ;;  %v10157_v6 = vld [vmem:[#allocation6 + $0x124] sm:$0xf]  ;;  %v10176_v15 = vld [vmem:[#allocation6 + $0x1b4] sm:$0xf0]  ;;  %v10175_v10 = vld [vmem:[#allocation6 + $0x1b4] sm:$0xf] }
 0x793   :  { %3599 = vmatpush.bf16.msra.mxu0 %v12690_v9  ;;  %3672 = vmatpush.bf16.msra.mxu2 %v12690_v9  ;;  %v12697_v2 = vpack.c.bf16 %v3576_v58, %v3574_v18  ;;  %v8640_v21 = vor.u32 %v10177_v63, %v8637_v33  ;;  %v8717_v8 = vld [vmem:[#allocation6 + $0x68] sm:$0xf0]  ;;  %v8787_v29 = vld [vmem:[#allocation6 + $0xf0] sm:$0xf]  ;;  %v10151_v37 = vld [vmem:[#allocation6 + $0xf4] sm:$0xf0] }
 0x794   :  { %v12703_v7 = vpack.c.bf16 %v3572_v30, %v3570_v51  ;;  %v8620_v30 = vor.u32 %v10174_v38, %v8619_v39  ;;  %v8605_v0 = vld [vmem:[#allocation6 + $0x188] sm:$0xf0]  ;;  %v8789_v3 = vld [vmem:[#allocation6 + $0xf8] sm:$0xf0]  ;;  %v8720_v34 = vor.u32 %v10132_v53, %v8717_v8  ;;  %v8788_v4 = vor.u32 %v10151_v37, %v8787_v29  ;;  %v10149_v28 = vld [vmem:[#allocation6 + $0xe4] sm:$0xf0] }
 0x795   :  { %3612 = vmatpush.bf16.msra.mxu1 %v12697_v2  ;;  %3685 = vmatpush.bf16.msrb.mxu3 %v12697_v2  ;;  %v10148_v59 = vld [vmem:[#allocation6 + $0xe4] sm:$0xf]  ;;  %v8781_v46 = vld [vmem:[#allocation6 + $0xe8] sm:$0xf0]  ;;  %v8539_v38 = vld [vmem:[#allocation6 + $0x100] sm:$0xf] }
 0x796   :  { %8535 = vmatmul.msk.bf16.vlgmr.msra.gmra.mxu2 %vm3588_vm7, %v10152_v32  ;;  %8527 = vmatmul.msk.bf16.vlgmr.msra.gmra.mxu0 %vm3588_vm7, %v10119_v5  ;;  %v10128_v33 = vld [vmem:[#allocation6 + $0x44] sm:$0xf]  ;;  %v8701_v44 = vld [vmem:[#allocation6 + $0x48] sm:$0xf0]  ;;  %v8784_v23 = vor.u32 %v10148_v59, %v8781_v46  ;;  %v8540_v35 = vor.u32 %v10154_v52, %v8539_v38  ;;  %v8763_v50 = vld [vmem:[#allocation6 + $0xc0] sm:$0xf] }
 0x797   :  { %3916 = vmatpush.bf16.msrb.mxu2 %v8600_v31  ;;  %3888 = vmatpush.bf16.msrb.mxu0 %v8596_v45  ;;  %v8629_v31 = vld [vmem:[#allocation6 + $0x1b8] sm:$0xf0]  ;;  %v8560_v45 = vor.u32 %v10157_v6, %v8557_v12  ;;  %v8704_v6 = vor.u32 %v10128_v33, %v8701_v44  ;;  %v10145_v24 = vld [vmem:[#allocation6 + $0xc4] sm:$0xf0]  ;;  %v8707_v29 = vld [vmem:[#allocation6 + $0x50] sm:$0xf] }
 0x798   :  { %v8632_v58 = vor.u32 %v10175_v10, %v8629_v31  ;;  %v10131_v37 = vld [vmem:[#allocation6 + $0x54] sm:$0xf0]  ;;  %v10120_v46 = vld [vmem:[#allocation6 + $0x4] sm:$0xf]  ;;  %v8739_v44 = vld [vmem:[#allocation6 + $0x90] sm:$0xf] }
 0x799   :  { %3613 = vmatpush.bf16.msra.mxu1 %v12703_v7  ;;  %3686 = vmatpush.bf16.msrb.mxu3 %v12703_v7  ;;  %v8675_v38 = vld [vmem:[#allocation6 + $0x10] sm:$0xf]  ;;  %v10123_v52 = vld [vmem:[#allocation6 + $0x14] sm:$0xf0] }
 0x79b   :  { %3917 = vmatpush.bf16.msrb.mxu2 %v8592_v48  ;;  %3889 = vmatpush.bf16.msrb.mxu0 %v8588_v49  ;;  %v10134_v48 = vld [vmem:[#allocation6 + $0x74] sm:$0xf]  ;;  %v8725_v49 = vld [vmem:[#allocation6 + $0x78] sm:$0xf0] }
 0x79c   :  { %8536 = vmatmul.msk.bf16.vlgmr.msrb.gmra.mxu3 %vm3588_vm7, %v10152_v32  ;;  %8528 = vmatmul.msk.bf16.vlgmr.msra.gmra.mxu1 %vm3588_vm7, %v10119_v5  ;;  %v8627_v32 = vld [vmem:[#allocation6 + $0x1b0] sm:$0xf]  ;;  %v10155_v5 = vld [vmem:[#allocation6 + $0x114] sm:$0xf]  ;;  %v8728_v27 = vor.u32 %v10134_v48, %v8725_v49  ;;  %v10144_v48 = vld [vmem:[#allocation6 + $0xc4] sm:$0xf]  ;;  %v8764_v49 = vor.u32 %v10145_v24, %v8763_v50 }
 0x79d   :  { %3902 = vmatpush.bf16.msrb.mxu1 %v8660_v36  ;;  %3930 = vmatpush.bf16.msra.mxu3 %v8664_v43  ;;  %v8628_v18 = vor.u32 %v10176_v15, %v8627_v32  ;;  %v8552_v51 = vor.u32 %v10155_v5, %v8549_v42  ;;  %v8611_v36 = vld [vmem:[#allocation6 + $0x190] sm:$0xf]  ;;  %v10172_v43 = vld [vmem:[#allocation6 + $0x194] sm:$0xf0]  ;;  %v10126_v32 = vld [vmem:[#allocation6 + $0x34] sm:$0xf] }
 0x79e   :  { %v8612_v19 = vor.u32 %v10172_v43, %v8611_v36  ;;  %v8693_v15 = vld [vmem:[#allocation6 + $0x38] sm:$0xf0]  ;;  %v8547_v5 = vld [vmem:[#allocation6 + $0x110] sm:$0xf]  ;;  %v10156_v42 = vld [vmem:[#allocation6 + $0x114] sm:$0xf0] }
 0x79f   :  { %3918 = vmatpush.bf16.msrb.mxu2 %v8584_v17  ;;  %3890 = vmatpush.bf16.msrb.mxu0 %v8580_v26  ;;  %v8616_v17 = vor.u32 %v10171_v54, %v8613_v25  ;;  %v10150_v26 = vld [vmem:[#allocation6 + $0xf4] sm:$0xf]  ;;  %v8696_v31 = vor.u32 %v10126_v32, %v8693_v15  ;;  %v8548_v39 = vor.u32 %v10156_v42, %v8547_v5  ;;  %v8765_v36 = vld [vmem:[#allocation6 + $0xc8] sm:$0xf0]  ;;  %v8715_v43 = vld [vmem:[#allocation6 + $0x60] sm:$0xf] }
 0x7a0   :  { %v10133_v54 = vld [vmem:[#allocation6 + $0x64] sm:$0xf0]  ;;  %v8768_v25 = vor.u32 %v10144_v48, %v8765_v36  ;;  %v8731_v15 = vld [vmem:[#allocation6 + $0x80] sm:$0xf]  ;;  %v8923_v36 = vld [vmem:[#allocation6 + $0x2f0] sm:$0xf] }
 0x7a1   :  { %3903 = vmatpush.bf16.msrb.mxu1 %v8652_v61  ;;  %3931 = vmatpush.bf16.msra.mxu3 %v8656_v56  ;;  %v10170_v61 = vld [vmem:[#allocation6 + $0x184] sm:$0xf0]  ;;  %v10169_v56 = vld [vmem:[#allocation6 + $0x184] sm:$0xf]  ;;  %v8716_v53 = vor.u32 %v10133_v54, %v8715_v43  ;;  %v8683_v5 = vld [vmem:[#allocation6 + $0x20] sm:$0xf] }
 0x7a2   :  { %v8604_v62 = vor.u32 %v10170_v61, %v8603_v57  ;;  %v8608_v55 = vor.u32 %v10169_v56, %v8605_v0  ;;  %v10142_v57 = vld [vmem:[#allocation6 + $0xb4] sm:$0xf]  ;;  %v8757_v61 = vld [vmem:[#allocation6 + $0xb8] sm:$0xf0]  ;;  %v10125_v42 = vld [vmem:[#allocation6 + $0x24] sm:$0xf0] }
 0x7a3   :  { %3919 = vmatpush.bf16.msrb.mxu2 %v8576_v40  ;;  %3891 = vmatpush.bf16.msrb.mxu0 %v8572_v22  ;;  %v10130_v40 = vld [vmem:[#allocation6 + $0x54] sm:$0xf]  ;;  %v8709_v22 = vld [vmem:[#allocation6 + $0x58] sm:$0xf0]  ;;  %v8760_v0 = vor.u32 %v10142_v57, %v8757_v61  ;;  %v10217_v43 = vld [vmem:[#allocation6 + $0x2f4] sm:$0xf0] }
 0x7a4   :  { %v8712_v11 = vor.u32 %v10130_v40, %v8709_v22  ;;  %v10140_v40 = vld [vmem:[#allocation6 + $0xa4] sm:$0xf]  ;;  %v8907_v57 = vld [vmem:[#allocation6 + $0x2d0] sm:$0xf]  ;;  %v10213_v61 = vld [vmem:[#allocation6 + $0x2d4] sm:$0xf0] }
 0x7a5   :  { %3904 = vmatpush.bf16.msrb.mxu1 %v8644_v16  ;;  %3932 = vmatpush.bf16.msra.mxu3 %v8648_v13  ;;  %v8792_v16 = vor.u32 %v10150_v26, %v8789_v3  ;;  %v8779_v13 = vld [vmem:[#allocation6 + $0xe0] sm:$0xf]  ;;  %v8708_v26 = vor.u32 %v10131_v37, %v8707_v29  ;;  %v10122_v3 = vld [vmem:[#allocation6 + $0x14] sm:$0xf]  ;;  %v8908_v37 = vor.u32 %v10213_v61, %v8907_v57  ;;  %v10194_v61 = vld [vmem:[#allocation6 + $0x244] sm:$0xf] }
 0x7a6   :  { %v8780_v63 = vor.u32 %v10149_v28, %v8779_v13  ;;  %v8699_v13 = vld [vmem:[#allocation6 + $0x40] sm:$0xf]  ;;  %v10129_v28 = vld [vmem:[#allocation6 + $0x44] sm:$0xf0] }
 0x7a7   :  { %3920 = vmatpush.bf16.msrb.mxu2 %v8568_v41  ;;  %3892 = vmatpush.bf16.msrb.mxu0 %v8564_v20  ;;  %v8771_v41 = vld [vmem:[#allocation6 + $0xd0] sm:$0xf]  ;;  %v10147_v20 = vld [vmem:[#allocation6 + $0xd4] sm:$0xf0] }
 0x7a8   :  { %v8772_v12 = vor.u32 %v10147_v20, %v8771_v41  ;;  %v10138_v41 = vld [vmem:[#allocation6 + $0x94] sm:$0xf] }
 0x7a9   :  { %3905 = vmatpush.bf16.msrb.mxu1 %v8636_v47  ;;  %3933 = vmatpush.bf16.msra.mxu3 %v8640_v21  ;;  %v10146_v47 = vld [vmem:[#allocation6 + $0xd4] sm:$0xf]  ;;  %v8773_v21 = vld [vmem:[#allocation6 + $0xd8] sm:$0xf0] }
 0x7aa   :  { %v8776_v10 = vor.u32 %v10146_v47, %v8773_v21  ;;  %v8741_v47 = vld [vmem:[#allocation6 + $0x98] sm:$0xf0]  ;;  %v8691_v21 = vld [vmem:[#allocation6 + $0x30] sm:$0xf] }
 0x7ab   :  { %3921 = vmatpush.bf16.msrb.mxu2 %v8560_v45  ;;  %v8555_v45 = vld [vmem:[#allocation6 + $0x120] sm:$0xf] }
 0x7ad   :  { %3906 = vmatpush.bf16.msrb.mxu1 %v8628_v18  ;;  %3934 = vmatpush.bf16.msra.mxu3 %v8632_v58  ;;  %v10158_v18 = vld [vmem:[#allocation6 + $0x124] sm:$0xf0] }
 0x7ae   :  { %v8556_v58 = vor.u32 %v10158_v18, %v8555_v45  ;;  %v8733_v18 = vld [vmem:[#allocation6 + $0x88] sm:$0xf0] }
 0x7af   :  { %3922 = vmatpush.bf16.msrb.mxu2 %v8552_v51  ;;  %v8723_v51 = vld [vmem:[#allocation6 + $0x70] sm:$0xf] }
 0x7b0   :  { %3893 = vmatpush.bf16.msrb.mxu0 %v8556_v58 }
 0x7b1   :  { %3907 = vmatpush.bf16.msrb.mxu1 %v8620_v30  ;;  %3935 = vmatpush.bf16.msra.mxu3 %v8624_v1  ;;  %v10135_v30 = vld [vmem:[#allocation6 + $0x74] sm:$0xf0] }
 0x7b2   :  { %v8724_v1 = vor.u32 %v10135_v30, %v8723_v51  ;;  %v8667_v51 = vld [vmem:[#allocation6] sm:$0xf]  ;;  %v10121_v30 = vld [vmem:[#allocation6 + $0x4] sm:$0xf0] }
 0x7b3   :  { %3923 = vmatpush.bf16.msrb.mxu2 %v8544_v14  ;;  %v10124_v14 = vld [vmem:[#allocation6 + $0x24] sm:$0xf] }
 0x7b4   :  { %3894 = vmatpush.bf16.msrb.mxu0 %v8548_v39  ;;  %v8684_v39 = vor.u32 %v10125_v42, %v8683_v5  ;;  %v8819_v5 = vld [vmem:[#allocation6 + $0x220] sm:$0xf]  ;;  %v10191_v42 = vld [vmem:[#allocation6 + $0x224] sm:$0xf0] }
 0x7b5   :  { %3908 = vmatpush.bf16.msrb.mxu1 %v8612_v19  ;;  %3936 = vmatpush.bf16.msra.mxu3 %v8616_v17  ;;  %v8755_v19 = vld [vmem:[#allocation6 + $0xb0] sm:$0xf]  ;;  %v10143_v17 = vld [vmem:[#allocation6 + $0xb4] sm:$0xf0] }
 0x7b6   :  { %v8756_v56 = vor.u32 %v10143_v17, %v8755_v19  ;;  %v8915_v19 = vld [vmem:[#allocation6 + $0x2e0] sm:$0xf] }
 0x7b7   :  { %4132 = vmatpush.bf16.msra.mxu2 %v8728_v27  ;;  %v8685_v27 = vld [vmem:[#allocation6 + $0x28] sm:$0xf0] }
 0x7b8   :  { %3895 = vmatpush.bf16.msrb.mxu0 %v8540_v35  ;;  %v8688_v8 = vor.u32 %v10124_v14, %v8685_v27  ;;  %v8676_v35 = vor.u32 %v10123_v52, %v8675_v38  ;;  %v8924_v14 = vor.u32 %v10217_v43, %v8923_v36  ;;  %v8820_v38 = vor.u32 %v10191_v42, %v8819_v5  ;;  %v8811_v52 = vld [vmem:[#allocation6 + $0x210] sm:$0xf] }
 0x7b9   :  { %3909 = vmatpush.bf16.msrb.mxu1 %v8604_v62  ;;  %3937 = vmatpush.bf16.msra.mxu3 %v8608_v55  ;;  %v8747_v55 = vld [vmem:[#allocation6 + $0xa0] sm:$0xf] }
 0x7bb   :  { %4133 = vmatpush.bf16.msra.mxu2 %v8720_v34  ;;  %v8677_v34 = vld [vmem:[#allocation6 + $0x18] sm:$0xf0] }
 0x7bc   :  { %4104 = vmatpush.bf16.msra.mxu0 %v8724_v1  ;;  %v8680_v62 = vor.u32 %v10122_v3, %v8677_v34  ;;  %v8668_v1 = vor.u32 %v10121_v30, %v8667_v51  ;;  %v10211_v3 = vld [vmem:[#allocation6 + $0x2c4] sm:$0xf0]  ;;  %v8803_v30 = vld [vmem:[#allocation6 + $0x200] sm:$0xf] }
 0x7bd   :  { %4118 = vmatpush.bf16.msra.mxu1 %v8788_v4  ;;  %4146 = vmatpush.bf16.msrb.mxu3 %v8792_v16  ;;  %v10141_v4 = vld [vmem:[#allocation6 + $0xa4] sm:$0xf0]  ;;  %v8749_v16 = vld [vmem:[#allocation6 + $0xa8] sm:$0xf0] }
 0x7be   :  { %v8748_v22 = vor.u32 %v10141_v4, %v8747_v55  ;;  %v8752_v59 = vor.u32 %v10140_v40, %v8749_v16  ;;  %v8851_v55 = vld [vmem:[#allocation6 + $0x260] sm:$0xf]  ;;  %v10199_v4 = vld [vmem:[#allocation6 + $0x264] sm:$0xf0]  ;;  %v10209_v16 = vld [vmem:[#allocation6 + $0x2b4] sm:$0xf0] }
 0x7bf   :  { %4134 = vmatpush.bf16.msra.mxu2 %v8712_v11  ;;  %v8669_v11 = vld [vmem:[#allocation6 + $0x8] sm:$0xf0] }
 0x7c0   :  { %4105 = vmatpush.bf16.msra.mxu0 %v8716_v53  ;;  %v8672_v33 = vor.u32 %v10120_v46, %v8669_v11  ;;  %v10215_v53 = vld [vmem:[#allocation6 + $0x2e4] sm:$0xf0]  ;;  %v10197_v46 = vld [vmem:[#allocation6 + $0x254] sm:$0xf0] }
 0x7c1   :  { %4119 = vmatpush.bf16.msra.mxu1 %v8780_v63  ;;  %4147 = vmatpush.bf16.msrb.mxu3 %v8784_v23  ;;  %v8700_v63 = vor.u32 %v10129_v28, %v8699_v13  ;;  %v10139_v23 = vld [vmem:[#allocation6 + $0x94] sm:$0xf0]  ;;  %v8852_v28 = vor.u32 %v10199_v4, %v8851_v55  ;;  %v8893_v4 = vld [vmem:[#allocation6 + $0x2b8] sm:$0xf0] }
 0x7c2   :  { %v8740_v20 = vor.u32 %v10139_v23, %v8739_v44  ;;  %v10207_v44 = vld [vmem:[#allocation6 + $0x2a4] sm:$0xf0] }
 0x7c3   :  { %4135 = vmatpush.bf16.msra.mxu2 %v8704_v6  ;;  %v10127_v6 = vld [vmem:[#allocation6 + $0x34] sm:$0xf0] }
 0x7c4   :  { %4106 = vmatpush.bf16.msra.mxu0 %v8708_v26  ;;  %v8692_v32 = vor.u32 %v10127_v6, %v8691_v21  ;;  %v8899_v26 = vld [vmem:[#allocation6 + $0x2c0] sm:$0xf]  ;;  %v8875_v21 = vld [vmem:[#allocation6 + $0x290] sm:$0xf]  ;;  %v10205_v6 = vld [vmem:[#allocation6 + $0x294] sm:$0xf0] }
 0x7c5   :  { %4120 = vmatpush.bf16.msra.mxu1 %v8772_v12  ;;  %4148 = vmatpush.bf16.msrb.mxu3 %v8776_v10  ;;  %v8744_v12 = vor.u32 %v10138_v41, %v8741_v47  ;;  %v10137_v10 = vld [vmem:[#allocation6 + $0x84] sm:$0xf0]  ;;  %v8900_v40 = vor.u32 %v10211_v3, %v8899_v26  ;;  %v8835_v41 = vld [vmem:[#allocation6 + $0x240] sm:$0xf]  ;;  %v10192_v3 = vld [vmem:[#allocation6 + $0x234] sm:$0xf] }
 0x7c6   :  { %v8732_v45 = vor.u32 %v10137_v10, %v8731_v15  ;;  %v10193_v15 = vld [vmem:[#allocation6 + $0x234] sm:$0xf0]  ;;  %v8876_v10 = vor.u32 %v10205_v6, %v8875_v21  ;;  %v10186_v6 = vld [vmem:[#allocation6 + $0x204] sm:$0xf] }
 0x7c7   :  { %4136 = vmatpush.bf16.msra.mxu2 %v8696_v31  ;;  %v10136_v31 = vld [vmem:[#allocation6 + $0x84] sm:$0xf] }
 0x7c8   :  { %4107 = vmatpush.bf16.msra.mxu0 %v8700_v63  ;;  %v8736_v58 = vor.u32 %v10136_v31, %v8733_v18  ;;  %v10185_v31 = vld [vmem:[%s13451_s10 + $0x10] sm:$0xff]  ;;  %v10203_v18 = vld [vmem:[#allocation6 + $0x284] sm:$0xf0] }
 0x7c9   :  { %4121 = vmatpush.bf16.msra.mxu1 %v8764_v49  ;;  %4149 = vmatpush.bf16.msrb.mxu3 %v8768_v25 }
 0x7cb   :  { %4137 = vmatpush.bf16.msra.mxu2 %v8688_v8  ;;  %v8916_v8 = vor.u32 %v10215_v53, %v8915_v19  ;;  %v10196_v53 = vld [vmem:[#allocation6 + $0x254] sm:$0xf] }
 0x7cc   :  { %4108 = vmatpush.bf16.msra.mxu0 %v8692_v32  ;;  %v8827_v32 = vld [vmem:[#allocation6 + $0x230] sm:$0xf] }
 0x7cd   :  { %4122 = vmatpush.bf16.msra.mxu1 %v8756_v56  ;;  %4150 = vmatpush.bf16.msrb.mxu3 %v8760_v0  ;;  %v8859_v56 = vld [vmem:[#allocation6 + $0x270] sm:$0xf]  ;;  %v10201_v0 = vld [vmem:[#allocation6 + $0x274] sm:$0xf0] }
 0x7ce   :  { %v8860_v34 = vor.u32 %v10201_v0, %v8859_v56  ;;  %v8837_v56 = vld [vmem:[#allocation6 + $0x248] sm:$0xf0]  ;;  %v10210_v0 = vld [vmem:[#allocation6 + $0x2c4] sm:$0xf] }
 0x7cf   :  { %4138 = vmatpush.bf16.msra.mxu2 %v8680_v62 }
 0x7d0   :  { %4109 = vmatpush.bf16.msra.mxu0 %v8684_v39 }
 0x7d1   :  { %4123 = vmatpush.bf16.msra.mxu1 %v8748_v22  ;;  %4151 = vmatpush.bf16.msrb.mxu3 %v8752_v59  ;;  %v8891_v22 = vld [vmem:[#allocation6 + $0x2b0] sm:$0xf] }
 0x7d2   :  { %v8843_v59 = vld [vmem:[#allocation6 + $0x250] sm:$0xf]  ;;  %v8892_v11 = vor.u32 %v10209_v16, %v8891_v22  ;;  %v10190_v22 = vld [vmem:[#allocation6 + $0x224] sm:$0xf]  ;;  %v8821_v16 = vld [vmem:[#allocation6 + $0x228] sm:$0xf0] }
 0x7d3   :  { %4139 = vmatpush.bf16.msra.mxu2 %v8672_v33  ;;  %v8883_v33 = vld [vmem:[#allocation6 + $0x2a0] sm:$0xf]  ;;  %v8844_v23 = vor.u32 %v10197_v46, %v8843_v59  ;;  %v8885_v59 = vld [vmem:[#allocation6 + $0x2a8] sm:$0xf0] }
 0x7d4   :  { %4110 = vmatpush.bf16.msra.mxu0 %v8676_v35  ;;  %v8884_v47 = vor.u32 %v10207_v44, %v8883_v33  ;;  %v10189_v35 = vld [vmem:[#allocation6 + $0x214] sm:$0xf0]  ;;  %v10188_v33 = vld [vmem:[#allocation6 + $0x214] sm:$0xf]  ;;  %v8813_v44 = vld [vmem:[#allocation6 + $0x218] sm:$0xf0] }
 0x7d5   :  { %4124 = vmatpush.bf16.msra.mxu1 %v8740_v20  ;;  %4152 = vmatpush.bf16.msrb.mxu3 %v8744_v12  ;;  %v10195_v20 = vld [vmem:[#allocation6 + $0x244] sm:$0xf0]  ;;  %v8812_v51 = vor.u32 %v10189_v35, %v8811_v52 }
 0x7d6   :  { %v8836_v12 = vor.u32 %v10195_v20, %v8835_v41  ;;  %v8816_v41 = vor.u32 %v10188_v33, %v8813_v44  ;;  %v8877_v20 = vld [vmem:[#allocation6 + $0x298] sm:$0xf0]  ;;  %v10245_v44 = vld [vmem:[#allocation6 + $0x3d4] sm:$0xf] }
 0x7d8   :  { %4111 = vmatpush.bf16.msra.mxu0 %v8668_v1  ;;  %v10187_v1 = vld [vmem:[#allocation6 + $0x204] sm:$0xf0] }
 0x7d9   :  { %4125 = vmatpush.bf16.msra.mxu1 %v8732_v45  ;;  %4153 = vmatpush.bf16.msrb.mxu3 %v8736_v58  ;;  %v8867_v45 = vld [vmem:[#allocation6 + $0x280] sm:$0xf]  ;;  %v8828_v58 = vor.u32 %v10193_v15, %v8827_v32  ;;  %v10202_v32 = vld [vmem:[#allocation6 + $0x284] sm:$0xf] }
 0x7da   :  { %v8868_v39 = vor.u32 %v10203_v18, %v8867_v45 }
 0x813   :  { %v3601_v54 = vpop.f32.mrf.mxu0 }
 0x819   :  { %v3674_v50 = vpop.f32.mrf.mxu2  ;;  %v3615_v17 = vpop.f32.mrf.mxu1 }
 0x81b   :  { %v3603_v29 = vpop.f32.mrf.mxu0 }
 0x81c   :  { %v3620_v62 = vpack.c.bf16 %v3603_v29, %v3601_v54  ;;  %v10198_v54 = vld [vmem:[#allocation6 + $0x264] sm:$0xf]  ;;  %v8840_v29 = vor.u32 %v10194_v61, %v8837_v56  ;;  %v10232_v61 = vld [vmem:[#allocation6 + $0x364] sm:$0xf0]  ;;  %v9051_v56 = vld [vmem:[#allocation6 + $0x3e0] sm:$0xf] }
 0x81f   :  { %v3688_v24 = vpop.f32.mrf.mxu3 }
 0x821   :  { %v3676_v48 = vpop.f32.mrf.mxu2  ;;  %v3617_v13 = vpop.f32.mrf.mxu1 }
 0x822   :  { %v3693_v49 = vpack.c.bf16 %v3676_v48, %v3674_v50  ;;  %v3621_v63 = vpack.c.bf16 %v3617_v13, %v3615_v17  ;;  %v8804_v50 = vor.u32 %v10187_v1, %v8803_v30  ;;  %v8861_v48 = vld [vmem:[#allocation6 + $0x278] sm:$0xf0]  ;;  %v10206_v13 = vld [vmem:[#allocation6 + $0x2a4] sm:$0xf] }
 0x823   :  { %v8909_v17 = vld [vmem:[#allocation6 + $0x2d8] sm:$0xf0] }
 0x824   :  { %3924 = vmatmul.bf16.vlgmr.msrb.gmra.mxu2 %v3693_v49  ;;  %3896 = vmatmul.bf16.vlgmr.msrb.gmra.mxu0 %v3693_v49  ;;  %v10216_v49 = vld [vmem:[#allocation6 + $0x2f4] sm:$0xf] }
 0x825   :  { %4177 = vmatpush.bf16.msrb.mxu2 %v12683_v60 }
 0x827   :  { %v3690_v25 = vpop.f32.mrf.mxu3 }
 0x828   :  { %v3694_v27 = vpack.c.bf16 %v3690_v25, %v3688_v24  ;;  %v10200_v24 = vld [vmem:[#allocation6 + $0x274] sm:$0xf]  ;;  %v8853_v25 = vld [vmem:[#allocation6 + $0x268] sm:$0xf0] }
 0x829   :  { %4178 = vmatpush.bf16.msrb.mxu2 %v12690_v9  ;;  %v8864_v36 = vor.u32 %v10200_v24, %v8861_v48 }
 0x82a   :  { %3910 = vmatmul.bf16.vlgmr.msrb.gmra.mxu1 %v3694_v27  ;;  %3938 = vmatmul.bf16.vlgmr.msra.gmra.mxu3 %v3694_v27  ;;  %v8856_v27 = vor.u32 %v10198_v54, %v8853_v25  ;;  %v10234_v54 = vld [vmem:[#allocation6 + $0x374] sm:$0xf0]  ;;  %v9059_v25 = vld [vmem:[#allocation6 + $0x3f0] sm:$0xf] }
 0x82b   :  { %4191 = vmatpush.bf16.msrb.mxu1 %v12697_v2  ;;  %4408 = vmatpush.bf16.msra.mxu3 %v8924_v14  ;;  %v10214_v14 = vld [vmem:[#allocation6 + $0x2e4] sm:$0xf] }
 0x82c   :  { %4422 = vmatpush.bf16.msrb.mxu0 %v8864_v36 }
 0x82f   :  { %4192 = vmatpush.bf16.msrb.mxu1 %v12703_v7  ;;  %4409 = vmatpush.bf16.msra.mxu3 %v8916_v8  ;;  %v8845_v8 = vld [vmem:[#allocation6 + $0x258] sm:$0xf0] }
 0x830   :  { %4423 = vmatpush.bf16.msrb.mxu0 %v8856_v27  ;;  %v10250_v27 = vld [vmem:[#allocation6 + $0x3f4] sm:$0xf0] }
 0x833   :  { %4410 = vmatpush.bf16.msra.mxu3 %v8908_v37  ;;  %v8901_v37 = vld [vmem:[#allocation6 + $0x2c8] sm:$0xf0] }
 0x834   :  { %4140 = vmatmul.bf16.vlgmr.msra.gmra.mxu2 %v3620_v62  ;;  %4112 = vmatmul.bf16.vlgmr.msra.gmra.mxu0 %v3620_v62  ;;  %v8904_v26 = vor.u32 %v10210_v0, %v8901_v37  ;;  %v10208_v62 = vld [vmem:[#allocation6 + $0x2b4] sm:$0xf]  ;;  %v10231_v37 = vld [vmem:[#allocation6 + $0x364] sm:$0xf] }
 0x835   :  { %4394 = vmatpush.bf16.msra.mxu2 %v8860_v34  ;;  %v8829_v34 = vld [vmem:[#allocation6 + $0x238] sm:$0xf0] }
 0x836   :  { %v8832_v55 = vor.u32 %v10192_v3, %v8829_v34 }
 0x837   :  { %4411 = vmatpush.bf16.msra.mxu3 %v8900_v40  ;;  %v8896_v40 = vor.u32 %v10208_v62, %v8893_v4  ;;  %v10247_v62 = vld [vmem:[#allocation6 + $0x3e4] sm:$0xf] }
 0x839   :  { %4395 = vmatpush.bf16.msra.mxu2 %v8852_v28  ;;  %v8824_v28 = vor.u32 %v10190_v22, %v8821_v16  ;;  %v10230_v22 = vld [vmem:[#allocation6 + $0x354] sm:$0xf0]  ;;  %v9043_v16 = vld [vmem:[#allocation6 + $0x3d0] sm:$0xf] }
 0x83a   :  { %4126 = vmatmul.bf16.vlgmr.msra.gmra.mxu1 %v3621_v63  ;;  %4154 = vmatmul.bf16.vlgmr.msrb.gmra.mxu3 %v3621_v63  ;;  %v8888_v63 = vor.u32 %v10206_v13, %v8885_v59  ;;  %v10229_v59 = vld [vmem:[#allocation6 + $0x354] sm:$0xf] }
 0x83b   :  { %4412 = vmatpush.bf16.msra.mxu3 %v8892_v11 }
 0x83d   :  { %4396 = vmatpush.bf16.msra.mxu2 %v8844_v23  ;;  %v10204_v23 = vld [vmem:[#allocation6 + $0x294] sm:$0xf] }
 0x83f   :  { %4413 = vmatpush.bf16.msra.mxu3 %v8884_v47  ;;  %v8880_v47 = vor.u32 %v10204_v23, %v8877_v20  ;;  %v9045_v23 = vld [vmem:[#allocation6 + $0x3d8] sm:$0xf0]  ;;  %v8971_v20 = vld [vmem:[#allocation6 + $0x340] sm:$0xf] }
 0x841   :  { %4397 = vmatpush.bf16.msra.mxu2 %v8836_v12  ;;  %v8805_v12 = vld [vmem:[#allocation6 + $0x208] sm:$0xf0] }
 0x842   :  { %v8808_v15 = vor.u32 %v10186_v6, %v8805_v12  ;;  %v10244_v12 = vld [vmem:[#allocation6 + $0x3c4] sm:$0xf0] }
 0x843   :  { %4414 = vmatpush.bf16.msra.mxu3 %v8876_v10  ;;  %v8869_v10 = vld [vmem:[#allocation6 + $0x288] sm:$0xf0] }
 0x844   :  { %8799 = vmatmul.msk.bf16.vlgmr.msrb.gmra.mxu2 %vm3588_vm7, %v10185_v31  ;;  %v8872_v18 = vor.u32 %v10202_v32, %v8869_v10  ;;  %v10227_v32 = vld [vmem:[#allocation6 + $0x344] sm:$0xf] }
 0x845   :  { %4398 = vmatpush.bf16.msra.mxu2 %v8828_v58 }
 0x847   :  { %4415 = vmatpush.bf16.msra.mxu3 %v8868_v39 }
 0x849   :  { %4399 = vmatpush.bf16.msra.mxu2 %v8820_v38 }
 0x84a   :  { %8800 = vmatmul.msk.bf16.vlgmr.msrb.gmra.mxu1 %vm3588_vm7, %v10185_v31 }
 0x84b   :  { %4485 = vmatpush.bf16.msrb.mxu3 %v12697_v2  ;;  %v8925_v2 = vld [vmem:[#allocation6 + $0x2f8] sm:$0xf0] }
 0x84c   :  { %v8928_v43 = vor.u32 %v10216_v49, %v8925_v2  ;;  %v10218_v2 = vld [vmem:[%s13451_s10 + $0x18] sm:$0xff] }
 0x84d   :  { %4400 = vmatpush.bf16.msra.mxu2 %v8812_v51 }
 0x84e   :  { %4436 = vmatpush.bf16.msra.mxu1 %v8928_v43  ;;  %v8995_v43 = vld [vmem:[#allocation6 + $0x370] sm:$0xf] }
 0x84f   :  { %4486 = vmatpush.bf16.msrb.mxu3 %v12703_v7  ;;  %v8917_v7 = vld [vmem:[#allocation6 + $0x2e8] sm:$0xf0] }
 0x850   :  { %v8920_v19 = vor.u32 %v10214_v14, %v8917_v7  ;;  %v8996_v14 = vor.u32 %v10234_v54, %v8995_v43  ;;  %v10233_v7 = vld [vmem:[#allocation6 + $0x374] sm:$0xf] }
 0x851   :  { %4401 = vmatpush.bf16.msra.mxu2 %v8804_v50 }
 0x852   :  { %4437 = vmatpush.bf16.msra.mxu1 %v8920_v19  ;;  %v8997_v19 = vld [vmem:[#allocation6 + $0x378] sm:$0xf0] }
 0x855   :  { %4471 = vmatpush.bf16.msrb.mxu2 %v12683_v60  ;;  %v10212_v60 = vld [vmem:[#allocation6 + $0x2d4] sm:$0xf] }
 0x856   :  { %v8912_v57 = vor.u32 %v10212_v60, %v8909_v17  ;;  %v10249_v60 = vld [vmem:[#allocation6 + $0x3f4] sm:$0xf] }
 0x858   :  { %4438 = vmatpush.bf16.msra.mxu1 %v8912_v57  ;;  %v8987_v57 = vld [vmem:[#allocation6 + $0x360] sm:$0xf] }
 0x859   :  { %4472 = vmatpush.bf16.msrb.mxu2 %v12690_v9  ;;  %v8848_v9 = vor.u32 %v10196_v53, %v8845_v8  ;;  %v9060_v53 = vor.u32 %v10250_v27, %v9059_v25  ;;  %v9000_v8 = vor.u32 %v10233_v7, %v8997_v19  ;;  %v8988_v0 = vor.u32 %v10232_v61, %v8987_v57  ;;  %v10241_v25 = vld [vmem:[#allocation6 + $0x3b4] sm:$0xf]  ;;  %v8955_v7 = vld [vmem:[#allocation6 + $0x320] sm:$0xf]  ;;  %v10224_v19 = vld [vmem:[#allocation6 + $0x324] sm:$0xf0] }
 0x85b   :  { %4424 = vmatpush.bf16.msrb.mxu0 %v8848_v9  ;;  %v9061_v9 = vld [vmem:[#allocation6 + $0x3f8] sm:$0xf0] }
 0x85c   :  { %4439 = vmatpush.bf16.msra.mxu1 %v8904_v26  ;;  %v9064_v17 = vor.u32 %v10249_v60, %v9061_v9  ;;  %v8989_v26 = vld [vmem:[#allocation6 + $0x368] sm:$0xf0]  ;;  %v10240_v60 = vld [vmem:[#allocation6 + $0x3a4] sm:$0xf0]  ;;  %v10223_v9 = vld [vmem:[#allocation6 + $0x324] sm:$0xf] }
 0x85d   :  { %v8992_v34 = vor.u32 %v10231_v37, %v8989_v26  ;;  %v10222_v26 = vld [vmem:[#allocation6 + $0x314] sm:$0xf0] }
 0x85f   :  { %4425 = vmatpush.bf16.msrb.mxu0 %v8840_v29  ;;  %v10248_v29 = vld [vmem:[#allocation6 + $0x3e4] sm:$0xf0] }
 0x860   :  { %4440 = vmatpush.bf16.msra.mxu1 %v8896_v40  ;;  %v9052_v3 = vor.u32 %v10248_v29, %v9051_v56  ;;  %v8979_v40 = vld [vmem:[#allocation6 + $0x350] sm:$0xf]  ;;  %v10239_v56 = vld [vmem:[#allocation6 + $0x3a4] sm:$0xf] }
 0x861   :  { %v8980_v13 = vor.u32 %v10230_v22, %v8979_v40  ;;  %v8947_v29 = vld [vmem:[#allocation6 + $0x310] sm:$0xf]  ;;  %v10221_v40 = vld [vmem:[#allocation6 + $0x314] sm:$0xf]  ;;  %v8949_v22 = vld [vmem:[#allocation6 + $0x318] sm:$0xf0] }
 0x863   :  { %4426 = vmatpush.bf16.msrb.mxu0 %v8832_v55  ;;  %v9053_v55 = vld [vmem:[#allocation6 + $0x3e8] sm:$0xf0] }
 0x864   :  { %4441 = vmatpush.bf16.msra.mxu1 %v8888_v63  ;;  %v9056_v4 = vor.u32 %v10247_v62, %v9053_v55  ;;  %v8948_v55 = vor.u32 %v10222_v26, %v8947_v29  ;;  %v12802_v29 = vld [vmem:[#allocation7 + $0xa0] sm:$0xff]  ;;  %v12806_v26 = vld [vmem:[#allocation7 + $0xa8] sm:$0xff] }
 0x867   :  { %4427 = vmatpush.bf16.msrb.mxu0 %v8824_v28  ;;  %v10246_v28 = vld [vmem:[#allocation6 + $0x3d4] sm:$0xf0] }
 0x868   :  { %4442 = vmatpush.bf16.msra.mxu1 %v8880_v47  ;;  %v9044_v63 = vor.u32 %v10246_v28, %v9043_v16  ;;  %v10228_v47 = vld [vmem:[#allocation6 + $0x344] sm:$0xf0]  ;;  %v10237_v16 = vld [vmem:[#allocation6 + $0x394] sm:$0xf]  ;;  %v9013_v28 = vld [vmem:[#allocation6 + $0x398] sm:$0xf0] }
 0x869   :  { %v8972_v6 = vor.u32 %v10228_v47, %v8971_v20  ;;  %v8941_v20 = vld [vmem:[#allocation6 + $0x308] sm:$0xf0] }
 0x86b   :  { %4428 = vmatpush.bf16.msrb.mxu0 %v8816_v41  ;;  %v9048_v41 = vor.u32 %v10245_v44, %v9045_v23  ;;  %v10236_v23 = vld [vmem:[#allocation6 + $0x384] sm:$0xf0] }
 0x86c   :  { %4443 = vmatpush.bf16.msra.mxu1 %v8872_v18 }
 0x86f   :  { %4429 = vmatpush.bf16.msrb.mxu0 %v8808_v15  ;;  %v8973_v15 = vld [vmem:[#allocation6 + $0x348] sm:$0xf0] }
 0x870   :  { %4702 = vmatpush.bf16.msrb.mxu1 %v9060_v53  ;;  %v9019_v53 = vld [vmem:[#allocation6 + $0x3a0] sm:$0xf] }
 0x871   :  { %v9020_v57 = vor.u32 %v10240_v60, %v9019_v53  ;;  %v12776_v53 = vld [vmem:[#allocation7 + $0xc0] sm:$0xff]  ;;  %v12780_v60 = vld [vmem:[#allocation7 + $0xc8] sm:$0xff] }
 0x873   :  { %4688 = vmatpush.bf16.msra.mxu0 %v8996_v14  ;;  %v9029_v14 = vld [vmem:[#allocation6 + $0x3b8] sm:$0xf0] }
 0x874   :  { %4703 = vmatpush.bf16.msrb.mxu1 %v9052_v3  ;;  %v9032_v27 = vor.u32 %v10241_v25, %v9029_v14  ;;  %v9011_v3 = vld [vmem:[#allocation6 + $0x390] sm:$0xf] }
 0x877   :  { %4689 = vmatpush.bf16.msra.mxu0 %v8988_v0  ;;  %v9021_v0 = vld [vmem:[#allocation6 + $0x3a8] sm:$0xf0] }
 0x878   :  { %4704 = vmatpush.bf16.msrb.mxu1 %v9044_v63  ;;  %v9024_v37 = vor.u32 %v10239_v56, %v9021_v0  ;;  %v10220_v63 = vld [vmem:[#allocation6 + $0x304] sm:$0xf0]  ;;  %v12794_v56 = vld [vmem:[#allocation7 + $0xb8] sm:$0xff] }
 0x879   :  { %v12798_v0 = vld [vmem:[#allocation7 + $0x1e8] sm:$0xff] }
 0x87b   :  { %4690 = vmatpush.bf16.msra.mxu0 %v8980_v13  ;;  %v8952_v13 = vor.u32 %v10221_v40, %v8949_v22  ;;  %v12822_v40 = vld [vmem:[#allocation7 + $0x1c8] sm:$0xff]  ;;  %v12826_v22 = vld [vmem:[#allocation7 + $0x80] sm:$0xff] }
 0x87f   :  { %4691 = vmatpush.bf16.msra.mxu0 %v8972_v6 }
 0x8a1   :  { %v12743_v10 = vpop.f32.mrf.mxu0 }
 0x8a7   :  { %v12722_v46 = vpop.f32.mrf.mxu1  ;;  %v3925_v11 = vpop.f32.mrf.mxu2 }
 0x8a9   :  { %v12745_v62 = vpop.f32.mrf.mxu0 }
 0x8ad   :  { %v3939_v21 = vpop.f32.mrf.mxu3 }
 0x8ae   :  { %v3940_v39 = vadd.f32 %v3939_v21, %v3925_v11  ;;  %v8981_v11 = vld [vmem:[#allocation6 + $0x358] sm:$0xf0]  ;;  %v9035_v21 = vld [vmem:[#allocation6 + $0x3c0] sm:$0xf] }
 0x8af   :  { %v12724_v31 = vpop.f32.mrf.mxu1  ;;  %v12726_v45 = vpop.f32.mrf.mxu2  ;;  %v8984_v33 = vor.u32 %v10229_v59, %v8981_v11  ;;  %v9036_v18 = vor.u32 %v10244_v12, %v9035_v21  ;;  %v9016_v59 = vor.u32 %v10237_v16, %v9013_v28  ;;  %v8939_v11 = vld [vmem:[#allocation6 + $0x300] sm:$0xf]  ;;  %v10235_v12 = vld [vmem:[#allocation6 + $0x384] sm:$0xf]  ;;  %v12828_v16 = vld [vmem:[#allocation7 + $0x1b0] sm:$0xff] }
 0x8b0   :  { %v8940_v44 = vor.u32 %v10220_v63, %v8939_v11  ;;  %v12834_v28 = vld [vmem:[#allocation7 + $0x1b8] sm:$0xff]  ;;  %v12842_v63 = vld [vmem:[#allocation7 + $0x70] sm:$0xff] }
 0x8b1   :  { %4705 = vmatpush.bf16.msrb.mxu1 %v9036_v18  ;;  %v4113_v18 = vpop.f32.mrf.mxu0 }
 0x8b5   :  { %v12728_v58 = vpop.f32.mrf.mxu3 }
 0x8b7   :  { %v12730_v5 = vpop.f32.mrf.mxu1  ;;  %v4141_v42 = vpop.f32.mrf.mxu2 }
 0x8b8   :  { %v4142_v38 = vadd.f32 %v4141_v42, %v3940_v39  ;;  %v8976_v42 = vor.u32 %v10227_v32, %v8973_v15  ;;  %v10243_v39 = vld [vmem:[#allocation6 + $0x3c4] sm:$0xf]  ;;  %v9005_v32 = vld [vmem:[#allocation6 + $0x388] sm:$0xf0] }
 0x8b9   :  { %v9008_v15 = vor.u32 %v10235_v12, %v9005_v32  ;;  %v12866_v12 = vld [vmem:[#allocation7 + $0x50] sm:$0xff]  ;;  %v12868_v32 = vld [vmem:[#allocation7 + $0x180] sm:$0xff] }
 0x8bd   :  { %v4155_v52 = vpop.f32.mrf.mxu3 }
 0x8be   :  { %v12732_v35 = vadd.f32 %v4155_v52, %v4142_v38  ;;  %v9037_v38 = vld [vmem:[#allocation6 + $0x3c8] sm:$0xf0] }
 0x8bf   :  { %v12734_v51 = vpop.f32.mrf.mxu1  ;;  %v12736_v30 = vpop.f32.mrf.mxu2  ;;  %v9040_v52 = vor.u32 %v10243_v39, %v9037_v38  ;;  %v12751_v39 = vld [vmem:[#allocation7 + $0xf8] sm:$0xff]  ;;  %v3912_v38 = vadd.f32 %v12722_v46, %v12743_v10 }
 0x8c5   :  { %v12747_v47 = vpop.f32.mrf.mxu3 }
 0x8c7   :  { %v4180_v1 = vpop.f32.mrf.mxu2  ;;  %v4194_v50 = vpop.f32.mrf.mxu1 }
 0x8cf   :  { %v4182_v24 = vpop.f32.mrf.mxu2  ;;  %v4196_v48 = vpop.f32.mrf.mxu1 }
 0x8d0   :  { %v4199_v49 = vpack.c.bf16 %v4182_v24, %v4180_v1  ;;  %v4200_v36 = vpack.c.bf16 %v4196_v48, %v4194_v50  ;;  %v8963_v1 = vld [vmem:[#allocation6 + $0x330] sm:$0xf]  ;;  %v10226_v50 = vld [vmem:[#allocation6 + $0x334] sm:$0xf0] }
 0x8d1   :  { %v9027_v24 = vld [vmem:[#allocation6 + $0x3b0] sm:$0xf]  ;;  %v8964_v48 = vor.u32 %v10226_v50, %v8963_v1 }
 0x8d2   :  { %4402 = vmatmul.bf16.vlgmr.msra.gmra.mxu2 %v4199_v49  ;;  %4416 = vmatmul.bf16.vlgmr.msra.gmra.mxu3 %v4200_v36 }
 0x8d3   :  { %4430 = vmatmul.bf16.vlgmr.msrb.gmra.mxu0 %v4199_v49  ;;  %4444 = vmatmul.bf16.vlgmr.msra.gmra.mxu1 %v4200_v36  ;;  %v10242_v49 = vld [vmem:[#allocation6 + $0x3b4] sm:$0xf0]  ;;  %v10225_v36 = vld [vmem:[#allocation6 + $0x334] sm:$0xf] }
 0x8d4   :  { %4716 = vmatpush.bf16.msra.mxu2 %v9000_v8  ;;  %4730 = vmatpush.bf16.msra.mxu3 %v9064_v17  ;;  %v9028_v43 = vor.u32 %v10242_v49, %v9027_v24  ;;  %v8956_v8 = vor.u32 %v10224_v19, %v8955_v7  ;;  %v8957_v17 = vld [vmem:[#allocation6 + $0x328] sm:$0xf0]  ;;  %v12770_v7 = vld [vmem:[#allocation7 + $0xd0] sm:$0xff]  ;;  %v12772_v19 = vld [vmem:[#allocation7 + $0xd8] sm:$0xff] }
 0x8d5   :  { %4692 = vmatpush.bf16.msra.mxu0 %v8964_v48  ;;  %v8960_v61 = vor.u32 %v10223_v9, %v8957_v17  ;;  %v12784_v9 = vld [vmem:[#allocation7 + $0x1f8] sm:$0xff]  ;;  %v12786_v17 = vpop.f32.mrf.mxu0 }
 0x8d6   :  { %4706 = vmatpush.bf16.msrb.mxu1 %v9028_v43 }
 0x8d8   :  { %4717 = vmatpush.bf16.msra.mxu2 %v8992_v34  ;;  %4731 = vmatpush.bf16.msra.mxu3 %v9056_v4  ;;  %v10238_v34 = vld [vmem:[#allocation6 + $0x394] sm:$0xf0] }
 0x8d9   :  { %4693 = vmatpush.bf16.msra.mxu0 %v8956_v8  ;;  %v9012_v4 = vor.u32 %v10238_v34, %v9011_v3  ;;  %v12778_v8 = vld [vmem:[#allocation7 + $0x1f0] sm:$0xff]  ;;  %v12810_v3 = vld [vmem:[#allocation7 + $0x1d8] sm:$0xff] }
 0x8da   :  { %4707 = vmatpush.bf16.msrb.mxu1 %v9020_v57  ;;  %v12790_v57 = vld [vmem:[#allocation7 + $0xb0] sm:$0xff] }
 0x8db   :  { %v12814_v34 = vld [vmem:[#allocation7 + $0x90] sm:$0xff] }
 0x8dc   :  { %4718 = vmatpush.bf16.msra.mxu2 %v8984_v33  ;;  %4732 = vmatpush.bf16.msra.mxu3 %v9048_v41  ;;  %v9003_v33 = vld [vmem:[#allocation6 + $0x380] sm:$0xf]  ;;  %v10219_v41 = vld [vmem:[#allocation6 + $0x304] sm:$0xf] }
 0x8dd   :  { %4694 = vmatpush.bf16.msra.mxu0 %v8948_v55  ;;  %v9004_v21 = vor.u32 %v10236_v23, %v9003_v33  ;;  %v8944_v6 = vor.u32 %v10219_v41, %v8941_v20  ;;  %v12816_v55 = vld [vmem:[#allocation7 + $0x1c0] sm:$0xff]  ;;  %v12850_v23 = vld [vmem:[#allocation7 + $0x1a8] sm:$0xff]  ;;  %v12856_v20 = vld [vmem:[#allocation7 + $0x190] sm:$0xff] }
 0x8de   :  { %4708 = vmatpush.bf16.msrb.mxu1 %v9012_v4  ;;  %v12818_v4 = vld [vmem:[#allocation7 + $0x98] sm:$0xff]  ;;  %v12844_v33 = vld [vmem:[#allocation7 + $0x1a0] sm:$0xff] }
 0x8df   :  { %v12854_v41 = vld [vmem:[#allocation7 + $0x60] sm:$0xff] }
 0x8e0   :  { %4719 = vmatpush.bf16.msra.mxu2 %v8976_v42  ;;  %4733 = vmatpush.bf16.msra.mxu3 %v9040_v52  ;;  %v12749_v42 = vld [vmem:[#allocation7 + $0xf0] sm:$0xff]  ;;  %v4114_v52 = vadd.f32 %v4113_v18, %v3912_v38  ;;  %v12874_v18 = vld [vmem:[#allocation7 + $0x188] sm:$0xff]  ;;  %v12878_v38 = vld [vmem:[#allocation7 + $0x40] sm:$0xff] }
 0x8e1   :  { %4695 = vmatpush.bf16.msra.mxu0 %v8940_v44  ;;  %v12846_v44 = vld [vmem:[#allocation7 + $0x78] sm:$0xff] }
 0x8e2   :  { %8935 = vmatmul.msk.bf16.vlgmr.msrb.gmra.mxu2 %vm3588_vm7, %v10218_v2  ;;  %8936 = vmatmul.msk.bf16.vlgmr.msrb.gmra.mxu3 %vm3588_vm7, %v10218_v2  ;;  %v8965_v2 = vld [vmem:[#allocation6 + $0x338] sm:$0xf0]  ;;  %v4128_v24 = vadd.f32 %v12730_v5, %v4114_v52  ;;  %v12766_v5 = vld [vmem:[#allocation7 + $0xe8] sm:$0xff]  ;;  %v12880_v52 = vld [vmem:[#allocation7 + $0x170] sm:$0xff] }
 0x8e3   :  { %v8968_v54 = vor.u32 %v10225_v36, %v8965_v2  ;;  %4709 = vmatpush.bf16.msrb.mxu1 %v9004_v21  ;;  %v12858_v21 = vld [vmem:[#allocation7 + $0x68] sm:$0xff]  ;;  %13675 = vst [vmem:[#allocation19_spill] sm:$0xff] %v12880_v52 }
 0x8e4   :  { %4734 = vmatpush.bf16.msra.mxu3 %v9032_v27  ;;  %v12764_v27 = vld [vmem:[#allocation7 + $0xe0] sm:$0xff] }
 0x8e5   :  { %4720 = vmatpush.bf16.msra.mxu2 %v8968_v54  ;;  %4836 = vmatpush.msrb.mxu0 %v12749_v42 }
 0x8e7   :  { %4837 = vmatpush.msrb.mxu0 %v12764_v27  ;;  %4856 = vmatpush.msra.mxu1 %v12778_v8 }
 0x8e8   :  { %4735 = vmatpush.bf16.msra.mxu3 %v9024_v37  ;;  %v12804_v37 = vld [vmem:[#allocation7 + $0x1d0] sm:$0xff] }
 0x8e9   :  { %4721 = vmatpush.bf16.msra.mxu2 %v8960_v61  ;;  %4838 = vmatpush.msrb.mxu0 %v12770_v7  ;;  %v12792_v61 = vld [vmem:[#allocation7 + $0x1e0] sm:$0xff] }
 0x8ea   :  { %4857 = vmatpush.msra.mxu1 %v12792_v61 }
 0x8eb   :  { %4839 = vmatpush.msrb.mxu0 %v12776_v53 }
 0x8ec   :  { %4736 = vmatpush.bf16.msra.mxu3 %v9016_v59  ;;  %4858 = vmatpush.msra.mxu1 %v12804_v37 }
 0x8ed   :  { %4722 = vmatpush.bf16.msra.mxu2 %v8952_v13  ;;  %4840 = vmatpush.msrb.mxu0 %v12790_v57  ;;  %v12830_v13 = vld [vmem:[#allocation7 + $0x88] sm:$0xff] }
 0x8ee   :  { %4859 = vmatpush.msra.mxu1 %v12816_v55 }
 0x8ef   :  { %4841 = vmatpush.msrb.mxu0 %v12802_v29 }
 0x8f0   :  { %4737 = vmatpush.bf16.msra.mxu3 %v9008_v15  ;;  %4860 = vmatpush.msra.mxu1 %v12828_v16  ;;  %v12870_v15 = vld [vmem:[#allocation7 + $0x58] sm:$0xff] }
 0x8f1   :  { %4723 = vmatpush.bf16.msra.mxu2 %v8944_v6  ;;  %4842 = vmatpush.msrb.mxu0 %v12814_v34  ;;  %v12862_v6 = vld [vmem:[#allocation7 + $0x198] sm:$0xff] }
 0x8f2   :  { %4861 = vmatpush.msra.mxu1 %v12844_v33 }
 0x8f3   :  { %4843 = vmatpush.msrb.mxu0 %v12826_v22 }
 0x8f4   :  { %4896 = vmatpush.msrb.mxu3 %v12784_v9  ;;  %4862 = vmatpush.msra.mxu1 %v12856_v20 }
 0x8f5   :  { %4876 = vmatpush.msrb.mxu2 %v12751_v39  ;;  %4844 = vmatpush.msrb.mxu0 %v12842_v63 }
 0x8f6   :  { %4897 = vmatpush.msrb.mxu3 %v12798_v0  ;;  %4863 = vmatpush.msra.mxu1 %v12868_v32 }
 0x8f7   :  { %4877 = vmatpush.msrb.mxu2 %v12766_v5  ;;  %4845 = vmatpush.msrb.mxu0 %v12854_v41 }
 0x8f8   :  { %4898 = vmatpush.msrb.mxu3 %v12810_v3  ;;  %4864 = vmatpush.msra.mxu1 %v12880_v52  ;;  %v12953_v52 = vld [vmem:[#allocation7 + $0x100] sm:$0xff] }
 0x8f9   :  { %4878 = vmatpush.msrb.mxu2 %v12772_v19  ;;  %4846 = vmatpush.msrb.mxu0 %v12866_v12 }
 0x8fa   :  { %4899 = vmatpush.msrb.mxu3 %v12822_v40 }
 0x8fb   :  { %4879 = vmatpush.msrb.mxu2 %v12780_v60  ;;  %4847 = vmatpush.msrb.mxu0 %v12878_v38 }
 0x8fc   :  { %4900 = vmatpush.msrb.mxu3 %v12834_v28 }
 0x8fd   :  { %4880 = vmatpush.msrb.mxu2 %v12794_v56 }
 0x8fe   :  { %4901 = vmatpush.msrb.mxu3 %v12850_v23 }
 0x8ff   :  { %4881 = vmatpush.msrb.mxu2 %v12806_v26 }
 0x900   :  { %4902 = vmatpush.msrb.mxu3 %v12862_v6 }
 0x901   :  { %4882 = vmatpush.msrb.mxu2 %v12818_v4 }
 0x902   :  { %4903 = vmatpush.msrb.mxu3 %v12874_v18 }
 0x903   :  { %4883 = vmatpush.msrb.mxu2 %v12830_v13 }
 0x905   :  { %4884 = vmatpush.msrb.mxu2 %v12846_v44 }
 0x907   :  { %4885 = vmatpush.msrb.mxu2 %v12858_v21 }
 0x909   :  { %4886 = vmatpush.msrb.mxu2 %v12870_v15 }
 0x950   :  { %v12836_v59 = vpop.f32.mrf.mxu0  ;;  %v12838_v11 = vpop.f32.mrf.mxu1 }
 0x955   :  { %v4403_v1 = vpop.f32.mrf.mxu2  ;;  %v4417_v50 = vpop.f32.mrf.mxu3 }
 0x956   :  { %v4418_v48 = vadd.f32 %v4417_v50, %v4403_v1  ;;  %v12882_v1 = vld [vmem:[#allocation7 + $0x48] sm:$0xff]  ;;  %v12886_v50 = vld [vmem:[#allocation7 + $0x178] sm:$0xff] }
 0x957   :  { %13676 = vst [vmem:[#allocation18_spill] sm:$0xff] %v12882_v1  ;;  %4887 = vmatpush.msrb.mxu2 %v12882_v1  ;;  %4904 = vmatpush.msrb.mxu3 %v12886_v50  ;;  %v12926_v1 = vld [vmem:[#allocation7 + $0x148] sm:$0xff] }
 0x958   :  { %v12758_v49 = vadd.f32 %v4418_v48, %v4128_v24  ;;  %13677 = vst [vmem:[#allocation20_spill] sm:$0xff] %v12886_v50  ;;  %v12890_v24 = vld [vmem:[#allocation7 + $0x30] sm:$0xff]  ;;  %v12892_v48 = vld [vmem:[#allocation7 + $0x160] sm:$0xff]  ;;  %v12910_v50 = vld [vmem:[#allocation7 + $0x28] sm:$0xff] }
 0x959   :  { %13678 = vst [vmem:[#allocation17_spill] sm:$0xff] %v12890_v24  ;;  %4848 = vmatpush.msrb.mxu0 %v12890_v24  ;;  %4865 = vmatpush.msra.mxu1 %v12892_v48  ;;  %v12918_v24 = vld [vmem:[#allocation7 + $0x10] sm:$0xff] }
 0x95a   :  { %13679 = vst [vmem:[#allocation34_spill] sm:$0xff] %v12892_v48  ;;  %v12914_v48 = vld [vmem:[#allocation7 + $0x158] sm:$0xff] }
 0x95b   :  { %13684 = vst [vmem:[#allocation30_spill] sm:$0xff] %v12910_v50 }
 0x95c   :  { %13685 = vst [vmem:[#allocation31_spill] sm:$0xff] %v12914_v48 }
 0x95d   :  { %v12760_v36 = vpop.f32.mrf.mxu2  ;;  %v12762_v2 = vpop.f32.mrf.mxu3  ;;  %13686 = vst [vmem:[#allocation28_spill] sm:$0xff] %v12918_v24 }
 0x95e   :  { %13689 = vst [vmem:[#allocation25_spill] sm:$0xff] %v12926_v1 }
 0x965   :  { %v4474_v43 = vpop.f32.mrf.mxu2  ;;  %v4488_v54 = vpop.f32.mrf.mxu3 }
 0x96d   :  { %v4476_v25 = vpop.f32.mrf.mxu2  ;;  %v4490_v46 = vpop.f32.mrf.mxu3 }
 0x96e   :  { %v4493_v10 = vpack.c.bf16 %v4476_v25, %v4474_v43  ;;  %v4494_v14 = vpack.c.bf16 %v4490_v46, %v4488_v54  ;;  %v12894_v43 = vld [vmem:[#allocation7 + $0x38] sm:$0xff]  ;;  %v12898_v54 = vld [vmem:[#allocation7 + $0x168] sm:$0xff]  ;;  %v12900_v25 = vpop.f32.mrf.mxu0  ;;  %v12902_v46 = vpop.f32.mrf.mxu1 }
 0x96f   :  { %13680 = vst [vmem:[#allocation33_spill] sm:$0xff] %v12894_v43  ;;  %4888 = vmatpush.msrb.mxu2 %v12894_v43  ;;  %4905 = vmatpush.msrb.mxu3 %v12898_v54  ;;  %v12920_v43 = vld [vmem:[#allocation7 + $0x140] sm:$0xff] }
 0x970   :  { %4696 = vmatmul.bf16.vlgmr.msra.gmra.mxu0 %v4493_v10  ;;  %4710 = vmatmul.bf16.vlgmr.msrb.gmra.mxu1 %v4494_v14  ;;  %13681 = vst [vmem:[#allocation24_spill] sm:$0xff] %v12898_v54  ;;  %v12922_v54 = vld [vmem:[#allocation7 + $0x18] sm:$0xff] }
 0x971   :  { %4724 = vmatmul.bf16.vlgmr.msra.gmra.mxu2 %v4493_v10  ;;  %4738 = vmatmul.bf16.vlgmr.msra.gmra.mxu3 %v4494_v14  ;;  %v12906_v10 = vld [vmem:[#allocation7 + $0x20] sm:$0xff]  ;;  %v12908_v14 = vld [vmem:[#allocation7 + $0x150] sm:$0xff]  ;;  %13687 = vst [vmem:[#allocation23_spill] sm:$0xff] %v12920_v43 }
 0x972   :  { %13682 = vst [vmem:[#allocation22_spill] sm:$0xff] %v12906_v10  ;;  %4849 = vmatpush.msrb.mxu0 %v12906_v10  ;;  %4866 = vmatpush.msra.mxu1 %v12908_v14  ;;  %v12938_v10 = vld [vmem:[#allocation7 + $0x138] sm:$0xff] }
 0x973   :  { %13683 = vst [vmem:[#allocation32_spill] sm:$0xff] %v12908_v14  ;;  %4889 = vmatpush.msrb.mxu2 %v12910_v50  ;;  %4906 = vmatpush.msrb.mxu3 %v12914_v48  ;;  %v12930_v14 = vld [vmem:[#allocation7] sm:$0xff]  ;;  %v12932_v50 = vld [vmem:[#allocation7 + $0x130] sm:$0xff]  ;;  %v12934_v48 = vld [vmem:[#allocation7 + $0x8] sm:$0xff] }
 0x974   :  { %13688 = vst [vmem:[#allocation29_spill] sm:$0xff] %v12922_v54  ;;  %4850 = vmatpush.msrb.mxu0 %v12918_v24  ;;  %4867 = vmatpush.msra.mxu1 %v12920_v43  ;;  %v12942_v43 = vld [vmem:[#allocation7 + $0x120] sm:$0xff] }
 0x975   :  { %4890 = vmatpush.msrb.mxu2 %v12922_v54  ;;  %4907 = vmatpush.msrb.mxu3 %v12926_v1  ;;  %13690 = vst [vmem:[#allocation21_spill] sm:$0xff] %v12930_v14  ;;  %v12944_v54 = vld [vmem:[#allocation7 + $0x128] sm:$0xff] }
 0x976   :  { %13691 = vst [vmem:[#allocation26_spill] sm:$0xff] %v12932_v50  ;;  %4851 = vmatpush.msrb.mxu0 %v12930_v14  ;;  %4868 = vmatpush.msra.mxu1 %v12932_v50  ;;  %v12949_v14 = vld [vmem:[#allocation7 + $0x110] sm:$0xff]  ;;  %v12951_v50 = vld [vmem:[#allocation7 + $0x118] sm:$0xff] }
 0x977   :  { %13692 = vst [vmem:[#allocation27_spill] sm:$0xff] %v12938_v10  ;;  %4891 = vmatpush.msrb.mxu2 %v12934_v48  ;;  %4908 = vmatpush.msrb.mxu3 %v12938_v10  ;;  %v12957_v10 = vld [vmem:[#allocation7 + $0x108] sm:$0xff] }
 0x978   :  { %4869 = vmatpush.msra.mxu1 %v12942_v43  ;;  %4942 = vmatpush.msra.mxu0 %v12749_v42  ;;  %13693 = vst [vmem:[#allocation35_spill] sm:$0xff] %v12949_v14  ;;  %v3914_v42 = vadd.f32 %v12724_v31, %v12745_v62  ;;  %v4748_v31 = vld [vmem:[%s13453_s12] sm:$0x3]  ;;  %s13718_s12 = sld [smem:[#allocation70_spill]] }
 0x979   :  { %4909 = vmatpush.msrb.mxu3 %v12944_v54  ;;  %4982 = vmatpush.msra.mxu2 %v12751_v39 }
 0x97a   :  { %4870 = vmatpush.msra.mxu1 %v12949_v14  ;;  %4943 = vmatpush.msra.mxu0 %v12764_v27  ;;  %v4116_v39 = vadd.f32 %v12786_v17, %v3914_v42  ;;  %v4420_v27 = vadd.f32 %v12762_v2, %v12760_v36 }
 0x97b   :  { %4910 = vmatpush.msrb.mxu3 %v12951_v50  ;;  %4983 = vmatpush.msra.mxu2 %v12766_v5 }
 0x97c   :  { %4871 = vmatpush.msra.mxu1 %v12953_v52  ;;  %4944 = vmatpush.msra.mxu0 %v12770_v7  ;;  %v4130_v62 = vadd.f32 %v12734_v51, %v4116_v39  ;;  %v3942_v51 = vadd.f32 %v12728_v58, %v12726_v45  ;;  %v13709_v39 = vld [vmem:[#allocation21_spill] sm:$0xff] }
 0x97d   :  { %4911 = vmatpush.msrb.mxu3 %v12957_v10  ;;  %4984 = vmatpush.msra.mxu2 %v12772_v19 }
 0x97e   :  { %4945 = vmatpush.msra.mxu0 %v12776_v53  ;;  %4962 = vmatpush.msrb.mxu1 %v12778_v8  ;;  %v4452_v19 = vadd.f32 %v4420_v27, %v4130_v62  ;;  %v4750_v8 = vperm.slane %v4748_v31, 0  ;;  %v13710_v27 = vld [vmem:[#allocation26_spill] sm:$0xff] }
 0x97f   :  { %4985 = vmatpush.msra.mxu2 %v12780_v60  ;;  %5002 = vmatpush.msra.mxu3 %v12784_v9  ;;  %v4446_v9 = vadd.f32 %v12838_v11, %v12836_v59  ;;  %v13695_v59 = vld [vmem:[#allocation18_spill] sm:$0xff]  ;;  %v13696_v11 = vld [vmem:[#allocation20_spill] sm:$0xff] }
 0x980   :  { %4946 = vmatpush.msra.mxu0 %v12790_v57  ;;  %4963 = vmatpush.msrb.mxu1 %v12792_v61  ;;  %v4448_v57 = vadd.f32 %v12902_v46, %v12900_v25  ;;  %v13707_v46 = vld [vmem:[#allocation29_spill] sm:$0xff] }
 0x981   :  { %4986 = vmatpush.msra.mxu2 %v12794_v56  ;;  %5003 = vmatpush.msra.mxu3 %v12798_v0 }
 0x982   :  { %4947 = vmatpush.msra.mxu0 %v12802_v29  ;;  %4964 = vmatpush.msrb.mxu1 %v12804_v37 }
 0x983   :  { %4987 = vmatpush.msra.mxu2 %v12806_v26  ;;  %5004 = vmatpush.msra.mxu3 %v12810_v3 }
 0x984   :  { %4948 = vmatpush.msra.mxu0 %v12814_v34  ;;  %4965 = vmatpush.msrb.mxu1 %v12816_v55  ;;  %v4751_v34 = vperm.slane %v4748_v31, 1  ;;  %v13711_v31 = vld [vmem:[#allocation27_spill] sm:$0xff] }
 0x985   :  { %4988 = vmatpush.msra.mxu2 %v12818_v4  ;;  %5005 = vmatpush.msra.mxu3 %v12822_v40 }
 0x986   :  { %4949 = vmatpush.msra.mxu0 %v12826_v22  ;;  %4966 = vmatpush.msrb.mxu1 %v12828_v16 }
 0x987   :  { %4989 = vmatpush.msra.mxu2 %v12830_v13  ;;  %5006 = vmatpush.msra.mxu3 %v12834_v28  ;;  %v13694_v13 = vld [vmem:[#allocation19_spill] sm:$0xff] }
 0x988   :  { %4950 = vmatpush.msra.mxu0 %v12842_v63  ;;  %4967 = vmatpush.msrb.mxu1 %v12844_v33  ;;  %v13697_v33 = vld [vmem:[#allocation17_spill] sm:$0xff] }
 0x989   :  { %4990 = vmatpush.msra.mxu2 %v12846_v44  ;;  %5007 = vmatpush.msra.mxu3 %v12850_v23  ;;  %v13698_v44 = vld [vmem:[#allocation34_spill] sm:$0xff] }
 0x98a   :  { %4951 = vmatpush.msra.mxu0 %v12854_v41  ;;  %4968 = vmatpush.msrb.mxu1 %v12856_v20  ;;  %v13699_v41 = vld [vmem:[#allocation33_spill] sm:$0xff]  ;;  %v13700_v20 = vld [vmem:[#allocation24_spill] sm:$0xff] }
 0x98b   :  { %4991 = vmatpush.msra.mxu2 %v12858_v21  ;;  %5008 = vmatpush.msra.mxu3 %v12862_v6  ;;  %v13701_v6 = vld [vmem:[#allocation22_spill] sm:$0xff] }
 0x98c   :  { %4952 = vmatpush.msra.mxu0 %v12866_v12  ;;  %4969 = vmatpush.msrb.mxu1 %v12868_v32  ;;  %v13702_v12 = vld [vmem:[#allocation32_spill] sm:$0xff] }
 0x98d   :  { %4992 = vmatpush.msra.mxu2 %v12870_v15  ;;  %5009 = vmatpush.msra.mxu3 %v12874_v18  ;;  %v13703_v15 = vld [vmem:[#allocation30_spill] sm:$0xff]  ;;  %v13704_v18 = vld [vmem:[#allocation31_spill] sm:$0xff] }
 0x98e   :  { %4953 = vmatpush.msra.mxu0 %v12878_v38  ;;  %4970 = vmatpush.msrb.mxu1 %v13694_v13 }
 0x98f   :  { %4993 = vmatpush.msra.mxu2 %v13695_v59  ;;  %5010 = vmatpush.msra.mxu3 %v13696_v11 }
 0x990   :  { %4954 = vmatpush.msra.mxu0 %v13697_v33  ;;  %4971 = vmatpush.msrb.mxu1 %v13698_v44 }
 0x991   :  { %4994 = vmatpush.msra.mxu2 %v13699_v41  ;;  %5011 = vmatpush.msra.mxu3 %v13700_v20 }
 0x992   :  { %4955 = vmatpush.msra.mxu0 %v13701_v6  ;;  %4972 = vmatpush.msrb.mxu1 %v13702_v12 }
 0x993   :  { %4995 = vmatpush.msra.mxu2 %v13703_v15  ;;  %5012 = vmatpush.msra.mxu3 %v13704_v18 }
 0x995   :  { %4996 = vmatpush.msra.mxu2 %v13707_v46 }
 0x997   :  { %4997 = vmatpush.msra.mxu2 %v12934_v48 }
 0x9ed   :  { %v4697_v1 = vpop.f32.mrf.mxu0  ;;  %v4711_v24 = vpop.f32.mrf.mxu1 }
 0x9ee   :  { %v4712_v14 = vadd.f32 %v4711_v24, %v4697_v1  ;;  %v13705_v1 = vld [vmem:[#allocation28_spill] sm:$0xff]  ;;  %v13706_v24 = vld [vmem:[#allocation23_spill] sm:$0xff] }
 0x9ef   :  { %4956 = vmatpush.msra.mxu0 %v13705_v1  ;;  %4973 = vmatpush.msrb.mxu1 %v13706_v24 }
 0x9f0   :  { %v4744_v53 = vadd.f32 %v4712_v14, %v12758_v49  ;;  %v4144_v49 = vadd.f32 %v12736_v30, %v3942_v51  ;;  %v4451_v30 = vadd.f32 %v4446_v9, %v12732_v35  ;;  %v13708_v14 = vld [vmem:[#allocation25_spill] sm:$0xff] }
 0x9f1   :  { %5013 = vmatpush.msra.mxu3 %v13708_v14  ;;  %4957 = vmatpush.msra.mxu0 %v13709_v39 }
 0x9f2   :  { %v12999_v45 = vadd.f32 %v4750_v8, %v4744_v53  ;;  %v4158_v56 = vadd.f32 %v12747_v47, %v4144_v49  ;;  %4974 = vmatpush.msrb.mxu1 %v13710_v27 }
 0x9f3   :  { %5014 = vmatpush.msra.mxu3 %v13711_v31 }
 0x9f4   :  { %v4725_v5 = vpop.f32.mrf.mxu2  ;;  %v4739_v7 = vpop.f32.mrf.mxu3  ;;  %v4453_v26 = vadd.f32 %v4448_v57, %v4158_v56  ;;  %4975 = vmatpush.msrb.mxu1 %v12942_v43 }
 0x9f5   :  { %v4699_v36 = vpop.f32.mrf.mxu0  ;;  %v4713_v2 = vpop.f32.mrf.mxu1  ;;  %v4740_v61 = vadd.f32 %v4739_v7, %v4725_v5  ;;  %5015 = vmatpush.msra.mxu3 %v12944_v54  ;;  %v13712_v7 = vld [vmem:[#allocation35_spill] sm:$0xff] }
 0x9f6   :  { %v4714_v60 = vadd.f32 %v4713_v2, %v4699_v36  ;;  %4976 = vmatpush.msrb.mxu1 %v13712_v7 }
 0x9f7   :  { %v4745_v3 = vadd.f32 %v4740_v61, %v4451_v30  ;;  %5016 = vmatpush.msra.mxu3 %v12951_v50 }
 0x9f8   :  { %v4746_v17 = vadd.f32 %v4714_v60, %v4452_v19  ;;  %4977 = vmatpush.msrb.mxu1 %v12953_v52 }
 0x9f9   :  { %v4755_v40 = vadd.f32 %v4751_v34, %v4745_v3  ;;  %5017 = vmatpush.msra.mxu3 %v12957_v10 }
 0x9fa   :  { %v13001_v58 = vadd.f32 %v4750_v8, %v4746_v17 }
 0x9fc   :  { %v4822_v0 = vadd.f32 %v13001_v58, %v12999_v45  ;;  %v4727_v29 = vpop.f32.mrf.mxu2  ;;  %v4741_v37 = vpop.f32.mrf.mxu3 }
 0x9fd   :  { %v4742_v55 = vadd.f32 %v4741_v37, %v4727_v29 }
 0x9fe   :  { %v4823_v35 = vrot.slane %v4822_v0, 4 }
 0x9ff   :  { %v4747_v47 = vadd.f32 %v4742_v55, %v4453_v26 }
 0xa00   :  { %v4824_v4 = vadd.f32 %v4823_v35, %v4822_v0 }
 0xa01   :  { %v4757_v22 = vadd.f32 %v4751_v34, %v4747_v47 }
 0xa02   :  { %v4825_v16 = vrot.slane %v4824_v4, 2 }
 0xa03   :  { %v4829_v28 = vadd.f32 %v4757_v22, %v4755_v40 }
 0xa04   :  { %v4826_v63 = vadd.f32 %v4825_v16, %v4824_v4 }
 0xa05   :  { %v4830_v23 = vrot.slane %v4829_v28, 4 }
 0xa06   :  { %v4827_v21 = vrot.slane %v4826_v63, 1 }
 0xa07   :  { %v4831_v32 = vadd.f32 %v4830_v23, %v4829_v28 }
 0xa08   :  { %v4828_v38 = vadd.f32 %v4827_v21, %v4826_v63 }
 0xa09   :  { %v4832_v25 = vrot.slane %v4831_v32, 2 }
 0xa0a   :  { %4852 = vmatmul.f32.vlgmr.msrb.gmra.mxu0 %v4828_v38  ;;  %4892 = vmatmul.f32.vlgmr.msrb.gmra.mxu2 %v4828_v38 }
 0xa0b   :  { %v4833_v42 = vadd.f32 %v4832_v25, %v4831_v32  ;;  %v5048_v32 = vld [vmem:[%s13454_s13] sm:$0x3] }
 0xa0c   :  { %v5050_v1 = vperm.slane %v5048_v32, 0 }
 0xa0d   :  { %v4834_v62 = vrot.slane %v4833_v42, 1 }
 0xa0f   :  { %v4835_v5 = vadd.f32 %v4834_v62, %v4833_v42  ;;  %v5062_v42 = vld [vmem:[%s13455_s14] sm:$0x3]  ;;  %v5051_v62 = vperm.slane %v5048_v32, 1  ;;  %v10311_v32 = vld [vmem:[#allocation9 + $0x1e4] sm:$0xf] }
 0xa11   :  { %4872 = vmatmul.f32.vlgmr.msra.gmra.mxu1 %v4835_v5  ;;  %4912 = vmatmul.f32.vlgmr.msrb.gmra.mxu3 %v4835_v5  ;;  %v5064_v5 = vperm.slane %v5062_v42, 0 }
 0xa87   :  { %v4853_v36 = vpop.f32.mrf.mxu0 }
 0xa8d   :  { %v4893_v8 = vpop.f32.mrf.mxu2 }
 0xa8e   :  { %v4873_v48 = vpop.f32.mrf.mxu1 }
 0xa8f   :  { %v4874_v2 = vadd.f32 %v4873_v48, %v4853_v36 }
 0xa91   :  { %v4916_v19 = vmul.f32 0.0078125, %v4874_v2 }
 0xa93   :  { %v4918_v53 = vperm.slane %v4916_v19, 0 }
 0xa94   :  { %v4913_v43 = vpop.f32.mrf.mxu3 }
 0xa95   :  { %v13050_v54 = vsub.f32 %v12999_v45, %v4918_v53  ;;  %v13053_v60 = vsub.f32 %v13001_v58, %v4918_v53  ;;  %v4914_v50 = vadd.f32 %v4913_v43, %v4893_v8  ;;  %v9128_v43 = vld [vmem:[#allocation9 + $0x170] sm:$0xf] }
 0xa97   :  { %v4924_v51 = vmul.f32 %v13050_v54, %v13050_v54  ;;  %v4926_v52 = vmul.f32 %v13053_v60, %v13053_v60  ;;  %v4917_v10 = vmul.f32 0.0078125, %v4914_v50  ;;  %v10298_v50 = vld [vmem:[#allocation9 + $0x174] sm:$0xf0] }
 0xa99   :  { %v4928_v9 = vadd.f32 %v4926_v52, %v4924_v51  ;;  %v4919_v17 = vperm.slane %v4917_v10, 0  ;;  %v10297_v51 = vld [vmem:[#allocation9 + $0x174] sm:$0xf]  ;;  %v9130_v52 = vld [vmem:[#allocation9 + $0x178] sm:$0xf0] }
 0xa9b   :  { %v4929_v49 = vrot.slane %v4928_v9, 4  ;;  %v13059_v57 = vsub.f32 %v4755_v40, %v4919_v17  ;;  %v13061_v61 = vsub.f32 %v4757_v22, %v4919_v17 }
 0xa9d   :  { %v4930_v45 = vadd.f32 %v4929_v49, %v4928_v9  ;;  %v4925_v58 = vmul.f32 %v13059_v57, %v13059_v57  ;;  %v4927_v56 = vmul.f32 %v13061_v61, %v13061_v61  ;;  %v5065_v49 = vperm.slane %v5062_v42, 1  ;;  %v9106_v42 = vld [vmem:[#allocation9 + $0x148] sm:$0xf0] }
 0xa9f   :  { %v4931_v30 = vrot.slane %v4930_v45, 2  ;;  %v4935_v0 = vadd.f32 %v4927_v56, %v4925_v58 }
 0xaa1   :  { %v4932_v29 = vadd.f32 %v4931_v30, %v4930_v45  ;;  %v4936_v37 = vrot.slane %v4935_v0, 4  ;;  %v9133_v30 = vor.u32 %v10297_v51, %v9130_v52  ;;  %v10307_v51 = vld [vmem:[#allocation9 + $0x1c4] sm:$0xf]  ;;  %v9170_v52 = vld [vmem:[#allocation9 + $0x1c8] sm:$0xf0] }
 0xaa3   :  { %v4933_v26 = vrot.slane %v4932_v29, 1  ;;  %v4937_v3 = vadd.f32 %v4936_v37, %v4935_v0  ;;  %v9120_v0 = vld [vmem:[#allocation9 + $0x160] sm:$0xf]  ;;  %v9067_v37 = vld [vmem:[%s13457_s16 + $0x4] sm:$0xf] }
 0xaa5   :  { %v4938_v34 = vrot.slane %v4937_v3, 2  ;;  %v4934_v55 = vadd.f32 %v4933_v26, %v4932_v29 }
 0xaa7   :  { %v4939_v35 = vadd.f32 %v4938_v34, %v4937_v3  ;;  %4958 = vmatmul.f32.vlgmr.msra.gmra.mxu0 %v4934_v55  ;;  %4998 = vmatmul.f32.vlgmr.msra.gmra.mxu2 %v4934_v55  ;;  %v10296_v34 = vld [vmem:[#allocation9 + $0x164] sm:$0xf0]  ;;  %v9122_v55 = vld [vmem:[#allocation9 + $0x168] sm:$0xf0] }
 0xaa9   :  { %v4940_v47 = vrot.slane %v4939_v35, 1 }
 0xaab   :  { %v4941_v4 = vadd.f32 %v4940_v47, %v4939_v35  ;;  %v9192_v35 = vld [vmem:[#allocation9 + $0x1f0] sm:$0xf]  ;;  %v10314_v47 = vld [vmem:[#allocation9 + $0x1f4] sm:$0xf0] }
 0xaad   :  { %4978 = vmatmul.f32.vlgmr.msrb.gmra.mxu1 %v4941_v4  ;;  %5018 = vmatmul.f32.vlgmr.msra.gmra.mxu3 %v4941_v4  ;;  %v10313_v4 = vld [vmem:[#allocation9 + $0x1f4] sm:$0xf] }
 0xb24   :  { %v4959_v40 = vpop.f32.mrf.mxu0 }
 0xb2a   :  { %v4979_v22 = vpop.f32.mrf.mxu1  ;;  %v4999_v59 = vpop.f32.mrf.mxu2 }
 0xb2b   :  { %v4980_v16 = vadd.f32 %v4979_v22, %v4959_v40 }
 0xb2d   :  { %v5022_v13 = vmul.f32 0.0078125, %v4980_v16  ;;  %v9194_v16 = vld [vmem:[#allocation9 + $0x1f8] sm:$0xf0] }
 0xb2f   :  { %v5024_v28 = vmax.f32 %v5022_v13, 0.0  ;;  %v9121_v13 = vor.u32 %v10296_v34, %v9120_v0  ;;  %v10305_v0 = vld [vmem:[#allocation9 + $0x1b4] sm:$0xf]  ;;  %v10286_v34 = vld [vmem:[#allocation9 + $0x114] sm:$0xf0] }
 0xb30   :  { %v5019_v11 = vpop.f32.mrf.mxu3 }
 0xb31   :  { %v5026_v63 = vadd.f32 1e-05, %v5024_v28  ;;  %v5020_v33 = vadd.f32 %v5019_v11, %v4999_v59 }
 0xb33   :  { %10465 = vrsqrt.f32 %v5026_v63  ;;  %v5023_v44 = vmul.f32 0.0078125, %v5020_v33  ;;  %vm5034_vm9 = vweird.f32 %v5026_v63  ;;  %v10294_v33 = vld [vmem:[#allocation9 + $0x154] sm:$0xf0] }
 0xb35   :  { %v5025_v23 = vmax.f32 %v5023_v44, 0.0  ;;  %v9193_v44 = vor.u32 %v10314_v47, %v9192_v35  ;;  %v10285_v35 = vld [vmem:[#allocation9 + $0x114] sm:$0xf]  ;;  %v9082_v47 = vld [vmem:[#allocation9 + $0x118] sm:$0xf0] }
 0xb37   :  { %v5027_v41 = vadd.f32 1e-05, %v5025_v23  ;;  %v9197_v23 = vor.u32 %v10313_v4, %v9194_v16  ;;  %v9152_v4 = vld [vmem:[#allocation9 + $0x1a0] sm:$0xf]  ;;  %v9154_v16 = vld [vmem:[#allocation9 + $0x1a8] sm:$0xf0] }
 0xb39   :  { %v10466_v20 = vpop.eup %10465  ;;  %10467 = vrsqrt.f32 %v5027_v41  ;;  %vm5044_vm12 = vweird.f32 %v5027_v41 }
 0xb3a   :  { %v5029_v21 = vmul.f32 %v10466_v20, %v5026_v63  ;;  %vm5035_vm8 = vweird.f32 %v10466_v20  ;;  %v9112_v63 = vld [vmem:[#allocation9 + $0x150] sm:$0xf] }
 0xb3b   :  { %vm5036_vm10 = vmor %vm5034_vm9, %vm5035_vm8 }
 0xb3c   :  { %v5030_v6 = vmul.f32 %v10466_v20, %v5029_v21  ;;  %v9184_v21 = vld [vmem:[#allocation9 + $0x1e0] sm:$0xf] }
 0xb3e   :  { %v5031_v12 = vmul.f32 0.5, %v5030_v6 }
 0xb3f   :  { %v10468_v15 = vpop.eup %10467 }
 0xb40   :  { %v5032_v18 = vsub.f32 1.5, %v5031_v12  ;;  %v5039_v38 = vmul.f32 %v10468_v15, %v5027_v41  ;;  %vm5045_vm11 = vweird.f32 %v10468_v15  ;;  %v10293_v41 = vld [vmem:[#allocation9 + $0x154] sm:$0xf]  ;;  %v10312_v12 = vld [vmem:[#allocation9 + $0x1e4] sm:$0xf0] }
 0xb41   :  { %vm5046_vm13 = vmor %vm5044_vm12, %vm5045_vm11 }
 0xb42   :  { %v5033_v24 = vmul.f32 %v10466_v20, %v5032_v18  ;;  %v5040_v25 = vmul.f32 %v10468_v15, %v5039_v38  ;;  %v9113_v18 = vor.u32 %v10294_v33, %v9112_v63  ;;  %v10283_v63 = vld [vmem:[#allocation9 + $0x104] sm:$0xf] }
 0xb44   :  { %v5037_v46 = vsel %vm5036_vm10, %v10466_v20, %v5033_v24  ;;  %v5041_v14 = vmul.f32 0.5, %v5040_v25  ;;  %v9114_v20 = vld [vmem:[#allocation9 + $0x158] sm:$0xf0]  ;;  %v10292_v24 = vld [vmem:[#allocation9 + $0x144] sm:$0xf0]  ;;  %v9185_v25 = vor.u32 %v10312_v12, %v9184_v21 }
 0xb45   :  { %v5054_v39 = vmul.f32 %v5050_v1, %v5037_v46  ;;  %v9117_v38 = vor.u32 %v10293_v41, %v9114_v20  ;;  %v9104_v1 = vld [vmem:[#allocation9 + $0x140] sm:$0xf]  ;;  %v9256_v41 = vld [vmem:[#allocation9 + $0x70] sm:$0xf]  ;;  %v10266_v20 = vld [vmem:[#allocation9 + $0x74] sm:$0xf0] }
 0xb46   :  { %v5042_v27 = vsub.f32 1.5, %v5041_v14  ;;  %v10291_v14 = vld [vmem:[#allocation9 + $0x144] sm:$0xf]  ;;  %v10265_v21 = vld [vmem:[#allocation9 + $0x74] sm:$0xf] }
 0xb47   :  { %v5056_v31 = vperm.slane %v5054_v39, 0  ;;  %v9176_v39 = vld [vmem:[#allocation9 + $0x1d0] sm:$0xf]  ;;  %v9258_v12 = vld [vmem:[#allocation9 + $0x78] sm:$0xf0] }
 0xb48   :  { %v5043_v7 = vmul.f32 %v10468_v15, %v5042_v27  ;;  %v10310_v27 = vld [vmem:[#allocation9 + $0x1d4] sm:$0xf0] }
 0xb49   :  { %v5058_v36 = vmul.f32 %v5056_v31, %v13050_v54  ;;  %v5060_v48 = vmul.f32 %v5056_v31, %v13053_v60  ;;  %v9129_v60 = vor.u32 %v10298_v50, %v9128_v43  ;;  %v10309_v31 = vld [vmem:[#allocation9 + $0x1d4] sm:$0xf]  ;;  %v9168_v43 = vld [vmem:[#allocation9 + $0x1c0] sm:$0xf]  ;;  %v10308_v50 = vld [vmem:[#allocation9 + $0x1c4] sm:$0xf0] }
 0xb4a   :  { %v5047_v2 = vsel %vm5046_vm13, %v10468_v15, %v5043_v7  ;;  %v9186_v15 = vld [vmem:[#allocation9 + $0x1e8] sm:$0xf0]  ;;  %v9109_v7 = vor.u32 %v10291_v14, %v9106_v42  ;;  %v9248_v14 = vld [vmem:[#allocation9 + $0x60] sm:$0xf]  ;;  %v10264_v42 = vld [vmem:[#allocation9 + $0x64] sm:$0xf0] }
 0xb4b   :  { %v5055_v19 = vmul.f32 %v5051_v62, %v5047_v2  ;;  %v5068_v53 = vadd.f32 %v5064_v5, %v5058_v36  ;;  %v5070_v8 = vadd.f32 %v5064_v5, %v5060_v48  ;;  %v9189_v46 = vor.u32 %v10311_v32, %v9186_v15  ;;  %v9178_v62 = vld [vmem:[#allocation9 + $0x1d8] sm:$0xf0]  ;;  %v9096_v36 = vld [vmem:[#allocation9 + $0x130] sm:$0xf]  ;;  %v10290_v48 = vld [vmem:[#allocation9 + $0x134] sm:$0xf0] }
 0xb4c   :  { %v9105_v5 = vor.u32 %v10292_v24, %v9104_v1  ;;  %v9177_v2 = vor.u32 %v10310_v27, %v9176_v39  ;;  %v9144_v32 = vld [vmem:[#allocation9 + $0x190] sm:$0xf]  ;;  %v10302_v15 = vld [vmem:[#allocation9 + $0x194] sm:$0xf0]  ;;  %v10263_v39 = vld [vmem:[#allocation9 + $0x64] sm:$0xf] }
 0xb4d   :  { %v5057_v10 = vperm.slane %v5055_v19, 0  ;;  %v5072_v9 = vmul.f32 0.2, %v5068_v53  ;;  %v5074_v17 = vmul.f32 0.2, %v5070_v8  ;;  %v9181_v19 = vor.u32 %v10309_v31, %v9178_v62 }
 0xb4e   :  { %v9145_v27 = vor.u32 %v10302_v15, %v9144_v32  ;;  %v9250_v62 = vld [vmem:[#allocation9 + $0x68] sm:$0xf0]  ;;  %v9216_v32 = vld [vmem:[#allocation9 + $0x20] sm:$0xf]  ;;  %v10256_v15 = vld [vmem:[#allocation9 + $0x24] sm:$0xf0] }
 0xb4f   :  { %v5059_v45 = vmul.f32 %v5057_v10, %v13059_v57  ;;  %v5061_v58 = vmul.f32 %v5057_v10, %v13061_v61  ;;  %v5076_v56 = vmax.f32 %v5068_v53, %v5072_v9  ;;  %v5078_v54 = vmax.f32 %v5070_v8, %v5074_v17  ;;  %v5082_v57 = vld [vmem:[%s13457_s16] sm:$0xf]  ;;  %v10295_v61 = vld [vmem:[#allocation9 + $0x164] sm:$0xf]  ;;  %v10289_v53 = vld [vmem:[#allocation9 + $0x134] sm:$0xf] }
 0xb50   :  { %v9125_v28 = vor.u32 %v10295_v61, %v9122_v55  ;;  %v9098_v8 = vld [vmem:[#allocation9 + $0x138] sm:$0xf0]  ;;  %v9097_v10 = vor.u32 %v10290_v48, %v9096_v36  ;;  %v9088_v17 = vld [vmem:[#allocation9 + $0x120] sm:$0xf]  ;;  %v10299_v36 = vld [vmem:[#allocation9 + $0x184] sm:$0xf] }
 0xb51   :  { %v13077_v29 = vpack.c.bf16 %v5078_v54, %v5076_v56  ;;  %v5069_v26 = vadd.f32 %v5065_v49, %v5059_v45  ;;  %v5071_v3 = vadd.f32 %v5065_v49, %v5061_v58  ;;  %v9101_v9 = vor.u32 %v10289_v53, %v9098_v8  ;;  %v10288_v49 = vld [vmem:[#allocation9 + $0x124] sm:$0xf0]  ;;  %v10287_v56 = vld [vmem:[#allocation9 + $0x124] sm:$0xf]  ;;  %v9090_v54 = vld [vmem:[#allocation9 + $0x128] sm:$0xf0] }
 0xb52   :  { %v9169_v45 = vor.u32 %v10308_v50, %v9168_v43  ;;  %v9173_v58 = vor.u32 %v10307_v51, %v9170_v52  ;;  %v9138_v48 = vld [vmem:[#allocation9 + $0x188] sm:$0xf0]  ;;  %v10281_v53 = vld [vmem:[#allocation9 + $0xf4] sm:$0xf]  ;;  %v9322_v8 = vld [vmem:[#allocation9 + $0xf8] sm:$0xf0]  ;;  %v9249_v43 = vor.u32 %v10264_v42, %v9248_v14  ;;  %v9253_v50 = vor.u32 %v10263_v39, %v9250_v62 }
 0xb53   :  { %5094 = vmatpush.bf16.msrb.mxu0 %v13077_v29  ;;  %5159 = vmatpush.bf16.msrb.mxu2 %v13077_v29  ;;  %v5073_v40 = vmul.f32 0.2, %v5069_v26  ;;  %v5075_v22 = vmul.f32 0.2, %v5071_v3  ;;  %v9240_v51 = vld [vmem:[#allocation9 + $0x50] sm:$0xf]  ;;  %v9217_v39 = vor.u32 %v10256_v15, %v9216_v32 }
 0xb54   :  { %v10273_v14 = vld [vmem:[#allocation9 + $0xb4] sm:$0xf]  ;;  %v9290_v42 = vld [vmem:[#allocation9 + $0xb8] sm:$0xf0]  ;;  %v10254_v62 = vld [vmem:[#allocation9 + $0x14] sm:$0xf0] }
 0xb55   :  { %v5077_v59 = vmax.f32 %v5069_v26, %v5073_v40  ;;  %v5079_v11 = vmax.f32 %v5071_v3, %v5075_v22  ;;  %v9089_v26 = vor.u32 %v10288_v49, %v9088_v17  ;;  %v9093_v3 = vor.u32 %v10287_v56, %v9090_v54  ;;  %v10304_v40 = vld [vmem:[#allocation9 + $0x1a4] sm:$0xf0]  ;;  %v10303_v22 = vld [vmem:[#allocation9 + $0x1a4] sm:$0xf]  ;;  %v10261_v17 = vld [vmem:[#allocation9 + $0x54] sm:$0xf] }
 0xb56   :  { %9068 = vmatmul.msk.bf16.vlgmr.msrb.gmra.mxu2 %vm5083_vm14, %v9067_v37  ;;  %9065 = vmatmul.msk.bf16.vlgmr.msrb.gmra.mxu0 %vm5083_vm14, %v5082_v57  ;;  %v9153_v33 = vor.u32 %v10304_v40, %v9152_v4  ;;  %v9242_v49 = vld [vmem:[#allocation9 + $0x58] sm:$0xf0]  ;;  %v9312_v56 = vld [vmem:[#allocation9 + $0xe0] sm:$0xf]  ;;  %v10280_v54 = vld [vmem:[#allocation9 + $0xe4] sm:$0xf0] }
 0xb57   :  { %5373 = vmatpush.bf16.msra.mxu0 %v9129_v60  ;;  %5399 = vmatpush.bf16.msra.mxu2 %v9133_v30  ;;  %v13089_v6 = vpack.c.bf16 %v5079_v11, %v5077_v59  ;;  %v9160_v60 = vld [vmem:[#allocation9 + $0x1b0] sm:$0xf]  ;;  %v10306_v30 = vld [vmem:[#allocation9 + $0x1b4] sm:$0xf0]  ;;  %v9072_v59 = vld [vmem:[#allocation9 + $0x100] sm:$0xf] }
 0xb58   :  { %v9161_v61 = vor.u32 %v10306_v30, %v9160_v60  ;;  %v10284_v11 = vld [vmem:[#allocation9 + $0x104] sm:$0xf0]  ;;  %v10279_v60 = vld [vmem:[#allocation9 + $0xe4] sm:$0xf]  ;;  %v9314_v30 = vld [vmem:[#allocation9 + $0xe8] sm:$0xf0] }
 0xb59   :  { %5107 = vmatpush.bf16.msra.mxu1 %v13089_v6  ;;  %5172 = vmatpush.bf16.msrb.mxu3 %v13089_v6  ;;  %v9073_v1 = vor.u32 %v10284_v11, %v9072_v59  ;;  %v10277_v4 = vld [vmem:[#allocation9 + $0xd4] sm:$0xf]  ;;  %v9306_v40 = vld [vmem:[#allocation9 + $0xd8] sm:$0xf0]  ;;  %v9443_v32 = vld [vmem:[#allocation9 + $0x2e0] sm:$0xf] }
 0xb5a   :  { %v10257_v59 = vld [vmem:[#allocation9 + $0x34] sm:$0xf]  ;;  %v9226_v11 = vld [vmem:[#allocation9 + $0x38] sm:$0xf0]  ;;  %v10344_v15 = vld [vmem:[#allocation9 + $0x2e4] sm:$0xf0] }
 0xb5b   :  { %5374 = vmatpush.bf16.msra.mxu0 %v9121_v13  ;;  %5400 = vmatpush.bf16.msra.mxu2 %v9125_v28  ;;  %v9085_v28 = vor.u32 %v10285_v35, %v9082_v47  ;;  %v9304_v35 = vld [vmem:[#allocation9 + $0xd0] sm:$0xf]  ;;  %v10278_v47 = vld [vmem:[#allocation9 + $0xd4] sm:$0xf0] }
 0xb5c   :  { %9069 = vmatmul.msk.bf16.vlgmr.msrb.gmra.mxu3 %vm5083_vm14, %v9067_v37  ;;  %9066 = vmatmul.msk.bf16.vlgmr.msra.gmra.mxu1 %vm5083_vm14, %v5082_v57  ;;  %v9162_v37 = vld [vmem:[#allocation9 + $0x1b8] sm:$0xf0]  ;;  %v9080_v57 = vld [vmem:[#allocation9 + $0x110] sm:$0xf] }
 0xb5d   :  { %5386 = vmatpush.bf16.msrb.mxu1 %v9193_v44  ;;  %5412 = vmatpush.bf16.msra.mxu3 %v9197_v23  ;;  %v9165_v55 = vor.u32 %v10305_v0, %v9162_v37  ;;  %v9081_v13 = vor.u32 %v10286_v34, %v9080_v57  ;;  %v9157_v44 = vor.u32 %v10303_v22, %v9154_v16  ;;  %v9074_v23 = vld [vmem:[#allocation9 + $0x108] sm:$0xf0]  ;;  %v10259_v57 = vld [vmem:[#allocation9 + $0x44] sm:$0xf] }
 0xb5e   :  { %v9077_v24 = vor.u32 %v10283_v63, %v9074_v23  ;;  %v9245_v37 = vor.u32 %v10261_v17, %v9242_v49  ;;  %v9234_v34 = vld [vmem:[#allocation9 + $0x48] sm:$0xf0]  ;;  %v9305_v63 = vor.u32 %v10278_v47, %v9304_v35  ;;  %v10276_v23 = vld [vmem:[#allocation9 + $0xc4] sm:$0xf0]  ;;  %v10251_v17 = vld [vmem:[#allocation9 + $0x4] sm:$0xf] }
 0xb5f   :  { %5375 = vmatpush.bf16.msra.mxu0 %v9113_v18  ;;  %5401 = vmatpush.bf16.msra.mxu2 %v9117_v38  ;;  %v10301_v18 = vld [vmem:[#allocation9 + $0x194] sm:$0xf]  ;;  %v9146_v38 = vld [vmem:[#allocation9 + $0x198] sm:$0xf0]  ;;  %v9237_v16 = vor.u32 %v10259_v57, %v9234_v34  ;;  %v10267_v57 = vld [vmem:[#allocation9 + $0x84] sm:$0xf] }
 0xb60   :  { %v9149_v31 = vor.u32 %v10301_v18, %v9146_v38  ;;  %v10255_v18 = vld [vmem:[#allocation9 + $0x24] sm:$0xf]  ;;  %v9218_v38 = vld [vmem:[#allocation9 + $0x28] sm:$0xf0]  ;;  %v9387_v47 = vld [vmem:[#allocation9 + $0x270] sm:$0xf] }
 0xb61   :  { %5387 = vmatpush.bf16.msrb.mxu1 %v9185_v25  ;;  %5413 = vmatpush.bf16.msra.mxu3 %v9189_v46  ;;  %v9257_v25 = vor.u32 %v10266_v20, %v9256_v41  ;;  %v9261_v46 = vor.u32 %v10265_v21, %v9258_v12  ;;  %v10275_v41 = vld [vmem:[#allocation9 + $0xc4] sm:$0xf]  ;;  %v9298_v20 = vld [vmem:[#allocation9 + $0xc8] sm:$0xf0]  ;;  %v9229_v12 = vor.u32 %v10257_v59, %v9226_v11  ;;  %v10328_v59 = vld [vmem:[#allocation9 + $0x264] sm:$0xf0] }
 0xb63   :  { %5376 = vmatpush.bf16.msra.mxu0 %v9105_v5  ;;  %5402 = vmatpush.bf16.msra.mxu2 %v9109_v7  ;;  %v9136_v5 = vld [vmem:[#allocation9 + $0x180] sm:$0xf]  ;;  %v10300_v7 = vld [vmem:[#allocation9 + $0x184] sm:$0xf0] }
 0xb64   :  { %v9137_v52 = vor.u32 %v10300_v7, %v9136_v5  ;;  %v10253_v5 = vld [vmem:[#allocation9 + $0x14] sm:$0xf]  ;;  %v9210_v7 = vld [vmem:[#allocation9 + $0x18] sm:$0xf0] }
 0xb65   :  { %5388 = vmatpush.bf16.msrb.mxu1 %v9177_v2  ;;  %5414 = vmatpush.bf16.msra.mxu3 %v9181_v19  ;;  %v9320_v2 = vld [vmem:[#allocation9 + $0xf0] sm:$0xf]  ;;  %v10282_v19 = vld [vmem:[#allocation9 + $0xf4] sm:$0xf0] }
 0xb67   :  { %5377 = vmatpush.bf16.msra.mxu0 %v9097_v10  ;;  %5403 = vmatpush.bf16.msra.mxu2 %v9101_v9  ;;  %v9141_v10 = vor.u32 %v10299_v36, %v9138_v48  ;;  %v10262_v9 = vld [vmem:[#allocation9 + $0x54] sm:$0xf0]  ;;  %v9293_v48 = vor.u32 %v10273_v14, %v9290_v42  ;;  %v9435_v14 = vld [vmem:[#allocation9 + $0x2d0] sm:$0xf] }
 0xb68   :  { %v9241_v0 = vor.u32 %v10262_v9, %v9240_v51  ;;  %v9282_v51 = vld [vmem:[#allocation9 + $0xa8] sm:$0xf0]  ;;  %v10252_v9 = vld [vmem:[#allocation9 + $0x4] sm:$0xf0]  ;;  %v10342_v42 = vld [vmem:[#allocation9 + $0x2d4] sm:$0xf0] }
 0xb69   :  { %5389 = vmatpush.bf16.msrb.mxu1 %v9169_v45  ;;  %5415 = vmatpush.bf16.msra.mxu3 %v9173_v58  ;;  %v9321_v45 = vor.u32 %v10282_v19, %v9320_v2  ;;  %v9325_v58 = vor.u32 %v10281_v53, %v9322_v8  ;;  %v9213_v19 = vor.u32 %v10253_v5, %v9210_v7  ;;  %v9280_v53 = vld [vmem:[#allocation9 + $0xa0] sm:$0xf]  ;;  %v10272_v8 = vld [vmem:[#allocation9 + $0xa4] sm:$0xf0] }
 0xb6a   :  { %v9427_v7 = vld [vmem:[#allocation9 + $0x2c0] sm:$0xf] }
 0xb6b   :  { %5378 = vmatpush.bf16.msra.mxu0 %v9089_v26  ;;  %5404 = vmatpush.bf16.msra.mxu2 %v9093_v3  ;;  %v9232_v26 = vld [vmem:[#allocation9 + $0x40] sm:$0xf]  ;;  %v10260_v3 = vld [vmem:[#allocation9 + $0x44] sm:$0xf0] }
 0xb6c   :  { %v9233_v22 = vor.u32 %v10260_v3, %v9232_v26  ;;  %v9264_v26 = vld [vmem:[#allocation9 + $0x80] sm:$0xf]  ;;  %v10268_v3 = vld [vmem:[#allocation9 + $0x84] sm:$0xf0] }
 0xb6d   :  { %5390 = vmatpush.bf16.msrb.mxu1 %v9161_v61  ;;  %5416 = vmatpush.bf16.msra.mxu3 %v9165_v55  ;;  %v9313_v61 = vor.u32 %v10280_v54, %v9312_v56  ;;  %v9317_v55 = vor.u32 %v10279_v60, %v9314_v30  ;;  %v9272_v56 = vld [vmem:[#allocation9 + $0x90] sm:$0xf]  ;;  %v10270_v54 = vld [vmem:[#allocation9 + $0x94] sm:$0xf0]  ;;  %v10269_v60 = vld [vmem:[#allocation9 + $0x94] sm:$0xf]  ;;  %v9265_v34 = vor.u32 %v10268_v3, %v9264_v26 }
 0xb6e   :  { %v9273_v30 = vor.u32 %v10270_v54, %v9272_v56  ;;  %v9331_v56 = vld [vmem:[#allocation9 + $0x200] sm:$0xf]  ;;  %v10316_v54 = vld [vmem:[#allocation9 + $0x204] sm:$0xf0] }
 0xb6f   :  { %5379 = vmatpush.bf16.msra.mxu0 %v9081_v13  ;;  %5405 = vmatpush.bf16.msra.mxu2 %v9085_v28  ;;  %v9224_v13 = vld [vmem:[#allocation9 + $0x30] sm:$0xf]  ;;  %v10258_v28 = vld [vmem:[#allocation9 + $0x34] sm:$0xf0]  ;;  %v9395_v3 = vld [vmem:[#allocation9 + $0x280] sm:$0xf] }
 0xb70   :  { %v9225_v21 = vor.u32 %v10258_v28, %v9224_v13  ;;  %v9379_v28 = vld [vmem:[#allocation9 + $0x260] sm:$0xf] }
 0xb71   :  { %5391 = vmatpush.bf16.msrb.mxu1 %v9153_v33  ;;  %5417 = vmatpush.bf16.msra.mxu3 %v9157_v44  ;;  %v9309_v33 = vor.u32 %v10277_v4, %v9306_v40  ;;  %v9296_v44 = vld [vmem:[#allocation9 + $0xc0] sm:$0xf]  ;;  %v10330_v4 = vld [vmem:[#allocation9 + $0x274] sm:$0xf0] }
 0xb73   :  { %5380 = vmatpush.bf16.msra.mxu0 %v9073_v1  ;;  %5406 = vmatpush.bf16.msra.mxu2 %v9077_v24  ;;  %v9297_v1 = vor.u32 %v10276_v23, %v9296_v44  ;;  %v9301_v24 = vor.u32 %v10275_v41, %v9298_v20  ;;  %v9380_v44 = vor.u32 %v10328_v59, %v9379_v28  ;;  %v9371_v23 = vld [vmem:[#allocation9 + $0x250] sm:$0xf]  ;;  %v10326_v41 = vld [vmem:[#allocation9 + $0x254] sm:$0xf0]  ;;  %v9373_v59 = vld [vmem:[#allocation9 + $0x258] sm:$0xf0] }
 0xb75   :  { %5392 = vmatpush.bf16.msrb.mxu1 %v9145_v27  ;;  %5418 = vmatpush.bf16.msra.mxu3 %v9149_v31  ;;  %v9221_v27 = vor.u32 %v10255_v18, %v9218_v38  ;;  %v9208_v31 = vld [vmem:[#allocation9 + $0x10] sm:$0xf]  ;;  %v9372_v18 = vor.u32 %v10326_v41, %v9371_v23  ;;  %v9437_v23 = vld [vmem:[#allocation9 + $0x2d8] sm:$0xf0]  ;;  %v10323_v41 = vld [vmem:[#allocation9 + $0x244] sm:$0xf] }
 0xb76   :  { %v9209_v2 = vor.u32 %v10254_v62, %v9208_v31  ;;  %v10322_v31 = vld [vmem:[#allocation9 + $0x234] sm:$0xf0]  ;;  %v9436_v62 = vor.u32 %v10342_v42, %v9435_v14  ;;  %v10337_v14 = vld [vmem:[#allocation9 + $0x2b4] sm:$0xf]  ;;  %v9421_v42 = vld [vmem:[#allocation9 + $0x2b8] sm:$0xf0] }
 0xb77   :  { %5585 = vmatpush.bf16.msrb.mxu0 %v9257_v25  ;;  %5611 = vmatpush.bf16.msrb.mxu2 %v9261_v46  ;;  %v9288_v25 = vld [vmem:[#allocation9 + $0xb0] sm:$0xf]  ;;  %v10274_v46 = vld [vmem:[#allocation9 + $0xb4] sm:$0xf0] }
 0xb78   :  { %v9289_v36 = vor.u32 %v10274_v46, %v9288_v25  ;;  %v10324_v25 = vld [vmem:[#allocation9 + $0x244] sm:$0xf0]  ;;  %v9444_v46 = vor.u32 %v10344_v15, %v9443_v32  ;;  %v10321_v32 = vld [vmem:[#allocation9 + $0x234] sm:$0xf]  ;;  %v9357_v15 = vld [vmem:[#allocation9 + $0x238] sm:$0xf0] }
 0xb79   :  { %5393 = vmatpush.bf16.msrb.mxu1 %v9137_v52  ;;  %5419 = vmatpush.bf16.msra.mxu3 %v9141_v10  ;;  %v9200_v10 = vld [vmem:[#allocation9] sm:$0xf] }
 0xb7a   :  { %v9201_v49 = vor.u32 %v10252_v9, %v9200_v10  ;;  %v9339_v10 = vld [vmem:[#allocation9 + $0x210] sm:$0xf]  ;;  %v10318_v9 = vld [vmem:[#allocation9 + $0x214] sm:$0xf0] }
 0xb7b   :  { %5586 = vmatpush.bf16.msrb.mxu0 %v9249_v43  ;;  %5612 = vmatpush.bf16.msrb.mxu2 %v9253_v50  ;;  %v10271_v43 = vld [vmem:[#allocation9 + $0xa4] sm:$0xf]  ;;  %v9281_v50 = vor.u32 %v10272_v8, %v9280_v53  ;;  %v10320_v53 = vld [vmem:[#allocation9 + $0x224] sm:$0xf0] }
 0xb7c   :  { %v9285_v52 = vor.u32 %v10271_v43, %v9282_v51  ;;  %v9419_v43 = vld [vmem:[#allocation9 + $0x2b0] sm:$0xf] }
 0xb7d   :  { %5598 = vmatpush.bf16.msra.mxu1 %v9321_v45  ;;  %5624 = vmatpush.bf16.msrb.mxu3 %v9325_v58  ;;  %v9202_v45 = vld [vmem:[#allocation9 + $0x8] sm:$0xf0] }
 0xb7e   :  { %v9205_v58 = vor.u32 %v10251_v17, %v9202_v45  ;;  %v10336_v45 = vld [vmem:[#allocation9 + $0x2a4] sm:$0xf0] }
 0xb7f   :  { %5587 = vmatpush.bf16.msrb.mxu0 %v9241_v0  ;;  %5613 = vmatpush.bf16.msrb.mxu2 %v9245_v37  ;;  %v9274_v0 = vld [vmem:[#allocation9 + $0x98] sm:$0xf0] }
 0xb80   :  { %v9277_v37 = vor.u32 %v10269_v60, %v9274_v0  ;;  %v10334_v0 = vld [vmem:[#allocation9 + $0x294] sm:$0xf0] }
 0xb81   :  { %5599 = vmatpush.bf16.msra.mxu1 %v9313_v61  ;;  %5625 = vmatpush.bf16.msrb.mxu3 %v9317_v55  ;;  %v9266_v61 = vld [vmem:[#allocation9 + $0x88] sm:$0xf0] }
 0xb82   :  { %v9269_v55 = vor.u32 %v10267_v57, %v9266_v61  ;;  %v10332_v57 = vld [vmem:[#allocation9 + $0x284] sm:$0xf0] }
 0xb83   :  { %5588 = vmatpush.bf16.msrb.mxu0 %v9233_v22  ;;  %5614 = vmatpush.bf16.msrb.mxu2 %v9237_v16  ;;  %v9388_v22 = vor.u32 %v10330_v4, %v9387_v47  ;;  %v9396_v61 = vor.u32 %v10332_v57, %v9395_v3  ;;  %v10327_v4 = vld [vmem:[#allocation9 + $0x264] sm:$0xf] }
 0xb85   :  { %5600 = vmatpush.bf16.msra.mxu1 %v9305_v63  ;;  %5626 = vmatpush.bf16.msrb.mxu3 %v9309_v33  ;;  %v9451_v63 = vld [vmem:[#allocation9 + $0x2f0] sm:$0xf]  ;;  %v10346_v33 = vld [vmem:[#allocation9 + $0x2f4] sm:$0xf0] }
 0xb87   :  { %5589 = vmatpush.bf16.msrb.mxu0 %v9225_v21  ;;  %5615 = vmatpush.bf16.msrb.mxu2 %v9229_v12  ;;  %v9452_v21 = vor.u32 %v10346_v33, %v9451_v63  ;;  %v10343_v63 = vld [vmem:[#allocation9 + $0x2e4] sm:$0xf]  ;;  %v9445_v33 = vld [vmem:[#allocation9 + $0x2e8] sm:$0xf0] }
 0xb89   :  { %5601 = vmatpush.bf16.msra.mxu1 %v9297_v1  ;;  %5627 = vmatpush.bf16.msrb.mxu3 %v9301_v24  ;;  %v9363_v24 = vld [vmem:[#allocation9 + $0x240] sm:$0xf] }
 0xb8b   :  { %5590 = vmatpush.bf16.msrb.mxu0 %v9217_v39  ;;  %5616 = vmatpush.bf16.msrb.mxu2 %v9221_v27  ;;  %v9364_v39 = vor.u32 %v10324_v25, %v9363_v24  ;;  %v9355_v27 = vld [vmem:[#allocation9 + $0x230] sm:$0xf]  ;;  %v10319_v25 = vld [vmem:[#allocation9 + $0x224] sm:$0xf] }
 0xb8d   :  { %5602 = vmatpush.bf16.msra.mxu1 %v9289_v36  ;;  %5628 = vmatpush.bf16.msrb.mxu3 %v9293_v48  ;;  %v10340_v36 = vld [vmem:[#allocation9 + $0x2c4] sm:$0xf0] }
 0xb8e   :  { %v9428_v8 = vor.u32 %v10340_v36, %v9427_v7  ;;  %v10335_v7 = vld [vmem:[#allocation9 + $0x2a4] sm:$0xf]  ;;  %v9413_v36 = vld [vmem:[#allocation9 + $0x2a8] sm:$0xf0] }
 0xb8f   :  { %5591 = vmatpush.bf16.msrb.mxu0 %v9209_v2  ;;  %5617 = vmatpush.bf16.msrb.mxu2 %v9213_v19  ;;  %v9356_v2 = vor.u32 %v10322_v31, %v9355_v27  ;;  %v9347_v19 = vld [vmem:[#allocation9 + $0x220] sm:$0xf]  ;;  %v9424_v27 = vor.u32 %v10337_v14, %v9421_v42  ;;  %v10317_v31 = vld [vmem:[#allocation9 + $0x214] sm:$0xf] }
 0xb90   :  { %v9348_v51 = vor.u32 %v10320_v53, %v9347_v19  ;;  %v9405_v19 = vld [vmem:[#allocation9 + $0x298] sm:$0xf0]  ;;  %v10315_v53 = vld [vmem:[#allocation9 + $0x204] sm:$0xf] }
 0xb91   :  { %5603 = vmatpush.bf16.msra.mxu1 %v9281_v50  ;;  %5629 = vmatpush.bf16.msrb.mxu3 %v9285_v52  ;;  %v10338_v50 = vld [vmem:[#allocation9 + $0x2b4] sm:$0xf0] }
 0xb92   :  { %v9420_v17 = vor.u32 %v10338_v50, %v9419_v43  ;;  %v9333_v43 = vld [vmem:[#allocation9 + $0x208] sm:$0xf0] }
 0xb93   :  { %5592 = vmatpush.bf16.msrb.mxu0 %v9201_v49  ;;  %5618 = vmatpush.bf16.msrb.mxu2 %v9205_v58  ;;  %v9411_v49 = vld [vmem:[#allocation9 + $0x2a0] sm:$0xf]  ;;  %v9340_v58 = vor.u32 %v10318_v9, %v9339_v10  ;;  %v9397_v10 = vld [vmem:[#allocation9 + $0x288] sm:$0xf0] }
 0xb94   :  { %v9412_v60 = vor.u32 %v10336_v45, %v9411_v49 }
 0xb95   :  { %5604 = vmatpush.bf16.msra.mxu1 %v9273_v30  ;;  %5630 = vmatpush.bf16.msrb.mxu3 %v9277_v37  ;;  %v9403_v30 = vld [vmem:[#allocation9 + $0x290] sm:$0xf]  ;;  %v9332_v37 = vor.u32 %v10316_v54, %v9331_v56 }
 0xb96   :  { %v9404_v26 = vor.u32 %v10334_v0, %v9403_v30 }
 0xb99   :  { %5605 = vmatpush.bf16.msra.mxu1 %v9265_v34  ;;  %5631 = vmatpush.bf16.msrb.mxu3 %v9269_v55  ;;  %v9326_v34 = vld [vmem:[%s13457_s16 + $0x8] sm:$0xf]  ;;  %v10329_v55 = vld [vmem:[#allocation9 + $0x274] sm:$0xf] }
 0xbd3   :  { %v5096_v35 = vpop.f32.mrf.mxu0 }
 0xbd4   :  { %v5113_v48 = vpack.c.bf16 %v5096_v35, %v5096_v35  ;;  %v9389_v35 = vld [vmem:[#allocation9 + $0x278] sm:$0xf0] }
 0xbd5   :  { %v9392_v47 = vor.u32 %v10329_v55, %v9389_v35  ;;  %v9518_v35 = vld [vmem:[#allocation9 + $0x370] sm:$0xf] }
 0xbd9   :  { %v5161_v40 = vpop.f32.mrf.mxu2  ;;  %v5109_v16 = vpop.f32.mrf.mxu1 }
 0xbda   :  { %v5178_v13 = vpack.c.bf16 %v5161_v40, %v5161_v40  ;;  %v5114_v52 = vpack.c.bf16 %v5109_v16, %v5109_v16  ;;  %v9381_v40 = vld [vmem:[#allocation9 + $0x268] sm:$0xf0]  ;;  %v9453_v16 = vld [vmem:[#allocation9 + $0x2f8] sm:$0xf0] }
 0xbdb   :  { %v5098_v11 = vpop.f32.mrf.mxu0 }
 0xbdc   :  { %5381 = vmatmul.bf16.vlgmr.msra.gmra.mxu0 %v5178_v13  ;;  %5407 = vmatmul.bf16.vlgmr.msra.gmra.mxu2 %v5178_v13  ;;  %v9384_v13 = vor.u32 %v10327_v4, %v9381_v40  ;;  %v9582_v4 = vld [vmem:[#allocation9 + $0x3f0] sm:$0xf] }
 0xbdd   :  { %5649 = vmatpush.bf16.msra.mxu0 %v13077_v29  ;;  %5863 = vmatpush.bf16.msra.mxu2 %v9388_v22  ;;  %v10345_v22 = vld [vmem:[#allocation9 + $0x2f4] sm:$0xf] }
 0xbde   :  { %v9456_v28 = vor.u32 %v10345_v22, %v9453_v16  ;;  %v10378_v22 = vld [vmem:[#allocation9 + $0x3f4] sm:$0xf0] }
 0xbdf   :  { %v5174_v20 = vpop.f32.mrf.mxu3  ;;  %v9583_v16 = vor.u32 %v10378_v22, %v9582_v4  ;;  %v10352_v22 = vld [vmem:[#allocation9 + $0x324] sm:$0xf0] }
 0xbe0   :  { %v5179_v12 = vpack.c.bf16 %v5174_v20, %v5174_v20 }
 0xbe1   :  { %5864 = vmatpush.bf16.msra.mxu2 %v9380_v44  ;;  %v5163_v38 = vpop.f32.mrf.mxu2  ;;  %v5111_v1 = vpop.f32.mrf.mxu1  ;;  %v10341_v44 = vld [vmem:[#allocation9 + $0x2d4] sm:$0xf] }
 0xbe2   :  { %5394 = vmatmul.bf16.vlgmr.msrb.gmra.mxu1 %v5179_v12  ;;  %5420 = vmatmul.bf16.vlgmr.msra.gmra.mxu3 %v5179_v12  ;;  %v9440_v20 = vor.u32 %v10341_v44, %v9437_v23  ;;  %v10339_v38 = vld [vmem:[#allocation9 + $0x2c4] sm:$0xf]  ;;  %v9429_v1 = vld [vmem:[#allocation9 + $0x2c8] sm:$0xf0] }
 0xbe3   :  { %5662 = vmatpush.bf16.msrb.mxu1 %v13089_v6  ;;  %5876 = vmatpush.bf16.msra.mxu3 %v9452_v21  ;;  %v9365_v21 = vld [vmem:[#allocation9 + $0x248] sm:$0xf0]  ;;  %v9432_v24 = vor.u32 %v10339_v38, %v9429_v1  ;;  %v10377_v38 = vld [vmem:[#allocation9 + $0x3f4] sm:$0xf]  ;;  %v9584_v1 = vld [vmem:[#allocation9 + $0x3f8] sm:$0xf0] }
 0xbe4   :  { %v9368_v12 = vor.u32 %v10323_v41, %v9365_v21  ;;  %v9587_v14 = vor.u32 %v10377_v38, %v9584_v1  ;;  %v10367_v38 = vld [vmem:[#allocation9 + $0x3a4] sm:$0xf] }
 0xbe5   :  { %5865 = vmatpush.bf16.msra.mxu2 %v9372_v18  ;;  %v9360_v18 = vor.u32 %v10321_v32, %v9357_v15  ;;  %v10359_v15 = vld [vmem:[#allocation9 + $0x364] sm:$0xf] }
 0xbe7   :  { %5877 = vmatpush.bf16.msra.mxu3 %v9444_v46  ;;  %v5176_v5 = vpop.f32.mrf.mxu3  ;;  %v9349_v46 = vld [vmem:[#allocation9 + $0x228] sm:$0xf0] }
 0xbe9   :  { %5866 = vmatpush.bf16.msra.mxu2 %v9364_v39  ;;  %v9352_v39 = vor.u32 %v10319_v25, %v9349_v46 }
 0xbeb   :  { %5878 = vmatpush.bf16.msra.mxu3 %v9436_v62  ;;  %v9341_v62 = vld [vmem:[#allocation9 + $0x218] sm:$0xf0] }
 0xbec   :  { %5593 = vmatmul.bf16.vlgmr.msrb.gmra.mxu0 %v5113_v48  ;;  %5619 = vmatmul.bf16.vlgmr.msrb.gmra.mxu2 %v5113_v48  ;;  %v9344_v5 = vor.u32 %v10317_v31, %v9341_v62  ;;  %v9416_v48 = vor.u32 %v10335_v7, %v9413_v36  ;;  %v9457_v7 = vld [vmem:[%s13457_s16 + $0xc] sm:$0xf]  ;;  %v9502_v36 = vld [vmem:[#allocation9 + $0x350] sm:$0xf] }
 0xbed   :  { %5867 = vmatpush.bf16.msra.mxu2 %v9356_v2  ;;  %5889 = vmatpush.bf16.msrb.mxu0 %v9392_v47  ;;  %v10333_v2 = vld [vmem:[#allocation9 + $0x294] sm:$0xf]  ;;  %v10362_v47 = vld [vmem:[#allocation9 + $0x374] sm:$0xf0] }
 0xbee   :  { %v9519_v40 = vor.u32 %v10362_v47, %v9518_v35  ;;  %v9560_v47 = vld [vmem:[#allocation9 + $0x3c8] sm:$0xf0] }
 0xbef   :  { %5879 = vmatpush.bf16.msra.mxu3 %v9428_v8  ;;  %v9408_v8 = vor.u32 %v10333_v2, %v9405_v19  ;;  %v10357_v2 = vld [vmem:[#allocation9 + $0x354] sm:$0xf] }
 0xbf1   :  { %5868 = vmatpush.bf16.msra.mxu2 %v9348_v51  ;;  %5890 = vmatpush.bf16.msrb.mxu0 %v9384_v13  ;;  %v9336_v51 = vor.u32 %v10315_v53, %v9333_v43  ;;  %v9510_v13 = vld [vmem:[#allocation9 + $0x360] sm:$0xf]  ;;  %v9504_v53 = vld [vmem:[#allocation9 + $0x358] sm:$0xf0] }
 0xbf2   :  { %5606 = vmatmul.bf16.vlgmr.msra.gmra.mxu1 %v5114_v52  ;;  %5632 = vmatmul.bf16.vlgmr.msrb.gmra.mxu3 %v5114_v52  ;;  %v10331_v52 = vld [vmem:[#allocation9 + $0x284] sm:$0xf]  ;;  %v9494_v43 = vld [vmem:[#allocation9 + $0x340] sm:$0xf] }
 0xbf3   :  { %5880 = vmatpush.bf16.msra.mxu3 %v9420_v17  ;;  %5902 = vmatpush.bf16.msra.mxu1 %v9456_v28  ;;  %v9400_v9 = vor.u32 %v10331_v52, %v9397_v10  ;;  %v9496_v10 = vld [vmem:[#allocation9 + $0x348] sm:$0xf0] }
 0xbf5   :  { %5869 = vmatpush.bf16.msra.mxu2 %v9340_v58 }
 0xbf7   :  { %5881 = vmatpush.bf16.msra.mxu3 %v9412_v60 }
 0xbf9   :  { %5870 = vmatpush.bf16.msra.mxu2 %v9332_v37 }
 0xbfb   :  { %5882 = vmatpush.bf16.msra.mxu3 %v9404_v26 }
 0xbfc   :  { %9327 = vmatmul.msk.bf16.vlgmr.msra.gmra.mxu0 %vm5083_vm14, %v9326_v34 }
 0xbfd   :  { %5929 = vmatpush.bf16.msrb.mxu2 %v13077_v29  ;;  %v10325_v29 = vld [vmem:[#allocation9 + $0x254] sm:$0xf] }
 0xbfe   :  { %v9376_v11 = vor.u32 %v10325_v29, %v9373_v59  ;;  %v10360_v29 = vld [vmem:[#allocation9 + $0x364] sm:$0xf0]  ;;  %v9574_v59 = vld [vmem:[#allocation9 + $0x3e0] sm:$0xf] }
 0xbff   :  { %5883 = vmatpush.bf16.msra.mxu3 %v9396_v61  ;;  %v9511_v44 = vor.u32 %v10360_v29, %v9510_v13  ;;  %v9550_v29 = vld [vmem:[#allocation9 + $0x3b0] sm:$0xf] }
 0xc00   :  { %5891 = vmatpush.bf16.msrb.mxu0 %v9376_v11  ;;  %v10376_v11 = vld [vmem:[#allocation9 + $0x3e4] sm:$0xf0] }
 0xc01   :  { %v9575_v23 = vor.u32 %v10376_v11, %v9574_v59  ;;  %v10370_v59 = vld [vmem:[#allocation9 + $0x3b4] sm:$0xf0]  ;;  %v10369_v11 = vld [vmem:[#allocation9 + $0x3b4] sm:$0xf] }
 0xc02   :  { %9328 = vmatmul.msk.bf16.vlgmr.msrb.gmra.mxu1 %vm5083_vm14, %v9326_v34 }
 0xc03   :  { %5942 = vmatpush.bf16.msrb.mxu3 %v13089_v6  ;;  %v9448_v6 = vor.u32 %v10343_v63, %v9445_v33  ;;  %v10361_v33 = vld [vmem:[#allocation9 + $0x374] sm:$0xf] }
 0xc04   :  { %5892 = vmatpush.bf16.msrb.mxu0 %v9368_v12 }
 0xc05   :  { %5903 = vmatpush.bf16.msra.mxu1 %v9448_v6  ;;  %v9520_v6 = vld [vmem:[#allocation9 + $0x378] sm:$0xf0] }
 0xc06   :  { %v9523_v12 = vor.u32 %v10361_v33, %v9520_v6  ;;  %v9551_v6 = vor.u32 %v10370_v59, %v9550_v29 }
 0xc08   :  { %5893 = vmatpush.bf16.msrb.mxu0 %v9360_v18  ;;  %v9512_v18 = vld [vmem:[#allocation9 + $0x368] sm:$0xf0] }
 0xc09   :  { %5904 = vmatpush.bf16.msra.mxu1 %v9440_v20  ;;  %v9515_v25 = vor.u32 %v10359_v15, %v9512_v18  ;;  %v9542_v15 = vld [vmem:[#allocation9 + $0x3a0] sm:$0xf]  ;;  %v10368_v18 = vld [vmem:[#allocation9 + $0x3a4] sm:$0xf0] }
 0xc0c   :  { %5894 = vmatpush.bf16.msrb.mxu0 %v9352_v39  ;;  %v10375_v39 = vld [vmem:[#allocation9 + $0x3e4] sm:$0xf] }
 0xc0d   :  { %5905 = vmatpush.bf16.msra.mxu1 %v9432_v24 }
 0xc10   :  { %5895 = vmatpush.bf16.msrb.mxu0 %v9344_v5 }
 0xc11   :  { %5906 = vmatpush.bf16.msra.mxu1 %v9424_v27  ;;  %v9576_v27 = vld [vmem:[#allocation9 + $0x3e8] sm:$0xf0] }
 0xc12   :  { %v9579_v62 = vor.u32 %v10375_v39, %v9576_v27  ;;  %v10365_v39 = vld [vmem:[#allocation9 + $0x394] sm:$0xf] }
 0xc14   :  { %5896 = vmatpush.bf16.msrb.mxu0 %v9336_v51  ;;  %v10355_v51 = vld [vmem:[#allocation9 + $0x344] sm:$0xf] }
 0xc15   :  { %5907 = vmatpush.bf16.msra.mxu1 %v9416_v48  ;;  %v10358_v48 = vld [vmem:[#allocation9 + $0x354] sm:$0xf0] }
 0xc16   :  { %v9503_v19 = vor.u32 %v10358_v48, %v9502_v36  ;;  %v10347_v48 = vld [vmem:[#allocation9 + $0x304] sm:$0xf] }
 0xc18   :  { %6143 = vmatpush.bf16.msra.mxu0 %v9519_v40  ;;  %v9478_v40 = vld [vmem:[#allocation9 + $0x320] sm:$0xf] }
 0xc19   :  { %5908 = vmatpush.bf16.msra.mxu1 %v9408_v8  ;;  %v9507_v8 = vor.u32 %v10357_v2, %v9504_v53  ;;  %v9479_v13 = vor.u32 %v10352_v22, %v9478_v40  ;;  %v9464_v2 = vld [vmem:[#allocation9 + $0x308] sm:$0xf0]  ;;  %v9526_v53 = vld [vmem:[#allocation9 + $0x380] sm:$0xf]  ;;  %v13152_v40 = vld [vmem:[#allocation10 + $0xb0] sm:$0xff] }
 0xc1a   :  { %v13155_v22 = vld [vmem:[#allocation10 + $0xb8] sm:$0xff] }
 0xc1c   :  { %6144 = vmatpush.bf16.msra.mxu0 %v9511_v44  ;;  %v9552_v44 = vld [vmem:[#allocation9 + $0x3b8] sm:$0xf0] }
 0xc1d   :  { %5909 = vmatpush.bf16.msra.mxu1 %v9400_v9  ;;  %v9566_v9 = vld [vmem:[#allocation9 + $0x3d0] sm:$0xf] }
 0xc20   :  { %6145 = vmatpush.bf16.msra.mxu0 %v9503_v19  ;;  %v9467_v19 = vor.u32 %v10347_v48, %v9464_v2  ;;  %v13229_v48 = vld [vmem:[#allocation10 + $0x188] sm:$0xff]  ;;  %v13233_v2 = vld [vmem:[#allocation10 + $0x40] sm:$0xff] }
 0xc21   :  { %6156 = vmatpush.bf16.msrb.mxu1 %v9583_v16  ;;  %v10351_v16 = vld [vmem:[#allocation9 + $0x324] sm:$0xf] }
 0xc25   :  { %6157 = vmatpush.bf16.msrb.mxu1 %v9575_v23  ;;  %v9555_v23 = vor.u32 %v10369_v11, %v9552_v44 }
 0xc59   :  { %v5382_v50 = vpop.f32.mrf.mxu0 }
 0xc5f   :  { %v5395_v17 = vpop.f32.mrf.mxu1  ;;  %v5408_v49 = vpop.f32.mrf.mxu2 }
 0xc60   :  { %v5396_v45 = vadd.f32 %v5395_v17, %v5382_v50  ;;  %v10356_v50 = vld [vmem:[#allocation9 + $0x344] sm:$0xf0]  ;;  %v10374_v17 = vld [vmem:[#allocation9 + $0x3d4] sm:$0xf0] }
 0xc61   :  { %v5384_v58 = vpop.f32.mrf.mxu0  ;;  %v9495_v52 = vor.u32 %v10356_v50, %v9494_v43  ;;  %v10363_v43 = vld [vmem:[#allocation9 + $0x384] sm:$0xf] }
 0xc62   :  { %v9567_v58 = vor.u32 %v10374_v17, %v9566_v9  ;;  %v13113_v9 = vld [vmem:[#allocation10 + $0xf0] sm:$0xff]  ;;  %v13115_v17 = vld [vmem:[#allocation10 + $0xf8] sm:$0xff] }
 0xc63   :  { %6146 = vmatpush.bf16.msra.mxu0 %v9495_v52 }
 0xc64   :  { %6158 = vmatpush.bf16.msrb.mxu1 %v9567_v58 }
 0xc65   :  { %v5421_v56 = vpop.f32.mrf.mxu3 }
 0xc66   :  { %v5422_v54 = vadd.f32 %v5421_v56, %v5408_v49  ;;  %v10373_v49 = vld [vmem:[#allocation9 + $0x3d4] sm:$0xf]  ;;  %v9568_v56 = vld [vmem:[#allocation9 + $0x3d8] sm:$0xf0] }
 0xc67   :  { %v5397_v60 = vpop.f32.mrf.mxu1  ;;  %v5410_v30 = vpop.f32.mrf.mxu2 }
 0xc68   :  { %v9486_v60 = vld [vmem:[#allocation9 + $0x330] sm:$0xf]  ;;  %v10354_v30 = vld [vmem:[#allocation9 + $0x334] sm:$0xf0] }
 0xc69   :  { %v5594_v0 = vpop.f32.mrf.mxu0 }
 0xc6a   :  { %v5595_v37 = vadd.f32 %v5594_v0, %v5396_v45  ;;  %v9499_v45 = vor.u32 %v10355_v51, %v9496_v10  ;;  %v10353_v0 = vld [vmem:[#allocation9 + $0x334] sm:$0xf]  ;;  %v9528_v51 = vld [vmem:[#allocation9 + $0x388] sm:$0xf0] }
 0xc6b   :  { %v9531_v52 = vor.u32 %v10363_v43, %v9528_v51  ;;  %v13245_v43 = vld [vmem:[#allocation10 + $0x30] sm:$0xff]  ;;  %v13249_v51 = vld [vmem:[#allocation10 + $0x38] sm:$0xff] }
 0xc6d   :  { %v5423_v26 = vpop.f32.mrf.mxu3 }
 0xc6e   :  { %v9488_v26 = vld [vmem:[#allocation9 + $0x338] sm:$0xf0] }
 0xc6f   :  { %v5607_v3 = vpop.f32.mrf.mxu1  ;;  %v5620_v57 = vpop.f32.mrf.mxu2 }
 0xc70   :  { %v13104_v34 = vadd.f32 %v5607_v3, %v5595_v37  ;;  %v5621_v61 = vadd.f32 %v5620_v57, %v5422_v54  ;;  %v9571_v54 = vor.u32 %v10373_v49, %v9568_v56  ;;  %v9487_v37 = vor.u32 %v10354_v30, %v9486_v60  ;;  %v9558_v3 = vld [vmem:[#allocation9 + $0x3c0] sm:$0xf]  ;;  %v10372_v57 = vld [vmem:[#allocation9 + $0x3c4] sm:$0xf0]  ;;  %v13125_v60 = vld [vmem:[#allocation10 + $0xd8] sm:$0xff] }
 0xc71   :  { %v5596_v55 = vpop.f32.mrf.mxu0  ;;  %v9559_v35 = vor.u32 %v10372_v57, %v9558_v3  ;;  %v13117_v49 = vld [vmem:[#allocation10 + $0xe0] sm:$0xff]  ;;  %v13127_v30 = vld [vmem:[#allocation10 + $0x1f0] sm:$0xff] }
 0xc72   :  { %v9491_v55 = vor.u32 %v10353_v0, %v9488_v26  ;;  %6147 = vmatpush.bf16.msra.mxu0 %v9487_v37  ;;  %v13131_v37 = vld [vmem:[#allocation10 + $0x1f8] sm:$0xff]  ;;  %v13133_v26 = vld [vmem:[#allocation10 + $0x1e0] sm:$0xff] }
 0xc73   :  { %6159 = vmatpush.bf16.msrb.mxu1 %v9559_v35  ;;  %v13135_v57 = vld [vmem:[#allocation10 + $0xc0] sm:$0xff] }
 0xc75   :  { %v5633_v28 = vpop.f32.mrf.mxu3 }
 0xc76   :  { %v13106_v63 = vadd.f32 %v5633_v28, %v5621_v61  ;;  %v10371_v61 = vld [vmem:[#allocation9 + $0x3c4] sm:$0xf]  ;;  %v9480_v28 = vld [vmem:[#allocation9 + $0x328] sm:$0xf0]  ;;  %6148 = vmatpush.bf16.msra.mxu0 %v9479_v13 }
 0xc77   :  { %v5609_v41 = vpop.f32.mrf.mxu1  ;;  %v5622_v20 = vpop.f32.mrf.mxu2  ;;  %v9563_v4 = vor.u32 %v10371_v61, %v9560_v47  ;;  %v9483_v33 = vor.u32 %v10351_v16, %v9480_v28  ;;  %6160 = vmatpush.bf16.msrb.mxu1 %v9551_v6  ;;  %v13138_v61 = vld [vmem:[#allocation10 + $0xc8] sm:$0xff]  ;;  %v13148_v47 = vld [vmem:[#allocation10 + $0x1d0] sm:$0xff]  ;;  %v13160_v16 = vld [vmem:[#allocation10 + $0xa0] sm:$0xff] }
 0xc78   :  { %v9470_v41 = vld [vmem:[#allocation9 + $0x310] sm:$0xf]  ;;  %v10350_v20 = vld [vmem:[#allocation9 + $0x314] sm:$0xf0]  ;;  %v13163_v13 = vld [vmem:[#allocation10 + $0xa8] sm:$0xff] }
 0xc79   :  { %v5651_v21 = vpop.f32.mrf.mxu0 }
 0xc7a   :  { %v5668_v32 = vpack.c.bf16 %v5651_v21, %v5651_v21  ;;  %v10349_v21 = vld [vmem:[#allocation9 + $0x314] sm:$0xf] }
 0xc7c   :  { %5871 = vmatmul.bf16.vlgmr.msra.gmra.mxu2 %v5668_v32  ;;  %5897 = vmatmul.bf16.vlgmr.msrb.gmra.mxu0 %v5668_v32  ;;  %v9472_v32 = vld [vmem:[#allocation9 + $0x318] sm:$0xf0] }
 0xc7d   :  { %v5635_v24 = vpop.f32.mrf.mxu3  ;;  %6169 = vmatpush.bf16.msra.mxu2 %v9523_v12  ;;  %v9471_v12 = vor.u32 %v10350_v20, %v9470_v41  ;;  %v9475_v1 = vor.u32 %v10349_v21, %v9472_v32  ;;  %v13175_v32 = vld [vmem:[#allocation10 + $0x1c0] sm:$0xff] }
 0xc7e   :  { %v9543_v24 = vor.u32 %v10368_v18, %v9542_v15  ;;  %v13181_v15 = vld [vmem:[#allocation10 + $0x1c8] sm:$0xff]  ;;  %v13185_v18 = vld [vmem:[#allocation10 + $0x80] sm:$0xff] }
 0xc7f   :  { %v5664_v46 = vpop.f32.mrf.mxu1  ;;  %6149 = vmatpush.bf16.msra.mxu0 %v9471_v12  ;;  %v13173_v12 = vld [vmem:[#allocation10 + $0x90] sm:$0xff] }
 0xc80   :  { %v5669_v42 = vpack.c.bf16 %v5664_v46, %v5664_v46  ;;  %6161 = vmatpush.bf16.msrb.mxu1 %v9543_v24  ;;  %v13193_v24 = vld [vmem:[#allocation10 + $0x1b8] sm:$0xff] }
 0xc81   :  { %v5653_v31 = vpop.f32.mrf.mxu0  ;;  %6170 = vmatpush.bf16.msra.mxu2 %v9515_v25  ;;  %v9544_v25 = vld [vmem:[#allocation9 + $0x3a8] sm:$0xf0] }
 0xc82   :  { %5884 = vmatmul.bf16.vlgmr.msra.gmra.mxu3 %v5669_v42  ;;  %5910 = vmatmul.bf16.vlgmr.msra.gmra.mxu1 %v5669_v42  ;;  %v9547_v46 = vor.u32 %v10367_v38, %v9544_v25  ;;  %v10366_v42 = vld [vmem:[#allocation9 + $0x394] sm:$0xf0]  ;;  %v9536_v31 = vld [vmem:[#allocation9 + $0x398] sm:$0xf0]  ;;  %v13187_v38 = vld [vmem:[#allocation10 + $0x1b0] sm:$0xff] }
 0xc83   :  { %6182 = vmatpush.bf16.msra.mxu3 %v9587_v14  ;;  %v9534_v14 = vld [vmem:[#allocation9 + $0x390] sm:$0xf] }
 0xc84   :  { %v9535_v27 = vor.u32 %v10366_v42, %v9534_v14  ;;  %v13197_v25 = vld [vmem:[#allocation10 + $0x70] sm:$0xff]  ;;  %v13201_v14 = vld [vmem:[#allocation10 + $0x78] sm:$0xff]  ;;  %v13205_v42 = vld [vmem:[#allocation10 + $0x1a8] sm:$0xff] }
 0xc85   :  { %6171 = vmatpush.bf16.msra.mxu2 %v9507_v8  ;;  %v10364_v8 = vld [vmem:[#allocation9 + $0x384] sm:$0xf0] }
 0xc86   :  { %6162 = vmatpush.bf16.msrb.mxu1 %v9535_v27  ;;  %v9527_v50 = vor.u32 %v10364_v8, %v9526_v53  ;;  %v13211_v27 = vld [vmem:[#allocation10 + $0x190] sm:$0xff]  ;;  %v13237_v53 = vld [vmem:[#allocation10 + $0x48] sm:$0xff]  ;;  %v13241_v8 = vld [vmem:[#allocation10 + $0x178] sm:$0xff] }
 0xc87   :  { %v5666_v5 = vpop.f32.mrf.mxu1  ;;  %6183 = vmatpush.bf16.msra.mxu3 %v9579_v62  ;;  %v9462_v62 = vld [vmem:[#allocation9 + $0x300] sm:$0xf] }
 0xc88   :  { %v10348_v5 = vld [vmem:[#allocation9 + $0x304] sm:$0xf0] }
 0xc89   :  { %6172 = vmatpush.bf16.msra.mxu2 %v9499_v45  ;;  %v9463_v36 = vor.u32 %v10348_v5, %v9462_v62  ;;  %v13121_v45 = vld [vmem:[#allocation10 + $0xe8] sm:$0xff]  ;;  %v13217_v62 = vld [vmem:[#allocation10 + $0x198] sm:$0xff]  ;;  %v13221_v5 = vld [vmem:[#allocation10 + $0x50] sm:$0xff] }
 0xc8a   :  { %6163 = vmatpush.bf16.msrb.mxu1 %v9527_v50  ;;  %v13247_v50 = vld [vmem:[#allocation10 + $0x160] sm:$0xff] }
 0xc8b   :  { %6184 = vmatpush.bf16.msra.mxu3 %v9571_v54  ;;  %6150 = vmatpush.bf16.msra.mxu0 %v9463_v36  ;;  %v13123_v54 = vld [vmem:[#allocation10 + $0xd0] sm:$0xff]  ;;  %v13225_v36 = vld [vmem:[#allocation10 + $0x58] sm:$0xff] }
 0xc8c   :  { %9458 = vmatmul.msk.bf16.vlgmr.msrb.gmra.mxu2 %vm5083_vm14, %v9457_v7 }
 0xc8d   :  { %6173 = vmatpush.bf16.msra.mxu2 %v9491_v55  ;;  %v13141_v55 = vld [vmem:[#allocation10 + $0x1e8] sm:$0xff] }
 0xc8e   :  { %6301 = vmatpush.msra.mxu1 %v13127_v30 }
 0xc8f   :  { %6185 = vmatpush.bf16.msra.mxu3 %v9563_v4  ;;  %6281 = vmatpush.msrb.mxu0 %v13113_v9  ;;  %v13150_v4 = vld [vmem:[#allocation10 + $0x1d8] sm:$0xff] }
 0xc90   :  { %6302 = vmatpush.msra.mxu1 %v13133_v26 }
 0xc91   :  { %6174 = vmatpush.bf16.msra.mxu2 %v9483_v33  ;;  %6282 = vmatpush.msrb.mxu0 %v13117_v49 }
 0xc92   :  { %9459 = vmatmul.msk.bf16.vlgmr.msrb.gmra.mxu3 %vm5083_vm14, %v9457_v7  ;;  %v9539_v7 = vor.u32 %v10365_v39, %v9536_v31  ;;  %6303 = vmatpush.msra.mxu1 %v13148_v47  ;;  %v13209_v39 = vld [vmem:[#allocation10 + $0x60] sm:$0xff]  ;;  %v13213_v31 = vld [vmem:[#allocation10 + $0x68] sm:$0xff] }
 0xc93   :  { %6186 = vmatpush.bf16.msra.mxu3 %v9555_v23  ;;  %6283 = vmatpush.msrb.mxu0 %v13123_v54 }
 0xc94   :  { %6304 = vmatpush.msra.mxu1 %v13175_v32 }
 0xc95   :  { %6175 = vmatpush.bf16.msra.mxu2 %v9475_v1  ;;  %6284 = vmatpush.msrb.mxu0 %v13135_v57  ;;  %v13189_v1 = vld [vmem:[#allocation10 + $0x88] sm:$0xff] }
 0xc96   :  { %6305 = vmatpush.msra.mxu1 %v13187_v38 }
 0xc97   :  { %6187 = vmatpush.bf16.msra.mxu3 %v9547_v46  ;;  %6285 = vmatpush.msrb.mxu0 %v13152_v40  ;;  %v13199_v46 = vld [vmem:[#allocation10 + $0x1a0] sm:$0xff] }
 0xc98   :  { %6306 = vmatpush.msra.mxu1 %v13199_v46 }
 0xc99   :  { %6176 = vmatpush.bf16.msra.mxu2 %v9467_v19  ;;  %6286 = vmatpush.msrb.mxu0 %v13160_v16  ;;  %v13235_v19 = vld [vmem:[#allocation10 + $0x170] sm:$0xff] }
 0xc9a   :  { %6307 = vmatpush.msra.mxu1 %v13211_v27 }
 0xc9b   :  { %6188 = vmatpush.bf16.msra.mxu3 %v9539_v7  ;;  %6287 = vmatpush.msrb.mxu0 %v13173_v12  ;;  %v13223_v7 = vld [vmem:[#allocation10 + $0x180] sm:$0xff] }
 0xc9c   :  { %6308 = vmatpush.msra.mxu1 %v13223_v7 }
 0xc9d   :  { %6321 = vmatpush.msrb.mxu2 %v13115_v17  ;;  %6288 = vmatpush.msrb.mxu0 %v13185_v18 }
 0xc9e   :  { %6309 = vmatpush.msra.mxu1 %v13235_v19 }
 0xc9f   :  { %6189 = vmatpush.bf16.msra.mxu3 %v9531_v52  ;;  %6322 = vmatpush.msrb.mxu2 %v13121_v45  ;;  %v13253_v52 = vld [vmem:[#allocation10 + $0x168] sm:$0xff] }
 0xca0   :  { %6289 = vmatpush.msrb.mxu0 %v13197_v25  ;;  %6310 = vmatpush.msra.mxu1 %v13247_v50 }
 0xca1   :  { %6323 = vmatpush.msrb.mxu2 %v13125_v60 }
 0xca2   :  { %6290 = vmatpush.msrb.mxu0 %v13209_v39 }
 0xca3   :  { %6341 = vmatpush.msrb.mxu3 %v13131_v37  ;;  %6324 = vmatpush.msrb.mxu2 %v13138_v61 }
 0xca4   :  { %6291 = vmatpush.msrb.mxu0 %v13221_v5 }
 0xca5   :  { %6342 = vmatpush.msrb.mxu3 %v13141_v55  ;;  %6325 = vmatpush.msrb.mxu2 %v13155_v22 }
 0xca6   :  { %6292 = vmatpush.msrb.mxu0 %v13233_v2 }
 0xca7   :  { %6343 = vmatpush.msrb.mxu3 %v13150_v4  ;;  %6326 = vmatpush.msrb.mxu2 %v13163_v13 }
 0xca8   :  { %6293 = vmatpush.msrb.mxu0 %v13245_v43 }
 0xca9   :  { %6344 = vmatpush.msrb.mxu3 %v13181_v15 }
 0xcab   :  { %6345 = vmatpush.msrb.mxu3 %v13193_v24 }
 0xcad   :  { %6346 = vmatpush.msrb.mxu3 %v13205_v42 }
 0xcaf   :  { %6347 = vmatpush.msrb.mxu3 %v13217_v62 }
 0xcb1   :  { %6348 = vmatpush.msrb.mxu3 %v13229_v48 }
 0xcb3   :  { %6349 = vmatpush.msrb.mxu3 %v13241_v8 }
 0xcb5   :  { %6350 = vmatpush.msrb.mxu3 %v13253_v52 }
 0xcf9   :  { %v5898_v10 = vpop.f32.mrf.mxu0 }
 0xcff   :  { %v5911_v58 = vpop.f32.mrf.mxu1  ;;  %v5872_v56 = vpop.f32.mrf.mxu2 }
 0xd00   :  { %v5912_v0 = vadd.f32 %v5911_v58, %v5898_v10  ;;  %v13257_v10 = vld [vmem:[#allocation10 + $0x20] sm:$0xff]  ;;  %v13259_v58 = vld [vmem:[#allocation10 + $0x150] sm:$0xff] }
 0xd01   :  { %v5900_v3 = vpop.f32.mrf.mxu0  ;;  %6294 = vmatpush.msrb.mxu0 %v13257_v10  ;;  %6311 = vmatpush.msra.mxu1 %v13259_v58 }
 0xd02   :  { %v13144_v35 = vadd.f32 %v5912_v0, %v13106_v63  ;;  %v13265_v0 = vld [vmem:[#allocation10 + $0x158] sm:$0xff]  ;;  %v13269_v3 = vld [vmem:[#allocation10 + $0x10] sm:$0xff] }
 0xd03   :  { %6351 = vmatpush.msrb.mxu3 %v13265_v0  ;;  %6295 = vmatpush.msrb.mxu0 %v13269_v3 }
 0xd05   :  { %v5885_v63 = vpop.f32.mrf.mxu3 }
 0xd06   :  { %v5886_v28 = vadd.f32 %v5885_v63, %v5872_v56  ;;  %v13261_v56 = vld [vmem:[#allocation10 + $0x28] sm:$0xff]  ;;  %v13271_v63 = vld [vmem:[#allocation10 + $0x140] sm:$0xff] }
 0xd07   :  { %v5874_v29 = vpop.f32.mrf.mxu2  ;;  %v5913_v59 = vpop.f32.mrf.mxu1  ;;  %6312 = vmatpush.msra.mxu1 %v13271_v63 }
 0xd08   :  { %v13169_v11 = vadd.f32 %v5886_v28, %v13104_v34  ;;  %v13177_v34 = vld [vmem:[#allocation10 + $0x98] sm:$0xff]  ;;  %v13277_v29 = vld [vmem:[#allocation10 + $0x148] sm:$0xff]  ;;  %v13281_v59 = vld [vmem:[#allocation10] sm:$0xff] }
 0xd09   :  { %6327 = vmatpush.msrb.mxu2 %v13177_v34  ;;  %v13273_v28 = vld [vmem:[#allocation10 + $0x18] sm:$0xff]  ;;  %6352 = vmatpush.msrb.mxu3 %v13277_v29 }
 0xd0a   :  { %6296 = vmatpush.msrb.mxu0 %v13281_v59 }
 0xd0b   :  { %6328 = vmatpush.msrb.mxu2 %v13189_v1 }
 0xd0d   :  { %v5887_v33 = vpop.f32.mrf.mxu3  ;;  %6329 = vmatpush.msrb.mxu2 %v13201_v14 }
 0xd0e   :  { %v13283_v33 = vld [vmem:[#allocation10 + $0x130] sm:$0xff] }
 0xd0f   :  { %v5931_v6 = vpop.f32.mrf.mxu2  ;;  %6330 = vmatpush.msrb.mxu2 %v13213_v31  ;;  %13713 = vst [vmem:[#allocation36_spill] sm:$0xff] %v13283_v33  ;;  %6313 = vmatpush.msra.mxu1 %v13283_v33  ;;  %v13304_v33 = vld [vmem:[#allocation10 + $0x100] sm:$0xff] }
 0xd10   :  { %v5948_v44 = vpack.c.bf16 %v5931_v6, %v5931_v6  ;;  %v13285_v6 = vld [vmem:[#allocation10 + $0x8] sm:$0xff] }
 0xd11   :  { %6331 = vmatpush.msrb.mxu2 %v13225_v36 }
 0xd12   :  { %6151 = vmatmul.bf16.vlgmr.msra.gmra.mxu0 %v5948_v44  ;;  %6177 = vmatmul.bf16.vlgmr.msra.gmra.mxu2 %v5948_v44  ;;  %v13289_v44 = vld [vmem:[#allocation10 + $0x138] sm:$0xff] }
 0xd13   :  { %6332 = vmatpush.msrb.mxu2 %v13237_v53  ;;  %13714 = vst [vmem:[#allocation37_spill] sm:$0xff] %v13289_v44  ;;  %6353 = vmatpush.msrb.mxu3 %v13289_v44  ;;  %v13308_v44 = vld [vmem:[#allocation10 + $0x108] sm:$0xff] }
 0xd14   :  { %6381 = vmatpush.msra.mxu0 %v13113_v9 }
 0xd15   :  { %v5944_v23 = vpop.f32.mrf.mxu3  ;;  %6333 = vmatpush.msrb.mxu2 %v13249_v51 }
 0xd16   :  { %v5949_v41 = vpack.c.bf16 %v5944_v23, %v5944_v23  ;;  %v13293_v23 = vld [vmem:[#allocation10 + $0x120] sm:$0xff]  ;;  %6382 = vmatpush.msra.mxu0 %v13117_v49 }
 0xd17   :  { %v5933_v20 = vpop.f32.mrf.mxu2  ;;  %6334 = vmatpush.msrb.mxu2 %v13261_v56  ;;  %6314 = vmatpush.msra.mxu1 %v13293_v23 }
 0xd18   :  { %6164 = vmatmul.bf16.vlgmr.msrb.gmra.mxu1 %v5949_v41  ;;  %6190 = vmatmul.bf16.vlgmr.msra.gmra.mxu3 %v5949_v41  ;;  %v13295_v41 = vld [vmem:[#allocation10 + $0x128] sm:$0xff]  ;;  %v13298_v20 = vld [vmem:[#allocation10 + $0x110] sm:$0xff] }
 0xd19   :  { %6335 = vmatpush.msrb.mxu2 %v13273_v28  ;;  %6354 = vmatpush.msrb.mxu3 %v13295_v41 }
 0xd1a   :  { %6315 = vmatpush.msra.mxu1 %v13298_v20  ;;  %6383 = vmatpush.msra.mxu0 %v13123_v54 }
 0xd1b   :  { %6336 = vmatpush.msrb.mxu2 %v13285_v6 }
 0xd1c   :  { %6316 = vmatpush.msra.mxu1 %v13304_v33  ;;  %6384 = vmatpush.msra.mxu0 %v13135_v57 }
 0xd1d   :  { %v5946_v21 = vpop.f32.mrf.mxu3  ;;  %6421 = vmatpush.msra.mxu2 %v13115_v17  ;;  %v6197_v17 = vld [vmem:[%s13459_s18] sm:$0x3] }
 0xd1e   :  { %v13300_v21 = vld [vmem:[#allocation10 + $0x118] sm:$0xff]  ;;  %6401 = vmatpush.msrb.mxu1 %v13127_v30  ;;  %6385 = vmatpush.msra.mxu0 %v13152_v40 }
 0xd1f   :  { %6355 = vmatpush.msrb.mxu3 %v13300_v21  ;;  %6422 = vmatpush.msra.mxu2 %v13121_v45 }
 0xd20   :  { %6402 = vmatpush.msrb.mxu1 %v13133_v26  ;;  %6386 = vmatpush.msra.mxu0 %v13160_v16 }
 0xd21   :  { %6356 = vmatpush.msrb.mxu3 %v13308_v44  ;;  %6423 = vmatpush.msra.mxu2 %v13125_v60  ;;  %v6199_v60 = vperm.slane %v6197_v17, 0 }
 0xd22   :  { %6403 = vmatpush.msrb.mxu1 %v13148_v47  ;;  %6387 = vmatpush.msra.mxu0 %v13173_v12  ;;  %v6200_v47 = vperm.slane %v6197_v17, 1 }
 0xd23   :  { %6424 = vmatpush.msra.mxu2 %v13138_v61  ;;  %6441 = vmatpush.msra.mxu3 %v13131_v37 }
 0xd24   :  { %6404 = vmatpush.msrb.mxu1 %v13175_v32  ;;  %6388 = vmatpush.msra.mxu0 %v13185_v18 }
 0xd25   :  { %6425 = vmatpush.msra.mxu2 %v13155_v22  ;;  %6442 = vmatpush.msra.mxu3 %v13141_v55 }
 0xd26   :  { %6405 = vmatpush.msrb.mxu1 %v13187_v38  ;;  %6389 = vmatpush.msra.mxu0 %v13197_v25 }
 0xd27   :  { %6426 = vmatpush.msra.mxu2 %v13163_v13  ;;  %6443 = vmatpush.msra.mxu3 %v13150_v4 }
 0xd28   :  { %6406 = vmatpush.msrb.mxu1 %v13199_v46  ;;  %6390 = vmatpush.msra.mxu0 %v13209_v39  ;;  %v13716_v46 = vld [vmem:[#allocation37_spill] sm:$0xff] }
 0xd29   :  { %6427 = vmatpush.msra.mxu2 %v13177_v34  ;;  %6444 = vmatpush.msra.mxu3 %v13181_v15 }
 0xd2a   :  { %6407 = vmatpush.msrb.mxu1 %v13211_v27  ;;  %6391 = vmatpush.msra.mxu0 %v13221_v5 }
 0xd2b   :  { %6428 = vmatpush.msra.mxu2 %v13189_v1  ;;  %6445 = vmatpush.msra.mxu3 %v13193_v24  ;;  %v13715_v24 = vld [vmem:[#allocation36_spill] sm:$0xff] }
 0xd2c   :  { %6408 = vmatpush.msrb.mxu1 %v13223_v7  ;;  %6392 = vmatpush.msra.mxu0 %v13233_v2 }
 0xd2d   :  { %6429 = vmatpush.msra.mxu2 %v13201_v14  ;;  %6446 = vmatpush.msra.mxu3 %v13205_v42 }
 0xd2e   :  { %6409 = vmatpush.msrb.mxu1 %v13235_v19  ;;  %6393 = vmatpush.msra.mxu0 %v13245_v43 }
 0xd2f   :  { %6430 = vmatpush.msra.mxu2 %v13213_v31  ;;  %6447 = vmatpush.msra.mxu3 %v13217_v62 }
 0xd30   :  { %6410 = vmatpush.msrb.mxu1 %v13247_v50  ;;  %6394 = vmatpush.msra.mxu0 %v13257_v10 }
 0xd31   :  { %6431 = vmatpush.msra.mxu2 %v13225_v36  ;;  %6448 = vmatpush.msra.mxu3 %v13229_v48 }
 0xd32   :  { %6411 = vmatpush.msrb.mxu1 %v13259_v58  ;;  %6395 = vmatpush.msra.mxu0 %v13269_v3 }
 0xd33   :  { %6432 = vmatpush.msra.mxu2 %v13237_v53  ;;  %6449 = vmatpush.msra.mxu3 %v13241_v8 }
 0xd34   :  { %6412 = vmatpush.msrb.mxu1 %v13271_v63  ;;  %6396 = vmatpush.msra.mxu0 %v13281_v59 }
 0xd35   :  { %6433 = vmatpush.msra.mxu2 %v13249_v51  ;;  %6450 = vmatpush.msra.mxu3 %v13253_v52 }
 0xd36   :  { %6413 = vmatpush.msrb.mxu1 %v13715_v24 }
 0xd37   :  { %6434 = vmatpush.msra.mxu2 %v13261_v56  ;;  %6451 = vmatpush.msra.mxu3 %v13265_v0 }
 0xd38   :  { %6414 = vmatpush.msrb.mxu1 %v13293_v23 }
 0xd39   :  { %6435 = vmatpush.msra.mxu2 %v13273_v28  ;;  %6452 = vmatpush.msra.mxu3 %v13277_v29 }
 0xd3a   :  { %6415 = vmatpush.msrb.mxu1 %v13298_v20 }
 0xd3b   :  { %6436 = vmatpush.msra.mxu2 %v13285_v6  ;;  %6453 = vmatpush.msra.mxu3 %v13716_v46 }
 0xd3c   :  { %6416 = vmatpush.msrb.mxu1 %v13304_v33 }
 0xd3d   :  { %6454 = vmatpush.msra.mxu3 %v13295_v41 }
 0xd3f   :  { %6455 = vmatpush.msra.mxu3 %v13300_v21 }
 0xd41   :  { %6456 = vmatpush.msra.mxu3 %v13308_v44 }
 0xd8f   :  { %v6152_v9 = vpop.f32.mrf.mxu0 }
 0xd95   :  { %v6165_v49 = vpop.f32.mrf.mxu1  ;;  %v6178_v45 = vpop.f32.mrf.mxu2 }
 0xd96   :  { %v6166_v54 = vadd.f32 %v6165_v49, %v6152_v9 }
 0xd97   :  { %v6154_v30 = vpop.f32.mrf.mxu0 }
 0xd98   :  { %v6195_v37 = vadd.f32 %v6166_v54, %v13169_v11 }
 0xd9a   :  { %v13341_v26 = vadd.f32 %v6199_v60, %v6195_v37 }
 0xd9b   :  { %v6191_v57 = vpop.f32.mrf.mxu3 }
 0xd9c   :  { %v6269_v61 = vrot.slane %v13341_v26, 4  ;;  %v6192_v55 = vadd.f32 %v6191_v57, %v6178_v45  ;;  %v6487_v57 = vld [vmem:[%s13460_s19] sm:$0x3] }
 0xd9d   :  { %v6167_v4 = vpop.f32.mrf.mxu1  ;;  %v6180_v40 = vpop.f32.mrf.mxu2 }
 0xd9e   :  { %v6270_v22 = vadd.f32 %v6269_v61, %v13341_v26  ;;  %v6196_v16 = vadd.f32 %v6192_v55, %v13144_v35  ;;  %v6489_v4 = vperm.slane %v6487_v57, 0 }
 0xda0   :  { %v6271_v13 = vrot.slane %v6270_v22, 2  ;;  %v6204_v11 = vadd.f32 %v6200_v47, %v6196_v16 }
 0xda2   :  { %v6272_v12 = vadd.f32 %v6271_v13, %v6270_v22  ;;  %v6275_v35 = vrot.slane %v6204_v11, 4 }
 0xda3   :  { %v6193_v32 = vpop.f32.mrf.mxu3 }
 0xda4   :  { %v6273_v34 = vrot.slane %v6272_v12, 1  ;;  %v6276_v15 = vadd.f32 %v6275_v35, %v6204_v11 }
 0xda6   :  { %v6277_v18 = vrot.slane %v6276_v15, 2  ;;  %v6274_v38 = vadd.f32 %v6273_v34, %v6272_v12  ;;  %v6490_v34 = vperm.slane %v6487_v57, 1  ;;  %v10379_v57 = vld [vmem:[#allocation12] sm:$0xff] }
 0xda8   :  { %v6278_v1 = vadd.f32 %v6277_v18, %v6276_v15  ;;  %6297 = vmatmul.f32.vlgmr.msrb.gmra.mxu0 %v6274_v38  ;;  %6337 = vmatmul.f32.vlgmr.msrb.gmra.mxu2 %v6274_v38 }
 0xdaa   :  { %v6279_v25 = vrot.slane %v6278_v1, 1 }
 0xdac   :  { %v6280_v14 = vadd.f32 %v6279_v25, %v6278_v1 }
 0xdae   :  { %6317 = vmatmul.f32.vlgmr.msra.gmra.mxu1 %v6280_v14  ;;  %6357 = vmatmul.f32.vlgmr.msrb.gmra.mxu3 %v6280_v14 }
 0xe25   :  { %v6298_v42 = vpop.f32.mrf.mxu0 }
 0xe2b   :  { %v6318_v39 = vpop.f32.mrf.mxu1  ;;  %v6338_v5 = vpop.f32.mrf.mxu2 }
 0xe2c   :  { %v6319_v27 = vadd.f32 %v6318_v39, %v6298_v42 }
 0xe2e   :  { %v6361_v31 = vmul.f32 0.03125, %v6319_v27 }
 0xe30   :  { %v6363_v62 = vperm.slane %v6361_v31, 0 }
 0xe31   :  { %v6358_v7 = vpop.f32.mrf.mxu3 }
 0xe32   :  { %v13385_v36 = vsub.f32 %v13341_v26, %v6363_v62  ;;  %v6359_v48 = vadd.f32 %v6358_v7, %v6338_v5  ;;  %v10402_v62 = vld [vmem:[#allocation12 + $0xb8] sm:$0xff] }
 0xe34   :  { %v6367_v2 = vmul.f32 %v13385_v36, %v13385_v36  ;;  %v6362_v19 = vmul.f32 0.03125, %v6359_v48 }
 0xe36   :  { %v6369_v53 = vrot.slane %v6367_v2, 4  ;;  %v6364_v8 = vperm.slane %v6362_v19, 0  ;;  %v10401_v19 = vld [vmem:[#allocation12 + $0xb0] sm:$0xff] }
 0xe38   :  { %v6370_v43 = vadd.f32 %v6369_v53, %v6367_v2  ;;  %v13389_v50 = vsub.f32 %v6204_v11, %v6364_v8  ;;  %v6499_v11 = vld [vmem:[%s13461_s20] sm:$0x3] }
 0xe39   :  { %v6501_v15 = vperm.slane %v6499_v11, 0  ;;  %v6502_v42 = vperm.slane %v6499_v11, 1  ;;  %v6513_v2 = vld [vmem:[%s13463_s22] sm:$0x1] }
 0xe3a   :  { %v6371_v51 = vrot.slane %v6370_v43, 2  ;;  %v6368_v52 = vmul.f32 %v13389_v50, %v13389_v50 }
 0xe3c   :  { %v6372_v10 = vadd.f32 %v6371_v51, %v6370_v43  ;;  %v6375_v58 = vrot.slane %v6368_v52, 4  ;;  %v10410_v43 = vld [vmem:[#allocation12 + $0xf8] sm:$0xff]  ;;  %v10400_v51 = vld [vmem:[#allocation12 + $0xa8] sm:$0xff] }
 0xe3e   :  { %v6373_v56 = vrot.slane %v6372_v10, 1  ;;  %v6376_v0 = vadd.f32 %v6375_v58, %v6368_v52  ;;  %v10409_v52 = vld [vmem:[#allocation12 + $0xf0] sm:$0xff]  ;;  %v10408_v58 = vld [vmem:[#allocation12 + $0xe8] sm:$0xff] }
 0xe40   :  { %v6374_v3 = vadd.f32 %v6373_v56, %v6372_v10  ;;  %v6377_v63 = vrot.slane %v6376_v0, 2  ;;  %v10399_v10 = vld [vmem:[#allocation12 + $0xa0] sm:$0xff]  ;;  %v10398_v56 = vld [vmem:[#allocation12 + $0x98] sm:$0xff] }
 0xe42   :  { %v6378_v28 = vadd.f32 %v6377_v63, %v6376_v0  ;;  %6397 = vmatmul.f32.vlgmr.msra.gmra.mxu0 %v6374_v3  ;;  %6437 = vmatmul.f32.vlgmr.msra.gmra.mxu2 %v6374_v3  ;;  %v10407_v0 = vld [vmem:[#allocation12 + $0xe0] sm:$0xff]  ;;  %v10397_v3 = vld [vmem:[#allocation12 + $0x90] sm:$0xff]  ;;  %v10406_v63 = vld [vmem:[#allocation12 + $0xd8] sm:$0xff] }
 0xe44   :  { %v6379_v29 = vrot.slane %v6378_v28, 1 }
 0xe46   :  { %v6380_v59 = vadd.f32 %v6379_v29, %v6378_v28  ;;  %v10396_v28 = vld [vmem:[#allocation12 + $0x88] sm:$0xff]  ;;  %v10405_v29 = vld [vmem:[#allocation12 + $0xd0] sm:$0xff] }
 0xe48   :  { %6417 = vmatmul.f32.vlgmr.msrb.gmra.mxu1 %v6380_v59  ;;  %6457 = vmatmul.f32.vlgmr.msra.gmra.mxu3 %v6380_v59  ;;  %v10395_v59 = vld [vmem:[#allocation12 + $0x80] sm:$0xff] }
 0xebf   :  { %v6398_v33 = vpop.f32.mrf.mxu0 }
 0xec5   :  { %v6418_v6 = vpop.f32.mrf.mxu1  ;;  %v6438_v20 = vpop.f32.mrf.mxu2 }
 0xec6   :  { %v6419_v44 = vadd.f32 %v6418_v6, %v6398_v33  ;;  %v10404_v33 = vld [vmem:[#allocation12 + $0xc8] sm:$0xff]  ;;  %v10403_v6 = vld [vmem:[#allocation12 + $0xc0] sm:$0xff] }
 0xec8   :  { %v6461_v23 = vmul.f32 0.03125, %v6419_v44  ;;  %v10386_v44 = vld [vmem:[#allocation12 + $0x38] sm:$0xff] }
 0xeca   :  { %v6463_v41 = vmax.f32 %v6461_v23, 0.0  ;;  %v10394_v23 = vld [vmem:[#allocation12 + $0x78] sm:$0xff] }
 0xecb   :  { %v6458_v21 = vpop.f32.mrf.mxu3 }
 0xecc   :  { %v6465_v9 = vadd.f32 1e-05, %v6463_v41  ;;  %v6459_v17 = vadd.f32 %v6458_v21, %v6438_v20  ;;  %v10385_v41 = vld [vmem:[#allocation12 + $0x30] sm:$0xff]  ;;  %v10384_v21 = vld [vmem:[#allocation12 + $0x28] sm:$0xff] }
 0xecd   :  { %v10393_v20 = vld [vmem:[#allocation12 + $0x70] sm:$0xff] }
 0xece   :  { %10469 = vrsqrt.f32 %v6465_v9  ;;  %v6462_v49 = vmul.f32 0.03125, %v6459_v17  ;;  %vm6473_vm0 = vweird.f32 %v6465_v9  ;;  %v10383_v17 = vld [vmem:[#allocation12 + $0x20] sm:$0xff] }
 0xed0   :  { %v6464_v45 = vmax.f32 %v6462_v49, 0.0  ;;  %v10391_v49 = vld [vmem:[#allocation12 + $0x60] sm:$0xff] }
 0xed2   :  { %v6466_v54 = vadd.f32 1e-05, %v6464_v45  ;;  %v10382_v45 = vld [vmem:[#allocation12 + $0x18] sm:$0xff] }
 0xed4   :  { %v10470_v60 = vpop.eup %10469  ;;  %10471 = vrsqrt.f32 %v6466_v54  ;;  %vm6483_vm3 = vweird.f32 %v6466_v54 }
 0xed5   :  { %v6468_v30 = vmul.f32 %v10470_v60, %v6465_v9  ;;  %vm6474_vm15 = vweird.f32 %v10470_v60  ;;  %v10392_v9 = vld [vmem:[#allocation12 + $0x68] sm:$0xff] }
 0xed6   :  { %vm6475_vm1 = vmor %vm6473_vm0, %vm6474_vm15 }
 0xed7   :  { %v6469_v37 = vmul.f32 %v10470_v60, %v6468_v30  ;;  %v10389_v30 = vld [vmem:[#allocation12 + $0x50] sm:$0xff] }
 0xed9   :  { %v6470_v26 = vmul.f32 0.5, %v6469_v37  ;;  %v10380_v37 = vld [vmem:[#allocation12 + $0x8] sm:$0xff] }
 0xeda   :  { %v10472_v61 = vpop.eup %10471 }
 0xedb   :  { %v6471_v55 = vsub.f32 1.5, %v6470_v26  ;;  %v6478_v47 = vmul.f32 %v10472_v61, %v6466_v54  ;;  %vm6484_vm2 = vweird.f32 %v10472_v61  ;;  %v10390_v54 = vld [vmem:[#allocation12 + $0x58] sm:$0xff]  ;;  %v10388_v26 = vld [vmem:[#allocation12 + $0x48] sm:$0xff] }
 0xedc   :  { %vm6485_vm4 = vmor %vm6483_vm3, %vm6484_vm2 }
 0xedd   :  { %v6472_v40 = vmul.f32 %v10470_v60, %v6471_v55  ;;  %v6479_v22 = vmul.f32 %v10472_v61, %v6478_v47 }
 0xedf   :  { %v6476_v16 = vsel %vm6475_vm1, %v10470_v60, %v6472_v40  ;;  %v6480_v13 = vmul.f32 0.5, %v6479_v22  ;;  %v10381_v60 = vld [vmem:[#allocation12 + $0x10] sm:$0xff] }
 0xee0   :  { %v6493_v12 = vmul.f32 %v6489_v4, %v6476_v16 }
 0xee1   :  { %v6481_v35 = vsub.f32 1.5, %v6480_v13 }
 0xee2   :  { %v6495_v32 = vperm.slane %v6493_v12, 0 }
 0xee3   :  { %v6482_v18 = vmul.f32 %v10472_v61, %v6481_v35 }
 0xee4   :  { %v6497_v38 = vmul.f32 %v6495_v32, %v13385_v36  ;;  %v9590_v36 = vld [vmem:[%s13463_s22 + $0x1] sm:$0x1]  ;;  %v10418_v32 = vld [vmem:[#allocation12 + $0x138] sm:$0xff] }
 0xee5   :  { %v6486_v1 = vsel %vm6485_vm4, %v10472_v61, %v6482_v18  ;;  %v10387_v61 = vld [vmem:[#allocation12 + $0x40] sm:$0xff]  ;;  %v10417_v18 = vld [vmem:[#allocation12 + $0x130] sm:$0xff] }
 0xee6   :  { %v6494_v24 = vmul.f32 %v6490_v34, %v6486_v1  ;;  %v6505_v25 = vadd.f32 %v6501_v15, %v6497_v38  ;;  %v10426_v34 = vld [vmem:[#allocation12 + $0x178] sm:$0xff]  ;;  %v10425_v38 = vld [vmem:[#allocation12 + $0x170] sm:$0xff] }
 0xee8   :  { %v6496_v46 = vperm.slane %v6494_v24, 0  ;;  %v6507_v14 = vmul.f32 0.2, %v6505_v25  ;;  %v10416_v24 = vld [vmem:[#allocation12 + $0x128] sm:$0xff] }
 0xeea   :  { %v6509_v39 = vmax.f32 %v6505_v25, %v6507_v14  ;;  %v6498_v27 = vmul.f32 %v6496_v46, %v13389_v50  ;;  %v9721_v25 = vld [vmem:[%s13463_s22 + $0x2] sm:$0x1]  ;;  %v10424_v46 = vld [vmem:[#allocation12 + $0x168] sm:$0xff]  ;;  %v9788_v14 = vld [vmem:[%s13463_s22 + $0x3] sm:$0x1] }
 0xeec   :  { %v6511_v31 = vpack.c.bf16 %v6509_v39, %v6509_v39  ;;  %v6506_v5 = vadd.f32 %v6502_v42, %v6498_v27  ;;  %v10415_v42 = vld [vmem:[#allocation12 + $0x120] sm:$0xff]  ;;  %v10414_v39 = vld [vmem:[#allocation12 + $0x118] sm:$0xff] }
 0xeed   :  { %v10434_v27 = vld [vmem:[#allocation12 + $0x1b8] sm:$0xff] }
 0xeee   :  { %v13402_v7 = vsel %vm6518_vm5, %v6511_v31, 0  ;;  %v6508_v48 = vmul.f32 0.2, %v6506_v5  ;;  %v10423_v31 = vld [vmem:[#allocation12 + $0x160] sm:$0xff] }
 0xeef   :  { %6532 = vmatpush.bf16.msrb.mxu0 %v13402_v7  ;;  %6597 = vmatpush.bf16.msrb.mxu2 %v13402_v7 }
 0xef0   :  { %v6510_v53 = vmax.f32 %v6506_v5, %v6508_v48  ;;  %v10442_v5 = vld [vmem:[#allocation12 + $0x1f8] sm:$0xff]  ;;  %v10433_v48 = vld [vmem:[#allocation12 + $0x1b0] sm:$0xff] }
 0xef2   :  { %9591 = vmatmul.msk.bf16.vlgmr.msrb.gmra.mxu2 %vm6514_vm6, %v9590_v36  ;;  %v6512_v8 = vpack.c.bf16 %v6510_v53, %v6510_v53  ;;  %9588 = vmatmul.msk.bf16.vlgmr.msrb.gmra.mxu0 %vm6514_vm6, %v6513_v2  ;;  %v10441_v53 = vld [vmem:[#allocation12 + $0x1f0] sm:$0xff] }
 0xef3   :  { %6747 = vmatpush.bf16.msra.mxu0 %v10402_v62  ;;  %6869 = vmatpush.bf16.msra.mxu2 %v10386_v44  ;;  %v10422_v62 = vld [vmem:[#allocation12 + $0x158] sm:$0xff] }
 0xef4   :  { %v13415_v50 = vsel %vm6518_vm5, %v6512_v8, 0  ;;  %v10420_v8 = vld [vmem:[#allocation12 + $0x148] sm:$0xff] }
 0xef5   :  { %6545 = vmatpush.bf16.msra.mxu1 %v13415_v50  ;;  %6610 = vmatpush.bf16.msrb.mxu3 %v13415_v50 }
 0xef7   :  { %6748 = vmatpush.bf16.msra.mxu0 %v10401_v19  ;;  %6870 = vmatpush.bf16.msra.mxu2 %v10385_v41  ;;  %v10421_v19 = vld [vmem:[#allocation12 + $0x150] sm:$0xff] }
 0xef8   :  { %9592 = vmatmul.msk.bf16.vlgmr.msrb.gmra.mxu3 %vm6514_vm6, %v9590_v36  ;;  %9589 = vmatmul.msk.bf16.vlgmr.msra.gmra.mxu1 %vm6514_vm6, %v6513_v2  ;;  %v10412_v36 = vld [vmem:[#allocation12 + $0x108] sm:$0xff] }
 0xef9   :  { %6760 = vmatpush.bf16.msrb.mxu1 %v10410_v43  ;;  %6882 = vmatpush.bf16.msra.mxu3 %v10394_v23  ;;  %v10432_v2 = vld [vmem:[#allocation12 + $0x1a8] sm:$0xff] }
 0xefa   :  { %v10440_v43 = vld [vmem:[#allocation12 + $0x1e8] sm:$0xff] }
 0xefb   :  { %6749 = vmatpush.bf16.msra.mxu0 %v10400_v51  ;;  %6871 = vmatpush.bf16.msra.mxu2 %v10384_v21  ;;  %v10431_v51 = vld [vmem:[#allocation12 + $0x1a0] sm:$0xff] }
 0xefd   :  { %6761 = vmatpush.bf16.msrb.mxu1 %v10409_v52  ;;  %6883 = vmatpush.bf16.msra.mxu3 %v10393_v20  ;;  %v10430_v52 = vld [vmem:[#allocation12 + $0x198] sm:$0xff] }
 0xeff   :  { %6750 = vmatpush.bf16.msra.mxu0 %v10399_v10  ;;  %6872 = vmatpush.bf16.msra.mxu2 %v10383_v17  ;;  %v10419_v10 = vld [vmem:[#allocation12 + $0x140] sm:$0xff] }
 0xf01   :  { %6762 = vmatpush.bf16.msrb.mxu1 %v10408_v58  ;;  %6884 = vmatpush.bf16.msra.mxu3 %v10392_v9  ;;  %v10439_v58 = vld [vmem:[#allocation12 + $0x1e0] sm:$0xff] }
 0xf03   :  { %6751 = vmatpush.bf16.msra.mxu0 %v10398_v56  ;;  %6873 = vmatpush.bf16.msra.mxu2 %v10382_v45  ;;  %v10429_v56 = vld [vmem:[#allocation12 + $0x190] sm:$0xff] }
 0xf05   :  { %6763 = vmatpush.bf16.msrb.mxu1 %v10407_v0  ;;  %6885 = vmatpush.bf16.msra.mxu3 %v10391_v49  ;;  %v10438_v0 = vld [vmem:[#allocation12 + $0x1d8] sm:$0xff] }
 0xf07   :  { %6752 = vmatpush.bf16.msra.mxu0 %v10397_v3  ;;  %6874 = vmatpush.bf16.msra.mxu2 %v10381_v60  ;;  %v10428_v3 = vld [vmem:[#allocation12 + $0x188] sm:$0xff] }
 0xf09   :  { %6764 = vmatpush.bf16.msrb.mxu1 %v10406_v63  ;;  %6886 = vmatpush.bf16.msra.mxu3 %v10390_v54  ;;  %v10437_v63 = vld [vmem:[#allocation12 + $0x1d0] sm:$0xff] }
 0xf0b   :  { %6753 = vmatpush.bf16.msra.mxu0 %v10396_v28  ;;  %6875 = vmatpush.bf16.msra.mxu2 %v10380_v37  ;;  %v10436_v28 = vld [vmem:[#allocation12 + $0x1c8] sm:$0xff] }
 0xf0d   :  { %6765 = vmatpush.bf16.msrb.mxu1 %v10405_v29  ;;  %6887 = vmatpush.bf16.msra.mxu3 %v10389_v30  ;;  %v10427_v29 = vld [vmem:[#allocation12 + $0x180] sm:$0xff] }
 0xf0f   :  { %6754 = vmatpush.bf16.msra.mxu0 %v10395_v59  ;;  %6876 = vmatpush.bf16.msra.mxu2 %v10379_v57 }
 0xf11   :  { %6766 = vmatpush.bf16.msrb.mxu1 %v10404_v33  ;;  %6888 = vmatpush.bf16.msra.mxu3 %v10388_v26 }
 0xf13   :  { %6907 = vmatpush.bf16.msrb.mxu0 %v13402_v7  ;;  %7057 = vmatpush.bf16.msrb.mxu2 %v10418_v32 }
 0xf15   :  { %6767 = vmatpush.bf16.msrb.mxu1 %v10403_v6  ;;  %6889 = vmatpush.bf16.msra.mxu3 %v10387_v61  ;;  %v10435_v6 = vld [vmem:[#allocation12 + $0x1c0] sm:$0xff] }
 0xf17   :  { %7058 = vmatpush.bf16.msrb.mxu2 %v10417_v18 }
 0xf19   :  { %6920 = vmatpush.bf16.msra.mxu1 %v13415_v50  ;;  %7070 = vmatpush.bf16.msrb.mxu3 %v10426_v34 }
 0xf1b   :  { %7059 = vmatpush.bf16.msrb.mxu2 %v10416_v24 }
 0xf1d   :  { %7071 = vmatpush.bf16.msrb.mxu3 %v10425_v38  ;;  %v10460_v38 = vld [vmem:[%s13717_s2] ss:$0 sm:$0xff] }
 0xf1f   :  { %7060 = vmatpush.bf16.msrb.mxu2 %v10415_v42 }
 0xf21   :  { %7072 = vmatpush.bf16.msrb.mxu3 %v10424_v46 }
 0xf23   :  { %7061 = vmatpush.bf16.msrb.mxu2 %v10414_v39 }
 0xf25   :  { %7073 = vmatpush.bf16.msrb.mxu3 %v10423_v31 }
 0xf29   :  { %7074 = vmatpush.bf16.msrb.mxu3 %v10422_v62 }
 0xf2d   :  { %7075 = vmatpush.bf16.msrb.mxu3 %v10421_v19 }
 0xf31   :  { %7076 = vmatpush.bf16.msrb.mxu3 %v10420_v8 }
 0xf35   :  { %7077 = vmatpush.bf16.msrb.mxu3 %v10419_v10 }
 0xf6f   :  { %v6534_v55 = vpop.f32.mrf.mxu0 }
 0xf70   :  { %v6551_v47 = vpack.c.bf16 %v6534_v55, %v6534_v55 }
 0xf72   :  { %6877 = vmatmul.bf16.vlgmr.msra.gmra.mxu2 %v6551_v47 }
 0xf75   :  { %v6599_v4 = vpop.f32.mrf.mxu2  ;;  %v6547_v22 = vpop.f32.mrf.mxu1 }
 0xf76   :  { %v6616_v40 = vpack.c.bf16 %v6599_v4, %v6599_v4  ;;  %v6552_v16 = vpack.c.bf16 %v6547_v22, %v6547_v22 }
 0xf77   :  { %v6536_v13 = vpop.f32.mrf.mxu0 }
 0xf78   :  { %6755 = vmatmul.bf16.vlgmr.msra.gmra.mxu0 %v6616_v40  ;;  %6890 = vmatmul.bf16.vlgmr.msra.gmra.mxu3 %v6552_v16 }
 0xf79   :  { %7096 = vmatpush.bf16.msra.mxu0 %v13402_v7  ;;  %v10413_v7 = vld [vmem:[#allocation12 + $0x110] sm:$0xff] }
 0xf7a   :  { %7062 = vmatpush.bf16.msrb.mxu2 %v10413_v7 }
 0xf7b   :  { %v6612_v11 = vpop.f32.mrf.mxu3 }
 0xf7c   :  { %v6617_v12 = vpack.c.bf16 %v6612_v11, %v6612_v11 }
 0xf7d   :  { %v6601_v35 = vpop.f32.mrf.mxu2  ;;  %v6549_v15 = vpop.f32.mrf.mxu1 }
 0xf7e   :  { %6768 = vmatmul.bf16.vlgmr.msrb.gmra.mxu1 %v6617_v12  ;;  %7063 = vmatpush.bf16.msrb.mxu2 %v10412_v36 }
 0xf7f   :  { %7109 = vmatpush.bf16.msrb.mxu1 %v13415_v50  ;;  %v10411_v50 = vld [vmem:[#allocation12 + $0x100] sm:$0xff] }
 0xf82   :  { %7064 = vmatpush.bf16.msrb.mxu2 %v10411_v50 }
 0xf83   :  { %v6614_v1 = vpop.f32.mrf.mxu3 }
 0xf88   :  { %9722 = vmatmul.msk.bf16.vlgmr.msrb.gmra.mxu0 %vm6514_vm6, %v9721_v25 }
 0xf89   :  { %7246 = vmatpush.bf16.msrb.mxu0 %v10434_v27 }
 0xf8d   :  { %7247 = vmatpush.bf16.msrb.mxu0 %v10433_v48 }
 0xf8e   :  { %9723 = vmatmul.msk.bf16.vlgmr.msra.gmra.mxu1 %vm6514_vm6, %v9721_v25 }
 0xf8f   :  { %7259 = vmatpush.bf16.msra.mxu1 %v10442_v5 }
 0xf91   :  { %7248 = vmatpush.bf16.msrb.mxu0 %v10432_v2 }
 0xf93   :  { %7260 = vmatpush.bf16.msra.mxu1 %v10441_v53 }
 0xf95   :  { %7249 = vmatpush.bf16.msrb.mxu0 %v10431_v51 }
 0xf97   :  { %7261 = vmatpush.bf16.msra.mxu1 %v10440_v43 }
 0xf98   :  { %9789 = vmatmul.msk.bf16.vlgmr.msra.gmra.mxu0 %vm6514_vm6, %v9788_v14 }
 0xf99   :  { %7250 = vmatpush.bf16.msrb.mxu0 %v10430_v52 }
 0xf9b   :  { %7262 = vmatpush.bf16.msra.mxu1 %v10439_v58 }
 0xf9d   :  { %7251 = vmatpush.bf16.msrb.mxu0 %v10429_v56 }
 0xf9e   :  { %9790 = vmatmul.msk.bf16.vlgmr.msrb.gmra.mxu1 %vm6514_vm6, %v9788_v14 }
 0xf9f   :  { %7263 = vmatpush.bf16.msra.mxu1 %v10438_v0 }
 0xfa1   :  { %7252 = vmatpush.bf16.msrb.mxu0 %v10428_v3 }
 0xfa3   :  { %7264 = vmatpush.bf16.msra.mxu1 %v10437_v63 }
 0xfa5   :  { %7253 = vmatpush.bf16.msrb.mxu0 %v10427_v29 }
 0xfa7   :  { %7265 = vmatpush.bf16.msra.mxu1 %v10436_v28 }
 0xfab   :  { %7266 = vmatpush.bf16.msra.mxu1 %v10435_v6 }
 0xff5   :  { %v6756_v59 = vpop.f32.mrf.mxu0  ;;  %v6878_v33 = vpop.f32.mrf.mxu2 }
 0xffb   :  { %v6769_v44 = vpop.f32.mrf.mxu1  ;;  %v6891_v41 = vpop.f32.mrf.mxu3 }
 0xffc   :  { %v6770_v23 = vadd.f32 %v6769_v44, %v6756_v59 }
 0xffd   :  { %v6758_v20 = vpop.f32.mrf.mxu0  ;;  %v6880_v21 = vpop.f32.mrf.mxu2 }
 0xffe   :  { %v6879_v9 = vadd.f32 %v6878_v33, %v6770_v23 }
0x1000   :  { %v6892_v17 = vadd.f32 %v6891_v41, %v6879_v9 }
0x1003   :  { %v6771_v49 = vpop.f32.mrf.mxu1  ;;  %v6893_v45 = vpop.f32.mrf.mxu3 }
0x1005   :  { %v6909_v54 = vpop.f32.mrf.mxu0 }
0x1006   :  { %v6926_v60 = vpack.c.bf16 %v6909_v54, %v6909_v54 }
0x1008   :  { %7065 = vmatmul.bf16.vlgmr.msrb.gmra.mxu2 %v6926_v60 }
0x100b   :  { %v6922_v30 = vpop.f32.mrf.mxu1 }
0x100c   :  { %v6927_v37 = vpack.c.bf16 %v6922_v30, %v6922_v30 }
0x100d   :  { %v6911_v26 = vpop.f32.mrf.mxu0 }
0x100e   :  { %7078 = vmatmul.bf16.vlgmr.msrb.gmra.mxu3 %v6927_v37 }
0x1013   :  { %v6924_v57 = vpop.f32.mrf.mxu1 }
0x1015   :  { %v7098_v61 = vpop.f32.mrf.mxu0 }
0x1016   :  { %v7115_v55 = vpack.c.bf16 %v7098_v61, %v7098_v61 }
0x1018   :  { %7254 = vmatmul.bf16.vlgmr.msrb.gmra.mxu0 %v7115_v55 }
0x101b   :  { %v7111_v47 = vpop.f32.mrf.mxu1 }
0x101c   :  { %v7116_v4 = vpack.c.bf16 %v7111_v47, %v7111_v47 }
0x101d   :  { %v7100_v40 = vpop.f32.mrf.mxu0 }
0x101e   :  { %7267 = vmatmul.bf16.vlgmr.msra.gmra.mxu1 %v7116_v4 }
0x1023   :  { %v7113_v22 = vpop.f32.mrf.mxu1 }
0x108b   :  { %v7066_v16 = vpop.f32.mrf.mxu2 }
0x1091   :  { %v7079_v13 = vpop.f32.mrf.mxu3 }
0x1092   :  { %v7080_v35 = vadd.f32 %v7079_v13, %v7066_v16 }
0x1093   :  { %v7068_v11 = vpop.f32.mrf.mxu2 }
0x1094   :  { %v7083_v15 = vadd.f32 %v7080_v35, %v6892_v17 }
0x1095   :  { %v7255_v12 = vpop.f32.mrf.mxu0 }
0x1099   :  { %v7081_v32 = vpop.f32.mrf.mxu3 }
0x109b   :  { %v7268_v34 = vpop.f32.mrf.mxu1 }
0x109c   :  { %v7269_v18 = vadd.f32 %v7268_v34, %v7255_v12 }
0x109d   :  { %v7257_v1 = vpop.f32.mrf.mxu0 }
0x109e   :  { %v7272_v24 = vadd.f32 %v7269_v18, %v7083_v15 }
0x10a0   :  { %v7277_v25 = vadd.f32 %v10460_v38, %v7272_v24 }
0x10a2   :  { %7278 = vst [vmem:[%s13718_s12] sm:$0x3] %v7277_v25 }
0x10a3   :  { %v7270_v46 = vpop.f32.mrf.mxu1 }
0x10a4   :  { %7283 = vsyncpa [#allocation3], 1 }
0x10a5   :  { %7284 = vsyncpa [#allocation5], 1 }
0x10a6   :  { %7285 = vsyncpa [#allocation8], 1 }
0x10a7   :  { %7286 = vsyncpa [#allocation11], 1 }

</bundles_post_ra>
